<compile_context>
chip_gen: v6e
topology: v6e:2x2x1
jax: 0.10.0
libtpu: 0.0.40
codegen_flags: <defaults>
</compile_context>

<pallas_src>
import jax
import jax.numpy as jnp
import numpy as np
from jax import lax
from jax.experimental import pallas as pl
from jax.experimental.pallas import tpu as pltpu


# ----------------------------------------------------------------------------
# Helpers
# ----------------------------------------------------------------------------
def _recip(x):
    """1/x via EUP approximate reciprocal + one Newton step (~f32 accurate)."""
    r = pl.reciprocal(x, approx=True)
    return r * (2.0 - x * r)


# ----------------------------------------------------------------------------
# Pallas kernel: one grid step == one block of Tt timesteps
# ----------------------------------------------------------------------------
def mclstm_kernel(xm_ref, xa_ref, w_aux_ref, w_state_ref, b_ref,
                  hs_ref, cs_ref,
                  c_scr, pre_scr):
    Tt, B, I = xm_ref.shape
    O = c_scr.shape[-1]
    n_r = O * O           # redistribution preactivation width
    n_i = I * O           # input-gate preactivation width

    # state = None  ->  c_0 = zeros(B, out_dim); scratch persists across blocks
    @pl.when(pl.program_id(0) == 0)
    def _():
        c_scr[...] = jnp.zeros_like(c_scr)

    # Hoisted, time-independent part of all three gate linears:
    #   one MXU matmul with M = Tt*B instead of 3 tiny matmuls per timestep.
    pre_scr[...] = (
        jnp.dot(xa_ref[...], w_aux_ref[...], preferred_element_type=jnp.float32)
        + b_ref[...])

    # Loop-invariant fused state weights: load into vregs once, reuse every step.
    w_state = w_state_ref[...]                   # (O, n_r + n_i + O)

    def step(tt, carry):
        c = c_scr[...]                           # (B, O) carried cell state
        xm_t = xm_ref[tt]                        # (B, I) mass input

        # normalised cell state used as gate input (MCGate.use_state branch)
        c_sum = jnp.sum(c, axis=-1, keepdims=True)
        safe_sum = jnp.where(c_sum == 0.0, jnp.ones_like(c_sum), c_sum)
        cn = c * _recip(safe_sum)

        # one fused dot for the state contribution of ALL three gates:
        #   [redistribution | in_gate | out_gate] preactivations
        row = tt * B
        s_all = (jnp.dot(cn, w_state, preferred_element_type=jnp.float32)
                 + pre_scr[pl.ds(row, B), :])    # (B, n_r + n_i + O)

        sr = s_all[:, :n_r].reshape(B, O, O)
        si = s_all[:, n_r:n_r + n_i].reshape(B, I, O)
        so = s_all[:, n_r + n_i:]

        # Softmax over the last dim with the denominator folded into the
        # contracting vector; the normalised R / I matrices never materialise.
        e_r = jnp.exp(sr - jnp.max(sr, axis=-1, keepdims=True))   # (B, O, O)
        cw = (c * _recip(jnp.sum(e_r, axis=-1)))[:, None, :]      # (B, 1, O)

        e_i = jnp.exp(si - jnp.max(si, axis=-1, keepdims=True))   # (B, I, O)
        xw = (xm_t * _recip(jnp.sum(e_i, axis=-1)))[:, None, :]   # (B, 1, I)

        o = jax.nn.sigmoid(so)                                    # (B, O)

        # c_tot = c @ R + xm @ I, as MXU batched contractions
        c_tot = (
            jnp.einsum('bqo,bop->bqp', cw, e_r,
                       preferred_element_type=jnp.float32)[:, 0, :]
            + jnp.einsum('bqi,bip->bqp', xw, e_i,
                         preferred_element_type=jnp.float32)[:, 0, :])

        h = o * c_tot
        c_new = c_tot - h

        hs_ref[tt] = h.astype(hs_ref.dtype)
        cs_ref[tt] = c_new.astype(cs_ref.dtype)
        c_scr[...] = c_new
        return carry

    # Short fixed trip-count -> fully unroll for LLO scheduler visibility.
    lax.fori_loop(0, Tt, step, 0, unroll=(Tt <= 16))


# ----------------------------------------------------------------------------
# Wrapper
# ----------------------------------------------------------------------------
def mclstm_forward(xm, xa, params, block_t=None):
    L, B, I = xm.shape
    A = xa.shape[-1]
    O = params["wo_c"].shape[0]

    Tt = L if block_t is None else block_t
    assert L % Tt == 0, "sequence length must be divisible by the time-block size"
    nt = L // Tt

    n_r, n_i, n_o = O * O, I * O, O
    N = n_r + n_i + n_o

    # Fuse the three gates so the kernel issues ONE state-dot per step and ONE
    # hoisted aux-dot (+ bias) per time block.
    w_aux = jnp.concatenate([params["wr_a"], params["wi_a"], params["wo_a"]], axis=1)    # (A, N)
    w_state = jnp.concatenate([params["wr_c"], params["wi_c"], params["wo_c"]], axis=1)  # (O, N)
    b_all = jnp.concatenate([params["br"], params["bi"], params["bo"]], axis=1)          # (1, N)

    # Flatten (L, B, A) -> (L*B, A): each time block is a contiguous row range,
    # so the hoisted aux matmul needs no in-kernel reshape / relayout.
    xa2d = xa.reshape(L * B, A)

    grid_spec = pltpu.PrefetchScalarGridSpec(
        num_scalar_prefetch=0,
        grid=(nt,),
        in_specs=[
            pl.BlockSpec((Tt, B, I), lambda t: (t, 0, 0)),       # xm time block
            pl.BlockSpec((Tt * B, A), lambda t: (t, 0)),         # xa rows of the block
            pl.BlockSpec((A, N), lambda t: (0, 0)),              # fused aux weights
            pl.BlockSpec((O, N), lambda t: (0, 0)),              # fused state weights
            pl.BlockSpec((1, N), lambda t: (0, 0)),              # fused biases
        ],
        out_specs=[
            pl.BlockSpec((Tt, B, O), lambda t: (t, 0, 0)),       # hs
            pl.BlockSpec((Tt, B, O), lambda t: (t, 0, 0)),       # cs
        ],
        scratch_shapes=[
            pltpu.VMEM((B, O), jnp.float32),          # carried cell state
            pltpu.VMEM((Tt * B, N), jnp.float32),     # hoisted aux preactivations
        ],
    )

    # NOTE: for production out_dim, store the weights in bf16 (cast at the MXU,
    # keep f32 accumulation), raise vmem_limit_bytes, single-buffer the
    # grid-invariant weight specs (pipeline_mode=pl.Buffered(1)), and add a
    # leading "parallel" batch grid axis for v7x megacore.  Unnecessary at
    # demo sizes.
    hs, cs = pl.pallas_call(
        mclstm_kernel,
        out_shape=(jax.ShapeDtypeStruct((L, B, O), jnp.float32),
                   jax.ShapeDtypeStruct((L, B, O), jnp.float32)),
        grid_spec=grid_spec,
        compiler_params=pltpu.CompilerParams(
            dimension_semantics=("arbitrary",)),     # sequential recurrence over time
    )(xm, xa2d, w_aux, w_state, b_all)
    return hs, cs


# ----------------------------------------------------------------------------
# Deterministic parameter initialisation (mirrors MassConservingLSTM.reset_parameters)
# ----------------------------------------------------------------------------
def init_params(key, in_dim, aux_dim, out_dim):
    G = aux_dim + out_dim  # gate input dim = aux_dim + out_dim (time_dependent=True)
    k_r, k_i, k_o = jax.random.split(key, 3)

    def weight(k, n_out):
        # deterministic stand-in for nn.init.orthogonal_ (scaled normal)
        return (jax.random.normal(k, (G, n_out), jnp.float32)
                / jnp.sqrt(jnp.float32(G)))

    wr = weight(k_r, out_dim * out_dim)
    wi = weight(k_i, in_dim * out_dim)
    wo = weight(k_o, out_dim)

    # biases follow reset_parameters: eye_ / zeros_ / constant_(-3)
    br = jnp.eye(out_dim, dtype=jnp.float32).reshape(1, out_dim * out_dim)
    bi = jnp.zeros((1, in_dim * out_dim), jnp.float32)
    bo = jnp.full((1, out_dim), -3.0, jnp.float32)

    # split rows: first aux_dim rows multiply xa, last out_dim rows multiply c/sum(c)
    return dict(
        wr_a=wr[:aux_dim], wr_c=wr[aux_dim:], br=br,
        wi_a=wi[:aux_dim], wi_c=wi[aux_dim:], bi=bi,
        wo_a=wo[:aux_dim], wo_c=wo[aux_dim:], bo=bo,
    )


# ----------------------------------------------------------------------------
# Pure-JAX reference (mirrors the PyTorch forward exactly) for verification
# ----------------------------------------------------------------------------
def mclstm_reference(xm, xa, params):
    L, B, I = xm.shape
    O = params["wo_c"].shape[0]

    def step(c, inp):
        xm_t, xa_t = inp
        c_sum = jnp.sum(c, axis=-1, keepdims=True)
        scale = jnp.where(c_sum == 0.0, jnp.ones_like(c_sum), c_sum)
        cn = c / scale

        def gate(wa, wc, b):
            return xa_t @ wa + cn @ wc + b

        r = jax.nn.softmax(
            gate(params["wr_a"], params["wr_c"], params["br"]).reshape(B, O, O), -1)
        ig = jax.nn.softmax(
            gate(params["wi_a"], params["wi_c"], params["bi"]).reshape(B, I, O), -1)
        o = jax.nn.sigmoid(gate(params["wo_a"], params["wo_c"], params["bo"]))

        c_new = (jnp.einsum("bo,bop->bp", c, r)
                 + jnp.einsum("bi,bip->bp", xm_t, ig))
        h = o * c_new
        c_new = c_new - h
        return c_new, (h, c_new)

    c0 = jnp.zeros((B, O), jnp.float32)
    _, (hs, cs) = jax.lax.scan(step, c0, (xm, xa))
    return hs, cs


# ----------------------------------------------------------------------------
# Main
# ----------------------------------------------------------------------------
if __name__ == "__main__":
    L, B = 8, 2
    in_dim, aux_dim, out_dim = 4, 3, 32

    key = jax.random.PRNGKey(0)
    k_p, k_m, k_a = jax.random.split(key, 3)

    params = init_params(k_p, in_dim, aux_dim, out_dim)
    xm = jax.random.uniform(k_m, (L, B, in_dim), jnp.float32)        # mass inputs >= 0
    xa = jax.random.normal(k_a, (L, B, aux_dim), jnp.float32)        # auxiliary inputs

    hs, cs = mclstm_forward(xm, xa, params)
    hs = jax.block_until_ready(hs)
    cs = jax.block_until_ready(cs)

    hs_ref, cs_ref = mclstm_reference(xm, xa, params)
    # Tolerance slightly looser than pure f32 because the kernel uses the EUP
    # approximate reciprocal (+ Newton refinement) for the softmax / cell-state
    # normalisation, accumulated over L recurrent steps.
    np.testing.assert_allclose(np.asarray(hs), np.asarray(hs_ref), rtol=2e-3, atol=2e-4)
    np.testing.assert_allclose(np.asarray(cs), np.asarray(cs_ref), rtol=2e-3, atol=2e-4)

    print("KERNEL_OK")
</pallas_src>

<mosaic_0001>
module attributes {stable_mosaic.version = 11 : i64} {
  func.func @mclstm_kernel(%arg0: i32, %arg1: memref<8x2x4xf32, #tpu.memory_space<vmem>>, %arg2: memref<16x3xf32, #tpu.memory_space<vmem>>, %arg3: memref<3x1184xf32, #tpu.memory_space<vmem>>, %arg4: memref<32x1184xf32, #tpu.memory_space<vmem>>, %arg5: memref<1x1184xf32, #tpu.memory_space<vmem>>, %arg6: memref<8x2x32xf32, #tpu.memory_space<vmem>>, %arg7: memref<8x2x32xf32, #tpu.memory_space<vmem>>, %arg8: memref<2x32xf32, #tpu.memory_space<vmem>>, %arg9: memref<16x1184xf32, #tpu.memory_space<vmem>>) attributes {dimension_semantics = [#tpu.dimension_semantics<arbitrary>], iteration_bounds = array<i64: 1>, scalar_prefetch = 0 : i64, scratch_operands = 2 : i64, tpu.core_type = #tpu.core_type<tc>, window_params = [{transform_indices = @transform_0, window_bounds = array<i64: 8, 2, 4>}, {transform_indices = @transform_1, window_bounds = array<i64: 16, 3>}, {pipeline_mode = #tpu.pipeline_mode<synchronous>, transform_indices = @transform_2, window_bounds = array<i64: 3, 1184>}, {pipeline_mode = #tpu.pipeline_mode<synchronous>, transform_indices = @transform_3, window_bounds = array<i64: 32, 1184>}, {pipeline_mode = #tpu.pipeline_mode<synchronous>, transform_indices = @transform_4, window_bounds = array<i64: 1, 1184>}, {transform_indices = @transform_5, window_bounds = array<i64: 8, 2, 32>}, {transform_indices = @transform_6, window_bounds = array<i64: 8, 2, 32>}]} {
    %c0_i32 = arith.constant 0 : i32
    %0 = arith.cmpi eq, %arg0, %c0_i32 : i32
    %1 = arith.extui %0 : i1 to i32
    %c0_i32_0 = arith.constant 0 : i32
    %2 = arith.cmpi ne, %1, %c0_i32_0 : i32
    scf.if %2 {
      %cst_219 = arith.constant 0.000000e+00 : f32
      %603 = vector.broadcast %cst_219 : f32 to vector<2x32xf32>
      %c0_220 = arith.constant 0 : index
      %c0_221 = arith.constant 0 : index
      %604 = vector.load %arg8[%c0_220, %c0_221] : memref<2x32xf32, #tpu.memory_space<vmem>>, vector<2x32xf32>
      tpu.vector_store %arg8[%c0_220, %c0_221], %603 {strides = array<i32>} : memref<2x32xf32, #tpu.memory_space<vmem>>, vector<2x32xf32>,
    } else {
    }
    %c0 = arith.constant 0 : index
    %c0_1 = arith.constant 0 : index
    %3 = vector.load %arg2[%c0, %c0_1] : memref<16x3xf32, #tpu.memory_space<vmem>>, vector<16x3xf32>
    %c0_2 = arith.constant 0 : index
    %c0_3 = arith.constant 0 : index
    %4 = vector.load %arg3[%c0_2, %c0_3] : memref<3x1184xf32, #tpu.memory_space<vmem>>, vector<3x1184xf32>
    %cst = arith.constant dense<0.000000e+00> : vector<16x1184xf32>
    %5 = tpu.matmul %3, %4, %cst {dimension_numbers = #tpu.dot_dimension_numbers<[1], [0], [0], [1], [0, 0, 1, 1], [], []>} : vector<16x3xf32>, vector<3x1184xf32>, vector<16x1184xf32> -> vector<16x1184xf32>
    %c0_4 = arith.constant 0 : index
    %c0_5 = arith.constant 0 : index
    %6 = vector.load %arg5[%c0_4, %c0_5] : memref<1x1184xf32, #tpu.memory_space<vmem>>, vector<1x1184xf32>
    %7 = vector.broadcast %6 : vector<1x1184xf32> to vector<16x1184xf32>
    %8 = arith.addf %5, %7 : vector<16x1184xf32>
    %c0_6 = arith.constant 0 : index
    %c0_7 = arith.constant 0 : index
    %9 = vector.load %arg9[%c0_6, %c0_7] : memref<16x1184xf32, #tpu.memory_space<vmem>>, vector<16x1184xf32>
    tpu.vector_store %arg9[%c0_6, %c0_7], %8 {strides = array<i32>} : memref<16x1184xf32, #tpu.memory_space<vmem>>, vector<16x1184xf32>,
    %c0_8 = arith.constant 0 : index
    %c0_9 = arith.constant 0 : index
    %10 = vector.load %arg4[%c0_8, %c0_9] : memref<32x1184xf32, #tpu.memory_space<vmem>>, vector<32x1184xf32>
    %c0_i32_10 = arith.constant 0 : i32
    %c0_11 = arith.constant 0 : index
    %c0_12 = arith.constant 0 : index
    %11 = vector.load %arg8[%c0_11, %c0_12] : memref<2x32xf32, #tpu.memory_space<vmem>>, vector<2x32xf32>
    %12 = arith.index_cast %c0_i32_10 : i32 to index
    %c0_13 = arith.constant 0 : index
    %c0_14 = arith.constant 0 : index
    %13 = vector.load %arg1[%12, %c0_13, %c0_14] : memref<8x2x4xf32, #tpu.memory_space<vmem>>, vector<1x2x4xf32>
    %14 = vector.shape_cast %13 : vector<1x2x4xf32> to vector<2x4xf32>
    %cst_15 = arith.constant dense<0.000000e+00> : vector<2xf32>
    %15 = vector.multi_reduction <add>, %11, %cst_15 [1] : vector<2x32xf32> to vector<2xf32>
    %16 = vector.shape_cast %15 : vector<2xf32> to vector<2x1xf32>
    %cst_16 = arith.constant 0.000000e+00 : f32
    %17 = vector.broadcast %cst_16 : f32 to vector<2x1xf32>
    %18 = arith.cmpf oeq, %16, %17 : vector<2x1xf32>
    %cst_17 = arith.constant 1.000000e+00 : f32
    %19 = vector.broadcast %cst_17 : f32 to vector<2x1xf32>
    %20 = arith.select %18, %19, %16 : vector<2x1xi1>, vector<2x1xf32>
    %21 = tpu.reciprocal %20 {approx = true} : vector<2x1xf32> -> vector<2x1xf32>
    %22 = arith.mulf %20, %21 : vector<2x1xf32>
    %cst_18 = arith.constant 2.000000e+00 : f32
    %23 = vector.broadcast %cst_18 : f32 to vector<2x1xf32>
    %24 = arith.subf %23, %22 : vector<2x1xf32>
    %25 = arith.mulf %21, %24 : vector<2x1xf32>
    %26 = vector.broadcast %25 : vector<2x1xf32> to vector<2x32xf32>
    %27 = arith.mulf %11, %26 : vector<2x32xf32>
    %c2_i32 = arith.constant 2 : i32
    %28 = arith.muli %c0_i32_10, %c2_i32 : i32
    %cst_19 = arith.constant dense<0.000000e+00> : vector<2x1184xf32>
    %29 = tpu.matmul %27, %10, %cst_19 {dimension_numbers = #tpu.dot_dimension_numbers<[1], [0], [0], [1], [0, 0, 1, 1], [], []>} : vector<2x32xf32>, vector<32x1184xf32>, vector<2x1184xf32> -> vector<2x1184xf32>
    %30 = arith.index_cast %28 : i32 to index
    %c0_20 = arith.constant 0 : index
    %31 = vector.load %arg9[%30, %c0_20] : memref<16x1184xf32, #tpu.memory_space<vmem>>, vector<2x1184xf32>
    %32 = arith.addf %29, %31 : vector<2x1184xf32>
    %33 = vector.extract_strided_slice %32 {offsets = [0, 0], sizes = [2, 1024], strides = [1, 1]} : vector<2x1184xf32> to vector<2x1024xf32>
    %34 = vector.shape_cast %33 : vector<2x1024xf32> to vector<2x32x32xf32>
    %35 = vector.extract_strided_slice %32 {offsets = [0, 1024], sizes = [2, 128], strides = [1, 1]} : vector<2x1184xf32> to vector<2x128xf32>
    %36 = vector.shape_cast %35 : vector<2x128xf32> to vector<2x4x32xf32>
    %37 = vector.extract_strided_slice %32 {offsets = [0, 1152], sizes = [2, 32], strides = [1, 1]} : vector<2x1184xf32> to vector<2x32xf32>
    %cst_21 = arith.constant dense<0xFF800000> : vector<2x32xf32>
    %38 = vector.multi_reduction <maximumf>, %34, %cst_21 [2] : vector<2x32x32xf32> to vector<2x32xf32>
    %39 = vector.shape_cast %38 : vector<2x32xf32> to vector<2x32x1xf32>
    %40 = vector.broadcast %39 : vector<2x32x1xf32> to vector<2x32x32xf32>
    %41 = arith.subf %34, %40 : vector<2x32x32xf32>
    %42 = math.exp %41 : vector<2x32x32xf32>
    %cst_22 = arith.constant dense<0.000000e+00> : vector<2x32xf32>
    %43 = vector.multi_reduction <add>, %42, %cst_22 [2] : vector<2x32x32xf32> to vector<2x32xf32>
    %44 = tpu.reciprocal %43 {approx = true} : vector<2x32xf32> -> vector<2x32xf32>
    %45 = arith.mulf %43, %44 : vector<2x32xf32>
    %cst_23 = arith.constant 2.000000e+00 : f32
    %46 = vector.broadcast %cst_23 : f32 to vector<2x32xf32>
    %47 = arith.subf %46, %45 : vector<2x32xf32>
    %48 = arith.mulf %44, %47 : vector<2x32xf32>
    %49 = arith.mulf %11, %48 : vector<2x32xf32>
    %50 = vector.shape_cast %49 : vector<2x32xf32> to vector<2x1x32xf32>
    %cst_24 = arith.constant dense<0xFF800000> : vector<2x4xf32>
    %51 = vector.multi_reduction <maximumf>, %36, %cst_24 [2] : vector<2x4x32xf32> to vector<2x4xf32>
    %52 = vector.shape_cast %51 : vector<2x4xf32> to vector<2x4x1xf32>
    %53 = vector.broadcast %52 : vector<2x4x1xf32> to vector<2x4x32xf32>
    %54 = arith.subf %36, %53 : vector<2x4x32xf32>
    %55 = math.exp %54 : vector<2x4x32xf32>
    %cst_25 = arith.constant dense<0.000000e+00> : vector<2x4xf32>
    %56 = vector.multi_reduction <add>, %55, %cst_25 [2] : vector<2x4x32xf32> to vector<2x4xf32>
    %57 = tpu.reciprocal %56 {approx = true} : vector<2x4xf32> -> vector<2x4xf32>
    %58 = arith.mulf %56, %57 : vector<2x4xf32>
    %cst_26 = arith.constant 2.000000e+00 : f32
    %59 = vector.broadcast %cst_26 : f32 to vector<2x4xf32>
    %60 = arith.subf %59, %58 : vector<2x4xf32>
    %61 = arith.mulf %57, %60 : vector<2x4xf32>
    %62 = arith.mulf %14, %61 : vector<2x4xf32>
    %63 = vector.shape_cast %62 : vector<2x4xf32> to vector<2x1x4xf32>
    %64 = arith.negf %37 : vector<2x32xf32>
    %65 = math.exp %64 : vector<2x32xf32>
    %cst_27 = arith.constant 1.000000e+00 : f32
    %66 = vector.broadcast %cst_27 : f32 to vector<2x32xf32>
    %67 = arith.addf %66, %65 : vector<2x32xf32>
    %68 = arith.divf %66, %67 : vector<2x32xf32>
    "tpu.trace_start"() <{level = 10 : i32, message = "bqo,bop->bqp"}> : () -> ()
    %cst_28 = arith.constant dense<0.000000e+00> : vector<2x1x32xf32>
    %69 = tpu.matmul %50, %42, %cst_28 {dimension_numbers = #tpu.dot_dimension_numbers<[2], [1], [1], [2], [0, 0, 0, 1, 1, 2], [0], [0]>} : vector<2x1x32xf32>, vector<2x32x32xf32>, vector<2x1x32xf32> -> vector<2x1x32xf32>
    "tpu.trace_stop"() : () -> ()
    %70 = vector.shape_cast %69 : vector<2x1x32xf32> to vector<2x32xf32>
    "tpu.trace_start"() <{level = 10 : i32, message = "bqi,bip->bqp"}> : () -> ()
    %cst_29 = arith.constant dense<0.000000e+00> : vector<2x1x32xf32>
    %71 = tpu.matmul %63, %55, %cst_29 {dimension_numbers = #tpu.dot_dimension_numbers<[2], [1], [1], [2], [0, 0, 0, 1, 1, 2], [0], [0]>} : vector<2x1x4xf32>, vector<2x4x32xf32>, vector<2x1x32xf32> -> vector<2x1x32xf32>
    "tpu.trace_stop"() : () -> ()
    %72 = vector.shape_cast %71 : vector<2x1x32xf32> to vector<2x32xf32>
    %73 = arith.addf %70, %72 : vector<2x32xf32>
    %74 = arith.mulf %68, %73 : vector<2x32xf32>
    %75 = arith.subf %73, %74 : vector<2x32xf32>
    %76 = arith.index_cast %c0_i32_10 : i32 to index
    %c0_30 = arith.constant 0 : index
    %c0_31 = arith.constant 0 : index
    %77 = vector.load %arg6[%76, %c0_30, %c0_31] : memref<8x2x32xf32, #tpu.memory_space<vmem>>, vector<1x2x32xf32>
    %78 = vector.shape_cast %77 : vector<1x2x32xf32> to vector<2x32xf32>
    %79 = vector.shape_cast %74 : vector<2x32xf32> to vector<1x2x32xf32>
    tpu.vector_store %arg6[%76, %c0_30, %c0_31], %79 {strides = array<i32>} : memref<8x2x32xf32, #tpu.memory_space<vmem>>, vector<1x2x32xf32>,
    %80 = arith.index_cast %c0_i32_10 : i32 to index
    %c0_32 = arith.constant 0 : index
    %c0_33 = arith.constant 0 : index
    %81 = vector.load %arg7[%80, %c0_32, %c0_33] : memref<8x2x32xf32, #tpu.memory_space<vmem>>, vector<1x2x32xf32>
    %82 = vector.shape_cast %81 : vector<1x2x32xf32> to vector<2x32xf32>
    %83 = vector.shape_cast %75 : vector<2x32xf32> to vector<1x2x32xf32>
    tpu.vector_store %arg7[%80, %c0_32, %c0_33], %83 {strides = array<i32>} : memref<8x2x32xf32, #tpu.memory_space<vmem>>, vector<1x2x32xf32>,
    %c0_34 = arith.constant 0 : index
    %c0_35 = arith.constant 0 : index
    %84 = vector.load %arg8[%c0_34, %c0_35] : memref<2x32xf32, #tpu.memory_space<vmem>>, vector<2x32xf32>
    tpu.vector_store %arg8[%c0_34, %c0_35], %75 {strides = array<i32>} : memref<2x32xf32, #tpu.memory_space<vmem>>, vector<2x32xf32>,
    %c1_i32 = arith.constant 1 : i32
    %c0_36 = arith.constant 0 : index
    %c0_37 = arith.constant 0 : index
    %85 = vector.load %arg8[%c0_36, %c0_37] : memref<2x32xf32, #tpu.memory_space<vmem>>, vector<2x32xf32>
    %86 = arith.index_cast %c1_i32 : i32 to index
    %c0_38 = arith.constant 0 : index
    %c0_39 = arith.constant 0 : index
    %87 = vector.load %arg1[%86, %c0_38, %c0_39] : memref<8x2x4xf32, #tpu.memory_space<vmem>>, vector<1x2x4xf32>
    %88 = vector.shape_cast %87 : vector<1x2x4xf32> to vector<2x4xf32>
    %cst_40 = arith.constant dense<0.000000e+00> : vector<2xf32>
    %89 = vector.multi_reduction <add>, %85, %cst_40 [1] : vector<2x32xf32> to vector<2xf32>
    %90 = vector.shape_cast %89 : vector<2xf32> to vector<2x1xf32>
    %cst_41 = arith.constant 0.000000e+00 : f32
    %91 = vector.broadcast %cst_41 : f32 to vector<2x1xf32>
    %92 = arith.cmpf oeq, %90, %91 : vector<2x1xf32>
    %cst_42 = arith.constant 1.000000e+00 : f32
    %93 = vector.broadcast %cst_42 : f32 to vector<2x1xf32>
    %94 = arith.select %92, %93, %90 : vector<2x1xi1>, vector<2x1xf32>
    %95 = tpu.reciprocal %94 {approx = true} : vector<2x1xf32> -> vector<2x1xf32>
    %96 = arith.mulf %94, %95 : vector<2x1xf32>
    %cst_43 = arith.constant 2.000000e+00 : f32
    %97 = vector.broadcast %cst_43 : f32 to vector<2x1xf32>
    %98 = arith.subf %97, %96 : vector<2x1xf32>
    %99 = arith.mulf %95, %98 : vector<2x1xf32>
    %100 = vector.broadcast %99 : vector<2x1xf32> to vector<2x32xf32>
    %101 = arith.mulf %85, %100 : vector<2x32xf32>
    %c2_i32_44 = arith.constant 2 : i32
    %102 = arith.muli %c1_i32, %c2_i32_44 : i32
    %cst_45 = arith.constant dense<0.000000e+00> : vector<2x1184xf32>
    %103 = tpu.matmul %101, %10, %cst_45 {dimension_numbers = #tpu.dot_dimension_numbers<[1], [0], [0], [1], [0, 0, 1, 1], [], []>} : vector<2x32xf32>, vector<32x1184xf32>, vector<2x1184xf32> -> vector<2x1184xf32>
    %104 = arith.index_cast %102 : i32 to index
    %c0_46 = arith.constant 0 : index
    %105 = vector.load %arg9[%104, %c0_46] : memref<16x1184xf32, #tpu.memory_space<vmem>>, vector<2x1184xf32>
    %106 = arith.addf %103, %105 : vector<2x1184xf32>
    %107 = vector.extract_strided_slice %106 {offsets = [0, 0], sizes = [2, 1024], strides = [1, 1]} : vector<2x1184xf32> to vector<2x1024xf32>
    %108 = vector.shape_cast %107 : vector<2x1024xf32> to vector<2x32x32xf32>
    %109 = vector.extract_strided_slice %106 {offsets = [0, 1024], sizes = [2, 128], strides = [1, 1]} : vector<2x1184xf32> to vector<2x128xf32>
    %110 = vector.shape_cast %109 : vector<2x128xf32> to vector<2x4x32xf32>
    %111 = vector.extract_strided_slice %106 {offsets = [0, 1152], sizes = [2, 32], strides = [1, 1]} : vector<2x1184xf32> to vector<2x32xf32>
    %cst_47 = arith.constant dense<0xFF800000> : vector<2x32xf32>
    %112 = vector.multi_reduction <maximumf>, %108, %cst_47 [2] : vector<2x32x32xf32> to vector<2x32xf32>
    %113 = vector.shape_cast %112 : vector<2x32xf32> to vector<2x32x1xf32>
    %114 = vector.broadcast %113 : vector<2x32x1xf32> to vector<2x32x32xf32>
    %115 = arith.subf %108, %114 : vector<2x32x32xf32>
    %116 = math.exp %115 : vector<2x32x32xf32>
    %cst_48 = arith.constant dense<0.000000e+00> : vector<2x32xf32>
    %117 = vector.multi_reduction <add>, %116, %cst_48 [2] : vector<2x32x32xf32> to vector<2x32xf32>
    %118 = tpu.reciprocal %117 {approx = true} : vector<2x32xf32> -> vector<2x32xf32>
    %119 = arith.mulf %117, %118 : vector<2x32xf32>
    %cst_49 = arith.constant 2.000000e+00 : f32
    %120 = vector.broadcast %cst_49 : f32 to vector<2x32xf32>
    %121 = arith.subf %120, %119 : vector<2x32xf32>
    %122 = arith.mulf %118, %121 : vector<2x32xf32>
    %123 = arith.mulf %85, %122 : vector<2x32xf32>
    %124 = vector.shape_cast %123 : vector<2x32xf32> to vector<2x1x32xf32>
    %cst_50 = arith.constant dense<0xFF800000> : vector<2x4xf32>
    %125 = vector.multi_reduction <maximumf>, %110, %cst_50 [2] : vector<2x4x32xf32> to vector<2x4xf32>
    %126 = vector.shape_cast %125 : vector<2x4xf32> to vector<2x4x1xf32>
    %127 = vector.broadcast %126 : vector<2x4x1xf32> to vector<2x4x32xf32>
    %128 = arith.subf %110, %127 : vector<2x4x32xf32>
    %129 = math.exp %128 : vector<2x4x32xf32>
    %cst_51 = arith.constant dense<0.000000e+00> : vector<2x4xf32>
    %130 = vector.multi_reduction <add>, %129, %cst_51 [2] : vector<2x4x32xf32> to vector<2x4xf32>
    %131 = tpu.reciprocal %130 {approx = true} : vector<2x4xf32> -> vector<2x4xf32>
    %132 = arith.mulf %130, %131 : vector<2x4xf32>
    %cst_52 = arith.constant 2.000000e+00 : f32
    %133 = vector.broadcast %cst_52 : f32 to vector<2x4xf32>
    %134 = arith.subf %133, %132 : vector<2x4xf32>
    %135 = arith.mulf %131, %134 : vector<2x4xf32>
    %136 = arith.mulf %88, %135 : vector<2x4xf32>
    %137 = vector.shape_cast %136 : vector<2x4xf32> to vector<2x1x4xf32>
    %138 = arith.negf %111 : vector<2x32xf32>
    %139 = math.exp %138 : vector<2x32xf32>
    %cst_53 = arith.constant 1.000000e+00 : f32
    %140 = vector.broadcast %cst_53 : f32 to vector<2x32xf32>
    %141 = arith.addf %140, %139 : vector<2x32xf32>
    %142 = arith.divf %140, %141 : vector<2x32xf32>
    "tpu.trace_start"() <{level = 10 : i32, message = "bqo,bop->bqp"}> : () -> ()
    %cst_54 = arith.constant dense<0.000000e+00> : vector<2x1x32xf32>
    %143 = tpu.matmul %124, %116, %cst_54 {dimension_numbers = #tpu.dot_dimension_numbers<[2], [1], [1], [2], [0, 0, 0, 1, 1, 2], [0], [0]>} : vector<2x1x32xf32>, vector<2x32x32xf32>, vector<2x1x32xf32> -> vector<2x1x32xf32>
    "tpu.trace_stop"() : () -> ()
    %144 = vector.shape_cast %143 : vector<2x1x32xf32> to vector<2x32xf32>
    "tpu.trace_start"() <{level = 10 : i32, message = "bqi,bip->bqp"}> : () -> ()
    %cst_55 = arith.constant dense<0.000000e+00> : vector<2x1x32xf32>
    %145 = tpu.matmul %137, %129, %cst_55 {dimension_numbers = #tpu.dot_dimension_numbers<[2], [1], [1], [2], [0, 0, 0, 1, 1, 2], [0], [0]>} : vector<2x1x4xf32>, vector<2x4x32xf32>, vector<2x1x32xf32> -> vector<2x1x32xf32>
    "tpu.trace_stop"() : () -> ()
    %146 = vector.shape_cast %145 : vector<2x1x32xf32> to vector<2x32xf32>
    %147 = arith.addf %144, %146 : vector<2x32xf32>
    %148 = arith.mulf %142, %147 : vector<2x32xf32>
    %149 = arith.subf %147, %148 : vector<2x32xf32>
    %150 = arith.index_cast %c1_i32 : i32 to index
    %c0_56 = arith.constant 0 : index
    %c0_57 = arith.constant 0 : index
    %151 = vector.load %arg6[%150, %c0_56, %c0_57] : memref<8x2x32xf32, #tpu.memory_space<vmem>>, vector<1x2x32xf32>
    %152 = vector.shape_cast %151 : vector<1x2x32xf32> to vector<2x32xf32>
    %153 = vector.shape_cast %148 : vector<2x32xf32> to vector<1x2x32xf32>
    tpu.vector_store %arg6[%150, %c0_56, %c0_57], %153 {strides = array<i32>} : memref<8x2x32xf32, #tpu.memory_space<vmem>>, vector<1x2x32xf32>,
    %154 = arith.index_cast %c1_i32 : i32 to index
    %c0_58 = arith.constant 0 : index
    %c0_59 = arith.constant 0 : index
    %155 = vector.load %arg7[%154, %c0_58, %c0_59] : memref<8x2x32xf32, #tpu.memory_space<vmem>>, vector<1x2x32xf32>
    %156 = vector.shape_cast %155 : vector<1x2x32xf32> to vector<2x32xf32>
    %157 = vector.shape_cast %149 : vector<2x32xf32> to vector<1x2x32xf32>
    tpu.vector_store %arg7[%154, %c0_58, %c0_59], %157 {strides = array<i32>} : memref<8x2x32xf32, #tpu.memory_space<vmem>>, vector<1x2x32xf32>,
    %c0_60 = arith.constant 0 : index
    %c0_61 = arith.constant 0 : index
    %158 = vector.load %arg8[%c0_60, %c0_61] : memref<2x32xf32, #tpu.memory_space<vmem>>, vector<2x32xf32>
    tpu.vector_store %arg8[%c0_60, %c0_61], %149 {strides = array<i32>} : memref<2x32xf32, #tpu.memory_space<vmem>>, vector<2x32xf32>,
    %c2_i32_62 = arith.constant 2 : i32
    %c0_63 = arith.constant 0 : index
    %c0_64 = arith.constant 0 : index
    %159 = vector.load %arg8[%c0_63, %c0_64] : memref<2x32xf32, #tpu.memory_space<vmem>>, vector<2x32xf32>
    %160 = arith.index_cast %c2_i32_62 : i32 to index
    %c0_65 = arith.constant 0 : index
    %c0_66 = arith.constant 0 : index
    %161 = vector.load %arg1[%160, %c0_65, %c0_66] : memref<8x2x4xf32, #tpu.memory_space<vmem>>, vector<1x2x4xf32>
    %162 = vector.shape_cast %161 : vector<1x2x4xf32> to vector<2x4xf32>
    %cst_67 = arith.constant dense<0.000000e+00> : vector<2xf32>
    %163 = vector.multi_reduction <add>, %159, %cst_67 [1] : vector<2x32xf32> to vector<2xf32>
    %164 = vector.shape_cast %163 : vector<2xf32> to vector<2x1xf32>
    %cst_68 = arith.constant 0.000000e+00 : f32
    %165 = vector.broadcast %cst_68 : f32 to vector<2x1xf32>
    %166 = arith.cmpf oeq, %164, %165 : vector<2x1xf32>
    %cst_69 = arith.constant 1.000000e+00 : f32
    %167 = vector.broadcast %cst_69 : f32 to vector<2x1xf32>
    %168 = arith.select %166, %167, %164 : vector<2x1xi1>, vector<2x1xf32>
    %169 = tpu.reciprocal %168 {approx = true} : vector<2x1xf32> -> vector<2x1xf32>
    %170 = arith.mulf %168, %169 : vector<2x1xf32>
    %cst_70 = arith.constant 2.000000e+00 : f32
    %171 = vector.broadcast %cst_70 : f32 to vector<2x1xf32>
    %172 = arith.subf %171, %170 : vector<2x1xf32>
    %173 = arith.mulf %169, %172 : vector<2x1xf32>
    %174 = vector.broadcast %173 : vector<2x1xf32> to vector<2x32xf32>
    %175 = arith.mulf %159, %174 : vector<2x32xf32>
    %c2_i32_71 = arith.constant 2 : i32
    %176 = arith.muli %c2_i32_62, %c2_i32_71 : i32
    %cst_72 = arith.constant dense<0.000000e+00> : vector<2x1184xf32>
    %177 = tpu.matmul %175, %10, %cst_72 {dimension_numbers = #tpu.dot_dimension_numbers<[1], [0], [0], [1], [0, 0, 1, 1], [], []>} : vector<2x32xf32>, vector<32x1184xf32>, vector<2x1184xf32> -> vector<2x1184xf32>
    %178 = arith.index_cast %176 : i32 to index
    %c0_73 = arith.constant 0 : index
    %179 = vector.load %arg9[%178, %c0_73] : memref<16x1184xf32, #tpu.memory_space<vmem>>, vector<2x1184xf32>
    %180 = arith.addf %177, %179 : vector<2x1184xf32>
    %181 = vector.extract_strided_slice %180 {offsets = [0, 0], sizes = [2, 1024], strides = [1, 1]} : vector<2x1184xf32> to vector<2x1024xf32>
    %182 = vector.shape_cast %181 : vector<2x1024xf32> to vector<2x32x32xf32>
    %183 = vector.extract_strided_slice %180 {offsets = [0, 1024], sizes = [2, 128], strides = [1, 1]} : vector<2x1184xf32> to vector<2x128xf32>
    %184 = vector.shape_cast %183 : vector<2x128xf32> to vector<2x4x32xf32>
    %185 = vector.extract_strided_slice %180 {offsets = [0, 1152], sizes = [2, 32], strides = [1, 1]} : vector<2x1184xf32> to vector<2x32xf32>
    %cst_74 = arith.constant dense<0xFF800000> : vector<2x32xf32>
    %186 = vector.multi_reduction <maximumf>, %182, %cst_74 [2] : vector<2x32x32xf32> to vector<2x32xf32>
    %187 = vector.shape_cast %186 : vector<2x32xf32> to vector<2x32x1xf32>
    %188 = vector.broadcast %187 : vector<2x32x1xf32> to vector<2x32x32xf32>
    %189 = arith.subf %182, %188 : vector<2x32x32xf32>
    %190 = math.exp %189 : vector<2x32x32xf32>
    %cst_75 = arith.constant dense<0.000000e+00> : vector<2x32xf32>
    %191 = vector.multi_reduction <add>, %190, %cst_75 [2] : vector<2x32x32xf32> to vector<2x32xf32>
    %192 = tpu.reciprocal %191 {approx = true} : vector<2x32xf32> -> vector<2x32xf32>
    %193 = arith.mulf %191, %192 : vector<2x32xf32>
    %cst_76 = arith.constant 2.000000e+00 : f32
    %194 = vector.broadcast %cst_76 : f32 to vector<2x32xf32>
    %195 = arith.subf %194, %193 : vector<2x32xf32>
    %196 = arith.mulf %192, %195 : vector<2x32xf32>
    %197 = arith.mulf %159, %196 : vector<2x32xf32>
    %198 = vector.shape_cast %197 : vector<2x32xf32> to vector<2x1x32xf32>
    %cst_77 = arith.constant dense<0xFF800000> : vector<2x4xf32>
    %199 = vector.multi_reduction <maximumf>, %184, %cst_77 [2] : vector<2x4x32xf32> to vector<2x4xf32>
    %200 = vector.shape_cast %199 : vector<2x4xf32> to vector<2x4x1xf32>
    %201 = vector.broadcast %200 : vector<2x4x1xf32> to vector<2x4x32xf32>
    %202 = arith.subf %184, %201 : vector<2x4x32xf32>
    %203 = math.exp %202 : vector<2x4x32xf32>
    %cst_78 = arith.constant dense<0.000000e+00> : vector<2x4xf32>
    %204 = vector.multi_reduction <add>, %203, %cst_78 [2] : vector<2x4x32xf32> to vector<2x4xf32>
    %205 = tpu.reciprocal %204 {approx = true} : vector<2x4xf32> -> vector<2x4xf32>
    %206 = arith.mulf %204, %205 : vector<2x4xf32>
    %cst_79 = arith.constant 2.000000e+00 : f32
    %207 = vector.broadcast %cst_79 : f32 to vector<2x4xf32>
    %208 = arith.subf %207, %206 : vector<2x4xf32>
    %209 = arith.mulf %205, %208 : vector<2x4xf32>
    %210 = arith.mulf %162, %209 : vector<2x4xf32>
    %211 = vector.shape_cast %210 : vector<2x4xf32> to vector<2x1x4xf32>
    %212 = arith.negf %185 : vector<2x32xf32>
    %213 = math.exp %212 : vector<2x32xf32>
    %cst_80 = arith.constant 1.000000e+00 : f32
    %214 = vector.broadcast %cst_80 : f32 to vector<2x32xf32>
    %215 = arith.addf %214, %213 : vector<2x32xf32>
    %216 = arith.divf %214, %215 : vector<2x32xf32>
    "tpu.trace_start"() <{level = 10 : i32, message = "bqo,bop->bqp"}> : () -> ()
    %cst_81 = arith.constant dense<0.000000e+00> : vector<2x1x32xf32>
    %217 = tpu.matmul %198, %190, %cst_81 {dimension_numbers = #tpu.dot_dimension_numbers<[2], [1], [1], [2], [0, 0, 0, 1, 1, 2], [0], [0]>} : vector<2x1x32xf32>, vector<2x32x32xf32>, vector<2x1x32xf32> -> vector<2x1x32xf32>
    "tpu.trace_stop"() : () -> ()
    %218 = vector.shape_cast %217 : vector<2x1x32xf32> to vector<2x32xf32>
    "tpu.trace_start"() <{level = 10 : i32, message = "bqi,bip->bqp"}> : () -> ()
    %cst_82 = arith.constant dense<0.000000e+00> : vector<2x1x32xf32>
    %219 = tpu.matmul %211, %203, %cst_82 {dimension_numbers = #tpu.dot_dimension_numbers<[2], [1], [1], [2], [0, 0, 0, 1, 1, 2], [0], [0]>} : vector<2x1x4xf32>, vector<2x4x32xf32>, vector<2x1x32xf32> -> vector<2x1x32xf32>
    "tpu.trace_stop"() : () -> ()
    %220 = vector.shape_cast %219 : vector<2x1x32xf32> to vector<2x32xf32>
    %221 = arith.addf %218, %220 : vector<2x32xf32>
    %222 = arith.mulf %216, %221 : vector<2x32xf32>
    %223 = arith.subf %221, %222 : vector<2x32xf32>
    %224 = arith.index_cast %c2_i32_62 : i32 to index
    %c0_83 = arith.constant 0 : index
    %c0_84 = arith.constant 0 : index
    %225 = vector.load %arg6[%224, %c0_83, %c0_84] : memref<8x2x32xf32, #tpu.memory_space<vmem>>, vector<1x2x32xf32>
    %226 = vector.shape_cast %225 : vector<1x2x32xf32> to vector<2x32xf32>
    %227 = vector.shape_cast %222 : vector<2x32xf32> to vector<1x2x32xf32>
    tpu.vector_store %arg6[%224, %c0_83, %c0_84], %227 {strides = array<i32>} : memref<8x2x32xf32, #tpu.memory_space<vmem>>, vector<1x2x32xf32>,
    %228 = arith.index_cast %c2_i32_62 : i32 to index
    %c0_85 = arith.constant 0 : index
    %c0_86 = arith.constant 0 : index
    %229 = vector.load %arg7[%228, %c0_85, %c0_86] : memref<8x2x32xf32, #tpu.memory_space<vmem>>, vector<1x2x32xf32>
    %230 = vector.shape_cast %229 : vector<1x2x32xf32> to vector<2x32xf32>
    %231 = vector.shape_cast %223 : vector<2x32xf32> to vector<1x2x32xf32>
    tpu.vector_store %arg7[%228, %c0_85, %c0_86], %231 {strides = array<i32>} : memref<8x2x32xf32, #tpu.memory_space<vmem>>, vector<1x2x32xf32>,
    %c0_87 = arith.constant 0 : index
    %c0_88 = arith.constant 0 : index
    %232 = vector.load %arg8[%c0_87, %c0_88] : memref<2x32xf32, #tpu.memory_space<vmem>>, vector<2x32xf32>
    tpu.vector_store %arg8[%c0_87, %c0_88], %223 {strides = array<i32>} : memref<2x32xf32, #tpu.memory_space<vmem>>, vector<2x32xf32>,
    %c3_i32 = arith.constant 3 : i32
    %c0_89 = arith.constant 0 : index
    %c0_90 = arith.constant 0 : index
    %233 = vector.load %arg8[%c0_89, %c0_90] : memref<2x32xf32, #tpu.memory_space<vmem>>, vector<2x32xf32>
    %234 = arith.index_cast %c3_i32 : i32 to index
    %c0_91 = arith.constant 0 : index
    %c0_92 = arith.constant 0 : index
    %235 = vector.load %arg1[%234, %c0_91, %c0_92] : memref<8x2x4xf32, #tpu.memory_space<vmem>>, vector<1x2x4xf32>
    %236 = vector.shape_cast %235 : vector<1x2x4xf32> to vector<2x4xf32>
    %cst_93 = arith.constant dense<0.000000e+00> : vector<2xf32>
    %237 = vector.multi_reduction <add>, %233, %cst_93 [1] : vector<2x32xf32> to vector<2xf32>
    %238 = vector.shape_cast %237 : vector<2xf32> to vector<2x1xf32>
    %cst_94 = arith.constant 0.000000e+00 : f32
    %239 = vector.broadcast %cst_94 : f32 to vector<2x1xf32>
    %240 = arith.cmpf oeq, %238, %239 : vector<2x1xf32>
    %cst_95 = arith.constant 1.000000e+00 : f32
    %241 = vector.broadcast %cst_95 : f32 to vector<2x1xf32>
    %242 = arith.select %240, %241, %238 : vector<2x1xi1>, vector<2x1xf32>
    %243 = tpu.reciprocal %242 {approx = true} : vector<2x1xf32> -> vector<2x1xf32>
    %244 = arith.mulf %242, %243 : vector<2x1xf32>
    %cst_96 = arith.constant 2.000000e+00 : f32
    %245 = vector.broadcast %cst_96 : f32 to vector<2x1xf32>
    %246 = arith.subf %245, %244 : vector<2x1xf32>
    %247 = arith.mulf %243, %246 : vector<2x1xf32>
    %248 = vector.broadcast %247 : vector<2x1xf32> to vector<2x32xf32>
    %249 = arith.mulf %233, %248 : vector<2x32xf32>
    %c2_i32_97 = arith.constant 2 : i32
    %250 = arith.muli %c3_i32, %c2_i32_97 : i32
    %cst_98 = arith.constant dense<0.000000e+00> : vector<2x1184xf32>
    %251 = tpu.matmul %249, %10, %cst_98 {dimension_numbers = #tpu.dot_dimension_numbers<[1], [0], [0], [1], [0, 0, 1, 1], [], []>} : vector<2x32xf32>, vector<32x1184xf32>, vector<2x1184xf32> -> vector<2x1184xf32>
    %252 = arith.index_cast %250 : i32 to index
    %c0_99 = arith.constant 0 : index
    %253 = vector.load %arg9[%252, %c0_99] : memref<16x1184xf32, #tpu.memory_space<vmem>>, vector<2x1184xf32>
    %254 = arith.addf %251, %253 : vector<2x1184xf32>
    %255 = vector.extract_strided_slice %254 {offsets = [0, 0], sizes = [2, 1024], strides = [1, 1]} : vector<2x1184xf32> to vector<2x1024xf32>
    %256 = vector.shape_cast %255 : vector<2x1024xf32> to vector<2x32x32xf32>
    %257 = vector.extract_strided_slice %254 {offsets = [0, 1024], sizes = [2, 128], strides = [1, 1]} : vector<2x1184xf32> to vector<2x128xf32>
    %258 = vector.shape_cast %257 : vector<2x128xf32> to vector<2x4x32xf32>
    %259 = vector.extract_strided_slice %254 {offsets = [0, 1152], sizes = [2, 32], strides = [1, 1]} : vector<2x1184xf32> to vector<2x32xf32>
    %cst_100 = arith.constant dense<0xFF800000> : vector<2x32xf32>
    %260 = vector.multi_reduction <maximumf>, %256, %cst_100 [2] : vector<2x32x32xf32> to vector<2x32xf32>
    %261 = vector.shape_cast %260 : vector<2x32xf32> to vector<2x32x1xf32>
    %262 = vector.broadcast %261 : vector<2x32x1xf32> to vector<2x32x32xf32>
    %263 = arith.subf %256, %262 : vector<2x32x32xf32>
    %264 = math.exp %263 : vector<2x32x32xf32>
    %cst_101 = arith.constant dense<0.000000e+00> : vector<2x32xf32>
    %265 = vector.multi_reduction <add>, %264, %cst_101 [2] : vector<2x32x32xf32> to vector<2x32xf32>
    %266 = tpu.reciprocal %265 {approx = true} : vector<2x32xf32> -> vector<2x32xf32>
    %267 = arith.mulf %265, %266 : vector<2x32xf32>
    %cst_102 = arith.constant 2.000000e+00 : f32
    %268 = vector.broadcast %cst_102 : f32 to vector<2x32xf32>
    %269 = arith.subf %268, %267 : vector<2x32xf32>
    %270 = arith.mulf %266, %269 : vector<2x32xf32>
    %271 = arith.mulf %233, %270 : vector<2x32xf32>
    %272 = vector.shape_cast %271 : vector<2x32xf32> to vector<2x1x32xf32>
    %cst_103 = arith.constant dense<0xFF800000> : vector<2x4xf32>
    %273 = vector.multi_reduction <maximumf>, %258, %cst_103 [2] : vector<2x4x32xf32> to vector<2x4xf32>
    %274 = vector.shape_cast %273 : vector<2x4xf32> to vector<2x4x1xf32>
    %275 = vector.broadcast %274 : vector<2x4x1xf32> to vector<2x4x32xf32>
    %276 = arith.subf %258, %275 : vector<2x4x32xf32>
    %277 = math.exp %276 : vector<2x4x32xf32>
    %cst_104 = arith.constant dense<0.000000e+00> : vector<2x4xf32>
    %278 = vector.multi_reduction <add>, %277, %cst_104 [2] : vector<2x4x32xf32> to vector<2x4xf32>
    %279 = tpu.reciprocal %278 {approx = true} : vector<2x4xf32> -> vector<2x4xf32>
    %280 = arith.mulf %278, %279 : vector<2x4xf32>
    %cst_105 = arith.constant 2.000000e+00 : f32
    %281 = vector.broadcast %cst_105 : f32 to vector<2x4xf32>
    %282 = arith.subf %281, %280 : vector<2x4xf32>
    %283 = arith.mulf %279, %282 : vector<2x4xf32>
    %284 = arith.mulf %236, %283 : vector<2x4xf32>
    %285 = vector.shape_cast %284 : vector<2x4xf32> to vector<2x1x4xf32>
    %286 = arith.negf %259 : vector<2x32xf32>
    %287 = math.exp %286 : vector<2x32xf32>
    %cst_106 = arith.constant 1.000000e+00 : f32
    %288 = vector.broadcast %cst_106 : f32 to vector<2x32xf32>
    %289 = arith.addf %288, %287 : vector<2x32xf32>
    %290 = arith.divf %288, %289 : vector<2x32xf32>
    "tpu.trace_start"() <{level = 10 : i32, message = "bqo,bop->bqp"}> : () -> ()
    %cst_107 = arith.constant dense<0.000000e+00> : vector<2x1x32xf32>
    %291 = tpu.matmul %272, %264, %cst_107 {dimension_numbers = #tpu.dot_dimension_numbers<[2], [1], [1], [2], [0, 0, 0, 1, 1, 2], [0], [0]>} : vector<2x1x32xf32>, vector<2x32x32xf32>, vector<2x1x32xf32> -> vector<2x1x32xf32>
    "tpu.trace_stop"() : () -> ()
    %292 = vector.shape_cast %291 : vector<2x1x32xf32> to vector<2x32xf32>
    "tpu.trace_start"() <{level = 10 : i32, message = "bqi,bip->bqp"}> : () -> ()
    %cst_108 = arith.constant dense<0.000000e+00> : vector<2x1x32xf32>
    %293 = tpu.matmul %285, %277, %cst_108 {dimension_numbers = #tpu.dot_dimension_numbers<[2], [1], [1], [2], [0, 0, 0, 1, 1, 2], [0], [0]>} : vector<2x1x4xf32>, vector<2x4x32xf32>, vector<2x1x32xf32> -> vector<2x1x32xf32>
    "tpu.trace_stop"() : () -> ()
    %294 = vector.shape_cast %293 : vector<2x1x32xf32> to vector<2x32xf32>
    %295 = arith.addf %292, %294 : vector<2x32xf32>
    %296 = arith.mulf %290, %295 : vector<2x32xf32>
    %297 = arith.subf %295, %296 : vector<2x32xf32>
    %298 = arith.index_cast %c3_i32 : i32 to index
    %c0_109 = arith.constant 0 : index
    %c0_110 = arith.constant 0 : index
    %299 = vector.load %arg6[%298, %c0_109, %c0_110] : memref<8x2x32xf32, #tpu.memory_space<vmem>>, vector<1x2x32xf32>
    %300 = vector.shape_cast %299 : vector<1x2x32xf32> to vector<2x32xf32>
    %301 = vector.shape_cast %296 : vector<2x32xf32> to vector<1x2x32xf32>
    tpu.vector_store %arg6[%298, %c0_109, %c0_110], %301 {strides = array<i32>} : memref<8x2x32xf32, #tpu.memory_space<vmem>>, vector<1x2x32xf32>,
    %302 = arith.index_cast %c3_i32 : i32 to index
    %c0_111 = arith.constant 0 : index
    %c0_112 = arith.constant 0 : index
    %303 = vector.load %arg7[%302, %c0_111, %c0_112] : memref<8x2x32xf32, #tpu.memory_space<vmem>>, vector<1x2x32xf32>
    %304 = vector.shape_cast %303 : vector<1x2x32xf32> to vector<2x32xf32>
    %305 = vector.shape_cast %297 : vector<2x32xf32> to vector<1x2x32xf32>
    tpu.vector_store %arg7[%302, %c0_111, %c0_112], %305 {strides = array<i32>} : memref<8x2x32xf32, #tpu.memory_space<vmem>>, vector<1x2x32xf32>,
    %c0_113 = arith.constant 0 : index
    %c0_114 = arith.constant 0 : index
    %306 = vector.load %arg8[%c0_113, %c0_114] : memref<2x32xf32, #tpu.memory_space<vmem>>, vector<2x32xf32>
    tpu.vector_store %arg8[%c0_113, %c0_114], %297 {strides = array<i32>} : memref<2x32xf32, #tpu.memory_space<vmem>>, vector<2x32xf32>,
    %c4_i32 = arith.constant 4 : i32
    %c0_115 = arith.constant 0 : index
    %c0_116 = arith.constant 0 : index
    %307 = vector.load %arg8[%c0_115, %c0_116] : memref<2x32xf32, #tpu.memory_space<vmem>>, vector<2x32xf32>
    %308 = arith.index_cast %c4_i32 : i32 to index
    %c0_117 = arith.constant 0 : index
    %c0_118 = arith.constant 0 : index
    %309 = vector.load %arg1[%308, %c0_117, %c0_118] : memref<8x2x4xf32, #tpu.memory_space<vmem>>, vector<1x2x4xf32>
    %310 = vector.shape_cast %309 : vector<1x2x4xf32> to vector<2x4xf32>
    %cst_119 = arith.constant dense<0.000000e+00> : vector<2xf32>
    %311 = vector.multi_reduction <add>, %307, %cst_119 [1] : vector<2x32xf32> to vector<2xf32>
    %312 = vector.shape_cast %311 : vector<2xf32> to vector<2x1xf32>
    %cst_120 = arith.constant 0.000000e+00 : f32
    %313 = vector.broadcast %cst_120 : f32 to vector<2x1xf32>
    %314 = arith.cmpf oeq, %312, %313 : vector<2x1xf32>
    %cst_121 = arith.constant 1.000000e+00 : f32
    %315 = vector.broadcast %cst_121 : f32 to vector<2x1xf32>
    %316 = arith.select %314, %315, %312 : vector<2x1xi1>, vector<2x1xf32>
    %317 = tpu.reciprocal %316 {approx = true} : vector<2x1xf32> -> vector<2x1xf32>
    %318 = arith.mulf %316, %317 : vector<2x1xf32>
    %cst_122 = arith.constant 2.000000e+00 : f32
    %319 = vector.broadcast %cst_122 : f32 to vector<2x1xf32>
    %320 = arith.subf %319, %318 : vector<2x1xf32>
    %321 = arith.mulf %317, %320 : vector<2x1xf32>
    %322 = vector.broadcast %321 : vector<2x1xf32> to vector<2x32xf32>
    %323 = arith.mulf %307, %322 : vector<2x32xf32>
    %c2_i32_123 = arith.constant 2 : i32
    %324 = arith.muli %c4_i32, %c2_i32_123 : i32
    %cst_124 = arith.constant dense<0.000000e+00> : vector<2x1184xf32>
    %325 = tpu.matmul %323, %10, %cst_124 {dimension_numbers = #tpu.dot_dimension_numbers<[1], [0], [0], [1], [0, 0, 1, 1], [], []>} : vector<2x32xf32>, vector<32x1184xf32>, vector<2x1184xf32> -> vector<2x1184xf32>
    %326 = arith.index_cast %324 : i32 to index
    %c0_125 = arith.constant 0 : index
    %327 = vector.load %arg9[%326, %c0_125] : memref<16x1184xf32, #tpu.memory_space<vmem>>, vector<2x1184xf32>
    %328 = arith.addf %325, %327 : vector<2x1184xf32>
    %329 = vector.extract_strided_slice %328 {offsets = [0, 0], sizes = [2, 1024], strides = [1, 1]} : vector<2x1184xf32> to vector<2x1024xf32>
    %330 = vector.shape_cast %329 : vector<2x1024xf32> to vector<2x32x32xf32>
    %331 = vector.extract_strided_slice %328 {offsets = [0, 1024], sizes = [2, 128], strides = [1, 1]} : vector<2x1184xf32> to vector<2x128xf32>
    %332 = vector.shape_cast %331 : vector<2x128xf32> to vector<2x4x32xf32>
    %333 = vector.extract_strided_slice %328 {offsets = [0, 1152], sizes = [2, 32], strides = [1, 1]} : vector<2x1184xf32> to vector<2x32xf32>
    %cst_126 = arith.constant dense<0xFF800000> : vector<2x32xf32>
    %334 = vector.multi_reduction <maximumf>, %330, %cst_126 [2] : vector<2x32x32xf32> to vector<2x32xf32>
    %335 = vector.shape_cast %334 : vector<2x32xf32> to vector<2x32x1xf32>
    %336 = vector.broadcast %335 : vector<2x32x1xf32> to vector<2x32x32xf32>
    %337 = arith.subf %330, %336 : vector<2x32x32xf32>
    %338 = math.exp %337 : vector<2x32x32xf32>
    %cst_127 = arith.constant dense<0.000000e+00> : vector<2x32xf32>
    %339 = vector.multi_reduction <add>, %338, %cst_127 [2] : vector<2x32x32xf32> to vector<2x32xf32>
    %340 = tpu.reciprocal %339 {approx = true} : vector<2x32xf32> -> vector<2x32xf32>
    %341 = arith.mulf %339, %340 : vector<2x32xf32>
    %cst_128 = arith.constant 2.000000e+00 : f32
    %342 = vector.broadcast %cst_128 : f32 to vector<2x32xf32>
    %343 = arith.subf %342, %341 : vector<2x32xf32>
    %344 = arith.mulf %340, %343 : vector<2x32xf32>
    %345 = arith.mulf %307, %344 : vector<2x32xf32>
    %346 = vector.shape_cast %345 : vector<2x32xf32> to vector<2x1x32xf32>
    %cst_129 = arith.constant dense<0xFF800000> : vector<2x4xf32>
    %347 = vector.multi_reduction <maximumf>, %332, %cst_129 [2] : vector<2x4x32xf32> to vector<2x4xf32>
    %348 = vector.shape_cast %347 : vector<2x4xf32> to vector<2x4x1xf32>
    %349 = vector.broadcast %348 : vector<2x4x1xf32> to vector<2x4x32xf32>
    %350 = arith.subf %332, %349 : vector<2x4x32xf32>
    %351 = math.exp %350 : vector<2x4x32xf32>
    %cst_130 = arith.constant dense<0.000000e+00> : vector<2x4xf32>
    %352 = vector.multi_reduction <add>, %351, %cst_130 [2] : vector<2x4x32xf32> to vector<2x4xf32>
    %353 = tpu.reciprocal %352 {approx = true} : vector<2x4xf32> -> vector<2x4xf32>
    %354 = arith.mulf %352, %353 : vector<2x4xf32>
    %cst_131 = arith.constant 2.000000e+00 : f32
    %355 = vector.broadcast %cst_131 : f32 to vector<2x4xf32>
    %356 = arith.subf %355, %354 : vector<2x4xf32>
    %357 = arith.mulf %353, %356 : vector<2x4xf32>
    %358 = arith.mulf %310, %357 : vector<2x4xf32>
    %359 = vector.shape_cast %358 : vector<2x4xf32> to vector<2x1x4xf32>
    %360 = arith.negf %333 : vector<2x32xf32>
    %361 = math.exp %360 : vector<2x32xf32>
    %cst_132 = arith.constant 1.000000e+00 : f32
    %362 = vector.broadcast %cst_132 : f32 to vector<2x32xf32>
    %363 = arith.addf %362, %361 : vector<2x32xf32>
    %364 = arith.divf %362, %363 : vector<2x32xf32>
    "tpu.trace_start"() <{level = 10 : i32, message = "bqo,bop->bqp"}> : () -> ()
    %cst_133 = arith.constant dense<0.000000e+00> : vector<2x1x32xf32>
    %365 = tpu.matmul %346, %338, %cst_133 {dimension_numbers = #tpu.dot_dimension_numbers<[2], [1], [1], [2], [0, 0, 0, 1, 1, 2], [0], [0]>} : vector<2x1x32xf32>, vector<2x32x32xf32>, vector<2x1x32xf32> -> vector<2x1x32xf32>
    "tpu.trace_stop"() : () -> ()
    %366 = vector.shape_cast %365 : vector<2x1x32xf32> to vector<2x32xf32>
    "tpu.trace_start"() <{level = 10 : i32, message = "bqi,bip->bqp"}> : () -> ()
    %cst_134 = arith.constant dense<0.000000e+00> : vector<2x1x32xf32>
    %367 = tpu.matmul %359, %351, %cst_134 {dimension_numbers = #tpu.dot_dimension_numbers<[2], [1], [1], [2], [0, 0, 0, 1, 1, 2], [0], [0]>} : vector<2x1x4xf32>, vector<2x4x32xf32>, vector<2x1x32xf32> -> vector<2x1x32xf32>
    "tpu.trace_stop"() : () -> ()
    %368 = vector.shape_cast %367 : vector<2x1x32xf32> to vector<2x32xf32>
    %369 = arith.addf %366, %368 : vector<2x32xf32>
    %370 = arith.mulf %364, %369 : vector<2x32xf32>
    %371 = arith.subf %369, %370 : vector<2x32xf32>
    %372 = arith.index_cast %c4_i32 : i32 to index
    %c0_135 = arith.constant 0 : index
    %c0_136 = arith.constant 0 : index
    %373 = vector.load %arg6[%372, %c0_135, %c0_136] : memref<8x2x32xf32, #tpu.memory_space<vmem>>, vector<1x2x32xf32>
    %374 = vector.shape_cast %373 : vector<1x2x32xf32> to vector<2x32xf32>
    %375 = vector.shape_cast %370 : vector<2x32xf32> to vector<1x2x32xf32>
    tpu.vector_store %arg6[%372, %c0_135, %c0_136], %375 {strides = array<i32>} : memref<8x2x32xf32, #tpu.memory_space<vmem>>, vector<1x2x32xf32>,
    %376 = arith.index_cast %c4_i32 : i32 to index
    %c0_137 = arith.constant 0 : index
    %c0_138 = arith.constant 0 : index
    %377 = vector.load %arg7[%376, %c0_137, %c0_138] : memref<8x2x32xf32, #tpu.memory_space<vmem>>, vector<1x2x32xf32>
    %378 = vector.shape_cast %377 : vector<1x2x32xf32> to vector<2x32xf32>
    %379 = vector.shape_cast %371 : vector<2x32xf32> to vector<1x2x32xf32>
    tpu.vector_store %arg7[%376, %c0_137, %c0_138], %379 {strides = array<i32>} : memref<8x2x32xf32, #tpu.memory_space<vmem>>, vector<1x2x32xf32>,
    %c0_139 = arith.constant 0 : index
    %c0_140 = arith.constant 0 : index
    %380 = vector.load %arg8[%c0_139, %c0_140] : memref<2x32xf32, #tpu.memory_space<vmem>>, vector<2x32xf32>
    tpu.vector_store %arg8[%c0_139, %c0_140], %371 {strides = array<i32>} : memref<2x32xf32, #tpu.memory_space<vmem>>, vector<2x32xf32>,
    %c5_i32 = arith.constant 5 : i32
    %c0_141 = arith.constant 0 : index
    %c0_142 = arith.constant 0 : index
    %381 = vector.load %arg8[%c0_141, %c0_142] : memref<2x32xf32, #tpu.memory_space<vmem>>, vector<2x32xf32>
    %382 = arith.index_cast %c5_i32 : i32 to index
    %c0_143 = arith.constant 0 : index
    %c0_144 = arith.constant 0 : index
    %383 = vector.load %arg1[%382, %c0_143, %c0_144] : memref<8x2x4xf32, #tpu.memory_space<vmem>>, vector<1x2x4xf32>
    %384 = vector.shape_cast %383 : vector<1x2x4xf32> to vector<2x4xf32>
    %cst_145 = arith.constant dense<0.000000e+00> : vector<2xf32>
    %385 = vector.multi_reduction <add>, %381, %cst_145 [1] : vector<2x32xf32> to vector<2xf32>
    %386 = vector.shape_cast %385 : vector<2xf32> to vector<2x1xf32>
    %cst_146 = arith.constant 0.000000e+00 : f32
    %387 = vector.broadcast %cst_146 : f32 to vector<2x1xf32>
    %388 = arith.cmpf oeq, %386, %387 : vector<2x1xf32>
    %cst_147 = arith.constant 1.000000e+00 : f32
    %389 = vector.broadcast %cst_147 : f32 to vector<2x1xf32>
    %390 = arith.select %388, %389, %386 : vector<2x1xi1>, vector<2x1xf32>
    %391 = tpu.reciprocal %390 {approx = true} : vector<2x1xf32> -> vector<2x1xf32>
    %392 = arith.mulf %390, %391 : vector<2x1xf32>
    %cst_148 = arith.constant 2.000000e+00 : f32
    %393 = vector.broadcast %cst_148 : f32 to vector<2x1xf32>
    %394 = arith.subf %393, %392 : vector<2x1xf32>
    %395 = arith.mulf %391, %394 : vector<2x1xf32>
    %396 = vector.broadcast %395 : vector<2x1xf32> to vector<2x32xf32>
    %397 = arith.mulf %381, %396 : vector<2x32xf32>
    %c2_i32_149 = arith.constant 2 : i32
    %398 = arith.muli %c5_i32, %c2_i32_149 : i32
    %cst_150 = arith.constant dense<0.000000e+00> : vector<2x1184xf32>
    %399 = tpu.matmul %397, %10, %cst_150 {dimension_numbers = #tpu.dot_dimension_numbers<[1], [0], [0], [1], [0, 0, 1, 1], [], []>} : vector<2x32xf32>, vector<32x1184xf32>, vector<2x1184xf32> -> vector<2x1184xf32>
    %400 = arith.index_cast %398 : i32 to index
    %c0_151 = arith.constant 0 : index
    %401 = vector.load %arg9[%400, %c0_151] : memref<16x1184xf32, #tpu.memory_space<vmem>>, vector<2x1184xf32>
    %402 = arith.addf %399, %401 : vector<2x1184xf32>
    %403 = vector.extract_strided_slice %402 {offsets = [0, 0], sizes = [2, 1024], strides = [1, 1]} : vector<2x1184xf32> to vector<2x1024xf32>
    %404 = vector.shape_cast %403 : vector<2x1024xf32> to vector<2x32x32xf32>
    %405 = vector.extract_strided_slice %402 {offsets = [0, 1024], sizes = [2, 128], strides = [1, 1]} : vector<2x1184xf32> to vector<2x128xf32>
    %406 = vector.shape_cast %405 : vector<2x128xf32> to vector<2x4x32xf32>
    %407 = vector.extract_strided_slice %402 {offsets = [0, 1152], sizes = [2, 32], strides = [1, 1]} : vector<2x1184xf32> to vector<2x32xf32>
    %cst_152 = arith.constant dense<0xFF800000> : vector<2x32xf32>
    %408 = vector.multi_reduction <maximumf>, %404, %cst_152 [2] : vector<2x32x32xf32> to vector<2x32xf32>
    %409 = vector.shape_cast %408 : vector<2x32xf32> to vector<2x32x1xf32>
    %410 = vector.broadcast %409 : vector<2x32x1xf32> to vector<2x32x32xf32>
    %411 = arith.subf %404, %410 : vector<2x32x32xf32>
    %412 = math.exp %411 : vector<2x32x32xf32>
    %cst_153 = arith.constant dense<0.000000e+00> : vector<2x32xf32>
    %413 = vector.multi_reduction <add>, %412, %cst_153 [2] : vector<2x32x32xf32> to vector<2x32xf32>
    %414 = tpu.reciprocal %413 {approx = true} : vector<2x32xf32> -> vector<2x32xf32>
    %415 = arith.mulf %413, %414 : vector<2x32xf32>
    %cst_154 = arith.constant 2.000000e+00 : f32
    %416 = vector.broadcast %cst_154 : f32 to vector<2x32xf32>
    %417 = arith.subf %416, %415 : vector<2x32xf32>
    %418 = arith.mulf %414, %417 : vector<2x32xf32>
    %419 = arith.mulf %381, %418 : vector<2x32xf32>
    %420 = vector.shape_cast %419 : vector<2x32xf32> to vector<2x1x32xf32>
    %cst_155 = arith.constant dense<0xFF800000> : vector<2x4xf32>
    %421 = vector.multi_reduction <maximumf>, %406, %cst_155 [2] : vector<2x4x32xf32> to vector<2x4xf32>
    %422 = vector.shape_cast %421 : vector<2x4xf32> to vector<2x4x1xf32>
    %423 = vector.broadcast %422 : vector<2x4x1xf32> to vector<2x4x32xf32>
    %424 = arith.subf %406, %423 : vector<2x4x32xf32>
    %425 = math.exp %424 : vector<2x4x32xf32>
    %cst_156 = arith.constant dense<0.000000e+00> : vector<2x4xf32>
    %426 = vector.multi_reduction <add>, %425, %cst_156 [2] : vector<2x4x32xf32> to vector<2x4xf32>
    %427 = tpu.reciprocal %426 {approx = true} : vector<2x4xf32> -> vector<2x4xf32>
    %428 = arith.mulf %426, %427 : vector<2x4xf32>
    %cst_157 = arith.constant 2.000000e+00 : f32
    %429 = vector.broadcast %cst_157 : f32 to vector<2x4xf32>
    %430 = arith.subf %429, %428 : vector<2x4xf32>
    %431 = arith.mulf %427, %430 : vector<2x4xf32>
    %432 = arith.mulf %384, %431 : vector<2x4xf32>
    %433 = vector.shape_cast %432 : vector<2x4xf32> to vector<2x1x4xf32>
    %434 = arith.negf %407 : vector<2x32xf32>
    %435 = math.exp %434 : vector<2x32xf32>
    %cst_158 = arith.constant 1.000000e+00 : f32
    %436 = vector.broadcast %cst_158 : f32 to vector<2x32xf32>
    %437 = arith.addf %436, %435 : vector<2x32xf32>
    %438 = arith.divf %436, %437 : vector<2x32xf32>
    "tpu.trace_start"() <{level = 10 : i32, message = "bqo,bop->bqp"}> : () -> ()
    %cst_159 = arith.constant dense<0.000000e+00> : vector<2x1x32xf32>
    %439 = tpu.matmul %420, %412, %cst_159 {dimension_numbers = #tpu.dot_dimension_numbers<[2], [1], [1], [2], [0, 0, 0, 1, 1, 2], [0], [0]>} : vector<2x1x32xf32>, vector<2x32x32xf32>, vector<2x1x32xf32> -> vector<2x1x32xf32>
    "tpu.trace_stop"() : () -> ()
    %440 = vector.shape_cast %439 : vector<2x1x32xf32> to vector<2x32xf32>
    "tpu.trace_start"() <{level = 10 : i32, message = "bqi,bip->bqp"}> : () -> ()
    %cst_160 = arith.constant dense<0.000000e+00> : vector<2x1x32xf32>
    %441 = tpu.matmul %433, %425, %cst_160 {dimension_numbers = #tpu.dot_dimension_numbers<[2], [1], [1], [2], [0, 0, 0, 1, 1, 2], [0], [0]>} : vector<2x1x4xf32>, vector<2x4x32xf32>, vector<2x1x32xf32> -> vector<2x1x32xf32>
    "tpu.trace_stop"() : () -> ()
    %442 = vector.shape_cast %441 : vector<2x1x32xf32> to vector<2x32xf32>
    %443 = arith.addf %440, %442 : vector<2x32xf32>
    %444 = arith.mulf %438, %443 : vector<2x32xf32>
    %445 = arith.subf %443, %444 : vector<2x32xf32>
    %446 = arith.index_cast %c5_i32 : i32 to index
    %c0_161 = arith.constant 0 : index
    %c0_162 = arith.constant 0 : index
    %447 = vector.load %arg6[%446, %c0_161, %c0_162] : memref<8x2x32xf32, #tpu.memory_space<vmem>>, vector<1x2x32xf32>
    %448 = vector.shape_cast %447 : vector<1x2x32xf32> to vector<2x32xf32>
    %449 = vector.shape_cast %444 : vector<2x32xf32> to vector<1x2x32xf32>
    tpu.vector_store %arg6[%446, %c0_161, %c0_162], %449 {strides = array<i32>} : memref<8x2x32xf32, #tpu.memory_space<vmem>>, vector<1x2x32xf32>,
    %450 = arith.index_cast %c5_i32 : i32 to index
    %c0_163 = arith.constant 0 : index
    %c0_164 = arith.constant 0 : index
    %451 = vector.load %arg7[%450, %c0_163, %c0_164] : memref<8x2x32xf32, #tpu.memory_space<vmem>>, vector<1x2x32xf32>
    %452 = vector.shape_cast %451 : vector<1x2x32xf32> to vector<2x32xf32>
    %453 = vector.shape_cast %445 : vector<2x32xf32> to vector<1x2x32xf32>
    tpu.vector_store %arg7[%450, %c0_163, %c0_164], %453 {strides = array<i32>} : memref<8x2x32xf32, #tpu.memory_space<vmem>>, vector<1x2x32xf32>,
    %c0_165 = arith.constant 0 : index
    %c0_166 = arith.constant 0 : index
    %454 = vector.load %arg8[%c0_165, %c0_166] : memref<2x32xf32, #tpu.memory_space<vmem>>, vector<2x32xf32>
    tpu.vector_store %arg8[%c0_165, %c0_166], %445 {strides = array<i32>} : memref<2x32xf32, #tpu.memory_space<vmem>>, vector<2x32xf32>,
    %c6_i32 = arith.constant 6 : i32
    %c0_167 = arith.constant 0 : index
    %c0_168 = arith.constant 0 : index
    %455 = vector.load %arg8[%c0_167, %c0_168] : memref<2x32xf32, #tpu.memory_space<vmem>>, vector<2x32xf32>
    %456 = arith.index_cast %c6_i32 : i32 to index
    %c0_169 = arith.constant 0 : index
    %c0_170 = arith.constant 0 : index
    %457 = vector.load %arg1[%456, %c0_169, %c0_170] : memref<8x2x4xf32, #tpu.memory_space<vmem>>, vector<1x2x4xf32>
    %458 = vector.shape_cast %457 : vector<1x2x4xf32> to vector<2x4xf32>
    %cst_171 = arith.constant dense<0.000000e+00> : vector<2xf32>
    %459 = vector.multi_reduction <add>, %455, %cst_171 [1] : vector<2x32xf32> to vector<2xf32>
    %460 = vector.shape_cast %459 : vector<2xf32> to vector<2x1xf32>
    %cst_172 = arith.constant 0.000000e+00 : f32
    %461 = vector.broadcast %cst_172 : f32 to vector<2x1xf32>
    %462 = arith.cmpf oeq, %460, %461 : vector<2x1xf32>
    %cst_173 = arith.constant 1.000000e+00 : f32
    %463 = vector.broadcast %cst_173 : f32 to vector<2x1xf32>
    %464 = arith.select %462, %463, %460 : vector<2x1xi1>, vector<2x1xf32>
    %465 = tpu.reciprocal %464 {approx = true} : vector<2x1xf32> -> vector<2x1xf32>
    %466 = arith.mulf %464, %465 : vector<2x1xf32>
    %cst_174 = arith.constant 2.000000e+00 : f32
    %467 = vector.broadcast %cst_174 : f32 to vector<2x1xf32>
    %468 = arith.subf %467, %466 : vector<2x1xf32>
    %469 = arith.mulf %465, %468 : vector<2x1xf32>
    %470 = vector.broadcast %469 : vector<2x1xf32> to vector<2x32xf32>
    %471 = arith.mulf %455, %470 : vector<2x32xf32>
    %c2_i32_175 = arith.constant 2 : i32
    %472 = arith.muli %c6_i32, %c2_i32_175 : i32
    %cst_176 = arith.constant dense<0.000000e+00> : vector<2x1184xf32>
    %473 = tpu.matmul %471, %10, %cst_176 {dimension_numbers = #tpu.dot_dimension_numbers<[1], [0], [0], [1], [0, 0, 1, 1], [], []>} : vector<2x32xf32>, vector<32x1184xf32>, vector<2x1184xf32> -> vector<2x1184xf32>
    %474 = arith.index_cast %472 : i32 to index
    %c0_177 = arith.constant 0 : index
    %475 = vector.load %arg9[%474, %c0_177] : memref<16x1184xf32, #tpu.memory_space<vmem>>, vector<2x1184xf32>
    %476 = arith.addf %473, %475 : vector<2x1184xf32>
    %477 = vector.extract_strided_slice %476 {offsets = [0, 0], sizes = [2, 1024], strides = [1, 1]} : vector<2x1184xf32> to vector<2x1024xf32>
    %478 = vector.shape_cast %477 : vector<2x1024xf32> to vector<2x32x32xf32>
    %479 = vector.extract_strided_slice %476 {offsets = [0, 1024], sizes = [2, 128], strides = [1, 1]} : vector<2x1184xf32> to vector<2x128xf32>
    %480 = vector.shape_cast %479 : vector<2x128xf32> to vector<2x4x32xf32>
    %481 = vector.extract_strided_slice %476 {offsets = [0, 1152], sizes = [2, 32], strides = [1, 1]} : vector<2x1184xf32> to vector<2x32xf32>
    %cst_178 = arith.constant dense<0xFF800000> : vector<2x32xf32>
    %482 = vector.multi_reduction <maximumf>, %478, %cst_178 [2] : vector<2x32x32xf32> to vector<2x32xf32>
    %483 = vector.shape_cast %482 : vector<2x32xf32> to vector<2x32x1xf32>
    %484 = vector.broadcast %483 : vector<2x32x1xf32> to vector<2x32x32xf32>
    %485 = arith.subf %478, %484 : vector<2x32x32xf32>
    %486 = math.exp %485 : vector<2x32x32xf32>
    %cst_179 = arith.constant dense<0.000000e+00> : vector<2x32xf32>
    %487 = vector.multi_reduction <add>, %486, %cst_179 [2] : vector<2x32x32xf32> to vector<2x32xf32>
    %488 = tpu.reciprocal %487 {approx = true} : vector<2x32xf32> -> vector<2x32xf32>
    %489 = arith.mulf %487, %488 : vector<2x32xf32>
    %cst_180 = arith.constant 2.000000e+00 : f32
    %490 = vector.broadcast %cst_180 : f32 to vector<2x32xf32>
    %491 = arith.subf %490, %489 : vector<2x32xf32>
    %492 = arith.mulf %488, %491 : vector<2x32xf32>
    %493 = arith.mulf %455, %492 : vector<2x32xf32>
    %494 = vector.shape_cast %493 : vector<2x32xf32> to vector<2x1x32xf32>
    %cst_181 = arith.constant dense<0xFF800000> : vector<2x4xf32>
    %495 = vector.multi_reduction <maximumf>, %480, %cst_181 [2] : vector<2x4x32xf32> to vector<2x4xf32>
    %496 = vector.shape_cast %495 : vector<2x4xf32> to vector<2x4x1xf32>
    %497 = vector.broadcast %496 : vector<2x4x1xf32> to vector<2x4x32xf32>
    %498 = arith.subf %480, %497 : vector<2x4x32xf32>
    %499 = math.exp %498 : vector<2x4x32xf32>
    %cst_182 = arith.constant dense<0.000000e+00> : vector<2x4xf32>
    %500 = vector.multi_reduction <add>, %499, %cst_182 [2] : vector<2x4x32xf32> to vector<2x4xf32>
    %501 = tpu.reciprocal %500 {approx = true} : vector<2x4xf32> -> vector<2x4xf32>
    %502 = arith.mulf %500, %501 : vector<2x4xf32>
    %cst_183 = arith.constant 2.000000e+00 : f32
    %503 = vector.broadcast %cst_183 : f32 to vector<2x4xf32>
    %504 = arith.subf %503, %502 : vector<2x4xf32>
    %505 = arith.mulf %501, %504 : vector<2x4xf32>
    %506 = arith.mulf %458, %505 : vector<2x4xf32>
    %507 = vector.shape_cast %506 : vector<2x4xf32> to vector<2x1x4xf32>
    %508 = arith.negf %481 : vector<2x32xf32>
    %509 = math.exp %508 : vector<2x32xf32>
    %cst_184 = arith.constant 1.000000e+00 : f32
    %510 = vector.broadcast %cst_184 : f32 to vector<2x32xf32>
    %511 = arith.addf %510, %509 : vector<2x32xf32>
    %512 = arith.divf %510, %511 : vector<2x32xf32>
    "tpu.trace_start"() <{level = 10 : i32, message = "bqo,bop->bqp"}> : () -> ()
    %cst_185 = arith.constant dense<0.000000e+00> : vector<2x1x32xf32>
    %513 = tpu.matmul %494, %486, %cst_185 {dimension_numbers = #tpu.dot_dimension_numbers<[2], [1], [1], [2], [0, 0, 0, 1, 1, 2], [0], [0]>} : vector<2x1x32xf32>, vector<2x32x32xf32>, vector<2x1x32xf32> -> vector<2x1x32xf32>
    "tpu.trace_stop"() : () -> ()
    %514 = vector.shape_cast %513 : vector<2x1x32xf32> to vector<2x32xf32>
    "tpu.trace_start"() <{level = 10 : i32, message = "bqi,bip->bqp"}> : () -> ()
    %cst_186 = arith.constant dense<0.000000e+00> : vector<2x1x32xf32>
    %515 = tpu.matmul %507, %499, %cst_186 {dimension_numbers = #tpu.dot_dimension_numbers<[2], [1], [1], [2], [0, 0, 0, 1, 1, 2], [0], [0]>} : vector<2x1x4xf32>, vector<2x4x32xf32>, vector<2x1x32xf32> -> vector<2x1x32xf32>
    "tpu.trace_stop"() : () -> ()
    %516 = vector.shape_cast %515 : vector<2x1x32xf32> to vector<2x32xf32>
    %517 = arith.addf %514, %516 : vector<2x32xf32>
    %518 = arith.mulf %512, %517 : vector<2x32xf32>
    %519 = arith.subf %517, %518 : vector<2x32xf32>
    %520 = arith.index_cast %c6_i32 : i32 to index
    %c0_187 = arith.constant 0 : index
    %c0_188 = arith.constant 0 : index
    %521 = vector.load %arg6[%520, %c0_187, %c0_188] : memref<8x2x32xf32, #tpu.memory_space<vmem>>, vector<1x2x32xf32>
    %522 = vector.shape_cast %521 : vector<1x2x32xf32> to vector<2x32xf32>
    %523 = vector.shape_cast %518 : vector<2x32xf32> to vector<1x2x32xf32>
    tpu.vector_store %arg6[%520, %c0_187, %c0_188], %523 {strides = array<i32>} : memref<8x2x32xf32, #tpu.memory_space<vmem>>, vector<1x2x32xf32>,
    %524 = arith.index_cast %c6_i32 : i32 to index
    %c0_189 = arith.constant 0 : index
    %c0_190 = arith.constant 0 : index
    %525 = vector.load %arg7[%524, %c0_189, %c0_190] : memref<8x2x32xf32, #tpu.memory_space<vmem>>, vector<1x2x32xf32>
    %526 = vector.shape_cast %525 : vector<1x2x32xf32> to vector<2x32xf32>
    %527 = vector.shape_cast %519 : vector<2x32xf32> to vector<1x2x32xf32>
    tpu.vector_store %arg7[%524, %c0_189, %c0_190], %527 {strides = array<i32>} : memref<8x2x32xf32, #tpu.memory_space<vmem>>, vector<1x2x32xf32>,
    %c0_191 = arith.constant 0 : index
    %c0_192 = arith.constant 0 : index
    %528 = vector.load %arg8[%c0_191, %c0_192] : memref<2x32xf32, #tpu.memory_space<vmem>>, vector<2x32xf32>
    tpu.vector_store %arg8[%c0_191, %c0_192], %519 {strides = array<i32>} : memref<2x32xf32, #tpu.memory_space<vmem>>, vector<2x32xf32>,
    %c7_i32 = arith.constant 7 : i32
    %c0_193 = arith.constant 0 : index
    %c0_194 = arith.constant 0 : index
    %529 = vector.load %arg8[%c0_193, %c0_194] : memref<2x32xf32, #tpu.memory_space<vmem>>, vector<2x32xf32>
    %530 = arith.index_cast %c7_i32 : i32 to index
    %c0_195 = arith.constant 0 : index
    %c0_196 = arith.constant 0 : index
    %531 = vector.load %arg1[%530, %c0_195, %c0_196] : memref<8x2x4xf32, #tpu.memory_space<vmem>>, vector<1x2x4xf32>
    %532 = vector.shape_cast %531 : vector<1x2x4xf32> to vector<2x4xf32>
    %cst_197 = arith.constant dense<0.000000e+00> : vector<2xf32>
    %533 = vector.multi_reduction <add>, %529, %cst_197 [1] : vector<2x32xf32> to vector<2xf32>
    %534 = vector.shape_cast %533 : vector<2xf32> to vector<2x1xf32>
    %cst_198 = arith.constant 0.000000e+00 : f32
    %535 = vector.broadcast %cst_198 : f32 to vector<2x1xf32>
    %536 = arith.cmpf oeq, %534, %535 : vector<2x1xf32>
    %cst_199 = arith.constant 1.000000e+00 : f32
    %537 = vector.broadcast %cst_199 : f32 to vector<2x1xf32>
    %538 = arith.select %536, %537, %534 : vector<2x1xi1>, vector<2x1xf32>
    %539 = tpu.reciprocal %538 {approx = true} : vector<2x1xf32> -> vector<2x1xf32>
    %540 = arith.mulf %538, %539 : vector<2x1xf32>
    %cst_200 = arith.constant 2.000000e+00 : f32
    %541 = vector.broadcast %cst_200 : f32 to vector<2x1xf32>
    %542 = arith.subf %541, %540 : vector<2x1xf32>
    %543 = arith.mulf %539, %542 : vector<2x1xf32>
    %544 = vector.broadcast %543 : vector<2x1xf32> to vector<2x32xf32>
    %545 = arith.mulf %529, %544 : vector<2x32xf32>
    %c2_i32_201 = arith.constant 2 : i32
    %546 = arith.muli %c7_i32, %c2_i32_201 : i32
    %cst_202 = arith.constant dense<0.000000e+00> : vector<2x1184xf32>
    %547 = tpu.matmul %545, %10, %cst_202 {dimension_numbers = #tpu.dot_dimension_numbers<[1], [0], [0], [1], [0, 0, 1, 1], [], []>} : vector<2x32xf32>, vector<32x1184xf32>, vector<2x1184xf32> -> vector<2x1184xf32>
    %548 = arith.index_cast %546 : i32 to index
    %c0_203 = arith.constant 0 : index
    %549 = vector.load %arg9[%548, %c0_203] : memref<16x1184xf32, #tpu.memory_space<vmem>>, vector<2x1184xf32>
    %550 = arith.addf %547, %549 : vector<2x1184xf32>
    %551 = vector.extract_strided_slice %550 {offsets = [0, 0], sizes = [2, 1024], strides = [1, 1]} : vector<2x1184xf32> to vector<2x1024xf32>
    %552 = vector.shape_cast %551 : vector<2x1024xf32> to vector<2x32x32xf32>
    %553 = vector.extract_strided_slice %550 {offsets = [0, 1024], sizes = [2, 128], strides = [1, 1]} : vector<2x1184xf32> to vector<2x128xf32>
    %554 = vector.shape_cast %553 : vector<2x128xf32> to vector<2x4x32xf32>
    %555 = vector.extract_strided_slice %550 {offsets = [0, 1152], sizes = [2, 32], strides = [1, 1]} : vector<2x1184xf32> to vector<2x32xf32>
    %cst_204 = arith.constant dense<0xFF800000> : vector<2x32xf32>
    %556 = vector.multi_reduction <maximumf>, %552, %cst_204 [2] : vector<2x32x32xf32> to vector<2x32xf32>
    %557 = vector.shape_cast %556 : vector<2x32xf32> to vector<2x32x1xf32>
    %558 = vector.broadcast %557 : vector<2x32x1xf32> to vector<2x32x32xf32>
    %559 = arith.subf %552, %558 : vector<2x32x32xf32>
    %560 = math.exp %559 : vector<2x32x32xf32>
    %cst_205 = arith.constant dense<0.000000e+00> : vector<2x32xf32>
    %561 = vector.multi_reduction <add>, %560, %cst_205 [2] : vector<2x32x32xf32> to vector<2x32xf32>
    %562 = tpu.reciprocal %561 {approx = true} : vector<2x32xf32> -> vector<2x32xf32>
    %563 = arith.mulf %561, %562 : vector<2x32xf32>
    %cst_206 = arith.constant 2.000000e+00 : f32
    %564 = vector.broadcast %cst_206 : f32 to vector<2x32xf32>
    %565 = arith.subf %564, %563 : vector<2x32xf32>
    %566 = arith.mulf %562, %565 : vector<2x32xf32>
    %567 = arith.mulf %529, %566 : vector<2x32xf32>
    %568 = vector.shape_cast %567 : vector<2x32xf32> to vector<2x1x32xf32>
    %cst_207 = arith.constant dense<0xFF800000> : vector<2x4xf32>
    %569 = vector.multi_reduction <maximumf>, %554, %cst_207 [2] : vector<2x4x32xf32> to vector<2x4xf32>
    %570 = vector.shape_cast %569 : vector<2x4xf32> to vector<2x4x1xf32>
    %571 = vector.broadcast %570 : vector<2x4x1xf32> to vector<2x4x32xf32>
    %572 = arith.subf %554, %571 : vector<2x4x32xf32>
    %573 = math.exp %572 : vector<2x4x32xf32>
    %cst_208 = arith.constant dense<0.000000e+00> : vector<2x4xf32>
    %574 = vector.multi_reduction <add>, %573, %cst_208 [2] : vector<2x4x32xf32> to vector<2x4xf32>
    %575 = tpu.reciprocal %574 {approx = true} : vector<2x4xf32> -> vector<2x4xf32>
    %576 = arith.mulf %574, %575 : vector<2x4xf32>
    %cst_209 = arith.constant 2.000000e+00 : f32
    %577 = vector.broadcast %cst_209 : f32 to vector<2x4xf32>
    %578 = arith.subf %577, %576 : vector<2x4xf32>
    %579 = arith.mulf %575, %578 : vector<2x4xf32>
    %580 = arith.mulf %532, %579 : vector<2x4xf32>
    %581 = vector.shape_cast %580 : vector<2x4xf32> to vector<2x1x4xf32>
    %582 = arith.negf %555 : vector<2x32xf32>
    %583 = math.exp %582 : vector<2x32xf32>
    %cst_210 = arith.constant 1.000000e+00 : f32
    %584 = vector.broadcast %cst_210 : f32 to vector<2x32xf32>
    %585 = arith.addf %584, %583 : vector<2x32xf32>
    %586 = arith.divf %584, %585 : vector<2x32xf32>
    "tpu.trace_start"() <{level = 10 : i32, message = "bqo,bop->bqp"}> : () -> ()
    %cst_211 = arith.constant dense<0.000000e+00> : vector<2x1x32xf32>
    %587 = tpu.matmul %568, %560, %cst_211 {dimension_numbers = #tpu.dot_dimension_numbers<[2], [1], [1], [2], [0, 0, 0, 1, 1, 2], [0], [0]>} : vector<2x1x32xf32>, vector<2x32x32xf32>, vector<2x1x32xf32> -> vector<2x1x32xf32>
    "tpu.trace_stop"() : () -> ()
    %588 = vector.shape_cast %587 : vector<2x1x32xf32> to vector<2x32xf32>
    "tpu.trace_start"() <{level = 10 : i32, message = "bqi,bip->bqp"}> : () -> ()
    %cst_212 = arith.constant dense<0.000000e+00> : vector<2x1x32xf32>
    %589 = tpu.matmul %581, %573, %cst_212 {dimension_numbers = #tpu.dot_dimension_numbers<[2], [1], [1], [2], [0, 0, 0, 1, 1, 2], [0], [0]>} : vector<2x1x4xf32>, vector<2x4x32xf32>, vector<2x1x32xf32> -> vector<2x1x32xf32>
    "tpu.trace_stop"() : () -> ()
    %590 = vector.shape_cast %589 : vector<2x1x32xf32> to vector<2x32xf32>
    %591 = arith.addf %588, %590 : vector<2x32xf32>
    %592 = arith.mulf %586, %591 : vector<2x32xf32>
    %593 = arith.subf %591, %592 : vector<2x32xf32>
    %594 = arith.index_cast %c7_i32 : i32 to index
    %c0_213 = arith.constant 0 : index
    %c0_214 = arith.constant 0 : index
    %595 = vector.load %arg6[%594, %c0_213, %c0_214] : memref<8x2x32xf32, #tpu.memory_space<vmem>>, vector<1x2x32xf32>
    %596 = vector.shape_cast %595 : vector<1x2x32xf32> to vector<2x32xf32>
    %597 = vector.shape_cast %592 : vector<2x32xf32> to vector<1x2x32xf32>
    tpu.vector_store %arg6[%594, %c0_213, %c0_214], %597 {strides = array<i32>} : memref<8x2x32xf32, #tpu.memory_space<vmem>>, vector<1x2x32xf32>,
    %598 = arith.index_cast %c7_i32 : i32 to index
    %c0_215 = arith.constant 0 : index
    %c0_216 = arith.constant 0 : index
    %599 = vector.load %arg7[%598, %c0_215, %c0_216] : memref<8x2x32xf32, #tpu.memory_space<vmem>>, vector<1x2x32xf32>
    %600 = vector.shape_cast %599 : vector<1x2x32xf32> to vector<2x32xf32>
    %601 = vector.shape_cast %593 : vector<2x32xf32> to vector<1x2x32xf32>
    tpu.vector_store %arg7[%598, %c0_215, %c0_216], %601 {strides = array<i32>} : memref<8x2x32xf32, #tpu.memory_space<vmem>>, vector<1x2x32xf32>,
    %c0_217 = arith.constant 0 : index
    %c0_218 = arith.constant 0 : index
    %602 = vector.load %arg8[%c0_217, %c0_218] : memref<2x32xf32, #tpu.memory_space<vmem>>, vector<2x32xf32>
    tpu.vector_store %arg8[%c0_217, %c0_218], %593 {strides = array<i32>} : memref<2x32xf32, #tpu.memory_space<vmem>>, vector<2x32xf32>,
    %c8_i32 = arith.constant 8 : i32
    return
  }
  func.func @transform_0(%arg0: i32) -> (i32, i32, i32) {
    %c0_i32 = arith.constant 0 : i32
    %c0_i32_0 = arith.constant 0 : i32
    %c0_i32_1 = arith.constant 0 : i32
    return %arg0, %c0_i32, %c0_i32_0 : i32, i32, i32
  }
  func.func @transform_1(%arg0: i32) -> (i32, i32) {
    %c0_i32 = arith.constant 0 : i32
    %c0_i32_0 = arith.constant 0 : i32
    return %arg0, %c0_i32 : i32, i32
  }
  func.func @transform_2(%arg0: i32) -> (i32, i32) {
    %c0_i32 = arith.constant 0 : i32
    %c0_i32_0 = arith.constant 0 : i32
    %c0_i32_1 = arith.constant 0 : i32
    return %c0_i32, %c0_i32_0 : i32, i32
  }
  func.func @transform_3(%arg0: i32) -> (i32, i32) {
    %c0_i32 = arith.constant 0 : i32
    %c0_i32_0 = arith.constant 0 : i32
    %c0_i32_1 = arith.constant 0 : i32
    return %c0_i32, %c0_i32_0 : i32, i32
  }
  func.func @transform_4(%arg0: i32) -> (i32, i32) {
    %c0_i32 = arith.constant 0 : i32
    %c0_i32_0 = arith.constant 0 : i32
    %c0_i32_1 = arith.constant 0 : i32
    return %c0_i32, %c0_i32_0 : i32, i32
  }
  func.func @transform_5(%arg0: i32) -> (i32, i32, i32) {
    %c0_i32 = arith.constant 0 : i32
    %c0_i32_0 = arith.constant 0 : i32
    %c0_i32_1 = arith.constant 0 : i32
    return %arg0, %c0_i32, %c0_i32_0 : i32, i32, i32
  }
  func.func @transform_6(%arg0: i32) -> (i32, i32, i32) {
    %c0_i32 = arith.constant 0 : i32
    %c0_i32_0 = arith.constant 0 : i32
    %c0_i32_1 = arith.constant 0 : i32
    return %arg0, %c0_i32, %c0_i32_0 : i32, i32, i32
  }
}

</mosaic_0001>

<bundles_post_ra>
// kernel: tpu_custom_call.1
= control target key start
LH: loop header
LB: loop body
LE: loop exit
PB: predicated region body
PF: predicated region fallthrough
CT: control target
= control target key end

     0   :  { %12 = vsyncpa [#allocation5], 0  ;;  %s14439_s0 = inlined_call_operand.vmem [shape: f32[8,2,4], index: 0, kind: input, shape index: {}]   ;;  %s14440_s1 = inlined_call_operand.vmem [shape: f32[16,3], index: 1, kind: input, shape index: {}]   ;;  %s14441_s2 = inlined_call_operand.vmem [shape: f32[3,1184], index: 2, kind: input, shape index: {}]   ;;  %s14442_s3 = inlined_call_operand.hbm [shape: f32[32,1184], index: 3, kind: input, shape index: {}]   ;;  %s14443_s4 = inlined_call_operand.vmem [shape: f32[1,1184], index: 4, kind: input, shape index: {}]   ;;  %s14444_s5 = inlined_call_operand.hbm [shape: f32[8,2,32], index: 5, kind: output, shape index: {0}]   ;;  %s14445_s6 = inlined_call_operand.hbm [shape: f32[8,2,32], index: 6, kind: output, shape index: {1}]  }
   0x1   :  { %13 = vsyncpa [#allocation6], 0 }
   0x2   :  { %14 = vsyncpa [#allocation9], 0  ;;  %s11981_s21 = smov [#allocation4]  }
   0x3   :  { %s26_s22 = sshll.u32 %s11981_s21, 4  ;;  %s27_s22 = int_to_ptr.vmem [resolvable:$true] %s26_s22 }
   0x4   :  { %s11923_s23 = scalar_lea.vmem %s27_s22, 5120  ;;  %p11928_p1 = scmp.lt.s32.totalorder %s27_s22, %s27_s22 }
   0x5   :  { %p11924_p0 = scmp.ne.s32.totalorder %s27_s22, %s11923_s23  ;;  %p11929_p2 = scmp.lt.s32.totalorder %s11923_s23, %s11923_s23 }
   0x7   :  { %p11930_p3 = por %p11929_p2, %p11928_p1 }
   0x9   :  { %p11931_p4 = pnand %p11930_p3, %p11924_p0 }
   0xb   :  { %11934 = shalt.err (!%p11931_p4)
}
   0xc   :  { %s11982_s24 = smov 1280   ;;  %s11983_s25 = smov 80  }
   0xd   :  { %32 = dma.hbm_to_vmem [thread:$0]  %s14442_s3, 5120, %s27_s22, [#allocation5], %s11982_s24, %s11982_s24, %s11983_s25  }
   0xe   :  { %11975 = dma.done.wait [#allocation5], 5120  }
   0xf   :  { %11976 = vsyncadd [#allocation5], 4294962176  ;;  %vm42_vm0 = vcmask 254976   ;;  %v14446_v0 = vmov 0.0   ;;  %v46_v1 = vld [vmem:[%s14441_s2] sm:$0x77]  ;;  %v55_v62 = vlaneseq }
  0x10   :  { %43 = vst.msk [vmem:[#allocation2] sm:$0x3] %vm42_vm0, %v14446_v0  ;;  %207 = vmatprep.mubr.f32.mxu0 %v14446_v0  ;;  %284 = vmatprep.mubr.f32.mxu1 %v14446_v0  ;;  %vm122_vm1 = vcmask 1042432   ;;  %v110_v3 = vcombine.high %v46_v1, %v46_v1  ;;  %v44_v5 = vld [vmem:[%s14440_s1] sm:$0xff]  ;;  %vm115_vm2 = vcmask 23552   ;;  %v45_v8 = vld [vmem:[%s14440_s1 + $0x8] sm:$0xff] }
  0x11   :  { %v47_v6 = vld [vmem:[%s14441_s2 + $0x8] sm:$0x77]  ;;  %v48_v9 = vld [vmem:[%s14441_s2 + $0x10] sm:$0x77]  ;;  %v49_v11 = vld [vmem:[%s14441_s2 + $0x18] sm:$0x77] }
  0x12   :  { %10876 = vmatprep.subr.msk.mxu0 %vm122_vm1, %v110_v3  ;;  %v111_v7 = vcombine.high %v47_v6, %v47_v6  ;;  %v112_v10 = vcombine.high %v48_v9, %v48_v9  ;;  %v113_v12 = vcombine.high %v49_v11, %v49_v11  ;;  %v50_v13 = vld [vmem:[%s14441_s2 + $0x20] sm:$0x77]  ;;  %v582_v16 = vld [vmem:[#allocation4 + $0x108] sm:$0xff]  ;;  %v579_v17 = vld [vmem:[#allocation4 + $0xf0] sm:$0xff]  ;;  %vm537_vm4 = vcmask 261120   ;;  %s11986_s19 = smov 96  }
  0x13   :  { %10877 = vmatpush1.msk.msra.mxu0 %vm122_vm1, %v46_v1  ;;  %v114_v14 = vcombine.high %v50_v13, %v50_v13  ;;  %v580_v15 = vld [vmem:[#allocation4 + $0xf8] sm:$0xff]  ;;  %v581_v18 = vld [vmem:[#allocation4 + $0x100] sm:$0xff]  ;;  %v570_v19 = vld [vmem:[#allocation4 + $0xa8] sm:$0xff]  ;;  %v12104_v63 = vshrl.u32 %v55_v62, 7  ;;  %s11987_s20 = smov 32   ;;  %vm1470_vm5 = vcmask 257024  }
  0x14   :  { %10878 = vmatmul.mubr.msk.f32.vlgmr.msra.gmra.mxu0 %vm115_vm2, %v44_v5  ;;  %10880 = vmatprep.subr.msk.mxu1 %vm122_vm1, %v111_v7  ;;  %v572_v20 = vld [vmem:[#allocation4 + $0xb8] sm:$0xff]  ;;  %v569_v21 = vld [vmem:[#allocation4 + $0xa0] sm:$0xff]  ;;  %v571_v22 = vld [vmem:[#allocation4 + $0xb0] sm:$0xff]  ;;  %vm11990_vm6 = vmmov 0   ;;  %vm1408_vm7 = vcmask 130112   ;;  %vm1415_vm8 = vcmask 195712  }
  0x15   :  { %213 = vmatprep.mubr.f32.mxu0 %v14446_v0  ;;  %10881 = vmatpush1.msk.msra.mxu1 %vm122_vm1, %v47_v6  ;;  %v560_v23 = vld [vmem:[#allocation4 + $0x58] sm:$0xff]  ;;  %v562_v24 = vld [vmem:[#allocation4 + $0x68] sm:$0xff]  ;;  %v559_v25 = vld [vmem:[#allocation4 + $0x50] sm:$0xff]  ;;  %v57_v1 = vsub.s32 0, %v12104_v63  ;;  %v61_v3 = vsub.s32 1, %v12104_v63  ;;  %v65_v6 = vsub.s32 2, %v12104_v63 }
  0x16   :  { %10882 = vmatmul.mubr.msk.f32.vlgmr.msra.gmra.mxu1 %vm115_vm2, %v44_v5  ;;  %10884 = vmatprep.subr.msk.mxu0 %vm122_vm1, %v112_v10  ;;  %v561_v26 = vld [vmem:[#allocation4 + $0x60] sm:$0xff]  ;;  %v550_v27 = vld [vmem:[#allocation4 + $0x8] sm:$0xff]  ;;  %v552_v28 = vld [vmem:[#allocation4 + $0x18] sm:$0xff]  ;;  %v73_v10 = vsub.s32 4, %v12104_v63  ;;  %vm1422_vm9 = vcmask 261312   ;;  %vm1443_vm10 = vcmask 1041409  }
  0x17   :  { %v12040_v2 = vld [vmem:[#allocation2] sm:$0x3]  ;;  %10885 = vmatpush1.msk.msra.mxu0 %vm122_vm1, %v48_v9  ;;  %290 = vmatprep.mubr.f32.mxu1 %v14446_v0  ;;  %v549_v29 = vld [vmem:[#allocation4] sm:$0xff]  ;;  %v551_v30 = vld [vmem:[#allocation4 + $0x10] sm:$0xff]  ;;  %v69_v9 = vsub.s32 3, %v12104_v63  ;;  %vm1686_vm11 = vcmask 1043456  }
  0x18   :  { %v592_v4 = vsel %vm42_vm0, %v12040_v2, 0.0  ;;  %10879 = vmatmul.mubr.msk.f32.gmra.mxu0 %vm115_vm2, %v45_v8  ;;  %10888 = vmatprep.subr.msk.mxu1 %vm122_vm1, %v113_v12  ;;  %v584_v31 = vld [vmem:[#allocation4 + $0x118] sm:$0xff]  ;;  %v586_v32 = vld [vmem:[#allocation4 + $0x128] sm:$0xff]  ;;  %v583_v40 = vld [vmem:[#allocation4 + $0x110] sm:$0xff]  ;;  %vm1683_vm12 = vcmask 31744  }
  0x19   :  { %593 = vadd.xlane.f32.xlu0 %v592_v4  ;;  %361 = vmatprep.mubr.f32.mxu0 %v14446_v0  ;;  %v585_v41 = vld [vmem:[#allocation4 + $0x120] sm:$0xff]  ;;  %v574_v42 = vld [vmem:[#allocation4 + $0xc8] sm:$0xff]  ;;  %v576_v43 = vld [vmem:[#allocation4 + $0xd8] sm:$0xff] }
  0x1a   :  { %10883 = vmatmul.mubr.msk.f32.gmra.mxu1 %vm115_vm2, %v45_v8  ;;  %10892 = vmatprep.subr.msk.mxu0 %vm122_vm1, %v114_v14  ;;  %v573_v44 = vld [vmem:[#allocation4 + $0xc0] sm:$0xff]  ;;  %v575_v45 = vld [vmem:[#allocation4 + $0xd0] sm:$0xff]  ;;  %v564_v46 = vld [vmem:[#allocation4 + $0x78] sm:$0xff]  ;;  %v77_v14 = vsub.s32 5, %v12104_v63 }
  0x1b   :  { %438 = vmatprep.mubr.f32.mxu1 %v14446_v0  ;;  %10889 = vmatpush1.msk.msra.mxu1 %vm122_vm1, %v49_v11  ;;  %v566_v47 = vld [vmem:[#allocation4 + $0x88] sm:$0xff]  ;;  %v563_v48 = vld [vmem:[#allocation4 + $0x70] sm:$0xff]  ;;  %v565_v49 = vld [vmem:[#allocation4 + $0x80] sm:$0xff] }
  0x1c   :  { %10886 = vmatmul.mubr.msk.f32.vlgmr.msra.gmra.mxu0 %vm115_vm2, %v44_v5  ;;  %639 = vmatprep.subr.mxu1 %v580_v15  ;;  %v554_v50 = vld [vmem:[#allocation4 + $0x28] sm:$0xff]  ;;  %v556_v51 = vld [vmem:[#allocation4 + $0x38] sm:$0xff]  ;;  %v553_v52 = vld [vmem:[#allocation4 + $0x20] sm:$0xff] }
  0x1d   :  { %367 = vmatprep.mubr.f32.mxu0 %v14446_v0  ;;  %10893 = vmatpush1.msk.msra.mxu0 %vm122_vm1, %v50_v13  ;;  %v555_v53 = vld [vmem:[#allocation4 + $0x30] sm:$0xff]  ;;  %v588_v54 = vld [vmem:[#allocation4 + $0x138] sm:$0xff]  ;;  %v578_v56 = vld [vmem:[#allocation4 + $0xe8] sm:$0xff] }
  0x1e   :  { %10890 = vmatmul.mubr.msk.f32.vlgmr.msra.gmra.mxu1 %vm115_vm2, %v44_v5  ;;  %710 = vmatprep.subr.mxu0 %v582_v16  ;;  %v587_v55 = vld [vmem:[#allocation4 + $0x130] sm:$0xff]  ;;  %v577_v57 = vld [vmem:[#allocation4 + $0xe0] sm:$0xff]  ;;  %v568_v58 = vld [vmem:[#allocation4 + $0x98] sm:$0xff] }
  0x1f   :  { %640 = vmatpush1.msra.mxu1 %v579_v17  ;;  %444 = vmatprep.mubr.f32.mxu1 %v14446_v0  ;;  %v567_v59 = vld [vmem:[#allocation4 + $0x90] sm:$0xff]  ;;  %v558_v60 = vld [vmem:[#allocation4 + $0x48] sm:$0xff]  ;;  %v557_v61 = vld [vmem:[#allocation4 + $0x40] sm:$0xff] }
  0x20   :  { %10887 = vmatmul.mubr.msk.f32.gmra.mxu0 %vm115_vm2, %v45_v8  ;;  %641 = vmatprep.subr.mxu1 %v570_v19 }
  0x21   :  { %515 = vmatprep.mubr.f32.mxu0 %v14446_v0  ;;  %642 = vmatpush1.msra.mxu1 %v569_v21 }
  0x22   :  { %10891 = vmatmul.mubr.msk.f32.gmra.mxu1 %vm115_vm2, %v45_v8  ;;  %643 = vmatprep.subr.mxu1 %v560_v23 }
  0x23   :  { %644 = vmatpush1.msra.mxu1 %v559_v25  ;;  %679 = vmatprep.mubr.f32.mxu1 %v14446_v0 }
  0x24   :  { %10894 = vmatmul.mubr.msk.f32.vlgmr.msra.gmra.mxu0 %vm115_vm2, %v44_v5  ;;  %645 = vmatprep.subr.mxu1 %v550_v27 }
  0x25   :  { %711 = vmatpush1.msra.mxu0 %v581_v18  ;;  %521 = vmatprep.mubr.f32.mxu0 %v14446_v0 }
  0x26   :  { %712 = vmatprep.subr.mxu0 %v572_v20  ;;  %646 = vmatpush1.msra.mxu1 %v549_v29  ;;  %v85_v29 = vsub.s32 7, %v12104_v63 }
  0x27   :  { %713 = vmatpush1.msra.mxu0 %v571_v22  ;;  %781 = vmatprep.subr.mxu1 %v584_v31 }
  0x28   :  { %714 = vmatprep.subr.mxu0 %v562_v24  ;;  %10895 = vmatmul.mubr.msk.f32.gmra.mxu0 %vm115_vm2, %v45_v8  ;;  %v81_v24 = vsub.s32 6, %v12104_v63 }
  0x29   :  { %715 = vmatpush1.msra.mxu0 %v561_v26  ;;  %750 = vmatprep.mubr.f32.mxu0 %v14446_v0 }
  0x2a   :  { %716 = vmatprep.subr.mxu0 %v552_v28 }
  0x2b   :  { %717 = vmatpush1.msra.mxu0 %v551_v30 }
  0x2c   :  { %852 = vmatprep.subr.mxu0 %v586_v32  ;;  %v52_v32 = vld [vmem:[%s14443_s4 + $0x8] sm:$0x3] }
  0xa2   :  { %v594_v33 = vpop.xlane.xlu0 %593 }
  0xa3   :  { %vm595_vm3 = vcmp.eq.f32.partialorder %v594_v33, 0.0 }
  0xa4   :  { %v596_v34 = vsel %vm595_vm3, 1.0, %v594_v33 }
  0xa5   :  { %11386 = vrcp.f32 %v596_v34 }
  0xb2   :  { %v11387_v35 = vpop.eup %11386 }
  0xb3   :  { %v598_v36 = vmul.f32 %v11387_v35, %v596_v34 }
  0xb5   :  { %v599_v37 = vsub.f32 2.0, %v598_v36 }
  0xb7   :  { %v600_v38 = vmul.f32 %v11387_v35, %v599_v37 }
  0xb9   :  { %v601_v39 = vmul.f32 %v600_v38, %v12040_v2  ;;  %v51_v2 = vld [vmem:[%s14443_s4] sm:$0xff]  ;;  %s11985_s4 = smov 64  }
  0xba   :  { %v58_v4 = vrot.slane %v51_v2, %v57_v1  ;;  %v62_v5 = vrot.slane %v51_v2, %v61_v3  ;;  %v66_v13 = vrot.slane %v51_v2, %v65_v6  ;;  %v70_v17 = vrot.slane %v51_v2, %v69_v9 }
  0xbb   :  { %10896 = vmatmul.mubr.msk.f32.vlgmr.msra.gmra.mxu1 %vm537_vm4, %v601_v39  ;;  %10897 = vmatmul.mubr.msk.f32.vlgmr.msra.gmra.mxu0 %vm537_vm4, %v601_v39  ;;  %v74_v18 = vrot.slane %v51_v2, %v73_v10  ;;  %v78_v23 = vrot.slane %v51_v2, %v77_v14  ;;  %v82_v35 = vrot.slane %v51_v2, %v81_v24 }
  0xbc   :  { %782 = vmatpush1.msra.mxu1 %v583_v40  ;;  %853 = vmatpush1.msra.mxu0 %v585_v41  ;;  %v86_v40 = vrot.slane %v51_v2, %v85_v29  ;;  %v90_v41 = vrot.slane %v52_v32, %v57_v1 }
  0xbd   :  { %783 = vmatprep.subr.mxu1 %v574_v42  ;;  %854 = vmatprep.subr.mxu0 %v576_v43 }
  0xbe   :  { %784 = vmatpush1.msra.mxu1 %v573_v44  ;;  %855 = vmatpush1.msra.mxu0 %v575_v45 }
  0xbf   :  { %785 = vmatprep.subr.mxu1 %v564_v46  ;;  %856 = vmatprep.subr.mxu0 %v566_v47  ;;  %v94_v46 = vrot.slane %v52_v32, %v61_v3 }
  0xc0   :  { %786 = vmatpush1.msra.mxu1 %v563_v48  ;;  %857 = vmatpush1.msra.mxu0 %v565_v49 }
  0xc1   :  { %787 = vmatprep.subr.mxu1 %v554_v50  ;;  %858 = vmatprep.subr.mxu0 %v556_v51 }
  0xc2   :  { %788 = vmatpush1.msra.mxu1 %v553_v52  ;;  %821 = vmatprep.mubr.f32.mxu1 %v14446_v0 }
  0xc3   :  { %859 = vmatpush1.msra.mxu0 %v555_v53  ;;  %892 = vmatprep.mubr.f32.mxu0 %v14446_v0 }
  0xc4   :  { %10898 = vmatmul.mubr.msk.f32.vlgmr.msra.gmra.mxu1 %vm537_vm4, %v601_v39  ;;  %10899 = vmatmul.mubr.msk.f32.vlgmr.msra.gmra.mxu0 %vm537_vm4, %v601_v39 }
  0xc5   :  { %923 = vmatprep.subr.mxu1 %v588_v54  ;;  %963 = vmatprep.mubr.f32.mxu1 %v14446_v0 }
  0xc6   :  { %924 = vmatpush1.msra.mxu1 %v587_v55  ;;  %11111 = vmatprep.subr.mxu0 %v14446_v0 }
  0xc7   :  { %925 = vmatprep.subr.mxu1 %v578_v56  ;;  %11119 = vmatprep.mubr.msk.f32.mxu0 %vm11990_vm6, %v14446_v0 }
  0xc8   :  { %926 = vmatpush1.msra.mxu1 %v577_v57 }
  0xc9   :  { %927 = vmatprep.subr.mxu1 %v568_v58 }
  0xca   :  { %928 = vmatpush1.msra.mxu1 %v567_v59 }
  0xcb   :  { %929 = vmatprep.subr.mxu1 %v558_v60 }
  0xcc   :  { %930 = vmatpush1.msra.mxu1 %v557_v61 }
  0xcd   :  { %10900 = vmatmul.mubr.msk.f32.vlgmr.msra.gmra.mxu1 %vm537_vm4, %v601_v39  ;;  %11122 = vmatprep.subr.mxu1 %v14446_v0 }
  0xce   :  { %11130 = vmatprep.mubr.msk.f32.mxu1 %vm11990_vm6, %v14446_v0 }
  0xd4   :  { %v209_v7 = vpop.f32.mrf.mxu0 }
  0xd5   :  { %v210_v8 = vadd.f32 %v209_v7, %v58_v4 }
  0xd6   :  { %v211_v11 = vpop.f32.mrf.mxu0  ;;  %v286_v20 = vpop.f32.mrf.mxu1 }
  0xd7   :  { %528 = vst [vmem:[#allocation3] sm:$0xff] %v210_v8  ;;  %v212_v12 = vadd.f32 %v211_v11, %v62_v5  ;;  %v287_v22 = vadd.f32 %v286_v20, %v66_v13 }
  0xd8   :  { %v215_v15 = vpop.f32.mrf.mxu0  ;;  %v288_v25 = vpop.f32.mrf.mxu1 }
  0xd9   :  { %529 = vst [vmem:[#allocation3 + $0x8] sm:$0xff] %v212_v12  ;;  %v216_v16 = vadd.f32 %v215_v15, %v58_v4  ;;  %530 = vst [vmem:[#allocation3 + $0x10] sm:$0xff] %v287_v22  ;;  %v289_v27 = vadd.f32 %v288_v25, %v70_v17 }
  0xda   :  { %v217_v19 = vpop.f32.mrf.mxu0  ;;  %v292_v30 = vpop.f32.mrf.mxu1 }
  0xdb   :  { %539 = vst [vmem:[#allocation3 + $0x50] sm:$0xff] %v216_v16  ;;  %v218_v21 = vadd.f32 %v217_v19, %v62_v5  ;;  %531 = vst [vmem:[#allocation3 + $0x18] sm:$0xff] %v289_v27  ;;  %v293_v33 = vadd.f32 %v292_v30, %v66_v13 }
  0xdc   :  { %v363_v26 = vpop.f32.mrf.mxu0  ;;  %v294_v36 = vpop.f32.mrf.mxu1 }
  0xdd   :  { %540 = vst [vmem:[#allocation3 + $0x58] sm:$0xff] %v218_v21  ;;  %v364_v28 = vadd.f32 %v363_v26, %v74_v18  ;;  %541 = vst [vmem:[#allocation3 + $0x60] sm:$0xff] %v293_v33  ;;  %v295_v38 = vadd.f32 %v294_v36, %v70_v17 }
  0xde   :  { %v365_v31 = vpop.f32.mrf.mxu0  ;;  %v440_v43 = vpop.f32.mrf.mxu1  ;;  %v602_v61 = vld [vmem:[#allocation3] sm:$0x3] }
  0xdf   :  { %532 = vst [vmem:[#allocation3 + $0x20] sm:$0xff] %v364_v28  ;;  %v366_v34 = vadd.f32 %v365_v31, %v78_v23  ;;  %542 = vst [vmem:[#allocation3 + $0x68] sm:$0xff] %v295_v38  ;;  %v441_v45 = vadd.f32 %v440_v43, %v82_v35 }
  0xe0   :  { %v369_v37 = vpop.f32.mrf.mxu0  ;;  %v442_v47 = vpop.f32.mrf.mxu1  ;;  %v604_v4 = vld [vmem:[#allocation3 + $0x10] sm:$0x3]  ;;  %v603_v13 = vld [vmem:[#allocation3 + $0x8] sm:$0x3] }
  0xe1   :  { %533 = vst [vmem:[#allocation3 + $0x28] sm:$0xff] %v366_v34  ;;  %v370_v39 = vadd.f32 %v369_v37, %v74_v18  ;;  %534 = vst [vmem:[#allocation3 + $0x30] sm:$0xff] %v441_v45  ;;  %v443_v49 = vadd.f32 %v442_v47, %v86_v40  ;;  %v11988_v34 = vmov 1983009808  }
  0xe2   :  { %v371_v42 = vpop.f32.mrf.mxu0  ;;  %v446_v52 = vpop.f32.mrf.mxu1  ;;  %v605_v8 = vld [vmem:[#allocation3 + $0x18] sm:$0x3] }
  0xe3   :  { %543 = vst [vmem:[#allocation3 + $0x70] sm:$0xff] %v370_v39  ;;  %v372_v44 = vadd.f32 %v371_v42, %v78_v23  ;;  %535 = vst [vmem:[#allocation3 + $0x38] sm:$0xff] %v443_v49  ;;  %v447_v54 = vadd.f32 %v446_v52, %v82_v35  ;;  %v1052_v35 = vunpack.c.l.s4 %v11988_v34  ;;  %v11989_v39 = vmov 1934713408  }
  0xe4   :  { %v517_v48 = vpop.f32.mrf.mxu0  ;;  %v448_v55 = vpop.f32.mrf.mxu1 }
  0xe5   :  { %544 = vst [vmem:[#allocation3 + $0x78] sm:$0xff] %v372_v44  ;;  %v518_v50 = vadd.f32 %v517_v48, %v90_v41  ;;  %545 = vst [vmem:[#allocation3 + $0x80] sm:$0xff] %v447_v54  ;;  %v449_v56 = vadd.f32 %v448_v55, %v86_v40  ;;  %v1053_v38 = vunpack.c.0.s8 %v1052_v35  ;;  %v1084_v40 = vunpack.c.l.s4 %v11989_v39 }
  0xe6   :  { %v519_v51 = vpop.f32.mrf.mxu0  ;;  %v606_v11 = vld [vmem:[#allocation3 + $0x20] sm:$0x3] }
  0xe7   :  { %536 = vst [vmem:[#allocation3 + $0x40] sm:$0xff] %v518_v50  ;;  %v520_v53 = vadd.f32 %v519_v51, %v94_v46  ;;  %546 = vst [vmem:[#allocation3 + $0x88] sm:$0xff] %v449_v56  ;;  %v12190_v44 = vsub.s32 %v1053_v38, %v12104_v63 }
  0xe8   :  { %v523_v57 = vpop.f32.mrf.mxu0  ;;  %v608_v16 = vld [vmem:[#allocation3 + $0x30] sm:$0x3]  ;;  %v607_v19 = vld [vmem:[#allocation3 + $0x28] sm:$0x3] }
  0xe9   :  { %538 = vst.msk [vmem:[#allocation3 + $0x48] sm:$0xff] %vm537_vm4, %v520_v53  ;;  %v524_v58 = vadd.f32 %v523_v57, %v90_v41  ;;  %14510 = vst [vmem:[#allocation13_spill] sm:$0xff] %v12190_v44 }
  0xea   :  { %v525_v59 = vpop.f32.mrf.mxu0  ;;  %v609_v22 = vld [vmem:[#allocation3 + $0x38] sm:$0x3] }
  0xeb   :  { %547 = vst [vmem:[#allocation3 + $0x90] sm:$0xff] %v524_v58  ;;  %v526_v60 = vadd.f32 %v525_v59, %v94_v46  ;;  %v1085_v46 = vunpack.c.0.s8 %v1084_v40 }
  0xed   :  { %548 = vst.msk [vmem:[#allocation3 + $0x98] sm:$0xff] %vm537_vm4, %v526_v60  ;;  %v12198_v53 = vsub.s32 %v1085_v46, %v12104_v63 }
  0xee   :  { %v610_v25 = vld [vmem:[#allocation3 + $0x40] sm:$0x3] }
  0xef   :  { %14511 = vst [vmem:[#allocation14_spill] sm:$0xff] %v12198_v53 }
 0x17b   :  { %v681_v1 = vpop.f32.mrf.mxu1  ;;  %v752_v3 = vpop.f32.mrf.mxu0 }
 0x17c   :  { %v12122_v2 = vadd.f32 %v681_v1, %v602_v61  ;;  %v12128_v5 = vadd.f32 %v752_v3, %v604_v4 }
 0x17d   :  { %v754_v6 = vpop.f32.mrf.mxu0  ;;  %v683_v7 = vpop.f32.mrf.mxu1 }
 0x17e   :  { %974 = vrot.lane.b32.xlu1 %v12122_v2, %s11985_s4  ;;  %971 = vrot.lane.b32.xlu0 %v12122_v2, %s11986_s19  ;;  %v12134_v9 = vadd.f32 %v754_v6, %v605_v8  ;;  %v684_v14 = vadd.f32 %v683_v7, %v603_v13 }
 0x182   :  { %977 = vrot.lane.b32.xlu1 %v12122_v2, %s11987_s20  ;;  %997 = vrot.lane.b32.xlu0 %v12128_v5, %s11987_s20 }
 0x184   :  { %v823_v10 = vpop.f32.mrf.mxu1  ;;  %v894_v15 = vpop.f32.mrf.mxu0 }
 0x185   :  { %v12140_v12 = vadd.f32 %v823_v10, %v606_v11  ;;  %v12149_v17 = vadd.f32 %v894_v15, %v608_v16 }
 0x186   :  { %991 = vrot.lane.b32.xlu1 %v12128_v5, %s11986_s19  ;;  %1004 = vrot.lane.b32.xlu0 %v12134_v9, %s11985_s4  ;;  %v825_v18 = vpop.f32.mrf.mxu1  ;;  %v896_v21 = vpop.f32.mrf.mxu0 }
 0x187   :  { %v12157_v20 = vadd.f32 %v825_v18, %v607_v19  ;;  %v12163_v23 = vadd.f32 %v896_v21, %v609_v22 }
 0x18a   :  { %994 = vrot.lane.b32.xlu1 %v12128_v5, %s11985_s4  ;;  %1011 = vrot.lane.b32.xlu0 %v12140_v12, %s11986_s19 }
 0x18d   :  { %v965_v24 = vpop.f32.mrf.mxu1 }
 0x18e   :  { %981 = vrot.lane.b32.xlu1 %v684_v14, %s11986_s19  ;;  %1017 = vrot.lane.b32.xlu0 %v12140_v12, %s11987_s20  ;;  %v12169_v26 = vadd.f32 %v965_v24, %v610_v25 }
 0x192   :  { %984 = vrot.lane.b32.xlu1 %v684_v14, %s11985_s4  ;;  %1031 = vrot.lane.b32.xlu0 %v12149_v17, %s11986_s19 }
 0x196   :  { %987 = vrot.lane.b32.xlu1 %v684_v14, %s11987_s20  ;;  %1037 = vrot.lane.b32.xlu0 %v12149_v17, %s11987_s20 }
 0x19a   :  { %1001 = vrot.lane.b32.xlu1 %v12134_v9, %s11986_s19  ;;  %1024 = vrot.lane.b32.xlu0 %v12157_v20, %s11985_s4 }
 0x19e   :  { %1007 = vrot.lane.b32.xlu1 %v12134_v9, %s11987_s20  ;;  %1044 = vrot.lane.b32.xlu0 %v12163_v23, %s11985_s4 }
 0x1a2   :  { %1014 = vrot.lane.b32.xlu1 %v12140_v12, %s11985_s4  ;;  %1251 = vrot.lane.b32.xlu0 %v12169_v26, %s11986_s19 }
 0x1a6   :  { %1034 = vrot.lane.b32.xlu1 %v12149_v17, %s11985_s4  ;;  %1257 = vrot.lane.b32.xlu0 %v12169_v26, %s11987_s20 }
 0x1aa   :  { %1021 = vrot.lane.b32.xlu1 %v12157_v20, %s11986_s19 }
 0x1ae   :  { %1027 = vrot.lane.b32.xlu1 %v12157_v20, %s11987_s20 }
 0x1b2   :  { %1041 = vrot.lane.b32.xlu1 %v12163_v23, %s11986_s19 }
 0x1b6   :  { %1047 = vrot.lane.b32.xlu1 %v12163_v23, %s11987_s20 }
 0x1ba   :  { %1254 = vrot.lane.b32.xlu1 %v12169_v26, %s11985_s4 }
 0x1f0   :  { %v975_v27 = vpop.permute.xlu1 %974  ;;  %v972_v28 = vpop.permute.xlu0 %971 }
 0x1f1   :  { %v1050_v45 = vcombine.low %v12122_v2, %v975_v27 }
 0x1f3   :  { %v1057_v50 = vrot.slane %v1050_v45, %v12190_v44 }
 0x1f4   :  { %v978_v29 = vpop.permute.xlu1 %977  ;;  %v998_v30 = vpop.permute.xlu0 %997 }
 0x1f5   :  { %v1058_v41 = vcombine.low %v972_v28, %v978_v29 }
 0x1f7   :  { %v1065_v47 = vrot.slane %v1058_v41, %v12190_v44 }
 0x1f8   :  { %v992_v31 = vpop.permute.xlu1 %991  ;;  %v1005_v32 = vpop.permute.xlu0 %1004 }
 0x1f9   :  { %v1082_v54 = vcombine.low %v1057_v50, %v1065_v47  ;;  %v1108_v59 = vcombine.low %v992_v31, %v998_v30  ;;  %v1116_v61 = vcombine.low %v12134_v9, %v1005_v32 }
 0x1fb   :  { %v1089_v3 = vrot.slane %v1082_v54, %v12198_v53  ;;  %v1115_v7 = vrot.slane %v1108_v59, %v12190_v44  ;;  %v1123_v10 = vrot.slane %v1116_v61, %v12190_v44 }
 0x1fc   :  { %v995_v33 = vpop.permute.xlu1 %994  ;;  %v1012_v36 = vpop.permute.xlu0 %1011 }
 0x1fd   :  { %v1100_v55 = vcombine.low %v12128_v5, %v995_v33 }
 0x1ff   :  { %v1107_v1 = vrot.slane %v1100_v55, %v12190_v44 }
 0x200   :  { %v982_v37 = vpop.permute.xlu1 %981  ;;  %v1018_v42 = vpop.permute.xlu0 %1017 }
 0x201   :  { %v1132_v11 = vcombine.low %v1107_v1, %v1115_v7  ;;  %v1158_v32 = vcombine.low %v1012_v36, %v1018_v42 }
 0x203   :  { %v1139_v18 = vrot.slane %v1132_v11, %v12198_v53 }
 0x204   :  { %v985_v43 = vpop.permute.xlu1 %984  ;;  %v12195_v51 = vpop.permute.xlu0 %1031 }
 0x205   :  { %v1066_v48 = vcombine.low %v684_v14, %v985_v43 }
 0x207   :  { %v1073_v56 = vrot.slane %v1066_v48, %v12190_v44 }
 0x208   :  { %v988_v49 = vpop.permute.xlu1 %987  ;;  %v1038_v2 = vpop.permute.xlu0 %1037 }
 0x209   :  { %v1074_v52 = vcombine.low %v982_v37, %v988_v49  ;;  %v1165_v37 = vrot.slane %v1158_v32, %v12190_v44 }
 0x20b   :  { %v1081_v57 = vrot.slane %v1074_v52, %v12190_v44 }
 0x20c   :  { %v1002_v58 = vpop.permute.xlu1 %1001  ;;  %v1025_v15 = vpop.permute.xlu0 %1024 }
 0x20d   :  { %v1090_v60 = vcombine.low %v1073_v56, %v1081_v57  ;;  %v1166_v33 = vcombine.low %v12157_v20, %v1025_v15  ;;  %v1208_v20 = vcombine.low %v12195_v51, %v1038_v2 }
 0x20f   :  { %v1097_v4 = vrot.slane %v1090_v60, %v12198_v53  ;;  %v1173_v40 = vrot.slane %v1166_v33, %v12190_v44  ;;  %v1215_v54 = vrot.slane %v1208_v20, %v12190_v44 }
 0x210   :  { %v1008_v6 = vpop.permute.xlu1 %1007  ;;  %v1045_v25 = vpop.permute.xlu0 %1044 }
 0x211   :  { %v1124_v5 = vcombine.low %v1002_v58, %v1008_v6  ;;  %v12208_v8 = vcombine.low %v1089_v3, %v1097_v4  ;;  %v12225_v31 = vcombine.high %v1089_v3, %v1097_v4  ;;  %v1216_v46 = vcombine.low %v12163_v23, %v1045_v25 }
 0x213   :  { %v1131_v13 = vrot.slane %v1124_v5, %v12190_v44  ;;  %v1285_v9 = vsel %vm537_vm4, %v12208_v8, -inf  ;;  %v1223_v57 = vrot.slane %v1216_v46, %v12190_v44 }
 0x214   :  { %v1015_v14 = vpop.permute.xlu1 %1014  ;;  %1286 = vmax.xlane.f32.xlu1 %v1285_v9  ;;  %v1252_v38 = vpop.permute.xlu0 %1251 }
 0x215   :  { %v1140_v16 = vcombine.low %v1123_v10, %v1131_v13  ;;  %v1150_v27 = vcombine.low %v12140_v12, %v1015_v14  ;;  %v1297_v12 = vsel %vm537_vm4, %v12225_v31, -inf }
 0x217   :  { %v1147_v19 = vrot.slane %v1140_v16, %v12198_v53  ;;  %v1157_v34 = vrot.slane %v1150_v27, %v12190_v44 }
 0x218   :  { %v1035_v21 = vpop.permute.xlu1 %1034  ;;  %v1258_v48 = vpop.permute.xlu0 %1257 }
 0x219   :  { %v12216_v22 = vcombine.high %v1139_v18, %v1147_v19  ;;  %v12218_v24 = vcombine.low %v1139_v18, %v1147_v19  ;;  %v1182_v41 = vcombine.low %v1157_v34, %v1165_v37  ;;  %v1200_v43 = vcombine.low %v12149_v17, %v1035_v21 }
 0x21a   :  { %v1268_v58 = vcombine.low %v1252_v38, %v1258_v48 }
 0x21b   :  { %v1300_v28 = vsel %vm537_vm4, %v12216_v22, -inf  ;;  %v1288_v30 = vsel %vm537_vm4, %v12218_v24, -inf  ;;  %v1207_v47 = vrot.slane %v1200_v43, %v12190_v44  ;;  %v1189_v49 = vrot.slane %v1182_v41, %v12198_v53 }
 0x21c   :  { %v1022_v29 = vpop.permute.xlu1 %1021  ;;  %1301 = vmax.xlane.f32.xlu1 %v1300_v28  ;;  %1289 = vmax.xlane.f32.xlu0 %v1288_v30  ;;  %v1275_v3 = vrot.slane %v1268_v58, %v12190_v44 }
 0x21d   :  { %v1232_v51 = vcombine.low %v1207_v47, %v1215_v54 }
 0x21f   :  { %v1239_v6 = vrot.slane %v1232_v51, %v12198_v53 }
 0x220   :  { %v1028_v35 = vpop.permute.xlu1 %1027  ;;  %1298 = vmax.xlane.f32.xlu0 %v1297_v12 }
 0x221   :  { %v1174_v39 = vcombine.low %v1022_v29, %v1028_v35 }
 0x223   :  { %v1181_v36 = vrot.slane %v1174_v39, %v12190_v44 }
 0x224   :  { %v1042_v42 = vpop.permute.xlu1 %1041 }
 0x225   :  { %v1190_v45 = vcombine.low %v1173_v40, %v1181_v36 }
 0x227   :  { %v1197_v50 = vrot.slane %v1190_v45, %v12198_v53 }
 0x228   :  { %v1048_v52 = vpop.permute.xlu1 %1047 }
 0x229   :  { %v1224_v55 = vcombine.low %v1042_v42, %v1048_v52  ;;  %v1199_v17 = vcombine.high %v1189_v49, %v1197_v50  ;;  %v1198_v56 = vcombine.low %v1189_v49, %v1197_v50 }
 0x22b   :  { %v1231_v59 = vrot.slane %v1224_v55, %v12190_v44  ;;  %v1303_v23 = vsel %vm537_vm4, %v1199_v17, -inf  ;;  %v1291_v60 = vsel %vm537_vm4, %v1198_v56, -inf }
 0x22c   :  { %v1255_v61 = vpop.permute.xlu1 %1254  ;;  %1304 = vmax.xlane.f32.xlu1 %v1303_v23  ;;  %1292 = vmax.xlane.f32.xlu0 %v1291_v60 }
 0x22d   :  { %v1240_v1 = vcombine.low %v1223_v57, %v1231_v59  ;;  %v1260_v2 = vcombine.low %v12169_v26, %v1255_v61 }
 0x22f   :  { %v1267_v4 = vrot.slane %v1260_v2, %v12190_v44  ;;  %v1247_v7 = vrot.slane %v1240_v1, %v12198_v53 }
 0x231   :  { %v1276_v5 = vcombine.low %v1267_v4, %v1275_v3  ;;  %v1249_v10 = vcombine.high %v1239_v6, %v1247_v7  ;;  %v1248_v11 = vcombine.low %v1239_v6, %v1247_v7 }
 0x233   :  { %v1306_v13 = vsel %vm537_vm4, %v1249_v10, -inf  ;;  %v1294_v9 = vsel %vm537_vm4, %v1248_v11, -inf  ;;  %v1283_v14 = vrot.slane %v1276_v5, %v12198_v53 }
 0x234   :  { %1307 = vmax.xlane.f32.xlu1 %v1306_v13  ;;  %1295 = vmax.xlane.f32.xlu0 %v1294_v9 }
 0x235   :  { %v1284_v26 = vcombine.high %v1283_v14, %v14446_v0  ;;  %v1471_v15 = vsel %vm1470_vm5, %v1283_v14, -inf }
 0x237   :  { %v1474_v16 = vsel %vm1470_vm5, %v1284_v26, -inf }
 0x238   :  { %1472 = vmax.xlane.f32.xlu0 %v1471_v15  ;;  %1475 = vmax.xlane.f32.xlu1 %v1474_v16 }
 0x29d   :  { %v1287_v18 = vpop.xlane.xlu1 %1286 }
 0x29e   :  { %v1309_v19 = vsub.f32 %v12208_v8, %v1287_v18 }
 0x2a0   :  { %v1317_v21 = vmul.f32 1.442695, %v1309_v19 }
 0x2a2   :  { %11388 = vpow2.f32 %v1317_v21 }
 0x2a5   :  { %v1302_v25 = vpop.xlane.xlu1 %1301  ;;  %v1290_v28 = vpop.xlane.xlu0 %1289 }
 0x2a6   :  { %v1314_v27 = vsub.f32 %v12216_v22, %v1302_v25  ;;  %v1310_v29 = vsub.f32 %v12218_v24, %v1290_v28 }
 0x2a8   :  { %v1327_v30 = vmul.f32 1.442695, %v1314_v27  ;;  %v1319_v32 = vmul.f32 1.442695, %v1310_v29 }
 0x2a9   :  { %v1299_v33 = vpop.xlane.xlu0 %1298 }
 0x2aa   :  { %11390 = vpow2.f32 %v1319_v32  ;;  %v1313_v34 = vsub.f32 %v12225_v31, %v1299_v33 }
 0x2ab   :  { %11392 = vpow2.f32 %v1327_v30 }
 0x2ac   :  { %v1325_v35 = vmul.f32 1.442695, %v1313_v34 }
 0x2ae   :  { %11394 = vpow2.f32 %v1325_v35 }
 0x2af   :  { %v12260_v12 = vpop.eup %11388 }
 0x2b0   :  { %v1333_v8 = vsel %vm537_vm4, %v12260_v12, 0.0 }
 0x2b1   :  { %1334 = vadd.xlane.f32.xlu0 %v1333_v8 }
 0x2b5   :  { %v1305_v37 = vpop.xlane.xlu1 %1304  ;;  %v1293_v22 = vpop.xlane.xlu0 %1292 }
 0x2b6   :  { %v1315_v38 = vsub.f32 %v1199_v17, %v1305_v37  ;;  %v1311_v39 = vsub.f32 %v1198_v56, %v1293_v22 }
 0x2b7   :  { %v11391_v24 = vpop.eup %11390 }
 0x2b8   :  { %v1329_v40 = vmul.f32 1.442695, %v1315_v38  ;;  %v1321_v41 = vmul.f32 1.442695, %v1311_v39  ;;  %v1336_v43 = vsel %vm537_vm4, %v11391_v24, 0.0  ;;  %v11393_v36 = vpop.eup %11392 }
 0x2b9   :  { %1337 = vadd.xlane.f32.xlu1 %v1336_v43  ;;  %v1348_v20 = vsel %vm537_vm4, %v11393_v36, 0.0 }
 0x2ba   :  { %11396 = vpow2.f32 %v1329_v40 }
 0x2bb   :  { %11398 = vpow2.f32 %v1321_v41  ;;  %v11395_v31 = vpop.eup %11394 }
 0x2bc   :  { %v1345_v45 = vsel %vm537_vm4, %v11395_v31, 0.0 }
 0x2bd   :  { %v1308_v42 = vpop.xlane.xlu1 %1307  ;;  %v1296_v46 = vpop.xlane.xlu0 %1295  ;;  %1349 = vadd.xlane.f32.xlu1 %v1348_v20  ;;  %1346 = vadd.xlane.f32.xlu0 %v1345_v45 }
 0x2be   :  { %v1316_v47 = vsub.f32 %v1249_v10, %v1308_v42  ;;  %v1312_v48 = vsub.f32 %v1248_v11, %v1296_v46 }
 0x2c0   :  { %v1331_v49 = vmul.f32 1.442695, %v1316_v47  ;;  %v1323_v50 = vmul.f32 1.442695, %v1312_v48 }
 0x2c1   :  { %v1476_v52 = vpop.xlane.xlu1 %1475  ;;  %v1473_v54 = vpop.xlane.xlu0 %1472 }
 0x2c2   :  { %11400 = vpow2.f32 %v1331_v49  ;;  %v1478_v55 = vsub.f32 %v1284_v26, %v1476_v52  ;;  %v1477_v17 = vsub.f32 %v1283_v14, %v1473_v54 }
 0x2c3   :  { %11402 = vpow2.f32 %v1323_v50 }
 0x2c4   :  { %v1481_v56 = vmul.f32 1.442695, %v1478_v55  ;;  %v1479_v57 = vmul.f32 1.442695, %v1477_v17  ;;  %v11991_v17 = vmov 1966171168  }
 0x2c6   :  { %11404 = vpow2.f32 %v1481_v56  ;;  %v1449_v56 = vunpack.c.l.s4 %v11991_v17  ;;  %v12381_v17 = vld [vmem:[#allocation4 + $0x8] sm:$0xff] }
 0x2c7   :  { %v11397_v58 = vpop.eup %11396  ;;  %11406 = vpow2.f32 %v1479_v57 }
 0x2c8   :  { %v11399_v51 = vpop.eup %11398  ;;  %v1351_v59 = vsel %vm537_vm4, %v11397_v58, 0.0 }
 0x2c9   :  { %1352 = vadd.xlane.f32.xlu1 %v1351_v59  ;;  %v1339_v23 = vsel %vm537_vm4, %v11399_v51, 0.0 }
 0x2ca   :  { %1340 = vadd.xlane.f32.xlu0 %v1339_v23 }
 0x2cf   :  { %v11401_v60 = vpop.eup %11400 }
 0x2d0   :  { %v11403_v61 = vpop.eup %11402  ;;  %11123 = vmatpush3.msra.mxu1 %v11401_v60  ;;  %v1354_v1 = vsel %vm537_vm4, %v11401_v60, 0.0 }
 0x2d1   :  { %11112 = vmatpush3.msra.mxu0 %v11403_v61  ;;  %11124 = vmatprep.subr.mxu1 %v14446_v0  ;;  %v1342_v2 = vsel %vm537_vm4, %v11403_v61, 0.0 }
 0x2d2   :  { %1355 = vadd.xlane.f32.xlu1 %v1354_v1  ;;  %11113 = vmatprep.subr.mxu0 %v14446_v0 }
 0x2d3   :  { %v12273_v3 = vpop.eup %11404  ;;  %1343 = vadd.xlane.f32.xlu0 %v1342_v2  ;;  %11114 = vmatpush3.msra.mxu0 %v11399_v51 }
 0x2d4   :  { %v12275_v4 = vpop.eup %11406  ;;  %11125 = vmatpush3.msra.mxu1 %v11397_v58  ;;  %11115 = vmatprep.subr.mxu0 %v14446_v0  ;;  %v1486_v6 = vsel %vm1470_vm5, %v12273_v3, 0.0 }
 0x2d5   :  { %11126 = vmatprep.subr.mxu1 %v14446_v0  ;;  %11116 = vmatpush3.msra.mxu0 %v11391_v24  ;;  %v1483_v7 = vsel %vm1470_vm5, %v12275_v4, 0.0 }
 0x2d6   :  { %11127 = vmatpush3.msra.mxu1 %v11393_v36  ;;  %1487 = vadd.xlane.f32.xlu1 %v1486_v6 }
 0x2d7   :  { %11128 = vmatprep.subr.mxu1 %v14446_v0  ;;  %11117 = vmatprep.subr.mxu0 %v14446_v0 }
 0x2d8   :  { %1484 = vadd.xlane.f32.xlu0 %v1483_v7  ;;  %11118 = vmatpush3.msra.mxu0 %v12260_v12  ;;  %v1398_v12 = vand.u32 127, %v55_v62 }
 0x2d9   :  { %11129 = vmatpush3.msra.mxu1 %v11395_v31  ;;  %11133 = vmatprep.subr.mxu0 %v14446_v0 }
 0x2da   :  { %11138 = vmatprep.subr.mxu1 %v14446_v0  ;;  %v1403_v38 = vadd.s32 4294967288, %v1398_v12  ;;  %v1410_v39 = vadd.s32 4294967280, %v1398_v12  ;;  %v1417_v36 = vadd.s32 4294967272, %v1398_v12  ;;  %v12300_v49 = vsub.s32 %v1398_v12, %v12104_v63 }
 0x2dc   :  { %v12294_v45 = vsub.s32 %v1403_v38, %v12104_v63  ;;  %v12297_v46 = vsub.s32 %v1410_v39, %v12104_v63  ;;  %v12303_v57 = vsub.s32 %v1417_v36, %v12104_v63 }
 0x33a   :  { %v1335_v10 = vpop.xlane.xlu0 %1334 }
 0x342   :  { %v1338_v5 = vpop.xlane.xlu1 %1337 }
 0x346   :  { %v1350_v11 = vpop.xlane.xlu1 %1349  ;;  %v1347_v13 = vpop.xlane.xlu0 %1346 }
 0x347   :  { %11408 = vrcp.f32 %v1350_v11 }
 0x348   :  { %11410 = vrcp.f32 %v1347_v13 }
 0x349   :  { %11412 = vrcp.f32 %v1338_v5 }
 0x34a   :  { %11414 = vrcp.f32 %v1335_v10 }
 0x352   :  { %v1353_v9 = vpop.xlane.xlu1 %1352 }
 0x353   :  { %11416 = vrcp.f32 %v1353_v9  ;;  %v1341_v14 = vpop.xlane.xlu0 %1340 }
 0x354   :  { %11418 = vrcp.f32 %v1341_v14  ;;  %v11409_v15 = vpop.eup %11408 }
 0x355   :  { %v11411_v18 = vpop.eup %11410  ;;  %v1370_v28 = vmul.f32 %v11409_v15, %v1350_v11 }
 0x356   :  { %v11413_v19 = vpop.eup %11412  ;;  %v1369_v29 = vmul.f32 %v11411_v18, %v1347_v13  ;;  %v1450_v13 = vunpack.c.0.s8 %v1449_v56  ;;  %v12384_v56 = vld [vmem:[#allocation4 + $0x60] sm:$0xff] }
 0x357   :  { %v11415_v21 = vpop.eup %11414  ;;  %v1366_v32 = vmul.f32 %v11413_v19, %v1338_v5  ;;  %v1378_v37 = vsub.f32 2.0, %v1370_v28 }
 0x358   :  { %v1365_v8 = vmul.f32 %v11415_v21, %v1335_v10  ;;  %v1377_v22 = vsub.f32 2.0, %v1369_v29 }
 0x359   :  { %v1374_v24 = vsub.f32 2.0, %v1366_v32  ;;  %v1386_v31 = vmul.f32 %v11409_v15, %v1378_v37 }
 0x35a   :  { %v1373_v43 = vsub.f32 2.0, %v1365_v8  ;;  %v1385_v42 = vmul.f32 %v11411_v18, %v1377_v22  ;;  %v590_v8 = vld [vmem:[%s14439_s0] sm:$0x3] }
 0x35b   :  { %v1356_v26 = vpop.xlane.xlu1 %1355  ;;  %v1382_v62 = vmul.f32 %v11413_v19, %v1374_v24  ;;  %v1431_v58 = vrot.slane %v1386_v31, %v12294_v45  ;;  %v12340_v31 = vld [vmem:[#allocation4 + $0xf8] sm:$0xff] }
 0x35c   :  { %11420 = vrcp.f32 %v1356_v26  ;;  %v1344_v16 = vpop.xlane.xlu0 %1343  ;;  %v1381_v54 = vmul.f32 %v11415_v21, %v1373_v43  ;;  %v1427_v51 = vrot.slane %v1385_v42, %v12300_v49  ;;  %v12349_v42 = vld [vmem:[#allocation4 + $0x108] sm:$0xff] }
 0x35d   :  { %11422 = vrcp.f32 %v1344_v16  ;;  %v1407_v60 = vrot.slane %v1382_v62, %v12294_v45  ;;  %v12360_v62 = vld [vmem:[#allocation4 + $0x100] sm:$0xff] }
 0x35e   :  { %v1402_v10 = vrot.slane %v1381_v54, %v12300_v49  ;;  %v12375_v54 = vld [vmem:[#allocation4 + $0x50] sm:$0xff] }
 0x35f   :  { %v1488_v25 = vpop.xlane.xlu1 %1487 }
 0x360   :  { %v11417_v27 = vpop.eup %11416  ;;  %11424 = vrcp.f32 %v1488_v25 }
 0x361   :  { %v11419_v30 = vpop.eup %11418  ;;  %v1371_v33 = vmul.f32 %v11417_v27, %v1353_v9  ;;  %v1485_v34 = vpop.xlane.xlu0 %1484  ;;  %v1432_v9 = vsel %vm1408_vm7, %v1431_v58, %v1427_v51  ;;  %v12387_v58 = vld [vmem:[#allocation4] sm:$0xff]  ;;  %v12390_v51 = vld [vmem:[#allocation4 + $0x18] sm:$0xff] }
 0x362   :  { %v1367_v35 = vmul.f32 %v11419_v30, %v1341_v14  ;;  %11426 = vrcp.f32 %v1485_v34 }
 0x363   :  { %v1379_v40 = vsub.f32 2.0, %v1371_v33 }
 0x364   :  { %v1375_v41 = vsub.f32 2.0, %v1367_v35  ;;  %v11754_v35 = vld [vmem:[#allocation2] sm:$0x3] }
 0x365   :  { %v1387_v47 = vmul.f32 %v11417_v27, %v1379_v40 }
 0x366   :  { %v1383_v50 = vmul.f32 %v11419_v30, %v1375_v41  ;;  %v12320_v30 = vsub.s32 %v1450_v13, %v12104_v63 }
 0x367   :  { %v1436_v61 = vrot.slane %v1387_v47, %v12297_v46  ;;  %v12363_v47 = vld [vmem:[#allocation4 + $0xa0] sm:$0xff] }
 0x368   :  { %v1414_v2 = vrot.slane %v1383_v50, %v12297_v46  ;;  %v12369_v50 = vld [vmem:[#allocation4 + $0x58] sm:$0xff] }
 0x369   :  { %v11421_v20 = vpop.eup %11420  ;;  %v1437_v18 = vsel %vm1415_vm8, %v1436_v61, %v1432_v9  ;;  %v967_v61 = vpop.f32.mrf.mxu1 }
 0x36a   :  { %v11423_v48 = vpop.eup %11422  ;;  %v1372_v52 = vmul.f32 %v11421_v20, %v1356_v26 }
 0x36b   :  { %v1368_v55 = vmul.f32 %v11423_v48, %v1344_v16  ;;  %v1409_v16 = vsel %vm1408_vm7, %v1407_v60, %v1402_v10  ;;  %v12400_v60 = vld [vmem:[#allocation4 + $0x128] sm:$0xff] }
 0x36c   :  { %v1380_v59 = vsub.f32 2.0, %v1372_v52  ;;  %v1416_v21 = vsel %vm1415_vm8, %v1414_v2, %v1409_v16  ;;  %v12372_v52 = vld [vmem:[#allocation4 + $0xb0] sm:$0xff] }
 0x36d   :  { %v11425_v23 = vpop.eup %11424  ;;  %v1376_v1 = vsub.f32 2.0, %v1368_v55  ;;  %v12378_v55 = vld [vmem:[#allocation4 + $0x68] sm:$0xff] }
 0x36e   :  { %v1388_v6 = vmul.f32 %v11421_v20, %v1380_v59  ;;  %v1492_v7 = vmul.f32 %v11425_v23, %v1488_v25  ;;  %v12352_v20 = vld [vmem:[#allocation4 + $0xf0] sm:$0xff] }
 0x36f   :  { %v11427_v5 = vpop.eup %11426  ;;  %v1384_v11 = vmul.f32 %v11423_v48, %v1376_v1  ;;  %v12366_v48 = vld [vmem:[#allocation4 + $0xb8] sm:$0xff]  ;;  %v12394_v59 = vld [vmem:[#allocation4 + $0x10] sm:$0xff]  ;;  %v611_v1 = vld [vmem:[#allocation3 + $0x48] sm:$0x3] }
 0x370   :  { %v1441_v14 = vrot.slane %v1388_v6, %v12303_v57  ;;  %v1494_v26 = vsub.f32 2.0, %v1492_v7  ;;  %v1491_v15 = vmul.f32 %v11427_v5, %v1485_v34  ;;  %v968_v2 = vadd.f32 %v967_v61, %v611_v1  ;;  %v12427_v61 = vld [vmem:[#allocation4 + $0xc0] sm:$0xff]  ;;  %v12430_v1 = vld [vmem:[#allocation4 + $0xd0] sm:$0xff] }
 0x371   :  { %v1421_v19 = vrot.slane %v1384_v11, %v12303_v57  ;;  %14512 = vst [vmem:[#allocation15_spill] sm:$0xff] %v12427_v61  ;;  %14513 = vst [vmem:[#allocation16_spill] sm:$0xff] %v12430_v1 }
 0x372   :  { %v1442_v25 = vsel %vm1422_vm9, %v1441_v14, %v1437_v18  ;;  %v1496_v27 = vmul.f32 %v11425_v23, %v1494_v26  ;;  %v1493_v28 = vsub.f32 2.0, %v1491_v15  ;;  %v12397_v23 = vld [vmem:[#allocation4 + $0x118] sm:$0xff]  ;;  %v10901_v6 = vmul.f32 -1.442695, %v968_v2 }
 0x373   :  { %v1423_v29 = vsel %vm1422_vm9, %v1421_v19, %v1416_v21  ;;  %v12433_v2 = vld [vmem:[#allocation4 + $0x78] sm:$0xff] }
 0x374   :  { %v1444_v32 = vsel %vm1443_vm10, %v1442_v25, %v1423_v29  ;;  %v1506_v33 = vrot.slane %v1496_v27, %v12300_v49  ;;  %v1495_v34 = vmul.f32 %v11427_v5, %v1493_v28  ;;  %11428 = vpow2.f32 %v10901_v6  ;;  %14514 = vst [vmem:[#allocation17_spill] sm:$0xff] %v12433_v2  ;;  %v12436_v6 = vld [vmem:[#allocation4 + $0x88] sm:$0xff] }
 0x375   :  { %v1446_v12 = vmul.f32 %v11754_v35, %v1444_v32  ;;  %14515 = vst [vmem:[#allocation18_spill] sm:$0xff] %v12436_v6 }
 0x376   :  { %v1502_v37 = vrot.slane %v1495_v34, %v12300_v49 }
 0x377   :  { %v1454_v22 = vrot.slane %v1446_v12, %v12320_v30 }
 0x378   :  { %v1507_v38 = vsel %vm1443_vm10, %v1506_v33, %v1502_v37 }
 0x379   :  { %v1509_v39 = vmul.f32 %v1507_v38, %v590_v8  ;;  %v1462_v63 = vrot.slane %v1454_v22, %v12320_v30  ;;  %v1455_v24 = vcombine.high %v1454_v22, %v1454_v22 }
 0x37b   :  { %11120 = vmatmul.mubr.msk.f32.vlgmr.msra.gmra.mxu0 %vm537_vm4, %v1462_v63  ;;  %v1469_v40 = vrot.slane %v1455_v24, %v12320_v30  ;;  %v1517_v41 = vrot.slane %v1509_v39, %v12320_v30 }
 0x37c   :  { %11134 = vmatpush3.msk.msra.mxu0 %vm1686_vm11, %v12275_v4  ;;  %11135 = vmatprep.mubr.msk.f32.mxu0 %vm11990_vm6, %v14446_v0 }
 0x37d   :  { %11131 = vmatmul.mubr.msk.f32.vlgmr.msra.gmra.mxu1 %vm537_vm4, %v1469_v40  ;;  %v1525_v43 = vrot.slane %v1517_v41, %v12320_v30  ;;  %v1518_v36 = vcombine.high %v1517_v41, %v1517_v41  ;;  %1937 = vmatprep.subr.mxu0 %v12340_v31  ;;  %v12415_v41 = vld [vmem:[#allocation4 + $0x110] sm:$0xff] }
 0x37e   :  { %11139 = vmatpush3.msk.msra.mxu1 %vm1686_vm11, %v12273_v3  ;;  %11140 = vmatprep.mubr.msk.f32.mxu1 %vm11990_vm6, %v14446_v0  ;;  %v12357_v3 = vld [vmem:[#allocation4 + $0xa8] sm:$0xff] }
 0x37f   :  { %11136 = vmatmul.mubr.msk.f32.vlgmr.msra.gmra.mxu0 %vm1683_vm12, %v1525_v43  ;;  %v1532_v4 = vrot.slane %v1518_v36, %v12320_v30  ;;  %2008 = vmatprep.subr.mxu1 %v12349_v42  ;;  %v12418_v43 = vld [vmem:[#allocation4 + $0x120] sm:$0xff]  ;;  %v12421_v36 = vld [vmem:[#allocation4 + $0xc8] sm:$0xff] }
 0x380   :  { %1938 = vmatpush1.msra.mxu0 %v12352_v20  ;;  %1977 = vmatprep.mubr.f32.mxu0 %v14446_v0 }
 0x381   :  { %11141 = vmatmul.mubr.msk.f32.vlgmr.msra.gmra.mxu1 %vm1683_vm12, %v1532_v4  ;;  %1939 = vmatprep.subr.mxu0 %v12357_v3  ;;  %v11429_v7 = vpop.eup %11428  ;;  %v12424_v4 = vld [vmem:[#allocation4 + $0xd8] sm:$0xff] }
 0x382   :  { %2009 = vmatpush1.msra.mxu1 %v12360_v62  ;;  %1940 = vmatpush1.msra.mxu0 %v12363_v47  ;;  %v1536_v5 = vadd.f32 1.0, %v11429_v7  ;;  %v12439_v7 = vld [vmem:[#allocation4 + $0x70] sm:$0xff] }
 0x383   :  { %2010 = vmatprep.subr.mxu1 %v12366_v48  ;;  %1941 = vmatprep.subr.mxu0 %v12369_v50  ;;  %14516 = vst [vmem:[#allocation19_spill] sm:$0xff] %v12439_v7 }
 0x384   :  { %2011 = vmatpush1.msra.mxu1 %v12372_v52  ;;  %1942 = vmatpush1.msra.mxu0 %v12375_v54  ;;  %11430 = vrcp.f32 %v1536_v5  ;;  %v12442_v5 = vld [vmem:[#allocation4 + $0x80] sm:$0xff] }
 0x385   :  { %2012 = vmatprep.subr.mxu1 %v12378_v55  ;;  %1943 = vmatprep.subr.mxu0 %v12381_v17  ;;  %14517 = vst [vmem:[#allocation20_spill] sm:$0xff] %v12442_v5 }
 0x386   :  { %2013 = vmatpush1.msra.mxu1 %v12384_v56  ;;  %1944 = vmatpush1.msra.mxu0 %v12387_v58 }
 0x387   :  { %2014 = vmatprep.subr.mxu1 %v12390_v51  ;;  %2048 = vmatprep.mubr.f32.mxu1 %v14446_v0 }
 0x388   :  { %2015 = vmatpush1.msra.mxu1 %v12394_v59  ;;  %2079 = vmatprep.subr.mxu0 %v12397_v23 }
 0x389   :  { %2150 = vmatprep.subr.mxu1 %v12400_v60 }
 0x391   :  { %v11431_v25 = vpop.eup %11430 }
 0x43b   :  { %v1607_v10 = vpop.f32.mrf.mxu0 }
 0x43d   :  { %v11121_v11 = vpop.f32.mrf.mxu0  ;;  %v1679_v13 = vpop.f32.mrf.mxu1 }
 0x43e   :  { %v12448_v11 = vld [vmem:[#allocation4 + $0x38] sm:$0xff] }
 0x43f   :  { %v11132_v9 = vpop.f32.mrf.mxu1  ;;  %v1756_v14 = vpop.f32.mrf.mxu0  ;;  %14519 = vst [vmem:[#allocation22_spill] sm:$0xff] %v12448_v11 }
 0x440   :  { %v1835_v19 = vadd.f32 %v1756_v14, %v1607_v10  ;;  %v12445_v10 = vld [vmem:[#allocation4 + $0x28] sm:$0xff]  ;;  %v12455_v9 = vld [vmem:[#allocation4 + $0x30] sm:$0xff]  ;;  %v12461_v14 = vld [vmem:[#allocation4 + $0x138] sm:$0xff] }
 0x441   :  { %v11137_v26 = vpop.f32.mrf.mxu0  ;;  %v1831_v15 = vpop.f32.mrf.mxu1  ;;  %14518 = vst [vmem:[#allocation21_spill] sm:$0xff] %v12445_v10  ;;  %14521 = vst [vmem:[#allocation24_spill] sm:$0xff] %v12455_v9 }
 0x442   :  { %v1836_v16 = vadd.f32 %v1831_v15, %v1679_v13  ;;  %v12451_v13 = vld [vmem:[#allocation4 + $0x20] sm:$0xff]  ;;  %14522 = vst [vmem:[#allocation25_spill] sm:$0xff] %v12461_v14  ;;  %v12465_v26 = vld [vmem:[#allocation4 + $0x130] sm:$0xff]  ;;  %v12469_v15 = vld [vmem:[#allocation4 + $0xe8] sm:$0xff] }
 0x443   :  { %v11142_v18 = vpop.f32.mrf.mxu1  ;;  %14520 = vst [vmem:[#allocation23_spill] sm:$0xff] %v12451_v13  ;;  %14523 = vst [vmem:[#allocation26_spill] sm:$0xff] %v12465_v26 }
 0x444   :  { %v1839_v21 = vrot.slane %v1836_v16, 7  ;;  %14524 = vst [vmem:[#allocation27_spill] sm:$0xff] %v12469_v15  ;;  %v12477_v18 = vld [vmem:[#allocation4 + $0x98] sm:$0xff] }
 0x445   :  { %14526 = vst [vmem:[#allocation29_spill] sm:$0xff] %v12477_v18 }
 0x446   :  { %v1840_v27 = vsel %vm1443_vm10, %v1839_v21, %v1835_v19  ;;  %v12483_v21 = vld [vmem:[#allocation4 + $0x48] sm:$0xff] }
 0x447   :  { %v1842_v28 = vmul.f32 %v11431_v25, %v1840_v27  ;;  %14528 = vst [vmem:[#allocation31_spill] sm:$0xff] %v12483_v21  ;;  %v12486_v25 = vld [vmem:[#allocation4 + $0x40] sm:$0xff] }
 0x448   :  { %14529 = vst [vmem:[#allocation32_spill] sm:$0xff] %v12486_v25  ;;  %v1870_v27 = vld [vmem:[#allocation3] sm:$0xc] }
 0x449   :  { %v1844_v29 = vrot.slane %v1842_v28, 1  ;;  %1849 = vst.msk [vmem:[#allocation7] sm:$0x3] %vm42_vm0, %v1842_v28  ;;  %v1847_v33 = vsub.f32 %v1835_v19, %v1842_v28  ;;  %v12480_v19 = vld [vmem:[#allocation4 + $0x90] sm:$0xff]  ;;  %v1890_v28 = vrot.slane %v1870_v27, 2 }
 0x44a   :  { %14527 = vst [vmem:[#allocation30_spill] sm:$0xff] %v12480_v19  ;;  %v1874_v27 = vld [vmem:[#allocation3 + $0x20] sm:$0xc] }
 0x44b   :  { %v1848_v32 = vsub.f32 %v1836_v16, %v1844_v29  ;;  %v12474_v16 = vld [vmem:[#allocation4 + $0xe0] sm:$0xff] }
 0x44c   :  { %14525 = vst [vmem:[#allocation28_spill] sm:$0xff] %v12474_v16 }
 0x44d   :  { %v1852_v34 = vrot.slane %v1848_v32, 7  ;;  %v1872_v32 = vld [vmem:[#allocation3 + $0x10] sm:$0xc] }
 0x44f   :  { %v1853_v35 = vsel %vm1443_vm10, %v1852_v34, %v1847_v33 }
 0x450   :  { %1855 = vst.msk [vmem:[#allocation8] sm:$0x3] %vm42_vm0, %v1853_v35  ;;  %1856 = vst.msk [vmem:[#allocation2] sm:$0x3] %vm42_vm0, %v1853_v35  ;;  %v1892_v35 = vrot.slane %v1872_v32, 2  ;;  %v1894_v32 = vrot.slane %v1874_v27, 2 }
 0x451   :  { %v1877_v27 = vld [vmem:[#allocation3 + $0x38] sm:$0xc] }
 0x457   :  { %v12408_v12 = vld [vmem:[#allocation2] sm:$0x3] }
 0x458   :  { %v1860_v8 = vsel %vm42_vm0, %v12408_v12, 0.0 }
 0x459   :  { %1861 = vadd.xlane.f32.xlu0 %v1860_v8 }
 0x4e2   :  { %v1862_v37 = vpop.xlane.xlu0 %1861 }
 0x4e3   :  { %vm1863_vm13 = vcmp.eq.f32.partialorder %v1862_v37, 0.0 }
 0x4e4   :  { %v1864_v22 = vsel %vm1863_vm13, 1.0, %v1862_v37  ;;  %v1871_v37 = vld [vmem:[#allocation3 + $0x8] sm:$0xc] }
 0x4e5   :  { %11432 = vrcp.f32 %v1864_v22 }
 0x4f2   :  { %v11433_v38 = vpop.eup %11432 }
 0x4f3   :  { %v1866_v39 = vmul.f32 %v11433_v38, %v1864_v22 }
 0x4f5   :  { %v1867_v63 = vsub.f32 2.0, %v1866_v39  ;;  %v1873_v39 = vld [vmem:[#allocation3 + $0x18] sm:$0xc] }
 0x4f7   :  { %v1868_v24 = vmul.f32 %v11433_v38, %v1867_v63  ;;  %v1891_v38 = vrot.slane %v1871_v37, 2 }
 0x4f9   :  { %v1869_v40 = vmul.f32 %v1868_v24, %v12408_v12 }
 0x4fb   :  { %10909 = vmatmul.mubr.msk.f32.vlgmr.msra.gmra.mxu0 %vm537_vm4, %v1869_v40  ;;  %10910 = vmatmul.mubr.msk.f32.vlgmr.msra.gmra.mxu1 %vm537_vm4, %v1869_v40 }
 0x4fc   :  { %2080 = vmatpush1.msra.mxu0 %v12415_v41  ;;  %2151 = vmatpush1.msra.mxu1 %v12418_v43 }
 0x4fd   :  { %2081 = vmatprep.subr.mxu0 %v12421_v36  ;;  %2152 = vmatprep.subr.mxu1 %v12424_v4 }
 0x4fe   :  { %2082 = vmatpush1.msra.mxu0 %v12427_v61  ;;  %2153 = vmatpush1.msra.mxu1 %v12430_v1 }
 0x4ff   :  { %2083 = vmatprep.subr.mxu0 %v12433_v2  ;;  %2154 = vmatprep.subr.mxu1 %v12436_v6 }
 0x500   :  { %2084 = vmatpush1.msra.mxu0 %v12439_v7  ;;  %2155 = vmatpush1.msra.mxu1 %v12442_v5 }
 0x501   :  { %2085 = vmatprep.subr.mxu0 %v12445_v10  ;;  %2156 = vmatprep.subr.mxu1 %v12448_v11 }
 0x502   :  { %2086 = vmatpush1.msra.mxu0 %v12451_v13  ;;  %2119 = vmatprep.mubr.f32.mxu0 %v14446_v0 }
 0x503   :  { %2157 = vmatpush1.msra.mxu1 %v12455_v9  ;;  %2190 = vmatprep.mubr.f32.mxu1 %v14446_v0 }
 0x504   :  { %10911 = vmatmul.mubr.msk.f32.vlgmr.msra.gmra.mxu0 %vm537_vm4, %v1869_v40  ;;  %10912 = vmatmul.mubr.msk.f32.vlgmr.msra.gmra.mxu1 %vm537_vm4, %v1869_v40 }
 0x505   :  { %2221 = vmatprep.subr.mxu0 %v12461_v14  ;;  %2261 = vmatprep.mubr.f32.mxu0 %v14446_v0 }
 0x506   :  { %2222 = vmatpush1.msra.mxu0 %v12465_v26  ;;  %11143 = vmatprep.subr.mxu1 %v14446_v0 }
 0x507   :  { %2223 = vmatprep.subr.mxu0 %v12469_v15  ;;  %11151 = vmatprep.mubr.msk.f32.mxu1 %vm11990_vm6, %v14446_v0 }
 0x508   :  { %2224 = vmatpush1.msra.mxu0 %v12474_v16 }
 0x509   :  { %2225 = vmatprep.subr.mxu0 %v12477_v18 }
 0x50a   :  { %2226 = vmatpush1.msra.mxu0 %v12480_v19 }
 0x50b   :  { %2227 = vmatprep.subr.mxu0 %v12483_v21 }
 0x50c   :  { %2228 = vmatpush1.msra.mxu0 %v12486_v25 }
 0x50d   :  { %10913 = vmatmul.mubr.msk.f32.vlgmr.msra.gmra.mxu0 %vm537_vm4, %v1869_v40  ;;  %11154 = vmatprep.subr.mxu0 %v14446_v0  ;;  %v1893_v40 = vrot.slane %v1873_v39, 2  ;;  %v1875_v39 = vld [vmem:[#allocation3 + $0x28] sm:$0xc] }
 0x50e   :  { %11162 = vmatprep.mubr.msk.f32.mxu0 %vm11990_vm6, %v14446_v0 }
 0x5bb   :  { %v1979_v29 = vpop.f32.mrf.mxu0  ;;  %v2050_v34 = vpop.f32.mrf.mxu1 }
 0x5bc   :  { %v12493_v33 = vadd.f32 %v1979_v29, %v1890_v28  ;;  %v12499_v8 = vadd.f32 %v2050_v34, %v1892_v35  ;;  %v1876_v35 = vld [vmem:[#allocation3 + $0x30] sm:$0xc] }
 0x5bd   :  { %v1981_v22 = vpop.f32.mrf.mxu0  ;;  %v2052_v24 = vpop.f32.mrf.mxu1 }
 0x5be   :  { %2272 = vrot.lane.b32.xlu0 %v12493_v33, %s11985_s4  ;;  %2269 = vrot.lane.b32.xlu1 %v12493_v33, %s11986_s19  ;;  %v12509_v63 = vadd.f32 %v1981_v22, %v1891_v38  ;;  %v12515_v28 = vadd.f32 %v2052_v24, %v1893_v40  ;;  %v1896_v22 = vrot.slane %v1876_v35, 2  ;;  %v1895_v40 = vrot.slane %v1875_v39, 2 }
 0x5bf   :  { %v1897_v35 = vrot.slane %v1877_v27, 2 }
 0x5c2   :  { %2275 = vrot.lane.b32.xlu1 %v12493_v33, %s11987_s20  ;;  %2289 = vrot.lane.b32.xlu0 %v12499_v8, %s11986_s19 }
 0x5c4   :  { %v2121_v29 = vpop.f32.mrf.mxu0  ;;  %v2192_v37 = vpop.f32.mrf.mxu1 }
 0x5c5   :  { %v12521_v34 = vadd.f32 %v2121_v29, %v1894_v32  ;;  %v12531_v38 = vadd.f32 %v2192_v37, %v1896_v22  ;;  %v1878_v37 = vld [vmem:[#allocation3 + $0x40] sm:$0xc] }
 0x5c6   :  { %2292 = vrot.lane.b32.xlu1 %v12499_v8, %s11985_s4  ;;  %2295 = vrot.lane.b32.xlu0 %v12499_v8, %s11987_s20  ;;  %v2123_v24 = vpop.f32.mrf.mxu0  ;;  %v2194_v32 = vpop.f32.mrf.mxu1  ;;  %v1898_v0 = vrot.slane %v1878_v37, 2 }
 0x5c7   :  { %v12541_v29 = vadd.f32 %v2123_v24, %v1895_v40  ;;  %v12547_v22 = vadd.f32 %v2194_v32, %v1897_v35 }
 0x5ca   :  { %2279 = vrot.lane.b32.xlu1 %v12509_v63, %s11986_s19  ;;  %2282 = vrot.lane.b32.xlu0 %v12509_v63, %s11985_s4 }
 0x5cd   :  { %v2263_v39 = vpop.f32.mrf.mxu0 }
 0x5ce   :  { %2285 = vrot.lane.b32.xlu1 %v12509_v63, %s11987_s20  ;;  %2302 = vrot.lane.b32.xlu0 %v12515_v28, %s11985_s4  ;;  %v12553_v24 = vadd.f32 %v2263_v39, %v1898_v0 }
 0x5d2   :  { %2299 = vrot.lane.b32.xlu1 %v12515_v28, %s11986_s19  ;;  %2309 = vrot.lane.b32.xlu0 %v12521_v34, %s11986_s19 }
 0x5d6   :  { %2305 = vrot.lane.b32.xlu1 %v12515_v28, %s11987_s20  ;;  %2315 = vrot.lane.b32.xlu0 %v12521_v34, %s11987_s20 }
 0x5da   :  { %2312 = vrot.lane.b32.xlu1 %v12521_v34, %s11985_s4  ;;  %2329 = vrot.lane.b32.xlu0 %v12531_v38, %s11986_s19 }
 0x5de   :  { %2332 = vrot.lane.b32.xlu1 %v12531_v38, %s11985_s4  ;;  %2335 = vrot.lane.b32.xlu0 %v12531_v38, %s11987_s20 }
 0x5e2   :  { %2319 = vrot.lane.b32.xlu1 %v12541_v29, %s11986_s19  ;;  %2322 = vrot.lane.b32.xlu0 %v12541_v29, %s11985_s4 }
 0x5e6   :  { %2325 = vrot.lane.b32.xlu1 %v12541_v29, %s11987_s20  ;;  %2342 = vrot.lane.b32.xlu0 %v12547_v22, %s11985_s4 }
 0x5ea   :  { %2339 = vrot.lane.b32.xlu1 %v12547_v22, %s11986_s19  ;;  %2549 = vrot.lane.b32.xlu0 %v12553_v24, %s11986_s19 }
 0x5ee   :  { %2345 = vrot.lane.b32.xlu1 %v12547_v22, %s11987_s20  ;;  %2555 = vrot.lane.b32.xlu0 %v12553_v24, %s11987_s20 }
 0x5f2   :  { %2552 = vrot.lane.b32.xlu1 %v12553_v24, %s11985_s4 }
 0x630   :  { %v2273_v40 = vpop.permute.xlu0 %2272  ;;  %v2270_v27 = vpop.permute.xlu1 %2269 }
 0x631   :  { %v2348_v19 = vcombine.low %v12493_v33, %v2273_v40 }
 0x633   :  { %v2355_v14 = vrot.slane %v2348_v19, %v12190_v44 }
 0x634   :  { %v2276_v32 = vpop.permute.xlu1 %2275  ;;  %v2290_v0 = vpop.permute.xlu0 %2289 }
 0x635   :  { %v2356_v39 = vcombine.low %v2270_v27, %v2276_v32 }
 0x637   :  { %v2363_v18 = vrot.slane %v2356_v39, %v12190_v44 }
 0x638   :  { %v2293_v35 = vpop.permute.xlu1 %2292  ;;  %v2296_v37 = vpop.permute.xlu0 %2295 }
 0x639   :  { %v2398_v13 = vcombine.low %v12499_v8, %v2293_v35  ;;  %v2380_v11 = vcombine.low %v2355_v14, %v2363_v18  ;;  %v2406_v10 = vcombine.low %v2290_v0, %v2296_v37 }
 0x63b   :  { %v2405_v40 = vrot.slane %v2398_v13, %v12190_v44  ;;  %v2387_v19 = vrot.slane %v2380_v11, %v12198_v53 }
 0x63c   :  { %v2280_v25 = vpop.permute.xlu1 %2279  ;;  %v2283_v21 = vpop.permute.xlu0 %2282 }
 0x63d   :  { %v2364_v16 = vcombine.low %v12509_v63, %v2283_v21  ;;  %v2413_v21 = vrot.slane %v2406_v10, %v12190_v44 }
 0x63f   :  { %v2371_v5 = vrot.slane %v2364_v16, %v12190_v44  ;;  %v2430_v16 = vcombine.low %v2405_v40, %v2413_v21 }
 0x640   :  { %v2286_v15 = vpop.permute.xlu1 %2285  ;;  %v2303_v26 = vpop.permute.xlu0 %2302 }
 0x641   :  { %v2372_v9 = vcombine.low %v2280_v25, %v2286_v15  ;;  %v2414_v63 = vcombine.low %v12515_v28, %v2303_v26  ;;  %v2437_v11 = vrot.slane %v2430_v16, %v12198_v53 }
 0x643   :  { %v2379_v27 = vrot.slane %v2372_v9, %v12190_v44  ;;  %v2421_v9 = vrot.slane %v2414_v63, %v12190_v44 }
 0x644   :  { %v2300_v32 = vpop.permute.xlu1 %2299  ;;  %v2310_v7 = vpop.permute.xlu0 %2309 }
 0x645   :  { %v2388_v33 = vcombine.low %v2371_v5, %v2379_v27 }
 0x647   :  { %v2395_v15 = vrot.slane %v2388_v33, %v12198_v53 }
 0x648   :  { %v2306_v25 = vpop.permute.xlu1 %2305  ;;  %v2316_v14 = vpop.permute.xlu0 %2315 }
 0x649   :  { %v2422_v18 = vcombine.low %v2300_v32, %v2306_v25  ;;  %v12577_v8 = vcombine.low %v2387_v19, %v2395_v15  ;;  %v12594_v25 = vcombine.high %v2387_v19, %v2395_v15 }
 0x64b   :  { %v2429_v5 = vrot.slane %v2422_v18, %v12190_v44  ;;  %v2583_v13 = vsel %vm537_vm4, %v12577_v8, -inf  ;;  %v2456_v18 = vcombine.low %v2310_v7, %v2316_v14 }
 0x64c   :  { %v2313_v10 = vpop.permute.xlu1 %2312  ;;  %2584 = vmax.xlane.f32.xlu1 %v2583_v13  ;;  %v2330_v26 = vpop.permute.xlu0 %2329 }
 0x64d   :  { %v2438_v28 = vcombine.low %v2421_v9, %v2429_v5  ;;  %v2448_v32 = vcombine.low %v12521_v34, %v2313_v10  ;;  %v2595_v34 = vsel %vm537_vm4, %v12594_v25, -inf  ;;  %v2463_v10 = vrot.slane %v2456_v18, %v12190_v44 }
 0x64f   :  { %v2445_v0 = vrot.slane %v2438_v28, %v12198_v53  ;;  %v2455_v16 = vrot.slane %v2448_v32, %v12190_v44 }
 0x650   :  { %v2333_v35 = vpop.permute.xlu1 %2332  ;;  %v2336_v37 = vpop.permute.xlu0 %2335 }
 0x651   :  { %v12585_v39 = vcombine.high %v2437_v11, %v2445_v0  ;;  %v12587_v27 = vcombine.low %v2437_v11, %v2445_v0  ;;  %v2498_v11 = vcombine.low %v12531_v38, %v2333_v35  ;;  %v2506_v0 = vcombine.low %v2330_v26, %v2336_v37 }
 0x652   :  { %v2480_v19 = vcombine.low %v2455_v16, %v2463_v10 }
 0x653   :  { %v2598_v33 = vsel %vm537_vm4, %v12585_v39, -inf  ;;  %v2586_v21 = vsel %vm537_vm4, %v12587_v27, -inf }
 0x654   :  { %v2320_v40 = vpop.permute.xlu1 %2319  ;;  %2599 = vmax.xlane.f32.xlu1 %v2598_v33  ;;  %v2323_v63 = vpop.permute.xlu0 %2322  ;;  %2587 = vmax.xlane.f32.xlu0 %v2586_v21  ;;  %v2505_v33 = vrot.slane %v2498_v11, %v12190_v44  ;;  %v2513_v21 = vrot.slane %v2506_v0, %v12190_v44 }
 0x655   :  { %v2464_v9 = vcombine.low %v12541_v29, %v2323_v63 }
 0x657   :  { %v2471_v7 = vrot.slane %v2464_v9, %v12190_v44  ;;  %v2530_v9 = vcombine.low %v2505_v33, %v2513_v21 }
 0x658   :  { %v2326_v5 = vpop.permute.xlu1 %2325  ;;  %v2343_v13 = vpop.permute.xlu0 %2342  ;;  %2596 = vmax.xlane.f32.xlu0 %v2595_v34 }
 0x659   :  { %v2472_v28 = vcombine.low %v2320_v40, %v2326_v5  ;;  %v2514_v63 = vcombine.low %v12547_v22, %v2343_v13  ;;  %v2487_v40 = vrot.slane %v2480_v19, %v12198_v53 }
 0x65b   :  { %v2479_v15 = vrot.slane %v2472_v28, %v12190_v44  ;;  %v2521_v5 = vrot.slane %v2514_v63, %v12190_v44 }
 0x65c   :  { %v2340_v14 = vpop.permute.xlu1 %2339  ;;  %v2550_v32 = vpop.permute.xlu0 %2549 }
 0x65d   :  { %v2488_v29 = vcombine.low %v2471_v7, %v2479_v15  ;;  %v2537_v15 = vrot.slane %v2530_v9, %v12198_v53 }
 0x65f   :  { %v2495_v18 = vrot.slane %v2488_v29, %v12198_v53 }
 0x660   :  { %v2346_v38 = vpop.permute.xlu1 %2345  ;;  %v2556_v26 = vpop.permute.xlu0 %2555 }
 0x661   :  { %v2522_v35 = vcombine.low %v2340_v14, %v2346_v38  ;;  %v2497_v37 = vcombine.high %v2487_v40, %v2495_v18  ;;  %v2496_v16 = vcombine.low %v2487_v40, %v2495_v18  ;;  %v2566_v10 = vcombine.low %v2550_v32, %v2556_v26 }
 0x663   :  { %v2529_v34 = vrot.slane %v2522_v35, %v12190_v44  ;;  %v2601_v28 = vsel %vm537_vm4, %v2497_v37, -inf  ;;  %v2589_v11 = vsel %vm537_vm4, %v2496_v16, -inf  ;;  %v2573_v19 = vrot.slane %v2566_v10, %v12190_v44 }
 0x664   :  { %v2553_v22 = vpop.permute.xlu1 %2552  ;;  %2602 = vmax.xlane.f32.xlu1 %v2601_v28  ;;  %2590 = vmax.xlane.f32.xlu0 %v2589_v11 }
 0x665   :  { %v2538_v13 = vcombine.low %v2521_v5, %v2529_v34  ;;  %v2558_v0 = vcombine.low %v12553_v24, %v2553_v22  ;;  %v14530_v24 = vmov 0.0  }
 0x667   :  { %v2565_v7 = vrot.slane %v2558_v0, %v12190_v44  ;;  %v2545_v14 = vrot.slane %v2538_v13, %v12198_v53 }
 0x669   :  { %v2574_v29 = vcombine.low %v2565_v7, %v2573_v19  ;;  %v2547_v32 = vcombine.high %v2537_v15, %v2545_v14  ;;  %v2546_v33 = vcombine.low %v2537_v15, %v2545_v14 }
 0x66b   :  { %v2604_v21 = vsel %vm537_vm4, %v2547_v32, -inf  ;;  %v2592_v63 = vsel %vm537_vm4, %v2546_v33, -inf  ;;  %v2581_v40 = vrot.slane %v2574_v29, %v12198_v53 }
 0x66c   :  { %2605 = vmax.xlane.f32.xlu1 %v2604_v21  ;;  %2593 = vmax.xlane.f32.xlu0 %v2592_v63 }
 0x66d   :  { %v2582_v18 = vcombine.high %v2581_v40, %v14530_v24  ;;  %v2759_v38 = vsel %vm1470_vm5, %v2581_v40, -inf }
 0x66f   :  { %v2762_v26 = vsel %vm1470_vm5, %v2582_v18, -inf }
 0x670   :  { %2760 = vmax.xlane.f32.xlu0 %v2759_v38  ;;  %2763 = vmax.xlane.f32.xlu1 %v2762_v26 }
 0x6d5   :  { %v2585_v35 = vpop.xlane.xlu1 %2584 }
 0x6d6   :  { %v2607_v9 = vsub.f32 %v12577_v8, %v2585_v35 }
 0x6d8   :  { %v2615_v5 = vmul.f32 1.442695, %v2607_v9 }
 0x6da   :  { %11434 = vpow2.f32 %v2615_v5 }
 0x6dd   :  { %v2600_v34 = vpop.xlane.xlu1 %2599  ;;  %v2588_v28 = vpop.xlane.xlu0 %2587 }
 0x6de   :  { %v2612_v10 = vsub.f32 %v12585_v39, %v2600_v34  ;;  %v2608_v11 = vsub.f32 %v12587_v27, %v2588_v28 }
 0x6e0   :  { %v2625_v22 = vmul.f32 1.442695, %v2612_v10  ;;  %v2617_v13 = vmul.f32 1.442695, %v2608_v11 }
 0x6e1   :  { %v2597_v0 = vpop.xlane.xlu0 %2596 }
 0x6e2   :  { %11436 = vpow2.f32 %v2617_v13  ;;  %v2611_v19 = vsub.f32 %v12594_v25, %v2597_v0 }
 0x6e3   :  { %11438 = vpow2.f32 %v2625_v22 }
 0x6e4   :  { %v2623_v7 = vmul.f32 1.442695, %v2611_v19 }
 0x6e6   :  { %11440 = vpow2.f32 %v2623_v7 }
 0x6e7   :  { %v12628_v15 = vpop.eup %11434 }
 0x6e8   :  { %v2631_v8 = vsel %vm537_vm4, %v12628_v15, 0.0 }
 0x6e9   :  { %2632 = vadd.xlane.f32.xlu0 %v2631_v8 }
 0x6ed   :  { %v2603_v14 = vpop.xlane.xlu1 %2602  ;;  %v2591_v39 = vpop.xlane.xlu0 %2590 }
 0x6ee   :  { %v2613_v29 = vsub.f32 %v2497_v37, %v2603_v14  ;;  %v2609_v21 = vsub.f32 %v2496_v16, %v2591_v39 }
 0x6ef   :  { %v11437_v27 = vpop.eup %11436 }
 0x6f0   :  { %v2627_v63 = vmul.f32 1.442695, %v2613_v29  ;;  %v2619_v38 = vmul.f32 1.442695, %v2609_v21  ;;  %v2634_v26 = vsel %vm537_vm4, %v11437_v27, 0.0  ;;  %v11439_v35 = vpop.eup %11438 }
 0x6f1   :  { %2635 = vadd.xlane.f32.xlu1 %v2634_v26  ;;  %v2646_v5 = vsel %vm537_vm4, %v11439_v35, 0.0 }
 0x6f2   :  { %11442 = vpow2.f32 %v2627_v63 }
 0x6f3   :  { %11444 = vpow2.f32 %v2619_v38  ;;  %v11441_v25 = vpop.eup %11440 }
 0x6f4   :  { %v2643_v34 = vsel %vm537_vm4, %v11441_v25, 0.0 }
 0x6f5   :  { %v2606_v9 = vpop.xlane.xlu1 %2605  ;;  %v2594_v10 = vpop.xlane.xlu0 %2593  ;;  %2647 = vadd.xlane.f32.xlu1 %v2646_v5  ;;  %2644 = vadd.xlane.f32.xlu0 %v2643_v34 }
 0x6f6   :  { %v2614_v28 = vsub.f32 %v2547_v32, %v2606_v9  ;;  %v2610_v37 = vsub.f32 %v2546_v33, %v2594_v10 }
 0x6f8   :  { %v2629_v16 = vmul.f32 1.442695, %v2614_v28  ;;  %v2621_v11 = vmul.f32 1.442695, %v2610_v37 }
 0x6f9   :  { %v2764_v22 = vpop.xlane.xlu1 %2763  ;;  %v2761_v13 = vpop.xlane.xlu0 %2760 }
 0x6fa   :  { %11446 = vpow2.f32 %v2629_v16  ;;  %v2766_v0 = vsub.f32 %v2582_v18, %v2764_v22  ;;  %v2765_v19 = vsub.f32 %v2581_v40, %v2761_v13 }
 0x6fb   :  { %11448 = vpow2.f32 %v2621_v11 }
 0x6fc   :  { %v2769_v7 = vmul.f32 1.442695, %v2766_v0  ;;  %v2767_v8 = vmul.f32 1.442695, %v2765_v19 }
 0x6fe   :  { %11450 = vpow2.f32 %v2769_v7 }
 0x6ff   :  { %v11443_v14 = vpop.eup %11442  ;;  %11452 = vpow2.f32 %v2767_v8 }
 0x700   :  { %v11445_v39 = vpop.eup %11444  ;;  %v2649_v29 = vsel %vm537_vm4, %v11443_v14, 0.0 }
 0x701   :  { %2650 = vadd.xlane.f32.xlu1 %v2649_v29  ;;  %v2637_v32 = vsel %vm537_vm4, %v11445_v39, 0.0 }
 0x702   :  { %2638 = vadd.xlane.f32.xlu0 %v2637_v32 }
 0x707   :  { %v11447_v33 = vpop.eup %11446 }
 0x708   :  { %v11449_v21 = vpop.eup %11448  ;;  %11155 = vmatpush3.msra.mxu0 %v11447_v33  ;;  %v2652_v63 = vsel %vm537_vm4, %v11447_v33, 0.0 }
 0x709   :  { %11144 = vmatpush3.msra.mxu1 %v11449_v21  ;;  %11156 = vmatprep.subr.mxu0 %v14530_v24  ;;  %v2640_v40 = vsel %vm537_vm4, %v11449_v21, 0.0 }
 0x70a   :  { %2653 = vadd.xlane.f32.xlu1 %v2652_v63  ;;  %11145 = vmatprep.subr.mxu1 %v14530_v24 }
 0x70b   :  { %v12641_v18 = vpop.eup %11450  ;;  %2641 = vadd.xlane.f32.xlu0 %v2640_v40  ;;  %11146 = vmatpush3.msra.mxu1 %v11445_v39 }
 0x70c   :  { %v12643_v38 = vpop.eup %11452  ;;  %11157 = vmatpush3.msra.mxu0 %v11443_v14  ;;  %11147 = vmatprep.subr.mxu1 %v14530_v24  ;;  %v2774_v26 = vsel %vm1470_vm5, %v12641_v18, 0.0 }
 0x70d   :  { %11158 = vmatprep.subr.mxu0 %v14530_v24  ;;  %11148 = vmatpush3.msra.mxu1 %v11437_v27  ;;  %v2771_v9 = vsel %vm1470_vm5, %v12643_v38, 0.0 }
 0x70e   :  { %11159 = vmatpush3.msra.mxu0 %v11439_v35  ;;  %2775 = vadd.xlane.f32.xlu1 %v2774_v26 }
 0x70f   :  { %11160 = vmatprep.subr.mxu0 %v14530_v24  ;;  %11149 = vmatprep.subr.mxu1 %v14530_v24 }
 0x710   :  { %2772 = vadd.xlane.f32.xlu0 %v2771_v9  ;;  %11150 = vmatpush3.msra.mxu1 %v12628_v15 }
 0x711   :  { %11161 = vmatpush3.msra.mxu0 %v11441_v25  ;;  %11165 = vmatprep.subr.mxu1 %v14530_v24 }
 0x712   :  { %3225 = vmatprep.subr.mxu0 %v12340_v31 }
 0x772   :  { %v2633_v34 = vpop.xlane.xlu0 %2632 }
 0x77a   :  { %v2636_v5 = vpop.xlane.xlu1 %2635 }
 0x77e   :  { %v2648_v27 = vpop.xlane.xlu1 %2647  ;;  %v2645_v10 = vpop.xlane.xlu0 %2644 }
 0x77f   :  { %11454 = vrcp.f32 %v2648_v27 }
 0x780   :  { %11456 = vrcp.f32 %v2645_v10 }
 0x781   :  { %11458 = vrcp.f32 %v2636_v5 }
 0x782   :  { %11460 = vrcp.f32 %v2633_v34 }
 0x78a   :  { %v2651_v35 = vpop.xlane.xlu1 %2650 }
 0x78b   :  { %11462 = vrcp.f32 %v2651_v35  ;;  %v2639_v28 = vpop.xlane.xlu0 %2638 }
 0x78c   :  { %11464 = vrcp.f32 %v2639_v28  ;;  %v11455_v16 = vpop.eup %11454 }
 0x78d   :  { %v11457_v25 = vpop.eup %11456  ;;  %v2668_v0 = vmul.f32 %v11455_v16, %v2648_v27 }
 0x78e   :  { %v11459_v11 = vpop.eup %11458  ;;  %v2667_v19 = vmul.f32 %v11457_v25, %v2645_v10 }
 0x78f   :  { %v11461_v31 = vpop.eup %11460  ;;  %v2664_v8 = vmul.f32 %v11459_v11, %v2636_v5  ;;  %v2676_v33 = vsub.f32 2.0, %v2668_v0 }
 0x790   :  { %v2663_v32 = vmul.f32 %v11461_v31, %v2633_v34  ;;  %v2675_v21 = vsub.f32 2.0, %v2667_v19 }
 0x791   :  { %v2672_v63 = vsub.f32 2.0, %v2664_v8  ;;  %v2684_v53 = vmul.f32 %v11455_v16, %v2676_v33 }
 0x792   :  { %v2671_v9 = vsub.f32 2.0, %v2663_v32  ;;  %v2683_v44 = vmul.f32 %v11457_v25, %v2675_v21 }
 0x793   :  { %v2654_v37 = vpop.xlane.xlu1 %2653  ;;  %v2680_v2 = vmul.f32 %v11459_v11, %v2672_v63 }
 0x794   :  { %11466 = vrcp.f32 %v2654_v37  ;;  %v2642_v15 = vpop.xlane.xlu0 %2641  ;;  %v2679_v5 = vmul.f32 %v11461_v31, %v2671_v9  ;;  %v2717_v34 = vrot.slane %v2683_v44, %v12300_v49  ;;  %v10908_v9 = vld [vmem:[%s14439_s0 + $0x2] sm:$0x3] }
 0x795   :  { %11468 = vrcp.f32 %v2642_v15  ;;  %v2702_v8 = vrot.slane %v2680_v2, %v12294_v45 }
 0x797   :  { %v2776_v22 = vpop.xlane.xlu1 %2775 }
 0x798   :  { %v11463_v13 = vpop.eup %11462  ;;  %11470 = vrcp.f32 %v2776_v22 }
 0x799   :  { %v11465_v7 = vpop.eup %11464  ;;  %v2669_v14 = vmul.f32 %v11463_v13, %v2651_v35  ;;  %v2773_v39 = vpop.xlane.xlu0 %2772 }
 0x79a   :  { %v2665_v29 = vmul.f32 %v11465_v7, %v2639_v28  ;;  %11472 = vrcp.f32 %v2773_v39  ;;  %v2721_v28 = vrot.slane %v2684_v53, %v12294_v45 }
 0x79b   :  { %v2677_v40 = vsub.f32 2.0, %v2669_v14 }
 0x79c   :  { %v2673_v26 = vsub.f32 2.0, %v2665_v29 }
 0x79d   :  { %v2685_v27 = vmul.f32 %v11463_v13, %v2677_v40 }
 0x79e   :  { %v2681_v1 = vmul.f32 %v11465_v7, %v2673_v26 }
 0x79f   :  { %v2726_v14 = vrot.slane %v2685_v27, %v12297_v46 }
 0x7a0   :  { %v2707_v25 = vrot.slane %v2681_v1, %v12297_v46 }
 0x7a1   :  { %v11467_v6 = vpop.eup %11466 }
 0x7a2   :  { %v11469_v10 = vpop.eup %11468  ;;  %v2670_v61 = vmul.f32 %v11467_v6, %v2654_v37  ;;  %v2698_v37 = vrot.slane %v2679_v5, %v12300_v49 }
 0x7a3   :  { %v2666_v35 = vmul.f32 %v11469_v10, %v2642_v15  ;;  %v2722_v15 = vsel %vm1408_vm7, %v2721_v28, %v2717_v34 }
 0x7a4   :  { %v2678_v0 = vsub.f32 2.0, %v2670_v61  ;;  %v2703_v7 = vsel %vm1408_vm7, %v2702_v8, %v2698_v37  ;;  %v2727_v2 = vsel %vm1415_vm8, %v2726_v14, %v2722_v15 }
 0x7a5   :  { %v11471_v19 = vpop.eup %11470  ;;  %v2674_v16 = vsub.f32 2.0, %v2666_v35  ;;  %v2708_v1 = vsel %vm1415_vm8, %v2707_v25, %v2703_v7 }
 0x7a6   :  { %v2686_v11 = vmul.f32 %v11467_v6, %v2678_v0  ;;  %v2780_v13 = vmul.f32 %v11471_v19, %v2776_v22 }
 0x7a7   :  { %v11473_v29 = vpop.eup %11472  ;;  %v2682_v31 = vmul.f32 %v11469_v10, %v2674_v16 }
 0x7a8   :  { %v2731_v53 = vrot.slane %v2686_v11, %v12303_v57  ;;  %v2782_v44 = vsub.f32 2.0, %v2780_v13  ;;  %v2779_v61 = vmul.f32 %v11473_v29, %v2773_v39 }
 0x7a9   :  { %v2712_v32 = vrot.slane %v2682_v31, %v12303_v57 }
 0x7aa   :  { %v2732_v6 = vsel %vm1422_vm9, %v2731_v53, %v2727_v2  ;;  %v2784_v22 = vmul.f32 %v11471_v19, %v2782_v44  ;;  %v2781_v33 = vsub.f32 2.0, %v2779_v61 }
 0x7ab   :  { %v2713_v21 = vsel %vm1422_vm9, %v2712_v32, %v2708_v1 }
 0x7ac   :  { %v2733_v63 = vsel %vm1443_vm10, %v2732_v6, %v2713_v21  ;;  %v2794_v40 = vrot.slane %v2784_v22, %v12300_v49  ;;  %v2783_v26 = vmul.f32 %v11473_v29, %v2781_v33  ;;  %v14531_v22 = vld [vmem:[#allocation15_spill] sm:$0xff]  ;;  %v14532_v33 = vld [vmem:[#allocation16_spill] sm:$0xff]  ;;  %v14533_v21 = vld [vmem:[#allocation17_spill] sm:$0xff] }
 0x7ad   :  { %v2735_v39 = vmul.f32 %v2733_v63, %v12408_v12  ;;  %v14534_v63 = vld [vmem:[#allocation18_spill] sm:$0xff] }
 0x7ae   :  { %v2790_v27 = vrot.slane %v2783_v26, %v12300_v49  ;;  %v14536_v26 = vld [vmem:[#allocation20_spill] sm:$0xff] }
 0x7af   :  { %v2743_v10 = vrot.slane %v2735_v39, %v12320_v30  ;;  %v14537_v39 = vld [vmem:[#allocation21_spill] sm:$0xff] }
 0x7b0   :  { %v2795_v5 = vsel %vm1443_vm10, %v2794_v40, %v2790_v27  ;;  %v14535_v40 = vld [vmem:[#allocation19_spill] sm:$0xff] }
 0x7b1   :  { %v2797_v35 = vmul.f32 %v10908_v9, %v2795_v5  ;;  %v2751_v28 = vrot.slane %v2743_v10, %v12320_v30  ;;  %v2744_v34 = vcombine.high %v2743_v10, %v2743_v10  ;;  %v14542_v9 = vld [vmem:[#allocation26_spill] sm:$0xff]  ;;  %v14543_v27 = vld [vmem:[#allocation27_spill] sm:$0xff]  ;;  %v14544_v10 = vld [vmem:[#allocation28_spill] sm:$0xff] }
 0x7b2   :  { %v14545_v5 = vld [vmem:[#allocation29_spill] sm:$0xff] }
 0x7b3   :  { %11152 = vmatmul.mubr.msk.f32.vlgmr.msra.gmra.mxu1 %vm537_vm4, %v2751_v28  ;;  %v2758_v0 = vrot.slane %v2744_v34, %v12320_v30  ;;  %v2805_v12 = vrot.slane %v2797_v35, %v12320_v30  ;;  %v14546_v35 = vld [vmem:[#allocation30_spill] sm:$0xff]  ;;  %v14547_v28 = vld [vmem:[#allocation31_spill] sm:$0xff]  ;;  %v14548_v34 = vld [vmem:[#allocation32_spill] sm:$0xff] }
 0x7b4   :  { %11166 = vmatpush3.msk.msra.mxu1 %vm1686_vm11, %v12643_v38  ;;  %11167 = vmatprep.mubr.msk.f32.mxu1 %vm11990_vm6, %v14530_v24 }
 0x7b5   :  { %11163 = vmatmul.mubr.msk.f32.vlgmr.msra.gmra.mxu0 %vm537_vm4, %v2758_v0  ;;  %11170 = vmatprep.subr.mxu1 %v14530_v24  ;;  %v2813_v19 = vrot.slane %v2805_v12, %v12320_v30  ;;  %v2806_v8 = vcombine.high %v2805_v12, %v2805_v12  ;;  %v3158_v0 = vld [vmem:[#allocation3] sm:$0x30] }
 0x7b6   :  { %3226 = vmatpush1.msra.mxu0 %v12352_v20  ;;  %3265 = vmatprep.mubr.f32.mxu0 %v14530_v24  ;;  %v2265_v20 = vpop.f32.mrf.mxu0  ;;  %v3178_v12 = vrot.slane %v3158_v0, 4 }
 0x7b7   :  { %11168 = vmatmul.mubr.msk.f32.vlgmr.msra.gmra.mxu1 %vm1683_vm12, %v2813_v19  ;;  %3227 = vmatprep.subr.mxu0 %v12357_v3  ;;  %v2820_v38 = vrot.slane %v2806_v8, %v12320_v30  ;;  %v3160_v8 = vld [vmem:[#allocation3 + $0x10] sm:$0x30] }
 0x7b8   :  { %11171 = vmatpush3.msk.msra.mxu1 %vm1686_vm11, %v12641_v18  ;;  %11172 = vmatprep.mubr.msk.f32.mxu1 %vm11990_vm6, %v14530_v24 }
 0x7b9   :  { %3296 = vmatprep.subr.mxu1 %v12349_v42  ;;  %3228 = vmatpush1.msra.mxu0 %v12363_v47  ;;  %v1879_v42 = vld [vmem:[#allocation3 + $0x48] sm:$0xc] }
 0x7ba   :  { %3229 = vmatprep.subr.mxu0 %v12369_v50  ;;  %v1899_v3 = vrot.slane %v1879_v42, 2 }
 0x7bb   :  { %11173 = vmatmul.mubr.msk.f32.vlgmr.msra.gmra.mxu1 %vm1683_vm12, %v2820_v38  ;;  %3230 = vmatpush1.msra.mxu0 %v12375_v54 }
 0x7bc   :  { %3297 = vmatpush1.msra.mxu1 %v12360_v62  ;;  %3231 = vmatprep.subr.mxu0 %v12381_v17  ;;  %v2266_v62 = vadd.f32 %v2265_v20, %v1899_v3  ;;  %v3180_v20 = vrot.slane %v3160_v8, 4 }
 0x7bd   :  { %3298 = vmatprep.subr.mxu1 %v12366_v48  ;;  %3232 = vmatpush1.msra.mxu0 %v12387_v58 }
 0x7be   :  { %3299 = vmatpush1.msra.mxu1 %v12372_v52  ;;  %3336 = vmatprep.mubr.f32.mxu1 %v14530_v24  ;;  %v10914_v47 = vmul.f32 -1.442695, %v2266_v62  ;;  %v3159_v62 = vld [vmem:[#allocation3 + $0x8] sm:$0x30] }
 0x7bf   :  { %3300 = vmatprep.subr.mxu1 %v12378_v55  ;;  %3367 = vmatprep.subr.mxu0 %v12397_v23 }
 0x7c0   :  { %3301 = vmatpush1.msra.mxu1 %v12384_v56  ;;  %11474 = vpow2.f32 %v10914_v47 }
 0x7c1   :  { %3302 = vmatprep.subr.mxu1 %v12390_v51 }
 0x7c2   :  { %3303 = vmatpush1.msra.mxu1 %v12394_v59 }
 0x7c3   :  { %3438 = vmatprep.subr.mxu1 %v12400_v60 }
 0x7cd   :  { %v11475_v48 = vpop.eup %11474 }
 0x7ce   :  { %v2824_v50 = vadd.f32 1.0, %v11475_v48  ;;  %v3179_v48 = vrot.slane %v3159_v62, 4  ;;  %v14550_v62 = vld [vmem:[#allocation14_spill] sm:$0xff] }
 0x7d0   :  { %11476 = vrcp.f32 %v2824_v50  ;;  %v3161_v50 = vld [vmem:[#allocation3 + $0x18] sm:$0x30] }
 0x7dd   :  { %v11477_v14 = vpop.eup %11476 }
 0x873   :  { %v2895_v52 = vpop.f32.mrf.mxu1 }
 0x875   :  { %v11153_v54 = vpop.f32.mrf.mxu1  ;;  %v2967_v55 = vpop.f32.mrf.mxu0 }
 0x877   :  { %v11164_v17 = vpop.f32.mrf.mxu0  ;;  %v3042_v56 = vpop.f32.mrf.mxu1 }
 0x878   :  { %v3121_v18 = vadd.f32 %v3042_v56, %v2895_v52  ;;  %v3162_v17 = vld [vmem:[#allocation3 + $0x20] sm:$0x30] }
 0x879   :  { %v11169_v58 = vpop.f32.mrf.mxu1 }
 0x87b   :  { %v3117_v51 = vpop.f32.mrf.mxu1 }
 0x87c   :  { %v3122_v23 = vadd.f32 %v3117_v51, %v2967_v55  ;;  %v3181_v55 = vrot.slane %v3161_v50, 4  ;;  %v3182_v51 = vrot.slane %v3162_v17, 4 }
 0x87d   :  { %v11174_v59 = vpop.f32.mrf.mxu1 }
 0x87e   :  { %v3125_v60 = vrot.slane %v3122_v23, 7  ;;  %v3164_v59 = vld [vmem:[#allocation3 + $0x30] sm:$0x30] }
 0x880   :  { %v3126_v16 = vsel %vm1443_vm10, %v3125_v60, %v3121_v18  ;;  %v3184_v60 = vrot.slane %v3164_v59, 4 }
 0x881   :  { %v3128_v25 = vmul.f32 %v11477_v14, %v3126_v16  ;;  %v3163_v16 = vld [vmem:[#allocation3 + $0x28] sm:$0x30] }
 0x883   :  { %v3130_v11 = vrot.slane %v3128_v25, 1  ;;  %3136 = vst.msk [vmem:[#allocation7 + $0x2] sm:$0x3] %vm42_vm0, %v3128_v25  ;;  %v3133_v29 = vsub.f32 %v3121_v18, %v3128_v25 }
 0x885   :  { %v3134_v13 = vsub.f32 %v3122_v23, %v3130_v11  ;;  %v3183_v11 = vrot.slane %v3163_v16, 4 }
 0x887   :  { %v3139_v37 = vrot.slane %v3134_v13, 7  ;;  %v3165_v13 = vld [vmem:[#allocation3 + $0x38] sm:$0x30] }
 0x889   :  { %v3140_v31 = vsel %vm1443_vm10, %v3139_v37, %v3133_v29 }
 0x88a   :  { %3143 = vst.msk [vmem:[#allocation8 + $0x2] sm:$0x3] %vm42_vm0, %v3140_v31  ;;  %3144 = vst.msk [vmem:[#allocation2] sm:$0x3] %vm42_vm0, %v3140_v31  ;;  %v3185_v31 = vrot.slane %v3165_v13, 4 }
 0x891   :  { %v12721_v15 = vld [vmem:[#allocation2] sm:$0x3] }
 0x892   :  { %v3148_v53 = vsel %vm42_vm0, %v12721_v15, 0.0 }
 0x893   :  { %3149 = vadd.xlane.f32.xlu0 %v3148_v53  ;;  %v3166_v53 = vld [vmem:[#allocation3 + $0x40] sm:$0x30] }
 0x91c   :  { %v3150_v44 = vpop.xlane.xlu0 %3149 }
 0x91d   :  { %vm3151_vm14 = vcmp.eq.f32.partialorder %v3150_v44, 0.0 }
 0x91e   :  { %v3152_v61 = vsel %vm3151_vm14, 1.0, %v3150_v44 }
 0x91f   :  { %11478 = vrcp.f32 %v3152_v61 }
 0x92c   :  { %v11479_v7 = vpop.eup %11478 }
 0x92d   :  { %v3154_v2 = vmul.f32 %v11479_v7, %v3152_v61 }
 0x92f   :  { %v3155_v32 = vsub.f32 2.0, %v3154_v2 }
 0x931   :  { %v3156_v1 = vmul.f32 %v11479_v7, %v3155_v32  ;;  %v3186_v7 = vrot.slane %v3166_v53, 4 }
 0x933   :  { %v3157_v6 = vmul.f32 %v3156_v1, %v12721_v15 }
 0x935   :  { %10922 = vmatmul.mubr.msk.f32.vlgmr.msra.gmra.mxu0 %vm537_vm4, %v3157_v6  ;;  %10923 = vmatmul.mubr.msk.f32.vlgmr.msra.gmra.mxu1 %vm537_vm4, %v3157_v6 }
 0x936   :  { %3368 = vmatpush1.msra.mxu0 %v12415_v41  ;;  %3439 = vmatpush1.msra.mxu1 %v12418_v43  ;;  %v14538_v41 = vld [vmem:[#allocation22_spill] sm:$0xff]  ;;  %v14539_v43 = vld [vmem:[#allocation23_spill] sm:$0xff] }
 0x937   :  { %3369 = vmatprep.subr.mxu0 %v12421_v36  ;;  %3440 = vmatprep.subr.mxu1 %v12424_v4  ;;  %v14540_v36 = vld [vmem:[#allocation24_spill] sm:$0xff]  ;;  %v14541_v4 = vld [vmem:[#allocation25_spill] sm:$0xff] }
 0x938   :  { %3370 = vmatpush1.msra.mxu0 %v14531_v22  ;;  %3441 = vmatpush1.msra.mxu1 %v14532_v33 }
 0x939   :  { %3371 = vmatprep.subr.mxu0 %v14533_v21  ;;  %3442 = vmatprep.subr.mxu1 %v14534_v63 }
 0x93a   :  { %3372 = vmatpush1.msra.mxu0 %v14535_v40  ;;  %3443 = vmatpush1.msra.mxu1 %v14536_v26 }
 0x93b   :  { %3373 = vmatprep.subr.mxu0 %v14537_v39  ;;  %3444 = vmatprep.subr.mxu1 %v14538_v41  ;;  %v14549_v41 = vld [vmem:[#allocation13_spill] sm:$0xff] }
 0x93c   :  { %3374 = vmatpush1.msra.mxu0 %v14539_v43  ;;  %3407 = vmatprep.mubr.f32.mxu0 %v14530_v24 }
 0x93d   :  { %3445 = vmatpush1.msra.mxu1 %v14540_v36  ;;  %3478 = vmatprep.mubr.f32.mxu1 %v14530_v24 }
 0x93e   :  { %10924 = vmatmul.mubr.msk.f32.vlgmr.msra.gmra.mxu0 %vm537_vm4, %v3157_v6  ;;  %10925 = vmatmul.mubr.msk.f32.vlgmr.msra.gmra.mxu1 %vm537_vm4, %v3157_v6 }
 0x93f   :  { %3509 = vmatprep.subr.mxu0 %v14541_v4  ;;  %3549 = vmatprep.mubr.f32.mxu0 %v14530_v24 }
 0x940   :  { %3510 = vmatpush1.msra.mxu0 %v14542_v9  ;;  %11175 = vmatprep.subr.mxu1 %v14530_v24 }
 0x941   :  { %3511 = vmatprep.subr.mxu0 %v14543_v27  ;;  %11183 = vmatprep.mubr.msk.f32.mxu1 %vm11990_vm6, %v14530_v24 }
 0x942   :  { %3512 = vmatpush1.msra.mxu0 %v14544_v10 }
 0x943   :  { %3513 = vmatprep.subr.mxu0 %v14545_v5 }
 0x944   :  { %3514 = vmatpush1.msra.mxu0 %v14546_v35 }
 0x945   :  { %3515 = vmatprep.subr.mxu0 %v14547_v28 }
 0x946   :  { %3516 = vmatpush1.msra.mxu0 %v14548_v34 }
 0x947   :  { %10926 = vmatmul.mubr.msk.f32.vlgmr.msra.gmra.mxu0 %vm537_vm4, %v3157_v6  ;;  %11186 = vmatprep.subr.mxu0 %v14530_v24 }
 0x948   :  { %11194 = vmatprep.mubr.msk.f32.mxu0 %vm11990_vm6, %v14530_v24 }
 0x9f5   :  { %v3267_v19 = vpop.f32.mrf.mxu0  ;;  %v3338_v42 = vpop.f32.mrf.mxu1 }
 0x9f6   :  { %v12762_v38 = vadd.f32 %v3267_v19, %v3178_v12  ;;  %v12768_v3 = vadd.f32 %v3338_v42, %v3180_v20 }
 0x9f7   :  { %v3269_v47 = vpop.f32.mrf.mxu0  ;;  %v3340_v54 = vpop.f32.mrf.mxu1 }
 0x9f8   :  { %3560 = vrot.lane.b32.xlu0 %v12762_v38, %s11985_s4  ;;  %3557 = vrot.lane.b32.xlu1 %v12762_v38, %s11986_s19  ;;  %v12778_v52 = vadd.f32 %v3269_v47, %v3179_v48  ;;  %v12784_v56 = vadd.f32 %v3340_v54, %v3181_v55 }
 0x9fc   :  { %3563 = vrot.lane.b32.xlu1 %v12762_v38, %s11987_s20  ;;  %3577 = vrot.lane.b32.xlu0 %v12768_v3, %s11986_s19 }
 0x9fe   :  { %v3409_v58 = vpop.f32.mrf.mxu0  ;;  %v3480_v18 = vpop.f32.mrf.mxu1 }
 0x9ff   :  { %v12790_v23 = vadd.f32 %v3409_v58, %v3182_v51  ;;  %v12800_v14 = vadd.f32 %v3480_v18, %v3184_v60 }
 0xa00   :  { %3580 = vrot.lane.b32.xlu1 %v12768_v3, %s11985_s4  ;;  %3583 = vrot.lane.b32.xlu0 %v12768_v3, %s11987_s20  ;;  %v3411_v25 = vpop.f32.mrf.mxu0  ;;  %v3482_v37 = vpop.f32.mrf.mxu1 }
 0xa01   :  { %v12810_v29 = vadd.f32 %v3411_v25, %v3183_v11  ;;  %v12816_v44 = vadd.f32 %v3482_v37, %v3185_v31 }
 0xa04   :  { %3567 = vrot.lane.b32.xlu1 %v12778_v52, %s11986_s19  ;;  %3570 = vrot.lane.b32.xlu0 %v12778_v52, %s11985_s4 }
 0xa07   :  { %v3551_v61 = vpop.f32.mrf.mxu0 }
 0xa08   :  { %3573 = vrot.lane.b32.xlu1 %v12778_v52, %s11987_s20  ;;  %3590 = vrot.lane.b32.xlu0 %v12784_v56, %s11985_s4  ;;  %v12822_v2 = vadd.f32 %v3551_v61, %v3186_v7 }
 0xa0c   :  { %3587 = vrot.lane.b32.xlu1 %v12784_v56, %s11986_s19  ;;  %3597 = vrot.lane.b32.xlu0 %v12790_v23, %s11986_s19 }
 0xa10   :  { %3593 = vrot.lane.b32.xlu1 %v12784_v56, %s11987_s20  ;;  %3603 = vrot.lane.b32.xlu0 %v12790_v23, %s11987_s20 }
 0xa14   :  { %3600 = vrot.lane.b32.xlu1 %v12790_v23, %s11985_s4  ;;  %3617 = vrot.lane.b32.xlu0 %v12800_v14, %s11986_s19 }
 0xa18   :  { %3620 = vrot.lane.b32.xlu1 %v12800_v14, %s11985_s4  ;;  %3623 = vrot.lane.b32.xlu0 %v12800_v14, %s11987_s20 }
 0xa1c   :  { %3607 = vrot.lane.b32.xlu1 %v12810_v29, %s11986_s19  ;;  %3610 = vrot.lane.b32.xlu0 %v12810_v29, %s11985_s4 }
 0xa20   :  { %3613 = vrot.lane.b32.xlu1 %v12810_v29, %s11987_s20  ;;  %3630 = vrot.lane.b32.xlu0 %v12816_v44, %s11985_s4 }
 0xa24   :  { %3627 = vrot.lane.b32.xlu1 %v12816_v44, %s11986_s19  ;;  %3837 = vrot.lane.b32.xlu0 %v12822_v2, %s11986_s19 }
 0xa28   :  { %3633 = vrot.lane.b32.xlu1 %v12816_v44, %s11987_s20  ;;  %3843 = vrot.lane.b32.xlu0 %v12822_v2, %s11987_s20 }
 0xa2c   :  { %3840 = vrot.lane.b32.xlu1 %v12822_v2, %s11985_s4 }
 0xa6a   :  { %v3561_v32 = vpop.permute.xlu0 %3560  ;;  %v3558_v1 = vpop.permute.xlu1 %3557 }
 0xa6b   :  { %v3636_v39 = vcombine.low %v12762_v38, %v3561_v32 }
 0xa6d   :  { %v3643_v27 = vrot.slane %v3636_v39, %v14549_v41 }
 0xa6e   :  { %v3564_v6 = vpop.permute.xlu1 %3563  ;;  %v3578_v22 = vpop.permute.xlu0 %3577 }
 0xa6f   :  { %v3644_v63 = vcombine.low %v3558_v1, %v3564_v6 }
 0xa71   :  { %v3651_v43 = vrot.slane %v3644_v63, %v14549_v41 }
 0xa72   :  { %v3581_v33 = vpop.permute.xlu1 %3580  ;;  %v3584_v21 = vpop.permute.xlu0 %3583 }
 0xa73   :  { %v3686_v5 = vcombine.low %v12768_v3, %v3581_v33  ;;  %v3668_v35 = vcombine.low %v3643_v27, %v3651_v43  ;;  %v3694_v28 = vcombine.low %v3578_v22, %v3584_v21 }
 0xa75   :  { %v3693_v38 = vrot.slane %v3686_v5, %v14549_v41  ;;  %v3701_v42 = vrot.slane %v3694_v28, %v14549_v41  ;;  %v3675_v47 = vrot.slane %v3668_v35, %v14550_v62 }
 0xa76   :  { %v3568_v40 = vpop.permute.xlu1 %3567  ;;  %v3571_v26 = vpop.permute.xlu0 %3570 }
 0xa77   :  { %v3652_v36 = vcombine.low %v12778_v52, %v3571_v26  ;;  %v3718_v55 = vcombine.low %v3693_v38, %v3701_v42 }
 0xa79   :  { %v3659_v34 = vrot.slane %v3652_v36, %v14549_v41  ;;  %v3725_v60 = vrot.slane %v3718_v55, %v14550_v62 }
 0xa7a   :  { %v3574_v4 = vpop.permute.xlu1 %3573  ;;  %v3591_v9 = vpop.permute.xlu0 %3590 }
 0xa7b   :  { %v3660_v10 = vcombine.low %v3568_v40, %v3574_v4  ;;  %v3702_v20 = vcombine.low %v12784_v56, %v3591_v9 }
 0xa7d   :  { %v3667_v0 = vrot.slane %v3660_v10, %v14549_v41  ;;  %v3709_v17 = vrot.slane %v3702_v20, %v14549_v41 }
 0xa7e   :  { %v3588_v12 = vpop.permute.xlu1 %3587  ;;  %v3598_v19 = vpop.permute.xlu0 %3597 }
 0xa7f   :  { %v3676_v8 = vcombine.low %v3659_v34, %v3667_v0 }
 0xa81   :  { %v3683_v48 = vrot.slane %v3676_v8, %v14550_v62 }
 0xa82   :  { %v3594_v3 = vpop.permute.xlu1 %3593  ;;  %v3604_v50 = vpop.permute.xlu0 %3603 }
 0xa83   :  { %v3710_v52 = vcombine.low %v3588_v12, %v3594_v3  ;;  %v12846_v54 = vcombine.low %v3675_v47, %v3683_v48  ;;  %v12863_v1 = vcombine.high %v3675_v47, %v3683_v48  ;;  %v3744_v6 = vcombine.low %v3598_v19, %v3604_v50 }
 0xa85   :  { %v3717_v58 = vrot.slane %v3710_v52, %v14549_v41  ;;  %v3871_v51 = vsel %vm537_vm4, %v12846_v54, -inf  ;;  %v3751_v40 = vrot.slane %v3744_v6, %v14549_v41 }
 0xa86   :  { %v3601_v59 = vpop.permute.xlu1 %3600  ;;  %3872 = vmax.xlane.f32.xlu1 %v3871_v51  ;;  %v3618_v56 = vpop.permute.xlu0 %3617 }
 0xa87   :  { %v3726_v18 = vcombine.low %v3709_v17, %v3717_v58  ;;  %v3736_v31 = vcombine.low %v12790_v23, %v3601_v59  ;;  %v3883_v23 = vsel %vm537_vm4, %v12863_v1, -inf }
 0xa89   :  { %v3733_v16 = vrot.slane %v3726_v18, %v14550_v62  ;;  %v3743_v22 = vrot.slane %v3736_v31, %v14549_v41 }
 0xa8a   :  { %v3621_v25 = vpop.permute.xlu1 %3620  ;;  %v3624_v11 = vpop.permute.xlu0 %3623 }
 0xa8b   :  { %v12854_v13 = vcombine.high %v3725_v60, %v3733_v16  ;;  %v12856_v37 = vcombine.low %v3725_v60, %v3733_v16  ;;  %v3786_v39 = vcombine.low %v12800_v14, %v3621_v25  ;;  %v3794_v43 = vcombine.low %v3618_v56, %v3624_v11 }
 0xa8c   :  { %v3768_v36 = vcombine.low %v3743_v22, %v3751_v40 }
 0xa8d   :  { %v3886_v53 = vsel %vm537_vm4, %v12854_v13, -inf  ;;  %v3874_v7 = vsel %vm537_vm4, %v12856_v37, -inf  ;;  %v3793_v5 = vrot.slane %v3786_v39, %v14549_v41  ;;  %v3801_v35 = vrot.slane %v3794_v43, %v14549_v41 }
 0xa8e   :  { %v3608_v61 = vpop.permute.xlu1 %3607  ;;  %3887 = vmax.xlane.f32.xlu1 %v3886_v53  ;;  %v3611_v32 = vpop.permute.xlu0 %3610  ;;  %3875 = vmax.xlane.f32.xlu0 %v3874_v7  ;;  %v3775_v34 = vrot.slane %v3768_v36, %v14550_v62 }
 0xa8f   :  { %v3752_v33 = vcombine.low %v12810_v29, %v3611_v32  ;;  %v3818_v42 = vcombine.low %v3793_v5, %v3801_v35 }
 0xa91   :  { %v3759_v4 = vrot.slane %v3752_v33, %v14549_v41  ;;  %v3825_v51 = vrot.slane %v3818_v42, %v14550_v62 }
 0xa92   :  { %v3614_v21 = vpop.permute.xlu1 %3613  ;;  %v3631_v63 = vpop.permute.xlu0 %3630  ;;  %3884 = vmax.xlane.f32.xlu0 %v3883_v23 }
 0xa93   :  { %v3760_v26 = vcombine.low %v3608_v61, %v3614_v21  ;;  %v3802_v28 = vcombine.low %v12816_v44, %v3631_v63 }
 0xa95   :  { %v3767_v9 = vrot.slane %v3760_v26, %v14549_v41  ;;  %v3809_v20 = vrot.slane %v3802_v28, %v14549_v41 }
 0xa96   :  { %v3628_v27 = vpop.permute.xlu1 %3627  ;;  %v3838_v10 = vpop.permute.xlu0 %3837 }
 0xa97   :  { %v3776_v29 = vcombine.low %v3759_v4, %v3767_v9 }
 0xa99   :  { %v3783_v0 = vrot.slane %v3776_v29, %v14550_v62 }
 0xa9a   :  { %v3634_v14 = vpop.permute.xlu1 %3633  ;;  %v3844_v12 = vpop.permute.xlu0 %3843 }
 0xa9b   :  { %v3810_v19 = vcombine.low %v3628_v27, %v3634_v14  ;;  %v3785_v8 = vcombine.high %v3775_v34, %v3783_v0  ;;  %v3784_v38 = vcombine.low %v3775_v34, %v3783_v0  ;;  %v3854_v48 = vcombine.low %v3838_v10, %v3844_v12 }
 0xa9d   :  { %v3817_v47 = vrot.slane %v3810_v19, %v14549_v41  ;;  %v3889_v3 = vsel %vm537_vm4, %v3785_v8, -inf  ;;  %v3877_v50 = vsel %vm537_vm4, %v3784_v38, -inf  ;;  %v3861_v17 = vrot.slane %v3854_v48, %v14549_v41 }
 0xa9e   :  { %v3841_v44 = vpop.permute.xlu1 %3840  ;;  %3890 = vmax.xlane.f32.xlu1 %v3889_v3  ;;  %3878 = vmax.xlane.f32.xlu0 %v3877_v50 }
 0xa9f   :  { %v3826_v52 = vcombine.low %v3809_v20, %v3817_v47  ;;  %v3846_v55 = vcombine.low %v12822_v2, %v3841_v44 }
 0xaa1   :  { %v3853_v58 = vrot.slane %v3846_v55, %v14549_v41  ;;  %v3833_v59 = vrot.slane %v3826_v52, %v14550_v62 }
 0xaa3   :  { %v3862_v56 = vcombine.low %v3853_v58, %v3861_v17  ;;  %v3835_v18 = vcombine.high %v3825_v51, %v3833_v59  ;;  %v3834_v60 = vcombine.low %v3825_v51, %v3833_v59 }
 0xaa5   :  { %v3892_v16 = vsel %vm537_vm4, %v3835_v18, -inf  ;;  %v3880_v25 = vsel %vm537_vm4, %v3834_v60, -inf  ;;  %v3869_v11 = vrot.slane %v3862_v56, %v14550_v62 }
 0xaa6   :  { %3893 = vmax.xlane.f32.xlu1 %v3892_v16  ;;  %3881 = vmax.xlane.f32.xlu0 %v3880_v25  ;;  %v12924_v25 = vld [vmem:[#allocation4 + $0xf8] sm:$0xff] }
 0xaa7   :  { %v3870_v2 = vcombine.high %v3869_v11, %v14530_v24  ;;  %v4047_v31 = vsel %vm1470_vm5, %v3869_v11, -inf }
 0xaa9   :  { %v4050_v53 = vsel %vm1470_vm5, %v3870_v2, -inf }
 0xaaa   :  { %4048 = vmax.xlane.f32.xlu0 %v4047_v31  ;;  %4051 = vmax.xlane.f32.xlu1 %v4050_v53 }
 0xb0f   :  { %v3873_v61 = vpop.xlane.xlu1 %3872 }
 0xb10   :  { %v3895_v7 = vsub.f32 %v12846_v54, %v3873_v61 }
 0xb12   :  { %v3903_v32 = vmul.f32 1.442695, %v3895_v7 }
 0xb14   :  { %11480 = vpow2.f32 %v3903_v32 }
 0xb17   :  { %v3888_v6 = vpop.xlane.xlu1 %3887  ;;  %v3876_v33 = vpop.xlane.xlu0 %3875 }
 0xb18   :  { %v3900_v22 = vsub.f32 %v12854_v13, %v3888_v6  ;;  %v3896_v21 = vsub.f32 %v12856_v37, %v3876_v33 }
 0xb1a   :  { %v3913_v23 = vmul.f32 1.442695, %v3900_v22  ;;  %v3905_v63 = vmul.f32 1.442695, %v3896_v21 }
 0xb1b   :  { %v3885_v40 = vpop.xlane.xlu0 %3884 }
 0xb1c   :  { %11482 = vpow2.f32 %v3905_v63  ;;  %v3899_v26 = vsub.f32 %v12863_v1, %v3885_v40 }
 0xb1d   :  { %11484 = vpow2.f32 %v3913_v23 }
 0xb1e   :  { %v3911_v39 = vmul.f32 1.442695, %v3899_v26 }
 0xb20   :  { %11486 = vpow2.f32 %v3911_v39 }
 0xb21   :  { %v12897_v43 = vpop.eup %11480 }
 0xb22   :  { %v3919_v54 = vsel %vm537_vm4, %v12897_v43, 0.0 }
 0xb23   :  { %3920 = vadd.xlane.f32.xlu0 %v3919_v54 }
 0xb27   :  { %v3891_v36 = vpop.xlane.xlu1 %3890  ;;  %v3879_v13 = vpop.xlane.xlu0 %3878 }
 0xb28   :  { %v3901_v4 = vsub.f32 %v3785_v8, %v3891_v36  ;;  %v3897_v9 = vsub.f32 %v3784_v38, %v3879_v13 }
 0xb29   :  { %v11483_v37 = vpop.eup %11482 }
 0xb2a   :  { %v3915_v27 = vmul.f32 1.442695, %v3901_v4  ;;  %v3907_v10 = vmul.f32 1.442695, %v3897_v9  ;;  %v3922_v29 = vsel %vm537_vm4, %v11483_v37, 0.0  ;;  %v11485_v5 = vpop.eup %11484 }
 0xb2b   :  { %3923 = vadd.xlane.f32.xlu1 %v3922_v29  ;;  %v3934_v28 = vsel %vm537_vm4, %v11485_v5, 0.0 }
 0xb2c   :  { %11488 = vpow2.f32 %v3915_v27 }
 0xb2d   :  { %11490 = vpow2.f32 %v3907_v10  ;;  %v11487_v1 = vpop.eup %11486 }
 0xb2e   :  { %v3931_v34 = vsel %vm537_vm4, %v11487_v1, 0.0 }
 0xb2f   :  { %v3894_v35 = vpop.xlane.xlu1 %3893  ;;  %v3882_v0 = vpop.xlane.xlu0 %3881  ;;  %3935 = vadd.xlane.f32.xlu1 %v3934_v28  ;;  %3932 = vadd.xlane.f32.xlu0 %v3931_v34 }
 0xb30   :  { %v3902_v14 = vsub.f32 %v3835_v18, %v3894_v35  ;;  %v3898_v12 = vsub.f32 %v3834_v60, %v3882_v0 }
 0xb32   :  { %v3917_v19 = vmul.f32 1.442695, %v3902_v14  ;;  %v3909_v8 = vmul.f32 1.442695, %v3898_v12 }
 0xb33   :  { %v4052_v38 = vpop.xlane.xlu1 %4051  ;;  %v4049_v42 = vpop.xlane.xlu0 %4048 }
 0xb34   :  { %11492 = vpow2.f32 %v3917_v19  ;;  %v4054_v20 = vsub.f32 %v3870_v2, %v4052_v38  ;;  %v4053_v47 = vsub.f32 %v3869_v11, %v4049_v42 }
 0xb35   :  { %11494 = vpow2.f32 %v3909_v8 }
 0xb36   :  { %v4057_v48 = vmul.f32 1.442695, %v4054_v20  ;;  %v4055_v3 = vmul.f32 1.442695, %v4053_v47 }
 0xb38   :  { %11496 = vpow2.f32 %v4057_v48 }
 0xb39   :  { %v11489_v50 = vpop.eup %11488  ;;  %11498 = vpow2.f32 %v4055_v3 }
 0xb3a   :  { %v11491_v44 = vpop.eup %11490  ;;  %v3937_v52 = vsel %vm537_vm4, %v11489_v50, 0.0 }
 0xb3b   :  { %3938 = vadd.xlane.f32.xlu1 %v3937_v52  ;;  %v3925_v55 = vsel %vm537_vm4, %v11491_v44, 0.0 }
 0xb3c   :  { %3926 = vadd.xlane.f32.xlu0 %v3925_v55 }
 0xb41   :  { %v11493_v17 = vpop.eup %11492 }
 0xb42   :  { %v11495_v58 = vpop.eup %11494  ;;  %11187 = vmatpush3.msra.mxu0 %v11493_v17  ;;  %v3940_v51 = vsel %vm537_vm4, %v11493_v17, 0.0 }
 0xb43   :  { %11176 = vmatpush3.msra.mxu1 %v11495_v58  ;;  %11188 = vmatprep.subr.mxu0 %v14530_v24  ;;  %v3928_v59 = vsel %vm537_vm4, %v11495_v58, 0.0 }
 0xb44   :  { %3941 = vadd.xlane.f32.xlu1 %v3940_v51  ;;  %11177 = vmatprep.subr.mxu1 %v14530_v24 }
 0xb45   :  { %v12910_v56 = vpop.eup %11496  ;;  %3929 = vadd.xlane.f32.xlu0 %v3928_v59  ;;  %11178 = vmatpush3.msra.mxu1 %v11491_v44 }
 0xb46   :  { %v12912_v18 = vpop.eup %11498  ;;  %11189 = vmatpush3.msra.mxu0 %v11489_v50  ;;  %11179 = vmatprep.subr.mxu1 %v14530_v24  ;;  %v4062_v60 = vsel %vm1470_vm5, %v12910_v56, 0.0 }
 0xb47   :  { %11190 = vmatprep.subr.mxu0 %v14530_v24  ;;  %11180 = vmatpush3.msra.mxu1 %v11483_v37  ;;  %v4059_v16 = vsel %vm1470_vm5, %v12912_v18, 0.0 }
 0xb48   :  { %11191 = vmatpush3.msra.mxu0 %v11485_v5  ;;  %4063 = vadd.xlane.f32.xlu1 %v4062_v60 }
 0xb49   :  { %11192 = vmatprep.subr.mxu0 %v14530_v24  ;;  %11181 = vmatprep.subr.mxu1 %v14530_v24 }
 0xb4a   :  { %4060 = vadd.xlane.f32.xlu0 %v4059_v16  ;;  %11182 = vmatpush3.msra.mxu1 %v12897_v43 }
 0xb4b   :  { %11193 = vmatpush3.msra.mxu0 %v11487_v1  ;;  %11197 = vmatprep.subr.mxu1 %v14530_v24 }
 0xb4c   :  { %4513 = vmatprep.subr.mxu0 %v12924_v25 }
 0xbac   :  { %v3921_v2 = vpop.xlane.xlu0 %3920 }
 0xbb4   :  { %v3924_v11 = vpop.xlane.xlu1 %3923 }
 0xbb8   :  { %v3936_v31 = vpop.xlane.xlu1 %3935  ;;  %v3933_v53 = vpop.xlane.xlu0 %3932 }
 0xbb9   :  { %11500 = vrcp.f32 %v3936_v31 }
 0xbba   :  { %11502 = vrcp.f32 %v3933_v53 }
 0xbbb   :  { %11504 = vrcp.f32 %v3924_v11 }
 0xbbc   :  { %11506 = vrcp.f32 %v3921_v2 }
 0xbc4   :  { %v3939_v61 = vpop.xlane.xlu1 %3938 }
 0xbc5   :  { %11508 = vrcp.f32 %v3939_v61  ;;  %v3927_v7 = vpop.xlane.xlu0 %3926 }
 0xbc6   :  { %11510 = vrcp.f32 %v3927_v7  ;;  %v11501_v6 = vpop.eup %11500 }
 0xbc7   :  { %v11503_v33 = vpop.eup %11502  ;;  %v3956_v26 = vmul.f32 %v11501_v6, %v3936_v31 }
 0xbc8   :  { %v11505_v21 = vpop.eup %11504  ;;  %v3955_v39 = vmul.f32 %v11503_v33, %v3933_v53 }
 0xbc9   :  { %v11507_v23 = vpop.eup %11506  ;;  %v3952_v54 = vmul.f32 %v11505_v21, %v3924_v11  ;;  %v3964_v37 = vsub.f32 2.0, %v3956_v26 }
 0xbca   :  { %v3951_v9 = vmul.f32 %v11507_v23, %v3921_v2  ;;  %v3963_v27 = vsub.f32 2.0, %v3955_v39  ;;  %v10921_v39 = vld [vmem:[%s14439_s0 + $0x4] sm:$0x3] }
 0xbcb   :  { %v3960_v10 = vsub.f32 2.0, %v3952_v54  ;;  %v3972_v35 = vmul.f32 %v11501_v6, %v3964_v37 }
 0xbcc   :  { %v3959_v1 = vsub.f32 2.0, %v3951_v9  ;;  %v3971_v28 = vmul.f32 %v11503_v33, %v3963_v27 }
 0xbcd   :  { %v3942_v32 = vpop.xlane.xlu1 %3941  ;;  %v3968_v0 = vmul.f32 %v11505_v21, %v3960_v10  ;;  %v4009_v20 = vrot.slane %v3972_v35, %v12294_v45  ;;  %v12977_v35 = vld [vmem:[#allocation4 + $0xa0] sm:$0xff] }
 0xbce   :  { %11512 = vrcp.f32 %v3942_v32  ;;  %v3930_v22 = vpop.xlane.xlu0 %3929  ;;  %v3967_v38 = vmul.f32 %v11507_v23, %v3959_v1  ;;  %v4005_v47 = vrot.slane %v3971_v28, %v12300_v49  ;;  %v12974_v1 = vld [vmem:[#allocation4 + $0x108] sm:$0xff]  ;;  %v12980_v28 = vld [vmem:[#allocation4 + $0x58] sm:$0xff] }
 0xbcf   :  { %11514 = vrcp.f32 %v3930_v22  ;;  %v3990_v50 = vrot.slane %v3968_v0, %v12294_v45  ;;  %v12990_v0 = vld [vmem:[#allocation4 + $0x8] sm:$0xff] }
 0xbd0   :  { %v3986_v59 = vrot.slane %v3967_v38, %v12300_v49  ;;  %v4010_v16 = vsel %vm1408_vm7, %v4009_v20, %v4005_v47  ;;  %v13006_v38 = vld [vmem:[#allocation4 + $0x118] sm:$0xff]  ;;  %v13015_v47 = vld [vmem:[#allocation4 + $0x10] sm:$0xff] }
 0xbd1   :  { %v4064_v63 = vpop.xlane.xlu1 %4063  ;;  %v13012_v20 = vld [vmem:[#allocation4 + $0x18] sm:$0xff] }
 0xbd2   :  { %v11509_v40 = vpop.eup %11508  ;;  %11516 = vrcp.f32 %v4064_v63  ;;  %v3991_v53 = vsel %vm1408_vm7, %v3990_v50, %v3986_v59  ;;  %v3553_v50 = vpop.f32.mrf.mxu0 }
 0xbd3   :  { %v11511_v43 = vpop.eup %11510  ;;  %v3957_v36 = vmul.f32 %v11509_v40, %v3939_v61  ;;  %v4061_v13 = vpop.xlane.xlu0 %4060 }
 0xbd4   :  { %v3953_v4 = vmul.f32 %v11511_v43, %v3927_v7  ;;  %11518 = vrcp.f32 %v4061_v13 }
 0xbd5   :  { %v3965_v29 = vsub.f32 2.0, %v3957_v36 }
 0xbd6   :  { %v3961_v5 = vsub.f32 2.0, %v3953_v4 }
 0xbd7   :  { %v3973_v14 = vmul.f32 %v11509_v40, %v3965_v29  ;;  %v12961_v29 = vld [vmem:[#allocation4 + $0xf0] sm:$0xff] }
 0xbd8   :  { %v3969_v19 = vmul.f32 %v11511_v43, %v3961_v5  ;;  %v12966_v5 = vld [vmem:[#allocation4 + $0xa8] sm:$0xff] }
 0xbd9   :  { %v4014_v44 = vrot.slane %v3973_v14, %v12297_v46  ;;  %v12993_v14 = vld [vmem:[#allocation4 + $0xb8] sm:$0xff] }
 0xbda   :  { %v3995_v55 = vrot.slane %v3969_v19, %v12297_v46  ;;  %v12999_v19 = vld [vmem:[#allocation4 + $0xb0] sm:$0xff] }
 0xbdb   :  { %v11513_v34 = vpop.eup %11512  ;;  %v4015_v61 = vsel %vm1415_vm8, %v4014_v44, %v4010_v16 }
 0xbdc   :  { %v11515_v12 = vpop.eup %11514  ;;  %v3958_v8 = vmul.f32 %v11513_v34, %v3942_v32  ;;  %v3996_v32 = vsel %vm1415_vm8, %v3995_v55, %v3991_v53 }
 0xbdd   :  { %v3954_v42 = vmul.f32 %v11515_v12, %v3930_v22 }
 0xbde   :  { %v3966_v48 = vsub.f32 2.0, %v3958_v8  ;;  %v13003_v8 = vld [vmem:[#allocation4 + $0x68] sm:$0xff] }
 0xbdf   :  { %v11517_v3 = vpop.eup %11516  ;;  %v3962_v52 = vsub.f32 2.0, %v3954_v42  ;;  %v13009_v42 = vld [vmem:[#allocation4 + $0x60] sm:$0xff] }
 0xbe0   :  { %v3974_v17 = vmul.f32 %v11513_v34, %v3966_v48  ;;  %v4068_v58 = vmul.f32 %v11517_v3, %v4064_v63  ;;  %v12987_v34 = vld [vmem:[#allocation4 + $0x100] sm:$0xff]  ;;  %v13018_v48 = vld [vmem:[#allocation4 + $0x128] sm:$0xff] }
 0xbe1   :  { %v11519_v51 = vpop.eup %11518  ;;  %v3970_v60 = vmul.f32 %v11515_v12, %v3962_v52  ;;  %v12996_v12 = vld [vmem:[#allocation4] sm:$0xff] }
 0xbe2   :  { %v4019_v11 = vrot.slane %v3974_v17, %v12303_v57  ;;  %v4070_v2 = vsub.f32 2.0, %v4068_v58  ;;  %v4067_v31 = vmul.f32 %v11519_v51, %v4061_v13 }
 0xbe3   :  { %v4000_v7 = vrot.slane %v3970_v60, %v12303_v57 }
 0xbe4   :  { %v4020_v6 = vsel %vm1422_vm9, %v4019_v11, %v4015_v61  ;;  %v4072_v22 = vmul.f32 %v11517_v3, %v4070_v2  ;;  %v4069_v33 = vsub.f32 2.0, %v4067_v31  ;;  %v3167_v3 = vld [vmem:[#allocation3 + $0x48] sm:$0x30] }
 0xbe5   :  { %v4001_v21 = vsel %vm1422_vm9, %v4000_v7, %v3996_v32  ;;  %v3187_v44 = vrot.slane %v3167_v3, 4  ;;  %v13042_v3 = vld [vmem:[#allocation4 + $0xd8] sm:$0xff] }
 0xbe6   :  { %v4021_v23 = vsel %vm1443_vm10, %v4020_v6, %v4001_v21  ;;  %v4082_v63 = vrot.slane %v4072_v22, %v12300_v49  ;;  %v4071_v40 = vmul.f32 %v11519_v51, %v4069_v33 }
 0xbe7   :  { %v4023_v26 = vmul.f32 %v4021_v23, %v12721_v15  ;;  %v3554_v52 = vadd.f32 %v3553_v50, %v3187_v44  ;;  %v13045_v50 = vld [vmem:[#allocation4 + $0xc0] sm:$0xff]  ;;  %v13048_v44 = vld [vmem:[#allocation4 + $0xd0] sm:$0xff] }
 0xbe8   :  { %v4078_v43 = vrot.slane %v4071_v40, %v12300_v49  ;;  %14551 = vst [vmem:[#allocation15_spill] sm:$0xff] %v13045_v50  ;;  %14552 = vst [vmem:[#allocation16_spill] sm:$0xff] %v13048_v44 }
 0xbe9   :  { %v4031_v54 = vrot.slane %v4023_v26, %v12320_v30  ;;  %v10927_v55 = vmul.f32 -1.442695, %v3554_v52  ;;  %v13051_v52 = vld [vmem:[#allocation4 + $0x78] sm:$0xff] }
 0xbea   :  { %v4083_v36 = vsel %vm1443_vm10, %v4082_v63, %v4078_v43  ;;  %14553 = vst [vmem:[#allocation17_spill] sm:$0xff] %v13051_v52 }
 0xbeb   :  { %v4085_v13 = vmul.f32 %v10921_v39, %v4083_v36  ;;  %v4039_v4 = vrot.slane %v4031_v54, %v12320_v30  ;;  %v4032_v9 = vcombine.high %v4031_v54, %v4031_v54  ;;  %11520 = vpow2.f32 %v10927_v55  ;;  %v13054_v55 = vld [vmem:[#allocation4 + $0x88] sm:$0xff] }
 0xbec   :  { %14554 = vst [vmem:[#allocation18_spill] sm:$0xff] %v13054_v55 }
 0xbed   :  { %11184 = vmatmul.mubr.msk.f32.vlgmr.msra.gmra.mxu1 %vm537_vm4, %v4039_v4  ;;  %v4046_v37 = vrot.slane %v4032_v9, %v12320_v30  ;;  %v4093_v15 = vrot.slane %v4085_v13, %v12320_v30 }
 0xbee   :  { %11198 = vmatpush3.msk.msra.mxu1 %vm1686_vm11, %v12912_v18  ;;  %11199 = vmatprep.mubr.msk.f32.mxu1 %vm11990_vm6, %v14530_v24 }
 0xbef   :  { %11195 = vmatmul.mubr.msk.f32.vlgmr.msra.gmra.mxu0 %vm537_vm4, %v4046_v37  ;;  %11202 = vmatprep.subr.mxu1 %v14530_v24  ;;  %v4101_v27 = vrot.slane %v4093_v15, %v12320_v30  ;;  %v4094_v10 = vcombine.high %v4093_v15, %v4093_v15 }
 0xbf0   :  { %4514 = vmatpush1.msra.mxu0 %v12961_v29  ;;  %4553 = vmatprep.mubr.f32.mxu0 %v14530_v24 }
 0xbf1   :  { %11200 = vmatmul.mubr.msk.f32.vlgmr.msra.gmra.mxu1 %vm1683_vm12, %v4101_v27  ;;  %4515 = vmatprep.subr.mxu0 %v12966_v5  ;;  %v4108_v18 = vrot.slane %v4094_v10, %v12320_v30  ;;  %v13033_v27 = vld [vmem:[#allocation4 + $0x110] sm:$0xff]  ;;  %v13036_v10 = vld [vmem:[#allocation4 + $0x120] sm:$0xff] }
 0xbf2   :  { %11203 = vmatpush3.msk.msra.mxu1 %vm1686_vm11, %v12910_v56  ;;  %11204 = vmatprep.mubr.msk.f32.mxu1 %vm11990_vm6, %v14530_v24  ;;  %v12984_v56 = vld [vmem:[#allocation4 + $0x50] sm:$0xff] }
 0xbf3   :  { %4584 = vmatprep.subr.mxu1 %v12974_v1  ;;  %4516 = vmatpush1.msra.mxu0 %v12977_v35 }
 0xbf4   :  { %4517 = vmatprep.subr.mxu0 %v12980_v28 }
 0xbf5   :  { %11205 = vmatmul.mubr.msk.f32.vlgmr.msra.gmra.mxu1 %vm1683_vm12, %v4108_v18  ;;  %4518 = vmatpush1.msra.mxu0 %v12984_v56  ;;  %v13039_v18 = vld [vmem:[#allocation4 + $0xc8] sm:$0xff] }
 0xbf6   :  { %4585 = vmatpush1.msra.mxu1 %v12987_v34  ;;  %4519 = vmatprep.subr.mxu0 %v12990_v0 }
 0xbf7   :  { %4586 = vmatprep.subr.mxu1 %v12993_v14  ;;  %4520 = vmatpush1.msra.mxu0 %v12996_v12 }
 0xbf8   :  { %4587 = vmatpush1.msra.mxu1 %v12999_v19  ;;  %4624 = vmatprep.mubr.f32.mxu1 %v14530_v24  ;;  %v11521_v17 = vpop.eup %11520 }
 0xbf9   :  { %4588 = vmatprep.subr.mxu1 %v13003_v8  ;;  %4655 = vmatprep.subr.mxu0 %v13006_v38  ;;  %v4112_v58 = vadd.f32 1.0, %v11521_v17  ;;  %v13057_v17 = vld [vmem:[#allocation4 + $0x70] sm:$0xff] }
 0xbfa   :  { %4589 = vmatpush1.msra.mxu1 %v13009_v42  ;;  %14555 = vst [vmem:[#allocation19_spill] sm:$0xff] %v13057_v17 }
 0xbfb   :  { %4590 = vmatprep.subr.mxu1 %v13012_v20  ;;  %11522 = vrcp.f32 %v4112_v58  ;;  %v13060_v58 = vld [vmem:[#allocation4 + $0x80] sm:$0xff] }
 0xbfc   :  { %4591 = vmatpush1.msra.mxu1 %v13015_v47  ;;  %14556 = vst [vmem:[#allocation20_spill] sm:$0xff] %v13060_v58 }
 0xbfd   :  { %4726 = vmatprep.subr.mxu1 %v13018_v48 }
 0xc08   :  { %v11523_v6 = vpop.eup %11522 }
 0xcad   :  { %v4183_v51 = vpop.f32.mrf.mxu1 }
 0xcaf   :  { %v11185_v59 = vpop.f32.mrf.mxu1  ;;  %v4255_v60 = vpop.f32.mrf.mxu0 }
 0xcb0   :  { %v13066_v59 = vld [vmem:[#allocation4 + $0x38] sm:$0xff] }
 0xcb1   :  { %v11196_v16 = vpop.f32.mrf.mxu0  ;;  %v4330_v11 = vpop.f32.mrf.mxu1  ;;  %14558 = vst [vmem:[#allocation22_spill] sm:$0xff] %v13066_v59 }
 0xcb2   :  { %v4409_v7 = vadd.f32 %v4330_v11, %v4183_v51  ;;  %v13063_v51 = vld [vmem:[#allocation4 + $0x28] sm:$0xff]  ;;  %v13073_v16 = vld [vmem:[#allocation4 + $0x30] sm:$0xff]  ;;  %v13079_v11 = vld [vmem:[#allocation4 + $0x138] sm:$0xff] }
 0xcb3   :  { %v11201_v2 = vpop.f32.mrf.mxu1  ;;  %14557 = vst [vmem:[#allocation21_spill] sm:$0xff] %v13063_v51  ;;  %14560 = vst [vmem:[#allocation24_spill] sm:$0xff] %v13073_v16 }
 0xcb4   :  { %14561 = vst [vmem:[#allocation25_spill] sm:$0xff] %v13079_v11  ;;  %v13083_v2 = vld [vmem:[#allocation4 + $0x130] sm:$0xff] }
 0xcb5   :  { %v4405_v31 = vpop.f32.mrf.mxu1  ;;  %14562 = vst [vmem:[#allocation26_spill] sm:$0xff] %v13083_v2 }
 0xcb6   :  { %v4410_v53 = vadd.f32 %v4405_v31, %v4255_v60  ;;  %v13069_v60 = vld [vmem:[#allocation4 + $0x20] sm:$0xff]  ;;  %v13087_v31 = vld [vmem:[#allocation4 + $0xe8] sm:$0xff] }
 0xcb7   :  { %v11206_v61 = vpop.f32.mrf.mxu1  ;;  %14559 = vst [vmem:[#allocation23_spill] sm:$0xff] %v13069_v60  ;;  %14563 = vst [vmem:[#allocation27_spill] sm:$0xff] %v13087_v31 }
 0xcb8   :  { %v4413_v32 = vrot.slane %v4410_v53, 7  ;;  %v13095_v61 = vld [vmem:[#allocation4 + $0x98] sm:$0xff] }
 0xcb9   :  { %14565 = vst [vmem:[#allocation29_spill] sm:$0xff] %v13095_v61 }
 0xcba   :  { %v4414_v22 = vsel %vm1443_vm10, %v4413_v32, %v4409_v7  ;;  %v13101_v32 = vld [vmem:[#allocation4 + $0x48] sm:$0xff] }
 0xcbb   :  { %v4416_v33 = vmul.f32 %v11523_v6, %v4414_v22  ;;  %14567 = vst [vmem:[#allocation31_spill] sm:$0xff] %v13101_v32  ;;  %v13104_v6 = vld [vmem:[#allocation4 + $0x40] sm:$0xff] }
 0xcbc   :  { %14568 = vst [vmem:[#allocation32_spill] sm:$0xff] %v13104_v6  ;;  %v4446_v22 = vld [vmem:[#allocation3] sm:$0xc0] }
 0xcbd   :  { %v4418_v21 = vrot.slane %v4416_v33, 1  ;;  %4424 = vst.msk [vmem:[#allocation7 + $0x4] sm:$0x3] %vm42_vm0, %v4416_v33  ;;  %v4421_v63 = vsub.f32 %v4409_v7, %v4416_v33  ;;  %v13098_v7 = vld [vmem:[#allocation4 + $0x90] sm:$0xff]  ;;  %v4466_v33 = vrot.slane %v4446_v22, 6 }
 0xcbe   :  { %14566 = vst [vmem:[#allocation30_spill] sm:$0xff] %v13098_v7  ;;  %v4450_v22 = vld [vmem:[#allocation3 + $0x20] sm:$0xc0] }
 0xcbf   :  { %v4422_v23 = vsub.f32 %v4410_v53, %v4418_v21  ;;  %v13092_v53 = vld [vmem:[#allocation4 + $0xe0] sm:$0xff] }
 0xcc0   :  { %14564 = vst [vmem:[#allocation28_spill] sm:$0xff] %v13092_v53 }
 0xcc1   :  { %v4427_v40 = vrot.slane %v4422_v23, 7  ;;  %v4448_v23 = vld [vmem:[#allocation3 + $0x10] sm:$0xc0] }
 0xcc3   :  { %v4428_v26 = vsel %vm1443_vm10, %v4427_v40, %v4421_v63 }
 0xcc4   :  { %4431 = vst.msk [vmem:[#allocation8 + $0x4] sm:$0x3] %vm42_vm0, %v4428_v26  ;;  %4432 = vst.msk [vmem:[#allocation2] sm:$0x3] %vm42_vm0, %v4428_v26  ;;  %v4468_v26 = vrot.slane %v4448_v23, 6  ;;  %v4470_v23 = vrot.slane %v4450_v22, 6 }
 0xcc5   :  { %v4453_v22 = vld [vmem:[#allocation3 + $0x38] sm:$0xc0] }
 0xccb   :  { %v13026_v39 = vld [vmem:[#allocation2] sm:$0x3] }
 0xccc   :  { %v4436_v43 = vsel %vm42_vm0, %v13026_v39, 0.0 }
 0xccd   :  { %4437 = vadd.xlane.f32.xlu0 %v4436_v43 }
 0xd56   :  { %v4438_v54 = vpop.xlane.xlu0 %4437 }
 0xd57   :  { %vm4439_vm15 = vcmp.eq.f32.partialorder %v4438_v54, 0.0 }
 0xd58   :  { %v4440_v36 = vsel %vm4439_vm15, 1.0, %v4438_v54  ;;  %v4447_v54 = vld [vmem:[#allocation3 + $0x8] sm:$0xc0] }
 0xd59   :  { %11524 = vrcp.f32 %v4440_v36 }
 0xd66   :  { %v11525_v13 = vpop.eup %11524 }
 0xd67   :  { %v4442_v4 = vmul.f32 %v11525_v13, %v4440_v36 }
 0xd69   :  { %v4443_v9 = vsub.f32 2.0, %v4442_v4  ;;  %v4449_v4 = vld [vmem:[#allocation3 + $0x18] sm:$0xc0] }
 0xd6b   :  { %v4444_v37 = vmul.f32 %v11525_v13, %v4443_v9  ;;  %v4467_v13 = vrot.slane %v4447_v54, 6 }
 0xd6d   :  { %v4445_v15 = vmul.f32 %v4444_v37, %v13026_v39 }
 0xd6f   :  { %10935 = vmatmul.mubr.msk.f32.vlgmr.msra.gmra.mxu0 %vm537_vm4, %v4445_v15  ;;  %10936 = vmatmul.mubr.msk.f32.vlgmr.msra.gmra.mxu1 %vm537_vm4, %v4445_v15 }
 0xd70   :  { %4656 = vmatpush1.msra.mxu0 %v13033_v27  ;;  %4727 = vmatpush1.msra.mxu1 %v13036_v10 }
 0xd71   :  { %4657 = vmatprep.subr.mxu0 %v13039_v18  ;;  %4728 = vmatprep.subr.mxu1 %v13042_v3 }
 0xd72   :  { %4658 = vmatpush1.msra.mxu0 %v13045_v50  ;;  %4729 = vmatpush1.msra.mxu1 %v13048_v44 }
 0xd73   :  { %4659 = vmatprep.subr.mxu0 %v13051_v52  ;;  %4730 = vmatprep.subr.mxu1 %v13054_v55 }
 0xd74   :  { %4660 = vmatpush1.msra.mxu0 %v13057_v17  ;;  %4731 = vmatpush1.msra.mxu1 %v13060_v58 }
 0xd75   :  { %4661 = vmatprep.subr.mxu0 %v13063_v51  ;;  %4732 = vmatprep.subr.mxu1 %v13066_v59 }
 0xd76   :  { %4662 = vmatpush1.msra.mxu0 %v13069_v60  ;;  %4695 = vmatprep.mubr.f32.mxu0 %v14530_v24 }
 0xd77   :  { %4733 = vmatpush1.msra.mxu1 %v13073_v16  ;;  %4766 = vmatprep.mubr.f32.mxu1 %v14530_v24 }
 0xd78   :  { %10937 = vmatmul.mubr.msk.f32.vlgmr.msra.gmra.mxu0 %vm537_vm4, %v4445_v15  ;;  %10938 = vmatmul.mubr.msk.f32.vlgmr.msra.gmra.mxu1 %vm537_vm4, %v4445_v15 }
 0xd79   :  { %4797 = vmatprep.subr.mxu0 %v13079_v11  ;;  %4837 = vmatprep.mubr.f32.mxu0 %v14530_v24 }
 0xd7a   :  { %4798 = vmatpush1.msra.mxu0 %v13083_v2  ;;  %11207 = vmatprep.subr.mxu1 %v14530_v24 }
 0xd7b   :  { %4799 = vmatprep.subr.mxu0 %v13087_v31  ;;  %11215 = vmatprep.mubr.msk.f32.mxu1 %vm11990_vm6, %v14530_v24 }
 0xd7c   :  { %4800 = vmatpush1.msra.mxu0 %v13092_v53 }
 0xd7d   :  { %4801 = vmatprep.subr.mxu0 %v13095_v61 }
 0xd7e   :  { %4802 = vmatpush1.msra.mxu0 %v13098_v7 }
 0xd7f   :  { %4803 = vmatprep.subr.mxu0 %v13101_v32 }
 0xd80   :  { %4804 = vmatpush1.msra.mxu0 %v13104_v6 }
 0xd81   :  { %10939 = vmatmul.mubr.msk.f32.vlgmr.msra.gmra.mxu0 %vm537_vm4, %v4445_v15  ;;  %11218 = vmatprep.subr.mxu0 %v14530_v24  ;;  %v4469_v15 = vrot.slane %v4449_v4, 6  ;;  %v4451_v4 = vld [vmem:[#allocation3 + $0x28] sm:$0xc0] }
 0xd82   :  { %11226 = vmatprep.mubr.msk.f32.mxu0 %vm11990_vm6, %v14530_v24 }
 0xe2f   :  { %v4555_v21 = vpop.f32.mrf.mxu0  ;;  %v4626_v40 = vpop.f32.mrf.mxu1 }
 0xe30   :  { %v13111_v63 = vadd.f32 %v4555_v21, %v4466_v33  ;;  %v13117_v43 = vadd.f32 %v4626_v40, %v4468_v26  ;;  %v4452_v26 = vld [vmem:[#allocation3 + $0x30] sm:$0xc0] }
 0xe31   :  { %v4557_v36 = vpop.f32.mrf.mxu0  ;;  %v4628_v37 = vpop.f32.mrf.mxu1 }
 0xe32   :  { %4848 = vrot.lane.b32.xlu0 %v13111_v63, %s11985_s4  ;;  %4845 = vrot.lane.b32.xlu1 %v13111_v63, %s11986_s19  ;;  %v13127_v9 = vadd.f32 %v4557_v36, %v4467_v13  ;;  %v13133_v33 = vadd.f32 %v4628_v37, %v4469_v15  ;;  %v4472_v36 = vrot.slane %v4452_v26, 6  ;;  %v4471_v15 = vrot.slane %v4451_v4, 6 }
 0xe33   :  { %v4473_v26 = vrot.slane %v4453_v22, 6 }
 0xe36   :  { %4851 = vrot.lane.b32.xlu1 %v13111_v63, %s11987_s20  ;;  %4865 = vrot.lane.b32.xlu0 %v13117_v43, %s11986_s19 }
 0xe38   :  { %v4697_v21 = vpop.f32.mrf.mxu0  ;;  %v4768_v54 = vpop.f32.mrf.mxu1 }
 0xe39   :  { %v13139_v40 = vadd.f32 %v4697_v21, %v4470_v23  ;;  %v13149_v13 = vadd.f32 %v4768_v54, %v4472_v36  ;;  %v4454_v54 = vld [vmem:[#allocation3 + $0x40] sm:$0xc0] }
 0xe3a   :  { %4868 = vrot.lane.b32.xlu1 %v13117_v43, %s11985_s4  ;;  %4871 = vrot.lane.b32.xlu0 %v13117_v43, %s11987_s20  ;;  %v4699_v37 = vpop.f32.mrf.mxu0  ;;  %v4770_v23 = vpop.f32.mrf.mxu1  ;;  %v4474_v6 = vrot.slane %v4454_v54, 6 }
 0xe3b   :  { %v13159_v21 = vadd.f32 %v4699_v37, %v4471_v15  ;;  %v13165_v36 = vadd.f32 %v4770_v23, %v4473_v26 }
 0xe3e   :  { %4855 = vrot.lane.b32.xlu1 %v13127_v9, %s11986_s19  ;;  %4858 = vrot.lane.b32.xlu0 %v13127_v9, %s11985_s4 }
 0xe41   :  { %v4839_v4 = vpop.f32.mrf.mxu0 }
 0xe42   :  { %4861 = vrot.lane.b32.xlu1 %v13127_v9, %s11987_s20  ;;  %4878 = vrot.lane.b32.xlu0 %v13133_v33, %s11985_s4  ;;  %v13171_v37 = vadd.f32 %v4839_v4, %v4474_v6 }
 0xe46   :  { %4875 = vrot.lane.b32.xlu1 %v13133_v33, %s11986_s19  ;;  %4885 = vrot.lane.b32.xlu0 %v13139_v40, %s11986_s19 }
 0xe4a   :  { %4881 = vrot.lane.b32.xlu1 %v13133_v33, %s11987_s20  ;;  %4891 = vrot.lane.b32.xlu0 %v13139_v40, %s11987_s20 }
 0xe4e   :  { %4888 = vrot.lane.b32.xlu1 %v13139_v40, %s11985_s4  ;;  %4905 = vrot.lane.b32.xlu0 %v13149_v13, %s11986_s19 }
 0xe52   :  { %4908 = vrot.lane.b32.xlu1 %v13149_v13, %s11985_s4  ;;  %4911 = vrot.lane.b32.xlu0 %v13149_v13, %s11987_s20 }
 0xe56   :  { %4895 = vrot.lane.b32.xlu1 %v13159_v21, %s11986_s19  ;;  %4898 = vrot.lane.b32.xlu0 %v13159_v21, %s11985_s4 }
 0xe5a   :  { %4901 = vrot.lane.b32.xlu1 %v13159_v21, %s11987_s20  ;;  %4918 = vrot.lane.b32.xlu0 %v13165_v36, %s11985_s4 }
 0xe5e   :  { %4915 = vrot.lane.b32.xlu1 %v13165_v36, %s11986_s19  ;;  %5125 = vrot.lane.b32.xlu0 %v13171_v37, %s11986_s19 }
 0xe62   :  { %4921 = vrot.lane.b32.xlu1 %v13165_v36, %s11987_s20  ;;  %5131 = vrot.lane.b32.xlu0 %v13171_v37, %s11987_s20 }
 0xe66   :  { %5128 = vrot.lane.b32.xlu1 %v13171_v37, %s11985_s4 }
 0xea4   :  { %v4849_v15 = vpop.permute.xlu0 %4848  ;;  %v4846_v22 = vpop.permute.xlu1 %4845 }
 0xea5   :  { %v4924_v61 = vcombine.low %v13111_v63, %v4849_v15 }
 0xea7   :  { %v4931_v16 = vrot.slane %v4924_v61, %v14549_v41 }
 0xea8   :  { %v4852_v23 = vpop.permute.xlu1 %4851  ;;  %v4866_v6 = vpop.permute.xlu0 %4865 }
 0xea9   :  { %v4932_v4 = vcombine.low %v4846_v22, %v4852_v23 }
 0xeab   :  { %v4939_v53 = vrot.slane %v4932_v4, %v14549_v41 }
 0xeac   :  { %v4869_v26 = vpop.permute.xlu1 %4868  ;;  %v4872_v54 = vpop.permute.xlu0 %4871 }
 0xead   :  { %v4974_v59 = vcombine.low %v13117_v43, %v4869_v26  ;;  %v4956_v51 = vcombine.low %v4931_v16, %v4939_v53  ;;  %v4982_v58 = vcombine.low %v4866_v6, %v4872_v54 }
 0xeaf   :  { %v4981_v15 = vrot.slane %v4974_v59, %v14549_v41  ;;  %v4963_v61 = vrot.slane %v4956_v51, %v14550_v62 }
 0xeb0   :  { %v4856_v32 = vpop.permute.xlu1 %4855  ;;  %v4859_v7 = vpop.permute.xlu0 %4858 }
 0xeb1   :  { %v4940_v31 = vcombine.low %v13127_v9, %v4859_v7  ;;  %v4989_v7 = vrot.slane %v4982_v58, %v14549_v41 }
 0xeb3   :  { %v4947_v17 = vrot.slane %v4940_v31, %v14549_v41  ;;  %v5006_v31 = vcombine.low %v4981_v15, %v4989_v7 }
 0xeb4   :  { %v4862_v2 = vpop.permute.xlu1 %4861  ;;  %v4879_v11 = vpop.permute.xlu0 %4878 }
 0xeb5   :  { %v4948_v60 = vcombine.low %v4856_v32, %v4862_v2  ;;  %v4990_v9 = vcombine.low %v13133_v33, %v4879_v11  ;;  %v5013_v51 = vrot.slane %v5006_v31, %v14550_v62 }
 0xeb7   :  { %v4955_v22 = vrot.slane %v4948_v60, %v14549_v41  ;;  %v4997_v60 = vrot.slane %v4990_v9, %v14549_v41 }
 0xeb8   :  { %v4876_v23 = vpop.permute.xlu1 %4875  ;;  %v4886_v55 = vpop.permute.xlu0 %4885 }
 0xeb9   :  { %v4964_v63 = vcombine.low %v4947_v17, %v4955_v22 }
 0xebb   :  { %v4971_v2 = vrot.slane %v4964_v63, %v14550_v62 }
 0xebc   :  { %v4882_v32 = vpop.permute.xlu1 %4881  ;;  %v4892_v16 = vpop.permute.xlu0 %4891 }
 0xebd   :  { %v4998_v53 = vcombine.low %v4876_v23, %v4882_v32  ;;  %v13195_v43 = vcombine.low %v4963_v61, %v4971_v2  ;;  %v13212_v32 = vcombine.high %v4963_v61, %v4971_v2 }
 0xebf   :  { %v5005_v17 = vrot.slane %v4998_v53, %v14549_v41  ;;  %v5159_v59 = vsel %vm537_vm4, %v13195_v43, -inf  ;;  %v5032_v53 = vcombine.low %v4886_v55, %v4892_v16 }
 0xec0   :  { %v4889_v58 = vpop.permute.xlu1 %4888  ;;  %5160 = vmax.xlane.f32.xlu1 %v5159_v59  ;;  %v4906_v11 = vpop.permute.xlu0 %4905 }
 0xec1   :  { %v5014_v33 = vcombine.low %v4997_v60, %v5005_v17  ;;  %v5024_v23 = vcombine.low %v13139_v40, %v4889_v58  ;;  %v5171_v40 = vsel %vm537_vm4, %v13212_v32, -inf  ;;  %v5039_v58 = vrot.slane %v5032_v53, %v14549_v41 }
 0xec3   :  { %v5021_v6 = vrot.slane %v5014_v33, %v14550_v62  ;;  %v5031_v31 = vrot.slane %v5024_v23, %v14549_v41 }
 0xec4   :  { %v4909_v26 = vpop.permute.xlu1 %4908  ;;  %v4912_v54 = vpop.permute.xlu0 %4911 }
 0xec5   :  { %v13203_v4 = vcombine.high %v5013_v51, %v5021_v6  ;;  %v13205_v22 = vcombine.low %v5013_v51, %v5021_v6  ;;  %v5074_v51 = vcombine.low %v13149_v13, %v4909_v26  ;;  %v5082_v6 = vcombine.low %v4906_v11, %v4912_v54 }
 0xec6   :  { %v5056_v61 = vcombine.low %v5031_v31, %v5039_v58 }
 0xec7   :  { %v5174_v63 = vsel %vm537_vm4, %v13203_v4, -inf  ;;  %v5162_v7 = vsel %vm537_vm4, %v13205_v22, -inf }
 0xec8   :  { %v4896_v15 = vpop.permute.xlu1 %4895  ;;  %5175 = vmax.xlane.f32.xlu1 %v5174_v63  ;;  %v4899_v9 = vpop.permute.xlu0 %4898  ;;  %5163 = vmax.xlane.f32.xlu0 %v5162_v7  ;;  %v5081_v63 = vrot.slane %v5074_v51, %v14549_v41  ;;  %v5089_v7 = vrot.slane %v5082_v6, %v14549_v41 }
 0xec9   :  { %v5040_v60 = vcombine.low %v13159_v21, %v4899_v9 }
 0xecb   :  { %v5047_v55 = vrot.slane %v5040_v60, %v14549_v41  ;;  %v5106_v60 = vcombine.low %v5081_v63, %v5089_v7 }
 0xecc   :  { %v4902_v17 = vpop.permute.xlu1 %4901  ;;  %v4919_v59 = vpop.permute.xlu0 %4918  ;;  %5172 = vmax.xlane.f32.xlu0 %v5171_v40 }
 0xecd   :  { %v5048_v33 = vcombine.low %v4896_v15, %v4902_v17  ;;  %v5090_v9 = vcombine.low %v13165_v36, %v4919_v59  ;;  %v5063_v15 = vrot.slane %v5056_v61, %v14550_v62 }
 0xecf   :  { %v5055_v2 = vrot.slane %v5048_v33, %v14549_v41  ;;  %v5097_v17 = vrot.slane %v5090_v9, %v14549_v41 }
 0xed0   :  { %v4916_v16 = vpop.permute.xlu1 %4915  ;;  %v5126_v23 = vpop.permute.xlu0 %5125 }
 0xed1   :  { %v5064_v21 = vcombine.low %v5047_v55, %v5055_v2  ;;  %v5113_v2 = vrot.slane %v5106_v60, %v14550_v62 }
 0xed3   :  { %v5071_v53 = vrot.slane %v5064_v21, %v14550_v62 }
 0xed4   :  { %v4922_v13 = vpop.permute.xlu1 %4921  ;;  %v5132_v11 = vpop.permute.xlu0 %5131 }
 0xed5   :  { %v5098_v26 = vcombine.low %v4916_v16, %v4922_v13  ;;  %v5073_v54 = vcombine.high %v5063_v15, %v5071_v53  ;;  %v5072_v31 = vcombine.low %v5063_v15, %v5071_v53  ;;  %v5142_v58 = vcombine.low %v5126_v23, %v5132_v11 }
 0xed7   :  { %v5105_v40 = vrot.slane %v5098_v26, %v14549_v41  ;;  %v5177_v33 = vsel %vm537_vm4, %v5073_v54, -inf  ;;  %v5165_v51 = vsel %vm537_vm4, %v5072_v31, -inf  ;;  %v5149_v61 = vrot.slane %v5142_v58, %v14549_v41 }
 0xed8   :  { %v5129_v36 = vpop.permute.xlu1 %5128  ;;  %5178 = vmax.xlane.f32.xlu1 %v5177_v33  ;;  %5166 = vmax.xlane.f32.xlu0 %v5165_v51 }
 0xed9   :  { %v5114_v59 = vcombine.low %v5097_v17, %v5105_v40  ;;  %v5134_v6 = vcombine.low %v13171_v37, %v5129_v36 }
 0xedb   :  { %v5141_v55 = vrot.slane %v5134_v6, %v14549_v41  ;;  %v5121_v16 = vrot.slane %v5114_v59, %v14550_v62 }
 0xedd   :  { %v5150_v21 = vcombine.low %v5141_v55, %v5149_v61  ;;  %v5123_v23 = vcombine.high %v5113_v2, %v5121_v16  ;;  %v5122_v63 = vcombine.low %v5113_v2, %v5121_v16 }
 0xedf   :  { %v5180_v7 = vsel %vm537_vm4, %v5123_v23, -inf  ;;  %v5168_v9 = vsel %vm537_vm4, %v5122_v63, -inf  ;;  %v5157_v15 = vrot.slane %v5150_v21, %v14550_v62 }
 0xee0   :  { %5181 = vmax.xlane.f32.xlu1 %v5180_v7  ;;  %5169 = vmax.xlane.f32.xlu0 %v5168_v9 }
 0xee1   :  { %v5158_v37 = vcombine.high %v5157_v15, %v14530_v24  ;;  %v5335_v53 = vsel %vm1470_vm5, %v5157_v15, -inf }
 0xee3   :  { %v5338_v13 = vsel %vm1470_vm5, %v5158_v37, -inf }
 0xee4   :  { %5336 = vmax.xlane.f32.xlu0 %v5335_v53  ;;  %5339 = vmax.xlane.f32.xlu1 %v5338_v13 }
 0xf49   :  { %v5161_v11 = vpop.xlane.xlu1 %5160 }
 0xf4a   :  { %v5183_v26 = vsub.f32 %v13195_v43, %v5161_v11 }
 0xf4c   :  { %v5191_v60 = vmul.f32 1.442695, %v5183_v26 }
 0xf4e   :  { %11526 = vpow2.f32 %v5191_v60 }
 0xf51   :  { %v5176_v17 = vpop.xlane.xlu1 %5175  ;;  %v5164_v58 = vpop.xlane.xlu0 %5163 }
 0xf52   :  { %v5188_v40 = vsub.f32 %v13203_v4, %v5176_v17  ;;  %v5184_v33 = vsub.f32 %v13205_v22, %v5164_v58 }
 0xf54   :  { %v5201_v51 = vmul.f32 1.442695, %v5188_v40  ;;  %v5193_v36 = vmul.f32 1.442695, %v5184_v33 }
 0xf55   :  { %v5173_v59 = vpop.xlane.xlu0 %5172 }
 0xf56   :  { %11528 = vpow2.f32 %v5193_v36  ;;  %v5187_v6 = vsub.f32 %v13212_v32, %v5173_v59 }
 0xf57   :  { %11530 = vpow2.f32 %v5201_v51 }
 0xf58   :  { %v5199_v61 = vmul.f32 1.442695, %v5187_v6 }
 0xf5a   :  { %11532 = vpow2.f32 %v5199_v61 }
 0xf5b   :  { %v13246_v55 = vpop.eup %11526 }
 0xf5c   :  { %v5207_v43 = vsel %vm537_vm4, %v13246_v55, 0.0 }
 0xf5d   :  { %5208 = vadd.xlane.f32.xlu0 %v5207_v43 }
 0xf61   :  { %v5179_v2 = vpop.xlane.xlu1 %5178  ;;  %v5167_v4 = vpop.xlane.xlu0 %5166 }
 0xf62   :  { %v5189_v16 = vsub.f32 %v5073_v54, %v5179_v2  ;;  %v5185_v21 = vsub.f32 %v5072_v31, %v5167_v4 }
 0xf63   :  { %v11529_v22 = vpop.eup %11528 }
 0xf64   :  { %v5203_v7 = vmul.f32 1.442695, %v5189_v16  ;;  %v5195_v9 = vmul.f32 1.442695, %v5185_v21  ;;  %v5210_v53 = vsel %vm537_vm4, %v11529_v22, 0.0  ;;  %v11531_v13 = vpop.eup %11530 }
 0xf65   :  { %5211 = vadd.xlane.f32.xlu1 %v5210_v53  ;;  %v5222_v26 = vsel %vm537_vm4, %v11531_v13, 0.0 }
 0xf66   :  { %11534 = vpow2.f32 %v5203_v7 }
 0xf67   :  { %11536 = vpow2.f32 %v5195_v9  ;;  %v11533_v32 = vpop.eup %11532 }
 0xf68   :  { %v5219_v60 = vsel %vm537_vm4, %v11533_v32, 0.0 }
 0xf69   :  { %v5182_v11 = vpop.xlane.xlu1 %5181  ;;  %v5170_v17 = vpop.xlane.xlu0 %5169  ;;  %5223 = vadd.xlane.f32.xlu1 %v5222_v26  ;;  %5220 = vadd.xlane.f32.xlu0 %v5219_v60 }
 0xf6a   :  { %v5190_v40 = vsub.f32 %v5123_v23, %v5182_v11  ;;  %v5186_v54 = vsub.f32 %v5122_v63, %v5170_v17 }
 0xf6c   :  { %v5205_v31 = vmul.f32 1.442695, %v5190_v40  ;;  %v5197_v58 = vmul.f32 1.442695, %v5186_v54 }
 0xf6d   :  { %v5340_v33 = vpop.xlane.xlu1 %5339  ;;  %v5337_v51 = vpop.xlane.xlu0 %5336 }
 0xf6e   :  { %11538 = vpow2.f32 %v5205_v31  ;;  %v5342_v36 = vsub.f32 %v5158_v37, %v5340_v33  ;;  %v5341_v59 = vsub.f32 %v5157_v15, %v5337_v51 }
 0xf6f   :  { %11540 = vpow2.f32 %v5197_v58 }
 0xf70   :  { %v5345_v6 = vmul.f32 1.442695, %v5342_v36  ;;  %v5343_v61 = vmul.f32 1.442695, %v5341_v59 }
 0xf72   :  { %11542 = vpow2.f32 %v5345_v6 }
 0xf73   :  { %v11535_v43 = vpop.eup %11534  ;;  %11544 = vpow2.f32 %v5343_v61 }
 0xf74   :  { %v11537_v2 = vpop.eup %11536  ;;  %v5225_v4 = vsel %vm537_vm4, %v11535_v43, 0.0 }
 0xf75   :  { %5226 = vadd.xlane.f32.xlu1 %v5225_v4  ;;  %v5213_v23 = vsel %vm537_vm4, %v11537_v2, 0.0 }
 0xf76   :  { %5214 = vadd.xlane.f32.xlu0 %v5213_v23 }
 0xf7b   :  { %v11539_v63 = vpop.eup %11538 }
 0xf7c   :  { %v11541_v16 = vpop.eup %11540  ;;  %11219 = vmatpush3.msra.mxu0 %v11539_v63  ;;  %v5228_v21 = vsel %vm537_vm4, %v11539_v63, 0.0 }
 0xf7d   :  { %11208 = vmatpush3.msra.mxu1 %v11541_v16  ;;  %11220 = vmatprep.subr.mxu0 %v14530_v24  ;;  %v5216_v15 = vsel %vm537_vm4, %v11541_v16, 0.0 }
 0xf7e   :  { %5229 = vadd.xlane.f32.xlu1 %v5228_v21  ;;  %11209 = vmatprep.subr.mxu1 %v14530_v24 }
 0xf7f   :  { %v13259_v37 = vpop.eup %11542  ;;  %5217 = vadd.xlane.f32.xlu0 %v5216_v15  ;;  %11210 = vmatpush3.msra.mxu1 %v11537_v2 }
 0xf80   :  { %v13261_v7 = vpop.eup %11544  ;;  %11221 = vmatpush3.msra.mxu0 %v11535_v43  ;;  %11211 = vmatprep.subr.mxu1 %v14530_v24  ;;  %v5350_v9 = vsel %vm1470_vm5, %v13259_v37, 0.0 }
 0xf81   :  { %11222 = vmatprep.subr.mxu0 %v14530_v24  ;;  %11212 = vmatpush3.msra.mxu1 %v11529_v22  ;;  %v5347_v53 = vsel %vm1470_vm5, %v13261_v7, 0.0 }
 0xf82   :  { %11223 = vmatpush3.msra.mxu0 %v11531_v13  ;;  %5351 = vadd.xlane.f32.xlu1 %v5350_v9 }
 0xf83   :  { %11224 = vmatprep.subr.mxu0 %v14530_v24  ;;  %11213 = vmatprep.subr.mxu1 %v14530_v24 }
 0xf84   :  { %5348 = vadd.xlane.f32.xlu0 %v5347_v53  ;;  %11214 = vmatpush3.msra.mxu1 %v13246_v55 }
 0xf85   :  { %11225 = vmatpush3.msra.mxu0 %v11533_v32  ;;  %11229 = vmatprep.subr.mxu1 %v14530_v24 }
 0xf86   :  { %5771 = vmatprep.subr.mxu0 %v12924_v25 }
 0xfe6   :  { %v5209_v26 = vpop.xlane.xlu0 %5208 }
 0xfee   :  { %v5212_v11 = vpop.xlane.xlu1 %5211 }
 0xff2   :  { %v5224_v22 = vpop.xlane.xlu1 %5223  ;;  %v5221_v60 = vpop.xlane.xlu0 %5220 }
 0xff3   :  { %11546 = vrcp.f32 %v5224_v22 }
 0xff4   :  { %11548 = vrcp.f32 %v5221_v60 }
 0xff5   :  { %11550 = vrcp.f32 %v5212_v11 }
 0xff6   :  { %11552 = vrcp.f32 %v5209_v26 }
 0xffe   :  { %v5227_v13 = vpop.xlane.xlu1 %5226 }
 0xfff   :  { %11554 = vrcp.f32 %v5227_v13  ;;  %v5215_v17 = vpop.xlane.xlu0 %5214 }
0x1000   :  { %11556 = vrcp.f32 %v5215_v17  ;;  %v11547_v54 = vpop.eup %11546 }
0x1001   :  { %v11549_v32 = vpop.eup %11548  ;;  %v5244_v51 = vmul.f32 %v11547_v54, %v5224_v22 }
0x1002   :  { %v11551_v31 = vpop.eup %11550  ;;  %v5243_v36 = vmul.f32 %v11549_v32, %v5221_v60 }
0x1003   :  { %v11553_v25 = vpop.eup %11552  ;;  %v5240_v6 = vmul.f32 %v11551_v31, %v5212_v11  ;;  %v5252_v23 = vsub.f32 2.0, %v5244_v51 }
0x1004   :  { %v5239_v4 = vmul.f32 %v11553_v25, %v5209_v26  ;;  %v5251_v63 = vsub.f32 2.0, %v5243_v36 }
0x1005   :  { %v5248_v16 = vsub.f32 2.0, %v5240_v6  ;;  %v5260_v53 = vmul.f32 %v11547_v54, %v5252_v23 }
0x1006   :  { %v5247_v9 = vsub.f32 2.0, %v5239_v4  ;;  %v5259_v62 = vmul.f32 %v11549_v32, %v5251_v63 }
0x1007   :  { %v5230_v40 = vpop.xlane.xlu1 %5229  ;;  %v5256_v52 = vmul.f32 %v11551_v31, %v5248_v16 }
0x1008   :  { %11558 = vrcp.f32 %v5230_v40  ;;  %v5218_v55 = vpop.xlane.xlu0 %5217  ;;  %v5255_v11 = vmul.f32 %v11553_v25, %v5247_v9  ;;  %v5293_v26 = vrot.slane %v5259_v62, %v12300_v49 }
0x1009   :  { %11560 = vrcp.f32 %v5218_v55  ;;  %v5278_v6 = vrot.slane %v5256_v52, %v12294_v45 }
0x100b   :  { %v5352_v58 = vpop.xlane.xlu1 %5351 }
0x100c   :  { %v11555_v33 = vpop.eup %11554  ;;  %11562 = vrcp.f32 %v5352_v58 }
0x100d   :  { %v11557_v59 = vpop.eup %11556  ;;  %v5245_v61 = vmul.f32 %v11555_v33, %v5227_v13  ;;  %v5349_v43 = vpop.xlane.xlu0 %5348 }
0x100e   :  { %v5241_v2 = vmul.f32 %v11557_v59, %v5215_v17  ;;  %11564 = vrcp.f32 %v5349_v43  ;;  %v5297_v17 = vrot.slane %v5260_v53, %v12294_v45  ;;  %v10934_v53 = vld [vmem:[%s14439_s0 + $0x6] sm:$0x3] }
0x100f   :  { %v5253_v21 = vsub.f32 2.0, %v5245_v61 }
0x1010   :  { %v5249_v15 = vsub.f32 2.0, %v5241_v2 }
0x1011   :  { %v5261_v22 = vmul.f32 %v11555_v33, %v5253_v21 }
0x1012   :  { %v5257_v44 = vmul.f32 %v11557_v59, %v5249_v15 }
0x1013   :  { %v5302_v61 = vrot.slane %v5261_v22, %v12297_v46 }
0x1014   :  { %v5283_v32 = vrot.slane %v5257_v44, %v12297_v46 }
0x1015   :  { %v11559_v41 = vpop.eup %11558 }
0x1016   :  { %v11561_v60 = vpop.eup %11560  ;;  %v5246_v50 = vmul.f32 %v11559_v41, %v5230_v40  ;;  %v5274_v40 = vrot.slane %v5255_v11, %v12300_v49 }
0x1017   :  { %v5242_v13 = vmul.f32 %v11561_v60, %v5218_v55  ;;  %v5298_v55 = vsel %vm1408_vm7, %v5297_v17, %v5293_v26 }
0x1018   :  { %v5254_v51 = vsub.f32 2.0, %v5246_v50  ;;  %v5279_v4 = vsel %vm1408_vm7, %v5278_v6, %v5274_v40  ;;  %v5303_v52 = vsel %vm1415_vm8, %v5302_v61, %v5298_v55 }
0x1019   :  { %v11563_v36 = vpop.eup %11562  ;;  %v5250_v54 = vsub.f32 2.0, %v5242_v13  ;;  %v5284_v44 = vsel %vm1415_vm8, %v5283_v32, %v5279_v4 }
0x101a   :  { %v5262_v31 = vmul.f32 %v11559_v41, %v5254_v51  ;;  %v5356_v33 = vmul.f32 %v11563_v36, %v5352_v58 }
0x101b   :  { %v11565_v2 = vpop.eup %11564  ;;  %v5258_v25 = vmul.f32 %v11561_v60, %v5250_v54 }
0x101c   :  { %v5307_v59 = vrot.slane %v5262_v31, %v12303_v57  ;;  %v5358_v62 = vsub.f32 2.0, %v5356_v33  ;;  %v5355_v50 = vmul.f32 %v11565_v2, %v5349_v43 }
0x101d   :  { %v5288_v23 = vrot.slane %v5258_v25, %v12303_v57 }
0x101e   :  { %v5308_v41 = vsel %vm1422_vm9, %v5307_v59, %v5303_v52  ;;  %v5360_v58 = vmul.f32 %v11563_v36, %v5358_v62  ;;  %v5357_v63 = vsub.f32 2.0, %v5355_v50 }
0x101f   :  { %v5289_v16 = vsel %vm1422_vm9, %v5288_v23, %v5284_v44 }
0x1020   :  { %v5309_v21 = vsel %vm1443_vm10, %v5308_v41, %v5289_v16  ;;  %v5370_v15 = vrot.slane %v5360_v58, %v12300_v49  ;;  %v5359_v9 = vmul.f32 %v11565_v2, %v5357_v63  ;;  %v14569_v58 = vld [vmem:[#allocation15_spill] sm:$0xff]  ;;  %v14570_v63 = vld [vmem:[#allocation16_spill] sm:$0xff]  ;;  %v14571_v16 = vld [vmem:[#allocation17_spill] sm:$0xff] }
0x1021   :  { %v5311_v43 = vmul.f32 %v5309_v21, %v13026_v39  ;;  %v14572_v21 = vld [vmem:[#allocation18_spill] sm:$0xff] }
0x1022   :  { %v5366_v22 = vrot.slane %v5359_v9, %v12300_v49  ;;  %v14574_v9 = vld [vmem:[#allocation20_spill] sm:$0xff] }
0x1023   :  { %v5319_v60 = vrot.slane %v5311_v43, %v12320_v30  ;;  %v14575_v43 = vld [vmem:[#allocation21_spill] sm:$0xff] }
0x1024   :  { %v5371_v11 = vsel %vm1443_vm10, %v5370_v15, %v5366_v22  ;;  %v14573_v15 = vld [vmem:[#allocation19_spill] sm:$0xff] }
0x1025   :  { %v5373_v13 = vmul.f32 %v10934_v53, %v5371_v11  ;;  %v5327_v17 = vrot.slane %v5319_v60, %v12320_v30  ;;  %v5320_v26 = vcombine.high %v5319_v60, %v5319_v60  ;;  %v14580_v53 = vld [vmem:[#allocation26_spill] sm:$0xff]  ;;  %v14581_v22 = vld [vmem:[#allocation27_spill] sm:$0xff]  ;;  %v14582_v60 = vld [vmem:[#allocation28_spill] sm:$0xff] }
0x1026   :  { %v14583_v11 = vld [vmem:[#allocation29_spill] sm:$0xff] }
0x1027   :  { %11216 = vmatmul.mubr.msk.f32.vlgmr.msra.gmra.mxu1 %vm537_vm4, %v5327_v17  ;;  %v5334_v51 = vrot.slane %v5320_v26, %v12320_v30  ;;  %v5381_v39 = vrot.slane %v5373_v13, %v12320_v30  ;;  %v14584_v13 = vld [vmem:[#allocation30_spill] sm:$0xff]  ;;  %v14585_v17 = vld [vmem:[#allocation31_spill] sm:$0xff]  ;;  %v14586_v26 = vld [vmem:[#allocation32_spill] sm:$0xff] }
0x1028   :  { %11230 = vmatpush3.msk.msra.mxu1 %vm1686_vm11, %v13261_v7  ;;  %11231 = vmatprep.mubr.msk.f32.mxu1 %vm11990_vm6, %v14530_v24 }
0x1029   :  { %11227 = vmatmul.mubr.msk.f32.vlgmr.msra.gmra.mxu0 %vm537_vm4, %v5334_v51  ;;  %11234 = vmatprep.subr.mxu1 %v14530_v24  ;;  %v5389_v36 = vrot.slane %v5381_v39, %v12320_v30  ;;  %v5382_v6 = vcombine.high %v5381_v39, %v5381_v39  ;;  %v5734_v51 = vld [vmem:[#allocation3 + $0x50] sm:$0x3] }
0x102a   :  { %5772 = vmatpush1.msra.mxu0 %v12961_v29  ;;  %5811 = vmatprep.mubr.f32.mxu0 %v14530_v24  ;;  %v4455_v29 = vld [vmem:[#allocation3 + $0x48] sm:$0xc0] }
0x102b   :  { %11232 = vmatmul.mubr.msk.f32.vlgmr.msra.gmra.mxu1 %vm1683_vm12, %v5389_v36  ;;  %5773 = vmatprep.subr.mxu0 %v12966_v5  ;;  %v5396_v7 = vrot.slane %v5382_v6, %v12320_v30  ;;  %v4841_v5 = vpop.f32.mrf.mxu0 }
0x102c   :  { %11235 = vmatpush3.msk.msra.mxu1 %vm1686_vm11, %v13259_v37  ;;  %11236 = vmatprep.mubr.msk.f32.mxu1 %vm11990_vm6, %v14530_v24 }
0x102d   :  { %5842 = vmatprep.subr.mxu1 %v12974_v1  ;;  %5774 = vmatpush1.msra.mxu0 %v12977_v35  ;;  %v4475_v1 = vrot.slane %v4455_v29, 6 }
0x102e   :  { %5775 = vmatprep.subr.mxu0 %v12980_v28 }
0x102f   :  { %11237 = vmatmul.mubr.msk.f32.vlgmr.msra.gmra.mxu1 %vm1683_vm12, %v5396_v7  ;;  %5776 = vmatpush1.msra.mxu0 %v12984_v56  ;;  %v4842_v35 = vadd.f32 %v4841_v5, %v4475_v1  ;;  %v5736_v7 = vld [vmem:[#allocation3 + $0x60] sm:$0x3]  ;;  %v5735_v1 = vld [vmem:[#allocation3 + $0x58] sm:$0x3] }
0x1030   :  { %5843 = vmatpush1.msra.mxu1 %v12987_v34  ;;  %5777 = vmatprep.subr.mxu0 %v12990_v0 }
0x1031   :  { %5844 = vmatprep.subr.mxu1 %v12993_v14  ;;  %5778 = vmatpush1.msra.mxu0 %v12996_v12  ;;  %v10940_v28 = vmul.f32 -1.442695, %v4842_v35 }
0x1032   :  { %5845 = vmatpush1.msra.mxu1 %v12999_v19  ;;  %5882 = vmatprep.mubr.f32.mxu1 %v14530_v24 }
0x1033   :  { %5846 = vmatprep.subr.mxu1 %v13003_v8  ;;  %5913 = vmatprep.subr.mxu0 %v13006_v38  ;;  %11566 = vpow2.f32 %v10940_v28 }
0x1034   :  { %5847 = vmatpush1.msra.mxu1 %v13009_v42 }
0x1035   :  { %5848 = vmatprep.subr.mxu1 %v13012_v20 }
0x1036   :  { %5849 = vmatpush1.msra.mxu1 %v13015_v47 }
0x1037   :  { %5984 = vmatprep.subr.mxu1 %v13018_v48 }
0x1040   :  { %v11567_v56 = vpop.eup %11566 }
0x1041   :  { %v5400_v34 = vadd.f32 1.0, %v11567_v56  ;;  %v5737_v56 = vld [vmem:[#allocation3 + $0x68] sm:$0x3] }
0x1043   :  { %11568 = vrcp.f32 %v5400_v34 }
0x1050   :  { %v11569_v61 = vpop.eup %11568 }
0x10e7   :  { %v5471_v0 = vpop.f32.mrf.mxu1 }
0x10e9   :  { %v11217_v14 = vpop.f32.mrf.mxu1  ;;  %v5543_v12 = vpop.f32.mrf.mxu0 }
0x10ea   :  { %v5738_v14 = vld [vmem:[#allocation3 + $0x70] sm:$0x3] }
0x10eb   :  { %v11228_v19 = vpop.f32.mrf.mxu0  ;;  %v5618_v8 = vpop.f32.mrf.mxu1 }
0x10ec   :  { %v5697_v37 = vadd.f32 %v5618_v8, %v5471_v0  ;;  %v5740_v8 = vld [vmem:[#allocation3 + $0x80] sm:$0x3] }
0x10ed   :  { %v11233_v38 = vpop.f32.mrf.mxu1 }
0x10ef   :  { %v5693_v42 = vpop.f32.mrf.mxu1 }
0x10f0   :  { %v5698_v20 = vadd.f32 %v5693_v42, %v5543_v12 }
0x10f1   :  { %v11238_v47 = vpop.f32.mrf.mxu1 }
0x10f2   :  { %v5701_v48 = vrot.slane %v5698_v20, 7 }
0x10f4   :  { %v5702_v54 = vsel %vm1443_vm10, %v5701_v48, %v5697_v37  ;;  %v5741_v48 = vld [vmem:[#allocation3 + $0x88] sm:$0x3] }
0x10f5   :  { %v5704_v32 = vmul.f32 %v11569_v61, %v5702_v54 }
0x10f7   :  { %v5706_v31 = vrot.slane %v5704_v32, 1  ;;  %5712 = vst.msk [vmem:[#allocation7 + $0x6] sm:$0x3] %vm42_vm0, %v5704_v32  ;;  %v5709_v2 = vsub.f32 %v5697_v37, %v5704_v32  ;;  %v5742_v32 = vld [vmem:[#allocation3 + $0x90] sm:$0x3] }
0x10f9   :  { %v5710_v33 = vsub.f32 %v5698_v20, %v5706_v31  ;;  %v5739_v20 = vld [vmem:[#allocation3 + $0x78] sm:$0x3] }
0x10fb   :  { %v5715_v40 = vrot.slane %v5710_v33, 7 }
0x10fd   :  { %v5716_v25 = vsel %vm1443_vm10, %v5715_v40, %v5709_v2 }
0x10fe   :  { %5719 = vst.msk [vmem:[#allocation8 + $0x6] sm:$0x3] %vm42_vm0, %v5716_v25  ;;  %5720 = vst.msk [vmem:[#allocation2] sm:$0x3] %vm42_vm0, %v5716_v25 }
0x1105   :  { %v13339_v55 = vld [vmem:[#allocation2] sm:$0x3] }
0x1106   :  { %v5724_v59 = vsel %vm42_vm0, %v13339_v55, 0.0 }
0x1107   :  { %5725 = vadd.xlane.f32.xlu0 %v5724_v59 }
0x1190   :  { %v5726_v62 = vpop.xlane.xlu0 %5725 }
0x1191   :  { %vm5727_vm1 = vcmp.eq.f32.partialorder %v5726_v62, 0.0 }
0x1192   :  { %v5728_v50 = vsel %vm5727_vm1, 1.0, %v5726_v62 }
0x1193   :  { %11570 = vrcp.f32 %v5728_v50 }
0x11a0   :  { %v11571_v4 = vpop.eup %11570 }
0x11a1   :  { %v5730_v52 = vmul.f32 %v11571_v4, %v5728_v50 }
0x11a3   :  { %v5731_v23 = vsub.f32 2.0, %v5730_v52 }
0x11a5   :  { %v5732_v44 = vmul.f32 %v11571_v4, %v5731_v23 }
0x11a7   :  { %v5733_v41 = vmul.f32 %v5732_v44, %v13339_v55  ;;  %v14587_v44 = vld [vmem:[#allocation13_spill] sm:$0xff] }
0x11a9   :  { %10948 = vmatmul.mubr.msk.f32.vlgmr.msra.gmra.mxu0 %vm537_vm4, %v5733_v41  ;;  %10949 = vmatmul.mubr.msk.f32.vlgmr.msra.gmra.mxu1 %vm537_vm4, %v5733_v41 }
0x11aa   :  { %5914 = vmatpush1.msra.mxu0 %v13033_v27  ;;  %5985 = vmatpush1.msra.mxu1 %v13036_v10  ;;  %v14576_v27 = vld [vmem:[#allocation22_spill] sm:$0xff]  ;;  %v14577_v10 = vld [vmem:[#allocation23_spill] sm:$0xff] }
0x11ab   :  { %5915 = vmatprep.subr.mxu0 %v13039_v18  ;;  %5986 = vmatprep.subr.mxu1 %v13042_v3  ;;  %v14578_v18 = vld [vmem:[#allocation24_spill] sm:$0xff]  ;;  %v14579_v3 = vld [vmem:[#allocation25_spill] sm:$0xff] }
0x11ac   :  { %5916 = vmatpush1.msra.mxu0 %v14569_v58  ;;  %5987 = vmatpush1.msra.mxu1 %v14570_v63 }
0x11ad   :  { %5917 = vmatprep.subr.mxu0 %v14571_v16  ;;  %5988 = vmatprep.subr.mxu1 %v14572_v21 }
0x11ae   :  { %5918 = vmatpush1.msra.mxu0 %v14573_v15  ;;  %5989 = vmatpush1.msra.mxu1 %v14574_v9 }
0x11af   :  { %5919 = vmatprep.subr.mxu0 %v14575_v43  ;;  %5990 = vmatprep.subr.mxu1 %v14576_v27 }
0x11b0   :  { %5920 = vmatpush1.msra.mxu0 %v14577_v10  ;;  %5953 = vmatprep.mubr.f32.mxu0 %v14530_v24 }
0x11b1   :  { %5991 = vmatpush1.msra.mxu1 %v14578_v18  ;;  %6024 = vmatprep.mubr.f32.mxu1 %v14530_v24 }
0x11b2   :  { %10950 = vmatmul.mubr.msk.f32.vlgmr.msra.gmra.mxu0 %vm537_vm4, %v5733_v41  ;;  %10951 = vmatmul.mubr.msk.f32.vlgmr.msra.gmra.mxu1 %vm537_vm4, %v5733_v41 }
0x11b3   :  { %6055 = vmatprep.subr.mxu0 %v14579_v3  ;;  %6095 = vmatprep.mubr.f32.mxu0 %v14530_v24 }
0x11b4   :  { %6056 = vmatpush1.msra.mxu0 %v14580_v53  ;;  %11239 = vmatprep.subr.mxu1 %v14530_v24 }
0x11b5   :  { %6057 = vmatprep.subr.mxu0 %v14581_v22  ;;  %11247 = vmatprep.mubr.msk.f32.mxu1 %vm11990_vm6, %v14530_v24 }
0x11b6   :  { %6058 = vmatpush1.msra.mxu0 %v14582_v60 }
0x11b7   :  { %6059 = vmatprep.subr.mxu0 %v14583_v11 }
0x11b8   :  { %6060 = vmatpush1.msra.mxu0 %v14584_v13 }
0x11b9   :  { %6061 = vmatprep.subr.mxu0 %v14585_v17  ;;  %v14588_v17 = vld [vmem:[#allocation14_spill] sm:$0xff] }
0x11ba   :  { %6062 = vmatpush1.msra.mxu0 %v14586_v26 }
0x11bb   :  { %10952 = vmatmul.mubr.msk.f32.vlgmr.msra.gmra.mxu0 %vm537_vm4, %v5733_v41  ;;  %11250 = vmatprep.subr.mxu0 %v14530_v24 }
0x11bc   :  { %11258 = vmatprep.mubr.msk.f32.mxu0 %vm11990_vm6, %v14530_v24 }
0x1269   :  { %v5813_v39 = vpop.f32.mrf.mxu0  ;;  %v5884_v6 = vpop.f32.mrf.mxu1 }
0x126a   :  { %v13380_v36 = vadd.f32 %v5813_v39, %v5734_v51  ;;  %v13386_v29 = vadd.f32 %v5884_v6, %v5736_v7 }
0x126b   :  { %v5815_v5 = vpop.f32.mrf.mxu0  ;;  %v5886_v28 = vpop.f32.mrf.mxu1 }
0x126c   :  { %6106 = vrot.lane.b32.xlu0 %v13380_v36, %s11985_s4  ;;  %6103 = vrot.lane.b32.xlu1 %v13380_v36, %s11986_s19  ;;  %v5816_v35 = vadd.f32 %v5815_v5, %v5735_v1  ;;  %v13398_v34 = vadd.f32 %v5886_v28, %v5737_v56 }
0x1270   :  { %6109 = vrot.lane.b32.xlu1 %v13380_v36, %s11987_s20  ;;  %6123 = vrot.lane.b32.xlu0 %v13386_v29, %s11986_s19 }
0x1272   :  { %v5955_v0 = vpop.f32.mrf.mxu0  ;;  %v6026_v19 = vpop.f32.mrf.mxu1 }
0x1273   :  { %v13403_v12 = vadd.f32 %v5955_v0, %v5738_v14  ;;  %v13413_v38 = vadd.f32 %v6026_v19, %v5740_v8 }
0x1274   :  { %6126 = vrot.lane.b32.xlu1 %v13386_v29, %s11985_s4  ;;  %6129 = vrot.lane.b32.xlu0 %v13386_v29, %s11987_s20  ;;  %v5957_v42 = vpop.f32.mrf.mxu0  ;;  %v6028_v37 = vpop.f32.mrf.mxu1 }
0x1275   :  { %v13423_v47 = vadd.f32 %v5957_v42, %v5739_v20  ;;  %v13429_v61 = vadd.f32 %v6028_v37, %v5741_v48 }
0x1278   :  { %6113 = vrot.lane.b32.xlu1 %v5816_v35, %s11986_s19  ;;  %6116 = vrot.lane.b32.xlu0 %v5816_v35, %s11985_s4 }
0x127b   :  { %v6097_v54 = vpop.f32.mrf.mxu0 }
0x127c   :  { %6119 = vrot.lane.b32.xlu1 %v5816_v35, %s11987_s20  ;;  %6136 = vrot.lane.b32.xlu0 %v13398_v34, %s11985_s4  ;;  %v13435_v31 = vadd.f32 %v6097_v54, %v5742_v32 }
0x1280   :  { %6133 = vrot.lane.b32.xlu1 %v13398_v34, %s11986_s19  ;;  %6143 = vrot.lane.b32.xlu0 %v13403_v12, %s11986_s19 }
0x1284   :  { %6139 = vrot.lane.b32.xlu1 %v13398_v34, %s11987_s20  ;;  %6149 = vrot.lane.b32.xlu0 %v13403_v12, %s11987_s20 }
0x1288   :  { %6146 = vrot.lane.b32.xlu1 %v13403_v12, %s11985_s4  ;;  %6163 = vrot.lane.b32.xlu0 %v13413_v38, %s11986_s19 }
0x128c   :  { %6166 = vrot.lane.b32.xlu1 %v13413_v38, %s11985_s4  ;;  %6169 = vrot.lane.b32.xlu0 %v13413_v38, %s11987_s20 }
0x1290   :  { %6153 = vrot.lane.b32.xlu1 %v13423_v47, %s11986_s19  ;;  %6156 = vrot.lane.b32.xlu0 %v13423_v47, %s11985_s4 }
0x1294   :  { %6159 = vrot.lane.b32.xlu1 %v13423_v47, %s11987_s20  ;;  %6176 = vrot.lane.b32.xlu0 %v13429_v61, %s11985_s4 }
0x1298   :  { %6173 = vrot.lane.b32.xlu1 %v13429_v61, %s11986_s19  ;;  %6383 = vrot.lane.b32.xlu0 %v13435_v31, %s11986_s19 }
0x129c   :  { %6179 = vrot.lane.b32.xlu1 %v13429_v61, %s11987_s20  ;;  %6389 = vrot.lane.b32.xlu0 %v13435_v31, %s11987_s20 }
0x12a0   :  { %6386 = vrot.lane.b32.xlu1 %v13435_v31, %s11985_s4 }
0x12de   :  { %v6107_v33 = vpop.permute.xlu0 %6106  ;;  %v6104_v2 = vpop.permute.xlu1 %6103 }
0x12df   :  { %v6182_v23 = vcombine.low %v13380_v36, %v6107_v33 }
0x12e1   :  { %v6189_v21 = vrot.slane %v6182_v23, %v14587_v44 }
0x12e2   :  { %v6110_v40 = vpop.permute.xlu1 %6109  ;;  %v6124_v25 = vpop.permute.xlu0 %6123 }
0x12e3   :  { %v6190_v50 = vcombine.low %v6104_v2, %v6110_v40 }
0x12e5   :  { %v6197_v41 = vrot.slane %v6190_v50, %v14587_v44 }
0x12e6   :  { %v6127_v59 = vpop.permute.xlu1 %6126  ;;  %v6130_v62 = vpop.permute.xlu0 %6129 }
0x12e7   :  { %v6232_v9 = vcombine.low %v13386_v29, %v6127_v59  ;;  %v6214_v43 = vcombine.low %v6189_v21, %v6197_v41  ;;  %v6240_v27 = vcombine.low %v6124_v25, %v6130_v62 }
0x12e9   :  { %v6239_v60 = vrot.slane %v6232_v9, %v14587_v44  ;;  %v6247_v11 = vrot.slane %v6240_v27, %v14587_v44  ;;  %v6221_v26 = vrot.slane %v6214_v43, %v14588_v17 }
0x12ea   :  { %v6114_v4 = vpop.permute.xlu1 %6113  ;;  %v6117_v52 = vpop.permute.xlu0 %6116 }
0x12eb   :  { %v6198_v58 = vcombine.low %v5816_v35, %v6117_v52  ;;  %v6264_v29 = vcombine.low %v6239_v60, %v6247_v11 }
0x12ed   :  { %v6205_v10 = vrot.slane %v6198_v58, %v14587_v44  ;;  %v6271_v0 = vrot.slane %v6264_v29, %v14588_v17 }
0x12ee   :  { %v6120_v63 = vpop.permute.xlu1 %6119  ;;  %v6137_v16 = vpop.permute.xlu0 %6136 }
0x12ef   :  { %v6206_v15 = vcombine.low %v6114_v4, %v6120_v63  ;;  %v6248_v13 = vcombine.low %v13398_v34, %v6137_v16 }
0x12f1   :  { %v6213_v18 = vrot.slane %v6206_v15, %v14587_v44  ;;  %v6255_v5 = vrot.slane %v6248_v13, %v14587_v44 }
0x12f2   :  { %v6134_v3 = vpop.permute.xlu1 %6133  ;;  %v6144_v53 = vpop.permute.xlu0 %6143 }
0x12f3   :  { %v6222_v22 = vcombine.low %v6205_v10, %v6213_v18 }
0x12f5   :  { %v6229_v51 = vrot.slane %v6222_v22, %v14588_v17 }
0x12f6   :  { %v6140_v39 = vpop.permute.xlu1 %6139  ;;  %v6150_v36 = vpop.permute.xlu0 %6149 }
0x12f7   :  { %v6256_v6 = vcombine.low %v6134_v3, %v6140_v39  ;;  %v13458_v7 = vcombine.low %v6221_v26, %v6229_v51  ;;  %v13475_v2 = vcombine.high %v6221_v26, %v6229_v51  ;;  %v6290_v40 = vcombine.low %v6144_v53, %v6150_v36 }
0x12f9   :  { %v6263_v1 = vrot.slane %v6256_v6, %v14587_v44  ;;  %v6417_v35 = vsel %vm537_vm4, %v13458_v7, -inf  ;;  %v6297_v4 = vrot.slane %v6290_v40, %v14587_v44 }
0x12fa   :  { %v6147_v28 = vpop.permute.xlu1 %6146  ;;  %6418 = vmax.xlane.f32.xlu1 %v6417_v35  ;;  %v6164_v56 = vpop.permute.xlu0 %6163 }
0x12fb   :  { %v6272_v34 = vcombine.low %v6255_v5, %v6263_v1  ;;  %v6282_v37 = vcombine.low %v13403_v12, %v6147_v28  ;;  %v6429_v12 = vsel %vm537_vm4, %v13475_v2, -inf }
0x12fd   :  { %v6279_v14 = vrot.slane %v6272_v34, %v14588_v17  ;;  %v6289_v25 = vrot.slane %v6282_v37, %v14587_v44 }
0x12fe   :  { %v6167_v19 = vpop.permute.xlu1 %6166  ;;  %v6170_v8 = vpop.permute.xlu0 %6169 }
0x12ff   :  { %v13466_v42 = vcombine.high %v6271_v0, %v6279_v14  ;;  %v13468_v20 = vcombine.low %v6271_v0, %v6279_v14  ;;  %v6332_v23 = vcombine.low %v13413_v38, %v6167_v19  ;;  %v6340_v41 = vcombine.low %v6164_v56, %v6170_v8 }
0x1300   :  { %v6314_v58 = vcombine.low %v6289_v25, %v6297_v4 }
0x1301   :  { %v6432_v48 = vsel %vm537_vm4, %v13466_v42, -inf  ;;  %v6420_v32 = vsel %vm537_vm4, %v13468_v20, -inf  ;;  %v6339_v9 = vrot.slane %v6332_v23, %v14587_v44  ;;  %v6347_v43 = vrot.slane %v6340_v41, %v14587_v44 }
0x1302   :  { %v6154_v54 = vpop.permute.xlu1 %6153  ;;  %6433 = vmax.xlane.f32.xlu1 %v6432_v48  ;;  %v6157_v33 = vpop.permute.xlu0 %6156  ;;  %6421 = vmax.xlane.f32.xlu0 %v6420_v32  ;;  %v6321_v10 = vrot.slane %v6314_v58, %v14588_v17 }
0x1303   :  { %v6298_v59 = vcombine.low %v13423_v47, %v6157_v33  ;;  %v6364_v11 = vcombine.low %v6339_v9, %v6347_v43 }
0x1305   :  { %v6305_v63 = vrot.slane %v6298_v59, %v14587_v44  ;;  %v6371_v35 = vrot.slane %v6364_v11, %v14588_v17 }
0x1306   :  { %v6160_v62 = vpop.permute.xlu1 %6159  ;;  %v6177_v50 = vpop.permute.xlu0 %6176  ;;  %6430 = vmax.xlane.f32.xlu0 %v6429_v12 }
0x1307   :  { %v6306_v52 = vcombine.low %v6154_v54, %v6160_v62  ;;  %v6348_v27 = vcombine.low %v13429_v61, %v6177_v50 }
0x1309   :  { %v6313_v16 = vrot.slane %v6306_v52, %v14587_v44  ;;  %v6355_v13 = vrot.slane %v6348_v27, %v14587_v44 }
0x130a   :  { %v6174_v21 = vpop.permute.xlu1 %6173  ;;  %v6384_v15 = vpop.permute.xlu0 %6383 }
0x130b   :  { %v6322_v47 = vcombine.low %v6305_v63, %v6313_v16 }
0x130d   :  { %v6329_v18 = vrot.slane %v6322_v47, %v14588_v17 }
0x130e   :  { %v6180_v38 = vpop.permute.xlu1 %6179  ;;  %v6390_v3 = vpop.permute.xlu0 %6389 }
0x130f   :  { %v6356_v53 = vcombine.low %v6174_v21, %v6180_v38  ;;  %v6331_v22 = vcombine.high %v6321_v10, %v6329_v18  ;;  %v6330_v60 = vcombine.low %v6321_v10, %v6329_v18  ;;  %v6400_v51 = vcombine.low %v6384_v15, %v6390_v3 }
0x1311   :  { %v6363_v26 = vrot.slane %v6356_v53, %v14587_v44  ;;  %v6435_v39 = vsel %vm537_vm4, %v6331_v22, -inf  ;;  %v6423_v36 = vsel %vm537_vm4, %v6330_v60, -inf  ;;  %v6407_v5 = vrot.slane %v6400_v51, %v14587_v44 }
0x1312   :  { %v6387_v61 = vpop.permute.xlu1 %6386  ;;  %6436 = vmax.xlane.f32.xlu1 %v6435_v39  ;;  %6424 = vmax.xlane.f32.xlu0 %v6423_v36 }
0x1313   :  { %v6372_v6 = vcombine.low %v6355_v13, %v6363_v26  ;;  %v6392_v29 = vcombine.low %v13435_v31, %v6387_v61 }
0x1315   :  { %v6399_v1 = vrot.slane %v6392_v29, %v14587_v44  ;;  %v6379_v28 = vrot.slane %v6372_v6, %v14588_v17 }
0x1317   :  { %v6408_v56 = vcombine.low %v6399_v1, %v6407_v5  ;;  %v6381_v34 = vcombine.high %v6371_v35, %v6379_v28  ;;  %v6380_v0 = vcombine.low %v6371_v35, %v6379_v28 }
0x1319   :  { %v6438_v14 = vsel %vm537_vm4, %v6381_v34, -inf  ;;  %v6426_v19 = vsel %vm537_vm4, %v6380_v0, -inf  ;;  %v6415_v8 = vrot.slane %v6408_v56, %v14588_v17 }
0x131a   :  { %6439 = vmax.xlane.f32.xlu1 %v6438_v14  ;;  %6427 = vmax.xlane.f32.xlu0 %v6426_v19  ;;  %v13536_v19 = vld [vmem:[#allocation4 + $0xf8] sm:$0xff] }
0x131b   :  { %v6416_v31 = vcombine.high %v6415_v8, %v14530_v24  ;;  %v6593_v37 = vsel %vm1470_vm5, %v6415_v8, -inf }
0x131d   :  { %v6596_v48 = vsel %vm1470_vm5, %v6416_v31, -inf }
0x131e   :  { %6594 = vmax.xlane.f32.xlu0 %v6593_v37  ;;  %6597 = vmax.xlane.f32.xlu1 %v6596_v48 }
0x1383   :  { %v6419_v54 = vpop.xlane.xlu1 %6418 }
0x1384   :  { %v6441_v32 = vsub.f32 %v13458_v7, %v6419_v54 }
0x1386   :  { %v6449_v33 = vmul.f32 1.442695, %v6441_v32 }
0x1388   :  { %11572 = vpow2.f32 %v6449_v33 }
0x138b   :  { %v6434_v40 = vpop.xlane.xlu1 %6433  ;;  %v6422_v59 = vpop.xlane.xlu0 %6421 }
0x138c   :  { %v6446_v25 = vsub.f32 %v13466_v42, %v6434_v40  ;;  %v6442_v62 = vsub.f32 %v13468_v20, %v6422_v59 }
0x138e   :  { %v6459_v12 = vmul.f32 1.442695, %v6446_v25  ;;  %v6451_v50 = vmul.f32 1.442695, %v6442_v62 }
0x138f   :  { %v6431_v4 = vpop.xlane.xlu0 %6430 }
0x1390   :  { %11574 = vpow2.f32 %v6451_v50  ;;  %v6445_v52 = vsub.f32 %v13475_v2, %v6431_v4 }
0x1391   :  { %11576 = vpow2.f32 %v6459_v12 }
0x1392   :  { %v6457_v23 = vmul.f32 1.442695, %v6445_v52 }
0x1394   :  { %11578 = vpow2.f32 %v6457_v23 }
0x1395   :  { %v13509_v41 = vpop.eup %11572 }
0x1396   :  { %v6465_v7 = vsel %vm537_vm4, %v13509_v41, 0.0 }
0x1397   :  { %6466 = vadd.xlane.f32.xlu0 %v6465_v7 }
0x139b   :  { %v6437_v58 = vpop.xlane.xlu1 %6436  ;;  %v6425_v42 = vpop.xlane.xlu0 %6424 }
0x139c   :  { %v6447_v63 = vsub.f32 %v6331_v22, %v6437_v58  ;;  %v6443_v16 = vsub.f32 %v6330_v60, %v6425_v42 }
0x139d   :  { %v11575_v20 = vpop.eup %11574 }
0x139e   :  { %v6461_v21 = vmul.f32 1.442695, %v6447_v63  ;;  %v6453_v15 = vmul.f32 1.442695, %v6443_v16  ;;  %v6468_v47 = vsel %vm537_vm4, %v11575_v20, 0.0  ;;  %v11577_v9 = vpop.eup %11576 }
0x139f   :  { %6469 = vadd.xlane.f32.xlu1 %v6468_v47  ;;  %v6480_v27 = vsel %vm537_vm4, %v11577_v9, 0.0 }
0x13a0   :  { %11580 = vpow2.f32 %v6461_v21 }
0x13a1   :  { %11582 = vpow2.f32 %v6453_v15  ;;  %v11579_v2 = vpop.eup %11578 }
0x13a2   :  { %v6477_v10 = vsel %vm537_vm4, %v11579_v2, 0.0 }
0x13a3   :  { %v6440_v43 = vpop.xlane.xlu1 %6439  ;;  %v6428_v18 = vpop.xlane.xlu0 %6427  ;;  %6481 = vadd.xlane.f32.xlu1 %v6480_v27  ;;  %6478 = vadd.xlane.f32.xlu0 %v6477_v10 }
0x13a4   :  { %v6448_v38 = vsub.f32 %v6381_v34, %v6440_v43  ;;  %v6444_v3 = vsub.f32 %v6380_v0, %v6428_v18 }
0x13a6   :  { %v6463_v53 = vmul.f32 1.442695, %v6448_v38  ;;  %v6455_v22 = vmul.f32 1.442695, %v6444_v3 }
0x13a7   :  { %v6598_v60 = vpop.xlane.xlu1 %6597  ;;  %v6595_v11 = vpop.xlane.xlu0 %6594 }
0x13a8   :  { %11584 = vpow2.f32 %v6463_v53  ;;  %v6600_v13 = vsub.f32 %v6416_v31, %v6598_v60  ;;  %v6599_v26 = vsub.f32 %v6415_v8, %v6595_v11 }
0x13a9   :  { %11586 = vpow2.f32 %v6455_v22 }
0x13aa   :  { %v6603_v51 = vmul.f32 1.442695, %v6600_v13  ;;  %v6601_v39 = vmul.f32 1.442695, %v6599_v26 }
0x13ac   :  { %11588 = vpow2.f32 %v6603_v51 }
0x13ad   :  { %v11581_v36 = vpop.eup %11580  ;;  %11590 = vpow2.f32 %v6601_v39 }
0x13ae   :  { %v11583_v61 = vpop.eup %11582  ;;  %v6483_v6 = vsel %vm537_vm4, %v11581_v36, 0.0 }
0x13af   :  { %6484 = vadd.xlane.f32.xlu1 %v6483_v6  ;;  %v6471_v29 = vsel %vm537_vm4, %v11583_v61, 0.0 }
0x13b0   :  { %6472 = vadd.xlane.f32.xlu0 %v6471_v29 }
0x13b5   :  { %v11585_v5 = vpop.eup %11584 }
0x13b6   :  { %v11587_v1 = vpop.eup %11586  ;;  %11251 = vmatpush3.msra.mxu0 %v11585_v5  ;;  %v6486_v35 = vsel %vm537_vm4, %v11585_v5, 0.0 }
0x13b7   :  { %11240 = vmatpush3.msra.mxu1 %v11587_v1  ;;  %11252 = vmatprep.subr.mxu0 %v14530_v24  ;;  %v6474_v28 = vsel %vm537_vm4, %v11587_v1, 0.0 }
0x13b8   :  { %6487 = vadd.xlane.f32.xlu1 %v6486_v35  ;;  %11241 = vmatprep.subr.mxu1 %v14530_v24 }
0x13b9   :  { %v13522_v56 = vpop.eup %11588  ;;  %6475 = vadd.xlane.f32.xlu0 %v6474_v28  ;;  %11242 = vmatpush3.msra.mxu1 %v11583_v61 }
0x13ba   :  { %v13524_v34 = vpop.eup %11590  ;;  %11253 = vmatpush3.msra.mxu0 %v11581_v36  ;;  %11243 = vmatprep.subr.mxu1 %v14530_v24  ;;  %v6608_v0 = vsel %vm1470_vm5, %v13522_v56, 0.0 }
0x13bb   :  { %11254 = vmatprep.subr.mxu0 %v14530_v24  ;;  %11244 = vmatpush3.msra.mxu1 %v11575_v20  ;;  %v6605_v14 = vsel %vm1470_vm5, %v13524_v34, 0.0 }
0x13bc   :  { %11255 = vmatpush3.msra.mxu0 %v11577_v9  ;;  %6609 = vadd.xlane.f32.xlu1 %v6608_v0 }
0x13bd   :  { %11256 = vmatprep.subr.mxu0 %v14530_v24  ;;  %11245 = vmatprep.subr.mxu1 %v14530_v24 }
0x13be   :  { %6606 = vadd.xlane.f32.xlu0 %v6605_v14  ;;  %11246 = vmatpush3.msra.mxu1 %v13509_v41 }
0x13bf   :  { %11257 = vmatpush3.msra.mxu0 %v11579_v2  ;;  %11261 = vmatprep.subr.mxu1 %v14530_v24 }
0x13c0   :  { %7059 = vmatprep.subr.mxu0 %v13536_v19 }
0x1420   :  { %v6467_v31 = vpop.xlane.xlu0 %6466 }
0x1428   :  { %v6470_v8 = vpop.xlane.xlu1 %6469 }
0x142c   :  { %v6482_v37 = vpop.xlane.xlu1 %6481  ;;  %v6479_v48 = vpop.xlane.xlu0 %6478 }
0x142d   :  { %11592 = vrcp.f32 %v6482_v37 }
0x142e   :  { %11594 = vrcp.f32 %v6479_v48 }
0x142f   :  { %11596 = vrcp.f32 %v6470_v8 }
0x1430   :  { %11598 = vrcp.f32 %v6467_v31 }
0x1438   :  { %v6485_v54 = vpop.xlane.xlu1 %6484 }
0x1439   :  { %11600 = vrcp.f32 %v6485_v54  ;;  %v6473_v32 = vpop.xlane.xlu0 %6472 }
0x143a   :  { %11602 = vrcp.f32 %v6473_v32  ;;  %v11593_v40 = vpop.eup %11592 }
0x143b   :  { %v11595_v59 = vpop.eup %11594  ;;  %v6502_v52 = vmul.f32 %v11593_v40, %v6482_v37 }
0x143c   :  { %v11597_v62 = vpop.eup %11596  ;;  %v6501_v23 = vmul.f32 %v11595_v59, %v6479_v48 }
0x143d   :  { %v11599_v12 = vpop.eup %11598  ;;  %v6498_v7 = vmul.f32 %v11597_v62, %v6470_v8  ;;  %v6510_v20 = vsub.f32 2.0, %v6502_v52 }
0x143e   :  { %v6497_v16 = vmul.f32 %v11599_v12, %v6467_v31  ;;  %v6509_v21 = vsub.f32 2.0, %v6501_v23  ;;  %v10947_v23 = vld [vmem:[%s14439_s0 + $0x8] sm:$0x3] }
0x143f   :  { %v6506_v15 = vsub.f32 2.0, %v6498_v7  ;;  %v6518_v43 = vmul.f32 %v11593_v40, %v6510_v20 }
0x1440   :  { %v6505_v2 = vsub.f32 2.0, %v6497_v16  ;;  %v6517_v27 = vmul.f32 %v11595_v59, %v6509_v21 }
0x1441   :  { %v6488_v33 = vpop.xlane.xlu1 %6487  ;;  %v6514_v18 = vmul.f32 %v11597_v62, %v6506_v15  ;;  %v6555_v13 = vrot.slane %v6518_v43, %v12294_v45  ;;  %v13589_v43 = vld [vmem:[#allocation4 + $0xa0] sm:$0xff] }
0x1442   :  { %11604 = vrcp.f32 %v6488_v33  ;;  %v6476_v25 = vpop.xlane.xlu0 %6475  ;;  %v6513_v60 = vmul.f32 %v11599_v12, %v6505_v2  ;;  %v6551_v26 = vrot.slane %v6517_v27, %v12300_v49  ;;  %v13586_v2 = vld [vmem:[#allocation4 + $0x108] sm:$0xff]  ;;  %v13592_v27 = vld [vmem:[#allocation4 + $0x58] sm:$0xff] }
0x1443   :  { %11606 = vrcp.f32 %v6476_v25  ;;  %v6536_v36 = vrot.slane %v6514_v18, %v12294_v45  ;;  %v13602_v18 = vld [vmem:[#allocation4 + $0x8] sm:$0xff] }
0x1444   :  { %v6532_v28 = vrot.slane %v6513_v60, %v12300_v49  ;;  %v6556_v14 = vsel %vm1408_vm7, %v6555_v13, %v6551_v26  ;;  %v13618_v60 = vld [vmem:[#allocation4 + $0x118] sm:$0xff]  ;;  %v13627_v26 = vld [vmem:[#allocation4 + $0x10] sm:$0xff] }
0x1445   :  { %v6610_v50 = vpop.xlane.xlu1 %6609  ;;  %v13624_v13 = vld [vmem:[#allocation4 + $0x18] sm:$0xff] }
0x1446   :  { %v11601_v4 = vpop.eup %11600  ;;  %11608 = vrcp.f32 %v6610_v50  ;;  %v6537_v48 = vsel %vm1408_vm7, %v6536_v36, %v6532_v28  ;;  %v5743_v36 = vld [vmem:[#allocation3 + $0x98] sm:$0x3] }
0x1447   :  { %v11603_v41 = vpop.eup %11602  ;;  %v6503_v58 = vmul.f32 %v11601_v4, %v6485_v54  ;;  %v6607_v42 = vpop.xlane.xlu0 %6606 }
0x1448   :  { %v6499_v63 = vmul.f32 %v11603_v41, %v6473_v32  ;;  %11610 = vrcp.f32 %v6607_v42 }
0x1449   :  { %v6511_v47 = vsub.f32 2.0, %v6503_v58 }
0x144a   :  { %v6507_v9 = vsub.f32 2.0, %v6499_v63 }
0x144b   :  { %v6519_v38 = vmul.f32 %v11601_v4, %v6511_v47  ;;  %v13573_v47 = vld [vmem:[#allocation4 + $0xf0] sm:$0xff] }
0x144c   :  { %v6515_v53 = vmul.f32 %v11603_v41, %v6507_v9  ;;  %v13578_v9 = vld [vmem:[#allocation4 + $0xa8] sm:$0xff] }
0x144d   :  { %v6560_v61 = vrot.slane %v6519_v38, %v12297_v46  ;;  %v13605_v38 = vld [vmem:[#allocation4 + $0xb8] sm:$0xff] }
0x144e   :  { %v6541_v29 = vrot.slane %v6515_v53, %v12297_v46  ;;  %v13611_v53 = vld [vmem:[#allocation4 + $0xb0] sm:$0xff] }
0x144f   :  { %v11605_v10 = vpop.eup %11604  ;;  %v6561_v54 = vsel %vm1415_vm8, %v6560_v61, %v6556_v14 }
0x1450   :  { %v11607_v3 = vpop.eup %11606  ;;  %v6504_v22 = vmul.f32 %v11605_v10, %v6488_v33  ;;  %v6542_v33 = vsel %vm1415_vm8, %v6541_v29, %v6537_v48 }
0x1451   :  { %v6500_v11 = vmul.f32 %v11607_v3, %v6476_v25 }
0x1452   :  { %v6512_v51 = vsub.f32 2.0, %v6504_v22  ;;  %v13615_v22 = vld [vmem:[#allocation4 + $0x68] sm:$0xff] }
0x1453   :  { %v11609_v39 = vpop.eup %11608  ;;  %v6508_v6 = vsub.f32 2.0, %v6500_v11  ;;  %v13621_v11 = vld [vmem:[#allocation4 + $0x60] sm:$0xff] }
0x1454   :  { %v6520_v5 = vmul.f32 %v11605_v10, %v6512_v51  ;;  %v6614_v1 = vmul.f32 %v11609_v39, %v6610_v50  ;;  %v13599_v10 = vld [vmem:[#allocation4 + $0x100] sm:$0xff]  ;;  %v13630_v51 = vld [vmem:[#allocation4 + $0x128] sm:$0xff] }
0x1455   :  { %v11611_v35 = vpop.eup %11610  ;;  %v6516_v0 = vmul.f32 %v11607_v3, %v6508_v6  ;;  %v13608_v3 = vld [vmem:[#allocation4] sm:$0xff] }
0x1456   :  { %v6565_v8 = vrot.slane %v6520_v5, %v12303_v57  ;;  %v6616_v31 = vsub.f32 2.0, %v6614_v1  ;;  %v6613_v37 = vmul.f32 %v11611_v35, %v6607_v42 }
0x1457   :  { %v6546_v32 = vrot.slane %v6516_v0, %v12303_v57 }
0x1458   :  { %v6566_v40 = vsel %vm1422_vm9, %v6565_v8, %v6561_v54  ;;  %v6618_v25 = vmul.f32 %v11609_v39, %v6616_v31  ;;  %v6615_v59 = vsub.f32 2.0, %v6613_v37  ;;  %v6099_v39 = vpop.f32.mrf.mxu0 }
0x1459   :  { %v6547_v62 = vsel %vm1422_vm9, %v6546_v32, %v6542_v33  ;;  %v6100_v61 = vadd.f32 %v6099_v39, %v5743_v36  ;;  %v13657_v39 = vld [vmem:[#allocation4 + $0xc0] sm:$0xff]  ;;  %v13660_v36 = vld [vmem:[#allocation4 + $0xd0] sm:$0xff] }
0x145a   :  { %v6567_v12 = vsel %vm1443_vm10, %v6566_v40, %v6547_v62  ;;  %v6628_v50 = vrot.slane %v6618_v25, %v12300_v49  ;;  %v6617_v4 = vmul.f32 %v11611_v35, %v6615_v59  ;;  %14589 = vst [vmem:[#allocation15_spill] sm:$0xff] %v13657_v39  ;;  %14590 = vst [vmem:[#allocation16_spill] sm:$0xff] %v13660_v36 }
0x145b   :  { %v6569_v52 = vmul.f32 %v6567_v12, %v13339_v55  ;;  %v10953_v6 = vmul.f32 -1.442695, %v6100_v61  ;;  %v13663_v61 = vld [vmem:[#allocation4 + $0x78] sm:$0xff] }
0x145c   :  { %v6624_v41 = vrot.slane %v6617_v4, %v12300_v49  ;;  %14591 = vst [vmem:[#allocation17_spill] sm:$0xff] %v13663_v61 }
0x145d   :  { %v6577_v7 = vrot.slane %v6569_v52, %v12320_v30  ;;  %11612 = vpow2.f32 %v10953_v6  ;;  %v13666_v6 = vld [vmem:[#allocation4 + $0x88] sm:$0xff] }
0x145e   :  { %v6629_v58 = vsel %vm1443_vm10, %v6628_v50, %v6624_v41  ;;  %14592 = vst [vmem:[#allocation18_spill] sm:$0xff] %v13666_v6 }
0x145f   :  { %v6631_v42 = vmul.f32 %v10947_v23, %v6629_v58  ;;  %v6585_v63 = vrot.slane %v6577_v7, %v12320_v30  ;;  %v6578_v16 = vcombine.high %v6577_v7, %v6577_v7 }
0x1461   :  { %11248 = vmatmul.mubr.msk.f32.vlgmr.msra.gmra.mxu1 %vm537_vm4, %v6585_v63  ;;  %v6592_v20 = vrot.slane %v6578_v16, %v12320_v30  ;;  %v6639_v55 = vrot.slane %v6631_v42, %v12320_v30 }
0x1462   :  { %11262 = vmatpush3.msk.msra.mxu1 %vm1686_vm11, %v13524_v34  ;;  %11263 = vmatprep.mubr.msk.f32.mxu1 %vm11990_vm6, %v14530_v24 }
0x1463   :  { %11259 = vmatmul.mubr.msk.f32.vlgmr.msra.gmra.mxu0 %vm537_vm4, %v6592_v20  ;;  %11266 = vmatprep.subr.mxu1 %v14530_v24  ;;  %v6647_v21 = vrot.slane %v6639_v55, %v12320_v30  ;;  %v6640_v15 = vcombine.high %v6639_v55, %v6639_v55  ;;  %v13645_v55 = vld [vmem:[#allocation4 + $0x110] sm:$0xff] }
0x1464   :  { %7060 = vmatpush1.msra.mxu0 %v13573_v47  ;;  %7099 = vmatprep.mubr.f32.mxu0 %v14530_v24 }
0x1465   :  { %11264 = vmatmul.mubr.msk.f32.vlgmr.msra.gmra.mxu1 %vm1683_vm12, %v6647_v21  ;;  %7061 = vmatprep.subr.mxu0 %v13578_v9  ;;  %v6654_v34 = vrot.slane %v6640_v15, %v12320_v30  ;;  %v13648_v21 = vld [vmem:[#allocation4 + $0x120] sm:$0xff]  ;;  %v13651_v15 = vld [vmem:[#allocation4 + $0xc8] sm:$0xff] }
0x1466   :  { %11267 = vmatpush3.msk.msra.mxu1 %vm1686_vm11, %v13522_v56  ;;  %11268 = vmatprep.mubr.msk.f32.mxu1 %vm11990_vm6, %v14530_v24  ;;  %v13596_v56 = vld [vmem:[#allocation4 + $0x50] sm:$0xff] }
0x1467   :  { %7130 = vmatprep.subr.mxu1 %v13586_v2  ;;  %7062 = vmatpush1.msra.mxu0 %v13589_v43 }
0x1468   :  { %7063 = vmatprep.subr.mxu0 %v13592_v27 }
0x1469   :  { %11269 = vmatmul.mubr.msk.f32.vlgmr.msra.gmra.mxu1 %vm1683_vm12, %v6654_v34  ;;  %7064 = vmatpush1.msra.mxu0 %v13596_v56  ;;  %v13654_v34 = vld [vmem:[#allocation4 + $0xd8] sm:$0xff] }
0x146a   :  { %7131 = vmatpush1.msra.mxu1 %v13599_v10  ;;  %7065 = vmatprep.subr.mxu0 %v13602_v18  ;;  %v11613_v29 = vpop.eup %11612 }
0x146b   :  { %7132 = vmatprep.subr.mxu1 %v13605_v38  ;;  %7066 = vmatpush1.msra.mxu0 %v13608_v3  ;;  %v6658_v5 = vadd.f32 1.0, %v11613_v29  ;;  %v13669_v29 = vld [vmem:[#allocation4 + $0x70] sm:$0xff] }
0x146c   :  { %7133 = vmatpush1.msra.mxu1 %v13611_v53  ;;  %7170 = vmatprep.mubr.f32.mxu1 %v14530_v24  ;;  %14593 = vst [vmem:[#allocation19_spill] sm:$0xff] %v13669_v29 }
0x146d   :  { %7134 = vmatprep.subr.mxu1 %v13615_v22  ;;  %7201 = vmatprep.subr.mxu0 %v13618_v60  ;;  %11614 = vrcp.f32 %v6658_v5  ;;  %v13672_v5 = vld [vmem:[#allocation4 + $0x80] sm:$0xff] }
0x146e   :  { %7135 = vmatpush1.msra.mxu1 %v13621_v11  ;;  %14594 = vst [vmem:[#allocation20_spill] sm:$0xff] %v13672_v5 }
0x146f   :  { %7136 = vmatprep.subr.mxu1 %v13624_v13 }
0x1470   :  { %7137 = vmatpush1.msra.mxu1 %v13627_v26 }
0x1471   :  { %7272 = vmatprep.subr.mxu1 %v13630_v51 }
0x147a   :  { %v11615_v33 = vpop.eup %11614 }
0x1521   :  { %v6729_v1 = vpop.f32.mrf.mxu1 }
0x1523   :  { %v11249_v35 = vpop.f32.mrf.mxu1  ;;  %v6801_v28 = vpop.f32.mrf.mxu0 }
0x1524   :  { %v13678_v35 = vld [vmem:[#allocation4 + $0x38] sm:$0xff] }
0x1525   :  { %v11260_v0 = vpop.f32.mrf.mxu0  ;;  %v6876_v14 = vpop.f32.mrf.mxu1  ;;  %14596 = vst [vmem:[#allocation22_spill] sm:$0xff] %v13678_v35 }
0x1526   :  { %v6955_v54 = vadd.f32 %v6876_v14, %v6729_v1  ;;  %v13675_v1 = vld [vmem:[#allocation4 + $0x28] sm:$0xff]  ;;  %v13685_v0 = vld [vmem:[#allocation4 + $0x30] sm:$0xff]  ;;  %v13691_v14 = vld [vmem:[#allocation4 + $0x138] sm:$0xff] }
0x1527   :  { %v11265_v8 = vpop.f32.mrf.mxu1  ;;  %14595 = vst [vmem:[#allocation21_spill] sm:$0xff] %v13675_v1  ;;  %14598 = vst [vmem:[#allocation24_spill] sm:$0xff] %v13685_v0 }
0x1528   :  { %14599 = vst [vmem:[#allocation25_spill] sm:$0xff] %v13691_v14  ;;  %v13695_v8 = vld [vmem:[#allocation4 + $0x130] sm:$0xff] }
0x1529   :  { %v6951_v31 = vpop.f32.mrf.mxu1  ;;  %14600 = vst [vmem:[#allocation26_spill] sm:$0xff] %v13695_v8 }
0x152a   :  { %v6956_v37 = vadd.f32 %v6951_v31, %v6801_v28  ;;  %v13681_v28 = vld [vmem:[#allocation4 + $0x20] sm:$0xff]  ;;  %v13699_v31 = vld [vmem:[#allocation4 + $0xe8] sm:$0xff] }
0x152b   :  { %v11270_v48 = vpop.f32.mrf.mxu1  ;;  %14597 = vst [vmem:[#allocation23_spill] sm:$0xff] %v13681_v28  ;;  %14601 = vst [vmem:[#allocation27_spill] sm:$0xff] %v13699_v31 }
0x152c   :  { %v6959_v32 = vrot.slane %v6956_v37, 7  ;;  %v13707_v48 = vld [vmem:[#allocation4 + $0x98] sm:$0xff] }
0x152d   :  { %14603 = vst [vmem:[#allocation29_spill] sm:$0xff] %v13707_v48 }
0x152e   :  { %v6960_v40 = vsel %vm1443_vm10, %v6959_v32, %v6955_v54  ;;  %v13713_v32 = vld [vmem:[#allocation4 + $0x48] sm:$0xff] }
0x152f   :  { %v6962_v25 = vmul.f32 %v11615_v33, %v6960_v40  ;;  %14605 = vst [vmem:[#allocation31_spill] sm:$0xff] %v13713_v32  ;;  %v13716_v33 = vld [vmem:[#allocation4 + $0x40] sm:$0xff]  ;;  %v6992_v40 = vld [vmem:[#allocation3 + $0x50] sm:$0xc] }
0x1530   :  { %14606 = vst [vmem:[#allocation32_spill] sm:$0xff] %v13716_v33 }
0x1531   :  { %v6964_v59 = vrot.slane %v6962_v25, 1  ;;  %6970 = vst.msk [vmem:[#allocation7 + $0x8] sm:$0x3] %vm42_vm0, %v6962_v25  ;;  %v6967_v12 = vsub.f32 %v6955_v54, %v6962_v25  ;;  %v13710_v54 = vld [vmem:[#allocation4 + $0x90] sm:$0xff]  ;;  %v7012_v25 = vrot.slane %v6992_v40, 2 }
0x1532   :  { %14604 = vst [vmem:[#allocation30_spill] sm:$0xff] %v13710_v54  ;;  %v6996_v40 = vld [vmem:[#allocation3 + $0x70] sm:$0xc] }
0x1533   :  { %v6968_v62 = vsub.f32 %v6956_v37, %v6964_v59  ;;  %v13704_v37 = vld [vmem:[#allocation4 + $0xe0] sm:$0xff] }
0x1534   :  { %14602 = vst [vmem:[#allocation28_spill] sm:$0xff] %v13704_v37 }
0x1535   :  { %v6973_v50 = vrot.slane %v6968_v62, 7  ;;  %v6994_v62 = vld [vmem:[#allocation3 + $0x60] sm:$0xc] }
0x1537   :  { %v6974_v4 = vsel %vm1443_vm10, %v6973_v50, %v6967_v12 }
0x1538   :  { %6977 = vst.msk [vmem:[#allocation8 + $0x8] sm:$0x3] %vm42_vm0, %v6974_v4  ;;  %6978 = vst.msk [vmem:[#allocation2] sm:$0x3] %vm42_vm0, %v6974_v4  ;;  %v7014_v4 = vrot.slane %v6994_v62, 2  ;;  %v7016_v62 = vrot.slane %v6996_v40, 2 }
0x1539   :  { %v6999_v40 = vld [vmem:[#allocation3 + $0x88] sm:$0xc] }
0x153f   :  { %v13638_v52 = vld [vmem:[#allocation2] sm:$0x3] }
0x1540   :  { %v6982_v23 = vsel %vm42_vm0, %v13638_v52, 0.0 }
0x1541   :  { %6983 = vadd.xlane.f32.xlu0 %v6982_v23 }
0x15ca   :  { %v6984_v41 = vpop.xlane.xlu0 %6983 }
0x15cb   :  { %vm6985_vm2 = vcmp.eq.f32.partialorder %v6984_v41, 0.0 }
0x15cc   :  { %v6986_v7 = vsel %vm6985_vm2, 1.0, %v6984_v41  ;;  %v6993_v41 = vld [vmem:[#allocation3 + $0x58] sm:$0xc] }
0x15cd   :  { %11616 = vrcp.f32 %v6986_v7 }
0x15da   :  { %v11617_v58 = vpop.eup %11616 }
0x15db   :  { %v6988_v42 = vmul.f32 %v11617_v58, %v6986_v7 }
0x15dd   :  { %v6989_v63 = vsub.f32 2.0, %v6988_v42  ;;  %v6995_v42 = vld [vmem:[#allocation3 + $0x68] sm:$0xc] }
0x15df   :  { %v6990_v16 = vmul.f32 %v11617_v58, %v6989_v63  ;;  %v7013_v58 = vrot.slane %v6993_v41, 2 }
0x15e1   :  { %v6991_v20 = vmul.f32 %v6990_v16, %v13638_v52 }
0x15e3   :  { %10961 = vmatmul.mubr.msk.f32.vlgmr.msra.gmra.mxu0 %vm537_vm4, %v6991_v20  ;;  %10962 = vmatmul.mubr.msk.f32.vlgmr.msra.gmra.mxu1 %vm537_vm4, %v6991_v20 }
0x15e4   :  { %7202 = vmatpush1.msra.mxu0 %v13645_v55  ;;  %7273 = vmatpush1.msra.mxu1 %v13648_v21 }
0x15e5   :  { %7203 = vmatprep.subr.mxu0 %v13651_v15  ;;  %7274 = vmatprep.subr.mxu1 %v13654_v34 }
0x15e6   :  { %7204 = vmatpush1.msra.mxu0 %v13657_v39  ;;  %7275 = vmatpush1.msra.mxu1 %v13660_v36 }
0x15e7   :  { %7205 = vmatprep.subr.mxu0 %v13663_v61  ;;  %7276 = vmatprep.subr.mxu1 %v13666_v6 }
0x15e8   :  { %7206 = vmatpush1.msra.mxu0 %v13669_v29  ;;  %7277 = vmatpush1.msra.mxu1 %v13672_v5 }
0x15e9   :  { %7207 = vmatprep.subr.mxu0 %v13675_v1  ;;  %7278 = vmatprep.subr.mxu1 %v13678_v35 }
0x15ea   :  { %7208 = vmatpush1.msra.mxu0 %v13681_v28  ;;  %7241 = vmatprep.mubr.f32.mxu0 %v14530_v24 }
0x15eb   :  { %7279 = vmatpush1.msra.mxu1 %v13685_v0  ;;  %7312 = vmatprep.mubr.f32.mxu1 %v14530_v24 }
0x15ec   :  { %10963 = vmatmul.mubr.msk.f32.vlgmr.msra.gmra.mxu0 %vm537_vm4, %v6991_v20  ;;  %10964 = vmatmul.mubr.msk.f32.vlgmr.msra.gmra.mxu1 %vm537_vm4, %v6991_v20 }
0x15ed   :  { %7343 = vmatprep.subr.mxu0 %v13691_v14  ;;  %7383 = vmatprep.mubr.f32.mxu0 %v14530_v24 }
0x15ee   :  { %7344 = vmatpush1.msra.mxu0 %v13695_v8  ;;  %11271 = vmatprep.subr.mxu1 %v14530_v24 }
0x15ef   :  { %7345 = vmatprep.subr.mxu0 %v13699_v31  ;;  %11279 = vmatprep.mubr.msk.f32.mxu1 %vm11990_vm6, %v14530_v24 }
0x15f0   :  { %7346 = vmatpush1.msra.mxu0 %v13704_v37 }
0x15f1   :  { %7347 = vmatprep.subr.mxu0 %v13707_v48 }
0x15f2   :  { %7348 = vmatpush1.msra.mxu0 %v13710_v54 }
0x15f3   :  { %7349 = vmatprep.subr.mxu0 %v13713_v32 }
0x15f4   :  { %7350 = vmatpush1.msra.mxu0 %v13716_v33 }
0x15f5   :  { %10965 = vmatmul.mubr.msk.f32.vlgmr.msra.gmra.mxu0 %vm537_vm4, %v6991_v20  ;;  %11282 = vmatprep.subr.mxu0 %v14530_v24  ;;  %v7015_v20 = vrot.slane %v6995_v42, 2  ;;  %v6997_v42 = vld [vmem:[#allocation3 + $0x78] sm:$0xc] }
0x15f6   :  { %11290 = vmatprep.mubr.msk.f32.mxu0 %vm11990_vm6, %v14530_v24 }
0x16a3   :  { %v7101_v59 = vpop.f32.mrf.mxu0  ;;  %v7172_v50 = vpop.f32.mrf.mxu1 }
0x16a4   :  { %v13723_v12 = vadd.f32 %v7101_v59, %v7012_v25  ;;  %v13729_v23 = vadd.f32 %v7172_v50, %v7014_v4  ;;  %v6998_v4 = vld [vmem:[#allocation3 + $0x80] sm:$0xc] }
0x16a5   :  { %v7103_v7 = vpop.f32.mrf.mxu0  ;;  %v7174_v16 = vpop.f32.mrf.mxu1 }
0x16a6   :  { %7394 = vrot.lane.b32.xlu0 %v13723_v12, %s11985_s4  ;;  %7391 = vrot.lane.b32.xlu1 %v13723_v12, %s11986_s19  ;;  %v13739_v63 = vadd.f32 %v7103_v7, %v7013_v58  ;;  %v13745_v25 = vadd.f32 %v7174_v16, %v7015_v20  ;;  %v7018_v7 = vrot.slane %v6998_v4, 2  ;;  %v7017_v20 = vrot.slane %v6997_v42, 2 }
0x16a7   :  { %v7019_v4 = vrot.slane %v6999_v40, 2 }
0x16aa   :  { %7397 = vrot.lane.b32.xlu1 %v13723_v12, %s11987_s20  ;;  %7411 = vrot.lane.b32.xlu0 %v13729_v23, %s11986_s19 }
0x16ac   :  { %v7243_v59 = vpop.f32.mrf.mxu0  ;;  %v7314_v41 = vpop.f32.mrf.mxu1 }
0x16ad   :  { %v13751_v50 = vadd.f32 %v7243_v59, %v7016_v62  ;;  %v13761_v58 = vadd.f32 %v7314_v41, %v7018_v7  ;;  %v7000_v41 = vld [vmem:[#allocation3 + $0x90] sm:$0xc] }
0x16ae   :  { %7414 = vrot.lane.b32.xlu1 %v13729_v23, %s11985_s4  ;;  %7417 = vrot.lane.b32.xlu0 %v13729_v23, %s11987_s20  ;;  %v7245_v16 = vpop.f32.mrf.mxu0  ;;  %v7316_v62 = vpop.f32.mrf.mxu1  ;;  %v7020_v33 = vrot.slane %v7000_v41, 2 }
0x16af   :  { %v13771_v59 = vadd.f32 %v7245_v16, %v7017_v20  ;;  %v13777_v7 = vadd.f32 %v7316_v62, %v7019_v4 }
0x16b2   :  { %7401 = vrot.lane.b32.xlu1 %v13739_v63, %s11986_s19  ;;  %7404 = vrot.lane.b32.xlu0 %v13739_v63, %s11985_s4 }
0x16b5   :  { %v7385_v42 = vpop.f32.mrf.mxu0 }
0x16b6   :  { %7407 = vrot.lane.b32.xlu1 %v13739_v63, %s11987_s20  ;;  %7424 = vrot.lane.b32.xlu0 %v13745_v25, %s11985_s4  ;;  %v13783_v16 = vadd.f32 %v7385_v42, %v7020_v33 }
0x16ba   :  { %7421 = vrot.lane.b32.xlu1 %v13745_v25, %s11986_s19  ;;  %7431 = vrot.lane.b32.xlu0 %v13751_v50, %s11986_s19 }
0x16be   :  { %7427 = vrot.lane.b32.xlu1 %v13745_v25, %s11987_s20  ;;  %7437 = vrot.lane.b32.xlu0 %v13751_v50, %s11987_s20 }
0x16c2   :  { %7434 = vrot.lane.b32.xlu1 %v13751_v50, %s11985_s4  ;;  %7451 = vrot.lane.b32.xlu0 %v13761_v58, %s11986_s19 }
0x16c6   :  { %7454 = vrot.lane.b32.xlu1 %v13761_v58, %s11985_s4  ;;  %7457 = vrot.lane.b32.xlu0 %v13761_v58, %s11987_s20 }
0x16ca   :  { %7441 = vrot.lane.b32.xlu1 %v13771_v59, %s11986_s19  ;;  %7444 = vrot.lane.b32.xlu0 %v13771_v59, %s11985_s4 }
0x16ce   :  { %7447 = vrot.lane.b32.xlu1 %v13771_v59, %s11987_s20  ;;  %7464 = vrot.lane.b32.xlu0 %v13777_v7, %s11985_s4 }
0x16d2   :  { %7461 = vrot.lane.b32.xlu1 %v13777_v7, %s11986_s19  ;;  %7671 = vrot.lane.b32.xlu0 %v13783_v16, %s11986_s19 }
0x16d6   :  { %7467 = vrot.lane.b32.xlu1 %v13777_v7, %s11987_s20  ;;  %7677 = vrot.lane.b32.xlu0 %v13783_v16, %s11987_s20 }
0x16da   :  { %7674 = vrot.lane.b32.xlu1 %v13783_v16, %s11985_s4 }
0x1718   :  { %v7395_v20 = vpop.permute.xlu0 %7394  ;;  %v7392_v40 = vpop.permute.xlu1 %7391 }
0x1719   :  { %v7470_v48 = vcombine.low %v13723_v12, %v7395_v20 }
0x171b   :  { %v7477_v0 = vrot.slane %v7470_v48, %v14587_v44 }
0x171c   :  { %v7398_v62 = vpop.permute.xlu1 %7397  ;;  %v7412_v33 = vpop.permute.xlu0 %7411 }
0x171d   :  { %v7478_v42 = vcombine.low %v7392_v40, %v7398_v62 }
0x171f   :  { %v7485_v37 = vrot.slane %v7478_v42, %v14587_v44 }
0x1720   :  { %v7415_v4 = vpop.permute.xlu1 %7414  ;;  %v7418_v41 = vpop.permute.xlu0 %7417 }
0x1721   :  { %v7520_v35 = vcombine.low %v13729_v23, %v7415_v4  ;;  %v7502_v1 = vcombine.low %v7477_v0, %v7485_v37  ;;  %v7528_v5 = vcombine.low %v7412_v33, %v7418_v41 }
0x1723   :  { %v7527_v20 = vrot.slane %v7520_v35, %v14587_v44  ;;  %v7509_v48 = vrot.slane %v7502_v1, %v14588_v17 }
0x1724   :  { %v7402_v32 = vpop.permute.xlu1 %7401  ;;  %v7405_v54 = vpop.permute.xlu0 %7404 }
0x1725   :  { %v7486_v31 = vcombine.low %v13739_v63, %v7405_v54  ;;  %v7535_v54 = vrot.slane %v7528_v5, %v14587_v44 }
0x1727   :  { %v7493_v29 = vrot.slane %v7486_v31, %v14587_v44  ;;  %v7552_v31 = vcombine.low %v7527_v20, %v7535_v54 }
0x1728   :  { %v7408_v8 = vpop.permute.xlu1 %7407  ;;  %v7425_v14 = vpop.permute.xlu0 %7424 }
0x1729   :  { %v7494_v28 = vcombine.low %v7402_v32, %v7408_v8  ;;  %v7536_v63 = vcombine.low %v13745_v25, %v7425_v14  ;;  %v7559_v1 = vrot.slane %v7552_v31, %v14588_v17 }
0x172b   :  { %v7501_v40 = vrot.slane %v7494_v28, %v14587_v44  ;;  %v7543_v28 = vrot.slane %v7536_v63, %v14587_v44 }
0x172c   :  { %v7422_v62 = vpop.permute.xlu1 %7421  ;;  %v7432_v6 = vpop.permute.xlu0 %7431 }
0x172d   :  { %v7510_v12 = vcombine.low %v7493_v29, %v7501_v40 }
0x172f   :  { %v7517_v8 = vrot.slane %v7510_v12, %v14588_v17 }
0x1730   :  { %v7428_v32 = vpop.permute.xlu1 %7427  ;;  %v7438_v0 = vpop.permute.xlu0 %7437 }
0x1731   :  { %v7544_v37 = vcombine.low %v7422_v62, %v7428_v32  ;;  %v13807_v23 = vcombine.low %v7509_v48, %v7517_v8  ;;  %v13824_v32 = vcombine.high %v7509_v48, %v7517_v8 }
0x1733   :  { %v7551_v29 = vrot.slane %v7544_v37, %v14587_v44  ;;  %v7705_v35 = vsel %vm537_vm4, %v13807_v23, -inf  ;;  %v7578_v37 = vcombine.low %v7432_v6, %v7438_v0 }
0x1734   :  { %v7435_v5 = vpop.permute.xlu1 %7434  ;;  %7706 = vmax.xlane.f32.xlu1 %v7705_v35  ;;  %v7452_v14 = vpop.permute.xlu0 %7451 }
0x1735   :  { %v7560_v25 = vcombine.low %v7543_v28, %v7551_v29  ;;  %v7570_v62 = vcombine.low %v13751_v50, %v7435_v5  ;;  %v7717_v50 = vsel %vm537_vm4, %v13824_v32, -inf  ;;  %v7585_v5 = vrot.slane %v7578_v37, %v14587_v44 }
0x1737   :  { %v7567_v33 = vrot.slane %v7560_v25, %v14588_v17  ;;  %v7577_v31 = vrot.slane %v7570_v62, %v14587_v44 }
0x1738   :  { %v7455_v4 = vpop.permute.xlu1 %7454  ;;  %v7458_v41 = vpop.permute.xlu0 %7457 }
0x1739   :  { %v13815_v42 = vcombine.high %v7559_v1, %v7567_v33  ;;  %v13817_v40 = vcombine.low %v7559_v1, %v7567_v33  ;;  %v7620_v1 = vcombine.low %v13761_v58, %v7455_v4  ;;  %v7628_v33 = vcombine.low %v7452_v14, %v7458_v41 }
0x173a   :  { %v7602_v48 = vcombine.low %v7577_v31, %v7585_v5 }
0x173b   :  { %v7720_v12 = vsel %vm537_vm4, %v13815_v42, -inf  ;;  %v7708_v54 = vsel %vm537_vm4, %v13817_v40, -inf }
0x173c   :  { %v7442_v20 = vpop.permute.xlu1 %7441  ;;  %7721 = vmax.xlane.f32.xlu1 %v7720_v12  ;;  %v7445_v63 = vpop.permute.xlu0 %7444  ;;  %7709 = vmax.xlane.f32.xlu0 %v7708_v54  ;;  %v7627_v12 = vrot.slane %v7620_v1, %v14587_v44  ;;  %v7635_v54 = vrot.slane %v7628_v33, %v14587_v44 }
0x173d   :  { %v7586_v28 = vcombine.low %v13771_v59, %v7445_v63 }
0x173f   :  { %v7593_v6 = vrot.slane %v7586_v28, %v14587_v44  ;;  %v7652_v28 = vcombine.low %v7627_v12, %v7635_v54 }
0x1740   :  { %v7448_v29 = vpop.permute.xlu1 %7447  ;;  %v7465_v35 = vpop.permute.xlu0 %7464  ;;  %7718 = vmax.xlane.f32.xlu0 %v7717_v50 }
0x1741   :  { %v7594_v25 = vcombine.low %v7442_v20, %v7448_v29  ;;  %v7636_v63 = vcombine.low %v13777_v7, %v7465_v35  ;;  %v7609_v20 = vrot.slane %v7602_v48, %v14588_v17 }
0x1743   :  { %v7601_v8 = vrot.slane %v7594_v25, %v14587_v44  ;;  %v7643_v29 = vrot.slane %v7636_v63, %v14587_v44 }
0x1744   :  { %v7462_v0 = vpop.permute.xlu1 %7461  ;;  %v7672_v62 = vpop.permute.xlu0 %7671 }
0x1745   :  { %v7610_v59 = vcombine.low %v7593_v6, %v7601_v8  ;;  %v7659_v8 = vrot.slane %v7652_v28, %v14588_v17 }
0x1747   :  { %v7617_v37 = vrot.slane %v7610_v59, %v14588_v17 }
0x1748   :  { %v7468_v58 = vpop.permute.xlu1 %7467  ;;  %v7678_v14 = vpop.permute.xlu0 %7677 }
0x1749   :  { %v7644_v4 = vcombine.low %v7462_v0, %v7468_v58  ;;  %v7619_v41 = vcombine.high %v7609_v20, %v7617_v37  ;;  %v7618_v31 = vcombine.low %v7609_v20, %v7617_v37  ;;  %v7688_v5 = vcombine.low %v7672_v62, %v7678_v14 }
0x174b   :  { %v7651_v50 = vrot.slane %v7644_v4, %v14587_v44  ;;  %v7723_v25 = vsel %vm537_vm4, %v7619_v41, -inf  ;;  %v7711_v1 = vsel %vm537_vm4, %v7618_v31, -inf  ;;  %v7695_v48 = vrot.slane %v7688_v5, %v14587_v44 }
0x174c   :  { %v7675_v7 = vpop.permute.xlu1 %7674  ;;  %7724 = vmax.xlane.f32.xlu1 %v7723_v25  ;;  %7712 = vmax.xlane.f32.xlu0 %v7711_v1 }
0x174d   :  { %v7660_v35 = vcombine.low %v7643_v29, %v7651_v50  ;;  %v7680_v33 = vcombine.low %v13783_v16, %v7675_v7 }
0x174f   :  { %v7687_v6 = vrot.slane %v7680_v33, %v14587_v44  ;;  %v7667_v0 = vrot.slane %v7660_v35, %v14588_v17 }
0x1751   :  { %v7696_v59 = vcombine.low %v7687_v6, %v7695_v48  ;;  %v7669_v62 = vcombine.high %v7659_v8, %v7667_v0  ;;  %v7668_v12 = vcombine.low %v7659_v8, %v7667_v0 }
0x1753   :  { %v7726_v54 = vsel %vm537_vm4, %v7669_v62, -inf  ;;  %v7714_v63 = vsel %vm537_vm4, %v7668_v12, -inf  ;;  %v7703_v20 = vrot.slane %v7696_v59, %v14588_v17 }
0x1754   :  { %7727 = vmax.xlane.f32.xlu1 %v7726_v54  ;;  %7715 = vmax.xlane.f32.xlu0 %v7714_v63 }
0x1755   :  { %v7704_v16 = vcombine.high %v7703_v20, %v14530_v24  ;;  %v7881_v37 = vsel %vm1470_vm5, %v7703_v20, -inf }
0x1757   :  { %v7884_v58 = vsel %vm1470_vm5, %v7704_v16, -inf }
0x1758   :  { %7882 = vmax.xlane.f32.xlu0 %v7881_v37  ;;  %7885 = vmax.xlane.f32.xlu1 %v7884_v58 }
0x17bd   :  { %v7707_v14 = vpop.xlane.xlu1 %7706 }
0x17be   :  { %v7729_v4 = vsub.f32 %v13807_v23, %v7707_v14 }
0x17c0   :  { %v7737_v28 = vmul.f32 1.442695, %v7729_v4 }
0x17c2   :  { %11618 = vpow2.f32 %v7737_v28 }
0x17c5   :  { %v7722_v29 = vpop.xlane.xlu1 %7721  ;;  %v7710_v5 = vpop.xlane.xlu0 %7709 }
0x17c6   :  { %v7734_v50 = vsub.f32 %v13815_v42, %v7722_v29  ;;  %v7730_v25 = vsub.f32 %v13817_v40, %v7710_v5 }
0x17c8   :  { %v7747_v1 = vmul.f32 1.442695, %v7734_v50  ;;  %v7739_v7 = vmul.f32 1.442695, %v7730_v25 }
0x17c9   :  { %v7719_v35 = vpop.xlane.xlu0 %7718 }
0x17ca   :  { %11620 = vpow2.f32 %v7739_v7  ;;  %v7733_v33 = vsub.f32 %v13824_v32, %v7719_v35 }
0x17cb   :  { %11622 = vpow2.f32 %v7747_v1 }
0x17cc   :  { %v7745_v48 = vmul.f32 1.442695, %v7733_v33 }
0x17ce   :  { %11624 = vpow2.f32 %v7745_v48 }
0x17cf   :  { %v13858_v6 = vpop.eup %11618 }
0x17d0   :  { %v7753_v23 = vsel %vm537_vm4, %v13858_v6, 0.0 }
0x17d1   :  { %7754 = vadd.xlane.f32.xlu0 %v7753_v23 }
0x17d5   :  { %v7725_v8 = vpop.xlane.xlu1 %7724  ;;  %v7713_v42 = vpop.xlane.xlu0 %7712 }
0x17d6   :  { %v7735_v0 = vsub.f32 %v7619_v41, %v7725_v8  ;;  %v7731_v59 = vsub.f32 %v7618_v31, %v7713_v42 }
0x17d7   :  { %v11621_v40 = vpop.eup %11620 }
0x17d8   :  { %v7749_v54 = vmul.f32 1.442695, %v7735_v0  ;;  %v7741_v63 = vmul.f32 1.442695, %v7731_v59  ;;  %v7756_v37 = vsel %vm537_vm4, %v11621_v40, 0.0  ;;  %v11623_v58 = vpop.eup %11622 }
0x17d9   :  { %7757 = vadd.xlane.f32.xlu1 %v7756_v37  ;;  %v7768_v4 = vsel %vm537_vm4, %v11623_v58, 0.0 }
0x17da   :  { %11626 = vpow2.f32 %v7749_v54 }
0x17db   :  { %11628 = vpow2.f32 %v7741_v63  ;;  %v11625_v32 = vpop.eup %11624 }
0x17dc   :  { %v7765_v28 = vsel %vm537_vm4, %v11625_v32, 0.0 }
0x17dd   :  { %v7728_v14 = vpop.xlane.xlu1 %7727  ;;  %v7716_v29 = vpop.xlane.xlu0 %7715  ;;  %7769 = vadd.xlane.f32.xlu1 %v7768_v4  ;;  %7766 = vadd.xlane.f32.xlu0 %v7765_v28 }
0x17de   :  { %v7736_v50 = vsub.f32 %v7669_v62, %v7728_v14  ;;  %v7732_v41 = vsub.f32 %v7668_v12, %v7716_v29 }
0x17e0   :  { %v7751_v31 = vmul.f32 1.442695, %v7736_v50  ;;  %v7743_v5 = vmul.f32 1.442695, %v7732_v41 }
0x17e1   :  { %v7886_v25 = vpop.xlane.xlu1 %7885  ;;  %v7883_v1 = vpop.xlane.xlu0 %7882 }
0x17e2   :  { %11630 = vpow2.f32 %v7751_v31  ;;  %v7888_v7 = vsub.f32 %v7704_v16, %v7886_v25  ;;  %v7887_v35 = vsub.f32 %v7703_v20, %v7883_v1 }
0x17e3   :  { %11632 = vpow2.f32 %v7743_v5 }
0x17e4   :  { %v7891_v33 = vmul.f32 1.442695, %v7888_v7  ;;  %v7889_v48 = vmul.f32 1.442695, %v7887_v35 }
0x17e6   :  { %11634 = vpow2.f32 %v7891_v33 }
0x17e7   :  { %v11627_v23 = vpop.eup %11626  ;;  %11636 = vpow2.f32 %v7889_v48 }
0x17e8   :  { %v11629_v8 = vpop.eup %11628  ;;  %v7771_v42 = vsel %vm537_vm4, %v11627_v23, 0.0 }
0x17e9   :  { %7772 = vadd.xlane.f32.xlu1 %v7771_v42  ;;  %v7759_v62 = vsel %vm537_vm4, %v11629_v8, 0.0 }
0x17ea   :  { %7760 = vadd.xlane.f32.xlu0 %v7759_v62 }
0x17ef   :  { %v11631_v12 = vpop.eup %11630 }
0x17f0   :  { %v11633_v0 = vpop.eup %11632  ;;  %11283 = vmatpush3.msra.mxu0 %v11631_v12  ;;  %v7774_v59 = vsel %vm537_vm4, %v11631_v12, 0.0 }
0x17f1   :  { %11272 = vmatpush3.msra.mxu1 %v11633_v0  ;;  %11284 = vmatprep.subr.mxu0 %v14530_v24  ;;  %v7762_v20 = vsel %vm537_vm4, %v11633_v0, 0.0 }
0x17f2   :  { %7775 = vadd.xlane.f32.xlu1 %v7774_v59  ;;  %11273 = vmatprep.subr.mxu1 %v14530_v24 }
0x17f3   :  { %v13871_v16 = vpop.eup %11634  ;;  %7763 = vadd.xlane.f32.xlu0 %v7762_v20  ;;  %11274 = vmatpush3.msra.mxu1 %v11629_v8 }
0x17f4   :  { %v13873_v54 = vpop.eup %11636  ;;  %11285 = vmatpush3.msra.mxu0 %v11627_v23  ;;  %11275 = vmatprep.subr.mxu1 %v14530_v24  ;;  %v7896_v63 = vsel %vm1470_vm5, %v13871_v16, 0.0 }
0x17f5   :  { %11286 = vmatprep.subr.mxu0 %v14530_v24  ;;  %11276 = vmatpush3.msra.mxu1 %v11621_v40  ;;  %v7893_v37 = vsel %vm1470_vm5, %v13873_v54, 0.0 }
0x17f6   :  { %11287 = vmatpush3.msra.mxu0 %v11623_v58  ;;  %7897 = vadd.xlane.f32.xlu1 %v7896_v63 }
0x17f7   :  { %11288 = vmatprep.subr.mxu0 %v14530_v24  ;;  %11277 = vmatprep.subr.mxu1 %v14530_v24 }
0x17f8   :  { %7894 = vadd.xlane.f32.xlu0 %v7893_v37  ;;  %11278 = vmatpush3.msra.mxu1 %v13858_v6 }
0x17f9   :  { %11289 = vmatpush3.msra.mxu0 %v11625_v32  ;;  %11293 = vmatprep.subr.mxu1 %v14530_v24 }
0x17fa   :  { %8347 = vmatprep.subr.mxu0 %v13536_v19 }
0x185a   :  { %v7755_v4 = vpop.xlane.xlu0 %7754 }
0x1862   :  { %v7758_v14 = vpop.xlane.xlu1 %7757 }
0x1866   :  { %v7770_v40 = vpop.xlane.xlu1 %7769  ;;  %v7767_v28 = vpop.xlane.xlu0 %7766 }
0x1867   :  { %11638 = vrcp.f32 %v7770_v40 }
0x1868   :  { %11640 = vrcp.f32 %v7767_v28 }
0x1869   :  { %11642 = vrcp.f32 %v7758_v14 }
0x186a   :  { %11644 = vrcp.f32 %v7755_v4 }
0x1872   :  { %v7773_v58 = vpop.xlane.xlu1 %7772 }
0x1873   :  { %11646 = vrcp.f32 %v7773_v58  ;;  %v7761_v29 = vpop.xlane.xlu0 %7760 }
0x1874   :  { %11648 = vrcp.f32 %v7761_v29  ;;  %v11639_v41 = vpop.eup %11638 }
0x1875   :  { %v11641_v32 = vpop.eup %11640  ;;  %v7790_v1 = vmul.f32 %v11639_v41, %v7770_v40 }
0x1876   :  { %v11643_v31 = vpop.eup %11642  ;;  %v7789_v7 = vmul.f32 %v11641_v32, %v7767_v28 }
0x1877   :  { %v11645_v19 = vpop.eup %11644  ;;  %v7786_v33 = vmul.f32 %v11643_v31, %v7758_v14  ;;  %v7798_v62 = vsub.f32 2.0, %v7790_v1 }
0x1878   :  { %v7785_v42 = vmul.f32 %v11645_v19, %v7755_v4  ;;  %v7797_v12 = vsub.f32 2.0, %v7789_v7 }
0x1879   :  { %v7794_v0 = vsub.f32 2.0, %v7786_v33  ;;  %v7806_v37 = vmul.f32 %v11639_v41, %v7798_v62 }
0x187a   :  { %v7793_v63 = vsub.f32 2.0, %v7785_v42  ;;  %v7805_v17 = vmul.f32 %v11641_v32, %v7797_v12 }
0x187b   :  { %v7776_v50 = vpop.xlane.xlu1 %7775  ;;  %v7802_v61 = vmul.f32 %v11643_v31, %v7794_v0 }
0x187c   :  { %11650 = vrcp.f32 %v7776_v50  ;;  %v7764_v6 = vpop.xlane.xlu0 %7763  ;;  %v7801_v14 = vmul.f32 %v11645_v19, %v7793_v63  ;;  %v7839_v4 = vrot.slane %v7805_v17, %v12300_v49 }
0x187d   :  { %11652 = vrcp.f32 %v7764_v6  ;;  %v7824_v33 = vrot.slane %v7802_v61, %v12294_v45 }
0x187f   :  { %v7898_v5 = vpop.xlane.xlu1 %7897 }
0x1880   :  { %v11647_v25 = vpop.eup %11646  ;;  %11654 = vrcp.f32 %v7898_v5 }
0x1881   :  { %v11649_v35 = vpop.eup %11648  ;;  %v7791_v48 = vmul.f32 %v11647_v25, %v7773_v58  ;;  %v7895_v23 = vpop.xlane.xlu0 %7894 }
0x1882   :  { %v7787_v8 = vmul.f32 %v11649_v35, %v7761_v29  ;;  %11656 = vrcp.f32 %v7895_v23  ;;  %v7843_v29 = vrot.slane %v7806_v37, %v12294_v45  ;;  %v10960_v37 = vld [vmem:[%s14439_s0 + $0xa] sm:$0x3] }
0x1883   :  { %v7799_v59 = vsub.f32 2.0, %v7791_v48 }
0x1884   :  { %v7795_v20 = vsub.f32 2.0, %v7787_v8 }
0x1885   :  { %v7807_v40 = vmul.f32 %v11647_v25, %v7799_v59 }
0x1886   :  { %v7803_v36 = vmul.f32 %v11649_v35, %v7795_v20 }
0x1887   :  { %v7848_v48 = vrot.slane %v7807_v40, %v12297_v46 }
0x1888   :  { %v7829_v32 = vrot.slane %v7803_v36, %v12297_v46 }
0x1889   :  { %v11651_v44 = vpop.eup %11650 }
0x188a   :  { %v11653_v28 = vpop.eup %11652  ;;  %v7792_v39 = vmul.f32 %v11651_v44, %v7776_v50  ;;  %v7820_v50 = vrot.slane %v7801_v14, %v12300_v49 }
0x188b   :  { %v7788_v58 = vmul.f32 %v11653_v28, %v7764_v6  ;;  %v7844_v6 = vsel %vm1408_vm7, %v7843_v29, %v7839_v4 }
0x188c   :  { %v7800_v1 = vsub.f32 2.0, %v7792_v39  ;;  %v7825_v42 = vsel %vm1408_vm7, %v7824_v33, %v7820_v50  ;;  %v7849_v61 = vsel %vm1415_vm8, %v7848_v48, %v7844_v6 }
0x188d   :  { %v11655_v7 = vpop.eup %11654  ;;  %v7796_v41 = vsub.f32 2.0, %v7788_v58  ;;  %v7830_v36 = vsel %vm1415_vm8, %v7829_v32, %v7825_v42 }
0x188e   :  { %v7808_v31 = vmul.f32 %v11651_v44, %v7800_v1  ;;  %v7902_v25 = vmul.f32 %v11655_v7, %v7898_v5 }
0x188f   :  { %v11657_v8 = vpop.eup %11656  ;;  %v7804_v19 = vmul.f32 %v11653_v28, %v7796_v41 }
0x1890   :  { %v7853_v35 = vrot.slane %v7808_v31, %v12303_v57  ;;  %v7904_v17 = vsub.f32 2.0, %v7902_v25  ;;  %v7901_v39 = vmul.f32 %v11657_v8, %v7895_v23 }
0x1891   :  { %v7834_v62 = vrot.slane %v7804_v19, %v12303_v57 }
0x1892   :  { %v7854_v44 = vsel %vm1422_vm9, %v7853_v35, %v7849_v61  ;;  %v7906_v5 = vmul.f32 %v11655_v7, %v7904_v17  ;;  %v7903_v12 = vsub.f32 2.0, %v7901_v39 }
0x1893   :  { %v7835_v0 = vsel %vm1422_vm9, %v7834_v62, %v7830_v36 }
0x1894   :  { %v7855_v59 = vsel %vm1443_vm10, %v7854_v44, %v7835_v0  ;;  %v7916_v20 = vrot.slane %v7906_v5, %v12300_v49  ;;  %v7905_v63 = vmul.f32 %v11657_v8, %v7903_v12  ;;  %v14607_v5 = vld [vmem:[#allocation15_spill] sm:$0xff]  ;;  %v14608_v12 = vld [vmem:[#allocation16_spill] sm:$0xff]  ;;  %v14609_v0 = vld [vmem:[#allocation17_spill] sm:$0xff] }
0x1895   :  { %v7857_v23 = vmul.f32 %v7855_v59, %v13638_v52  ;;  %v14610_v59 = vld [vmem:[#allocation18_spill] sm:$0xff] }
0x1896   :  { %v7912_v40 = vrot.slane %v7905_v63, %v12300_v49  ;;  %v14612_v63 = vld [vmem:[#allocation20_spill] sm:$0xff] }
0x1897   :  { %v7865_v28 = vrot.slane %v7857_v23, %v12320_v30  ;;  %v14613_v23 = vld [vmem:[#allocation21_spill] sm:$0xff] }
0x1898   :  { %v7917_v14 = vsel %vm1443_vm10, %v7916_v20, %v7912_v40  ;;  %v14611_v20 = vld [vmem:[#allocation19_spill] sm:$0xff] }
0x1899   :  { %v7919_v58 = vmul.f32 %v10960_v37, %v7917_v14  ;;  %v7873_v29 = vrot.slane %v7865_v28, %v12320_v30  ;;  %v7866_v4 = vcombine.high %v7865_v28, %v7865_v28  ;;  %v14618_v37 = vld [vmem:[#allocation26_spill] sm:$0xff]  ;;  %v14619_v40 = vld [vmem:[#allocation27_spill] sm:$0xff]  ;;  %v14620_v28 = vld [vmem:[#allocation28_spill] sm:$0xff] }
0x189a   :  { %v14621_v14 = vld [vmem:[#allocation29_spill] sm:$0xff] }
0x189b   :  { %v7927_v1 = vrot.slane %v7919_v58, %v12320_v30  ;;  %11280 = vmatmul.mubr.msk.f32.vlgmr.msra.gmra.mxu1 %vm537_vm4, %v7873_v29  ;;  %v7880_v52 = vrot.slane %v7866_v4, %v12320_v30  ;;  %v14622_v58 = vld [vmem:[#allocation30_spill] sm:$0xff]  ;;  %v14623_v29 = vld [vmem:[#allocation31_spill] sm:$0xff]  ;;  %v14624_v4 = vld [vmem:[#allocation32_spill] sm:$0xff] }
0x189c   :  { %11294 = vmatpush3.msk.msra.mxu1 %vm1686_vm11, %v13873_v54  ;;  %11295 = vmatprep.mubr.msk.f32.mxu1 %vm11990_vm6, %v14530_v24 }
0x189d   :  { %11291 = vmatmul.mubr.msk.f32.vlgmr.msra.gmra.mxu0 %vm537_vm4, %v7880_v52  ;;  %11298 = vmatprep.subr.mxu1 %v14530_v24  ;;  %v7935_v7 = vrot.slane %v7927_v1, %v12320_v30  ;;  %v7928_v33 = vcombine.high %v7927_v1, %v7927_v1  ;;  %v8280_v1 = vld [vmem:[#allocation3 + $0x50] sm:$0x30] }
0x189e   :  { %8348 = vmatpush1.msra.mxu0 %v13573_v47  ;;  %8387 = vmatprep.mubr.f32.mxu0 %v14530_v24  ;;  %v7001_v47 = vld [vmem:[#allocation3 + $0x98] sm:$0xc]  ;;  %v8300_v52 = vrot.slane %v8280_v1, 4 }
0x189f   :  { %11296 = vmatmul.mubr.msk.f32.vlgmr.msra.gmra.mxu1 %vm1683_vm12, %v7935_v7  ;;  %8349 = vmatprep.subr.mxu0 %v13578_v9  ;;  %v7942_v54 = vrot.slane %v7928_v33, %v12320_v30  ;;  %v7387_v9 = vpop.f32.mrf.mxu0  ;;  %v8282_v33 = vld [vmem:[#allocation3 + $0x60] sm:$0x30] }
0x18a0   :  { %11299 = vmatpush3.msk.msra.mxu1 %vm1686_vm11, %v13871_v16  ;;  %11300 = vmatprep.mubr.msk.f32.mxu1 %vm11990_vm6, %v14530_v24 }
0x18a1   :  { %8418 = vmatprep.subr.mxu1 %v13586_v2  ;;  %8350 = vmatpush1.msra.mxu0 %v13589_v43  ;;  %v7021_v2 = vrot.slane %v7001_v47, 2 }
0x18a2   :  { %8351 = vmatprep.subr.mxu0 %v13592_v27 }
0x18a3   :  { %11301 = vmatmul.mubr.msk.f32.vlgmr.msra.gmra.mxu1 %vm1683_vm12, %v7942_v54  ;;  %8352 = vmatpush1.msra.mxu0 %v13596_v56  ;;  %v7388_v43 = vadd.f32 %v7387_v9, %v7021_v2  ;;  %v8302_v9 = vrot.slane %v8282_v33, 4 }
0x18a4   :  { %8419 = vmatpush1.msra.mxu1 %v13599_v10  ;;  %8353 = vmatprep.subr.mxu0 %v13602_v18 }
0x18a5   :  { %8420 = vmatprep.subr.mxu1 %v13605_v38  ;;  %8354 = vmatpush1.msra.mxu0 %v13608_v3  ;;  %v10966_v27 = vmul.f32 -1.442695, %v7388_v43  ;;  %v8281_v43 = vld [vmem:[#allocation3 + $0x58] sm:$0x30] }
0x18a6   :  { %8421 = vmatpush1.msra.mxu1 %v13611_v53  ;;  %8458 = vmatprep.mubr.f32.mxu1 %v14530_v24 }
0x18a7   :  { %8422 = vmatprep.subr.mxu1 %v13615_v22  ;;  %8489 = vmatprep.subr.mxu0 %v13618_v60  ;;  %11658 = vpow2.f32 %v10966_v27 }
0x18a8   :  { %8423 = vmatpush1.msra.mxu1 %v13621_v11 }
0x18a9   :  { %8424 = vmatprep.subr.mxu1 %v13624_v13 }
0x18aa   :  { %8425 = vmatpush1.msra.mxu1 %v13627_v26 }
0x18ab   :  { %8560 = vmatprep.subr.mxu1 %v13630_v51 }
0x18b4   :  { %v11659_v56 = vpop.eup %11658 }
0x18b5   :  { %v7946_v10 = vadd.f32 1.0, %v11659_v56  ;;  %v8301_v56 = vrot.slane %v8281_v43, 4  ;;  %v14626_v43 = vld [vmem:[#allocation14_spill] sm:$0xff] }
0x18b7   :  { %11660 = vrcp.f32 %v7946_v10  ;;  %v8283_v10 = vld [vmem:[#allocation3 + $0x68] sm:$0x30] }
0x18c4   :  { %v11661_v48 = vpop.eup %11660 }
0x195b   :  { %v8017_v18 = vpop.f32.mrf.mxu1 }
0x195d   :  { %v11281_v38 = vpop.f32.mrf.mxu1  ;;  %v8089_v3 = vpop.f32.mrf.mxu0 }
0x195f   :  { %v11292_v53 = vpop.f32.mrf.mxu0  ;;  %v8164_v22 = vpop.f32.mrf.mxu1 }
0x1960   :  { %v8243_v16 = vadd.f32 %v8164_v22, %v8017_v18  ;;  %v8284_v53 = vld [vmem:[#allocation3 + $0x70] sm:$0x30] }
0x1961   :  { %v11297_v60 = vpop.f32.mrf.mxu1 }
0x1963   :  { %v8239_v11 = vpop.f32.mrf.mxu1 }
0x1964   :  { %v8244_v13 = vadd.f32 %v8239_v11, %v8089_v3  ;;  %v8303_v3 = vrot.slane %v8283_v10, 4  ;;  %v8304_v11 = vrot.slane %v8284_v53, 4 }
0x1965   :  { %v11302_v26 = vpop.f32.mrf.mxu1 }
0x1966   :  { %v8247_v51 = vrot.slane %v8244_v13, 7  ;;  %v8286_v26 = vld [vmem:[#allocation3 + $0x80] sm:$0x30] }
0x1968   :  { %v8248_v41 = vsel %vm1443_vm10, %v8247_v51, %v8243_v16  ;;  %v8306_v51 = vrot.slane %v8286_v26, 4 }
0x1969   :  { %v8250_v32 = vmul.f32 %v11661_v48, %v8248_v41  ;;  %v8285_v41 = vld [vmem:[#allocation3 + $0x78] sm:$0x30] }
0x196b   :  { %v8252_v31 = vrot.slane %v8250_v32, 1  ;;  %8258 = vst.msk [vmem:[#allocation7 + $0xa] sm:$0x3] %vm42_vm0, %v8250_v32  ;;  %v8255_v8 = vsub.f32 %v8243_v16, %v8250_v32 }
0x196d   :  { %v8256_v25 = vsub.f32 %v8244_v13, %v8252_v31  ;;  %v8305_v31 = vrot.slane %v8285_v41, 4 }
0x196f   :  { %v8261_v50 = vrot.slane %v8256_v25, 7  ;;  %v8287_v25 = vld [vmem:[#allocation3 + $0x88] sm:$0x30] }
0x1971   :  { %v8262_v19 = vsel %vm1443_vm10, %v8261_v50, %v8255_v8 }
0x1972   :  { %8265 = vst.msk [vmem:[#allocation8 + $0xa] sm:$0x3] %vm42_vm0, %v8262_v19  ;;  %8266 = vst.msk [vmem:[#allocation2] sm:$0x3] %vm42_vm0, %v8262_v19  ;;  %v8307_v19 = vrot.slane %v8287_v25, 4 }
0x1979   :  { %v13951_v6 = vld [vmem:[#allocation2] sm:$0x3] }
0x197a   :  { %v8270_v35 = vsel %vm42_vm0, %v13951_v6, 0.0 }
0x197b   :  { %8271 = vadd.xlane.f32.xlu0 %v8270_v35  ;;  %v8288_v35 = vld [vmem:[#allocation3 + $0x90] sm:$0x30] }
0x1a04   :  { %v8272_v17 = vpop.xlane.xlu0 %8271 }
0x1a05   :  { %vm8273_vm3 = vcmp.eq.f32.partialorder %v8272_v17, 0.0 }
0x1a06   :  { %v8274_v39 = vsel %vm8273_vm3, 1.0, %v8272_v17 }
0x1a07   :  { %11662 = vrcp.f32 %v8274_v39 }
0x1a14   :  { %v11663_v42 = vpop.eup %11662 }
0x1a15   :  { %v8276_v61 = vmul.f32 %v11663_v42, %v8274_v39 }
0x1a17   :  { %v8277_v62 = vsub.f32 2.0, %v8276_v61 }
0x1a19   :  { %v8278_v36 = vmul.f32 %v11663_v42, %v8277_v62  ;;  %v8308_v42 = vrot.slane %v8288_v35, 4 }
0x1a1b   :  { %v8279_v44 = vmul.f32 %v8278_v36, %v13951_v6 }
0x1a1d   :  { %10974 = vmatmul.mubr.msk.f32.vlgmr.msra.gmra.mxu0 %vm537_vm4, %v8279_v44  ;;  %10975 = vmatmul.mubr.msk.f32.vlgmr.msra.gmra.mxu1 %vm537_vm4, %v8279_v44 }
0x1a1e   :  { %8490 = vmatpush1.msra.mxu0 %v13645_v55  ;;  %8561 = vmatpush1.msra.mxu1 %v13648_v21  ;;  %v14614_v55 = vld [vmem:[#allocation22_spill] sm:$0xff]  ;;  %v14615_v21 = vld [vmem:[#allocation23_spill] sm:$0xff] }
0x1a1f   :  { %8491 = vmatprep.subr.mxu0 %v13651_v15  ;;  %8562 = vmatprep.subr.mxu1 %v13654_v34  ;;  %v14616_v15 = vld [vmem:[#allocation24_spill] sm:$0xff]  ;;  %v14617_v34 = vld [vmem:[#allocation25_spill] sm:$0xff] }
0x1a20   :  { %8492 = vmatpush1.msra.mxu0 %v14607_v5  ;;  %8563 = vmatpush1.msra.mxu1 %v14608_v12 }
0x1a21   :  { %8493 = vmatprep.subr.mxu0 %v14609_v0  ;;  %8564 = vmatprep.subr.mxu1 %v14610_v59 }
0x1a22   :  { %8494 = vmatpush1.msra.mxu0 %v14611_v20  ;;  %8565 = vmatpush1.msra.mxu1 %v14612_v63 }
0x1a23   :  { %8495 = vmatprep.subr.mxu0 %v14613_v23  ;;  %8566 = vmatprep.subr.mxu1 %v14614_v55  ;;  %v14625_v55 = vld [vmem:[#allocation13_spill] sm:$0xff] }
0x1a24   :  { %8496 = vmatpush1.msra.mxu0 %v14615_v21  ;;  %8529 = vmatprep.mubr.f32.mxu0 %v14530_v24 }
0x1a25   :  { %8567 = vmatpush1.msra.mxu1 %v14616_v15  ;;  %8600 = vmatprep.mubr.f32.mxu1 %v14530_v24 }
0x1a26   :  { %10976 = vmatmul.mubr.msk.f32.vlgmr.msra.gmra.mxu0 %vm537_vm4, %v8279_v44  ;;  %10977 = vmatmul.mubr.msk.f32.vlgmr.msra.gmra.mxu1 %vm537_vm4, %v8279_v44 }
0x1a27   :  { %8631 = vmatprep.subr.mxu0 %v14617_v34  ;;  %8671 = vmatprep.mubr.f32.mxu0 %v14530_v24 }
0x1a28   :  { %8632 = vmatpush1.msra.mxu0 %v14618_v37  ;;  %11303 = vmatprep.subr.mxu1 %v14530_v24 }
0x1a29   :  { %8633 = vmatprep.subr.mxu0 %v14619_v40  ;;  %11311 = vmatprep.mubr.msk.f32.mxu1 %vm11990_vm6, %v14530_v24 }
0x1a2a   :  { %8634 = vmatpush1.msra.mxu0 %v14620_v28 }
0x1a2b   :  { %8635 = vmatprep.subr.mxu0 %v14621_v14 }
0x1a2c   :  { %8636 = vmatpush1.msra.mxu0 %v14622_v58 }
0x1a2d   :  { %8637 = vmatprep.subr.mxu0 %v14623_v29 }
0x1a2e   :  { %8638 = vmatpush1.msra.mxu0 %v14624_v4 }
0x1a2f   :  { %10978 = vmatmul.mubr.msk.f32.vlgmr.msra.gmra.mxu0 %vm537_vm4, %v8279_v44  ;;  %11314 = vmatprep.subr.mxu0 %v14530_v24 }
0x1a30   :  { %11322 = vmatprep.mubr.msk.f32.mxu0 %vm11990_vm6, %v14530_v24 }
0x1add   :  { %v8389_v7 = vpop.f32.mrf.mxu0  ;;  %v8460_v47 = vpop.f32.mrf.mxu1 }
0x1ade   :  { %v13992_v54 = vadd.f32 %v8389_v7, %v8300_v52  ;;  %v13998_v2 = vadd.f32 %v8460_v47, %v8302_v9 }
0x1adf   :  { %v8391_v27 = vpop.f32.mrf.mxu0  ;;  %v8462_v38 = vpop.f32.mrf.mxu1 }
0x1ae0   :  { %8682 = vrot.lane.b32.xlu0 %v13992_v54, %s11985_s4  ;;  %8679 = vrot.lane.b32.xlu1 %v13992_v54, %s11986_s19  ;;  %v14008_v18 = vadd.f32 %v8391_v27, %v8301_v56  ;;  %v14014_v22 = vadd.f32 %v8462_v38, %v8303_v3 }
0x1ae4   :  { %8685 = vrot.lane.b32.xlu1 %v13992_v54, %s11987_s20  ;;  %8699 = vrot.lane.b32.xlu0 %v13998_v2, %s11986_s19 }
0x1ae6   :  { %v8531_v60 = vpop.f32.mrf.mxu0  ;;  %v8602_v16 = vpop.f32.mrf.mxu1 }
0x1ae7   :  { %v14020_v13 = vadd.f32 %v8531_v60, %v8304_v11  ;;  %v14030_v48 = vadd.f32 %v8602_v16, %v8306_v51 }
0x1ae8   :  { %8702 = vrot.lane.b32.xlu1 %v13998_v2, %s11985_s4  ;;  %8705 = vrot.lane.b32.xlu0 %v13998_v2, %s11987_s20  ;;  %v8533_v32 = vpop.f32.mrf.mxu0  ;;  %v8604_v50 = vpop.f32.mrf.mxu1 }
0x1ae9   :  { %v14040_v8 = vadd.f32 %v8533_v32, %v8305_v31  ;;  %v14046_v17 = vadd.f32 %v8604_v50, %v8307_v19 }
0x1aec   :  { %8689 = vrot.lane.b32.xlu1 %v14008_v18, %s11986_s19  ;;  %8692 = vrot.lane.b32.xlu0 %v14008_v18, %s11985_s4 }
0x1aef   :  { %v8673_v39 = vpop.f32.mrf.mxu0 }
0x1af0   :  { %8695 = vrot.lane.b32.xlu1 %v14008_v18, %s11987_s20  ;;  %8712 = vrot.lane.b32.xlu0 %v14014_v22, %s11985_s4  ;;  %v14052_v61 = vadd.f32 %v8673_v39, %v8308_v42 }
0x1af4   :  { %8709 = vrot.lane.b32.xlu1 %v14014_v22, %s11986_s19  ;;  %8719 = vrot.lane.b32.xlu0 %v14020_v13, %s11986_s19 }
0x1af8   :  { %8715 = vrot.lane.b32.xlu1 %v14014_v22, %s11987_s20  ;;  %8725 = vrot.lane.b32.xlu0 %v14020_v13, %s11987_s20 }
0x1afc   :  { %8722 = vrot.lane.b32.xlu1 %v14020_v13, %s11985_s4  ;;  %8739 = vrot.lane.b32.xlu0 %v14030_v48, %s11986_s19 }
0x1b00   :  { %8742 = vrot.lane.b32.xlu1 %v14030_v48, %s11985_s4  ;;  %8745 = vrot.lane.b32.xlu0 %v14030_v48, %s11987_s20 }
0x1b04   :  { %8729 = vrot.lane.b32.xlu1 %v14040_v8, %s11986_s19  ;;  %8732 = vrot.lane.b32.xlu0 %v14040_v8, %s11985_s4 }
0x1b08   :  { %8735 = vrot.lane.b32.xlu1 %v14040_v8, %s11987_s20  ;;  %8752 = vrot.lane.b32.xlu0 %v14046_v17, %s11985_s4 }
0x1b0c   :  { %8749 = vrot.lane.b32.xlu1 %v14046_v17, %s11986_s19  ;;  %8959 = vrot.lane.b32.xlu0 %v14052_v61, %s11986_s19 }
0x1b10   :  { %8755 = vrot.lane.b32.xlu1 %v14046_v17, %s11987_s20  ;;  %8965 = vrot.lane.b32.xlu0 %v14052_v61, %s11987_s20 }
0x1b14   :  { %8962 = vrot.lane.b32.xlu1 %v14052_v61, %s11985_s4 }
0x1b52   :  { %v8683_v62 = vpop.permute.xlu0 %8682  ;;  %v8680_v36 = vpop.permute.xlu1 %8679 }
0x1b53   :  { %v8758_v23 = vcombine.low %v13992_v54, %v8683_v62 }
0x1b55   :  { %v8765_v40 = vrot.slane %v8758_v23, %v14625_v55 }
0x1b56   :  { %v8686_v44 = vpop.permute.xlu1 %8685  ;;  %v8700_v5 = vpop.permute.xlu0 %8699 }
0x1b57   :  { %v8766_v59 = vcombine.low %v8680_v36, %v8686_v44 }
0x1b59   :  { %v8773_v21 = vrot.slane %v8766_v59, %v14625_v55 }
0x1b5a   :  { %v8703_v12 = vpop.permute.xlu1 %8702  ;;  %v8706_v0 = vpop.permute.xlu0 %8705 }
0x1b5b   :  { %v8808_v14 = vcombine.low %v13998_v2, %v8703_v12  ;;  %v8790_v58 = vcombine.low %v8765_v40, %v8773_v21  ;;  %v8816_v29 = vcombine.low %v8700_v5, %v8706_v0 }
0x1b5d   :  { %v8815_v54 = vrot.slane %v8808_v14, %v14625_v55  ;;  %v8823_v47 = vrot.slane %v8816_v29, %v14625_v55  ;;  %v8797_v27 = vrot.slane %v8790_v58, %v14626_v43 }
0x1b5e   :  { %v8690_v20 = vpop.permute.xlu1 %8689  ;;  %v8693_v63 = vpop.permute.xlu0 %8692 }
0x1b5f   :  { %v8774_v15 = vcombine.low %v14008_v18, %v8693_v63  ;;  %v8840_v3 = vcombine.low %v8815_v54, %v8823_v47 }
0x1b61   :  { %v8781_v4 = vrot.slane %v8774_v15, %v14625_v55  ;;  %v8847_v51 = vrot.slane %v8840_v3, %v14626_v43 }
0x1b62   :  { %v8696_v34 = vpop.permute.xlu1 %8695  ;;  %v8713_v37 = vpop.permute.xlu0 %8712 }
0x1b63   :  { %v8782_v28 = vcombine.low %v8690_v20, %v8696_v34  ;;  %v8824_v9 = vcombine.low %v14014_v22, %v8713_v37 }
0x1b65   :  { %v8789_v1 = vrot.slane %v8782_v28, %v14625_v55  ;;  %v8831_v53 = vrot.slane %v8824_v9, %v14625_v55 }
0x1b66   :  { %v8710_v52 = vpop.permute.xlu1 %8709  ;;  %v8720_v7 = vpop.permute.xlu0 %8719 }
0x1b67   :  { %v8798_v33 = vcombine.low %v8781_v4, %v8789_v1 }
0x1b69   :  { %v8805_v56 = vrot.slane %v8798_v33, %v14626_v43 }
0x1b6a   :  { %v8716_v2 = vpop.permute.xlu1 %8715  ;;  %v8726_v10 = vpop.permute.xlu0 %8725 }
0x1b6b   :  { %v8832_v18 = vcombine.low %v8710_v52, %v8716_v2  ;;  %v14076_v38 = vcombine.low %v8797_v27, %v8805_v56  ;;  %v14093_v36 = vcombine.high %v8797_v27, %v8805_v56  ;;  %v8866_v44 = vcombine.low %v8720_v7, %v8726_v10 }
0x1b6d   :  { %v8839_v60 = vrot.slane %v8832_v18, %v14625_v55  ;;  %v8993_v11 = vsel %vm537_vm4, %v14076_v38, -inf  ;;  %v8873_v20 = vrot.slane %v8866_v44, %v14625_v55 }
0x1b6e   :  { %v8723_v26 = vpop.permute.xlu1 %8722  ;;  %8994 = vmax.xlane.f32.xlu1 %v8993_v11  ;;  %v8740_v22 = vpop.permute.xlu0 %8739 }
0x1b6f   :  { %v8848_v16 = vcombine.low %v8831_v53, %v8839_v60  ;;  %v8858_v19 = vcombine.low %v14020_v13, %v8723_v26  ;;  %v9005_v13 = vsel %vm537_vm4, %v14093_v36, -inf }
0x1b71   :  { %v8855_v41 = vrot.slane %v8848_v16, %v14626_v43  ;;  %v8865_v5 = vrot.slane %v8858_v19, %v14625_v55 }
0x1b72   :  { %v8743_v32 = vpop.permute.xlu1 %8742  ;;  %v8746_v31 = vpop.permute.xlu0 %8745 }
0x1b73   :  { %v14084_v25 = vcombine.high %v8847_v51, %v8855_v41  ;;  %v14086_v50 = vcombine.low %v8847_v51, %v8855_v41  ;;  %v8908_v23 = vcombine.low %v14030_v48, %v8743_v32  ;;  %v8916_v21 = vcombine.low %v8740_v22, %v8746_v31 }
0x1b74   :  { %v8890_v15 = vcombine.low %v8865_v5, %v8873_v20 }
0x1b75   :  { %v9008_v35 = vsel %vm537_vm4, %v14084_v25, -inf  ;;  %v8996_v42 = vsel %vm537_vm4, %v14086_v50, -inf  ;;  %v8915_v14 = vrot.slane %v8908_v23, %v14625_v55  ;;  %v8923_v58 = vrot.slane %v8916_v21, %v14625_v55 }
0x1b76   :  { %v8730_v39 = vpop.permute.xlu1 %8729  ;;  %9009 = vmax.xlane.f32.xlu1 %v9008_v35  ;;  %v8733_v62 = vpop.permute.xlu0 %8732  ;;  %8997 = vmax.xlane.f32.xlu0 %v8996_v42  ;;  %v8897_v4 = vrot.slane %v8890_v15, %v14626_v43 }
0x1b77   :  { %v8874_v12 = vcombine.low %v14040_v8, %v8733_v62  ;;  %v8940_v47 = vcombine.low %v8915_v14, %v8923_v58 }
0x1b79   :  { %v8881_v34 = vrot.slane %v8874_v12, %v14625_v55  ;;  %v8947_v11 = vrot.slane %v8940_v47, %v14626_v43 }
0x1b7a   :  { %v8736_v0 = vpop.permute.xlu1 %8735  ;;  %v8753_v59 = vpop.permute.xlu0 %8752  ;;  %9006 = vmax.xlane.f32.xlu0 %v9005_v13 }
0x1b7b   :  { %v8882_v63 = vcombine.low %v8730_v39, %v8736_v0  ;;  %v8924_v29 = vcombine.low %v14046_v17, %v8753_v59 }
0x1b7d   :  { %v8889_v37 = vrot.slane %v8882_v63, %v14625_v55  ;;  %v8931_v9 = vrot.slane %v8924_v29, %v14625_v55 }
0x1b7e   :  { %v8750_v40 = vpop.permute.xlu1 %8749  ;;  %v8960_v28 = vpop.permute.xlu0 %8959 }
0x1b7f   :  { %v8898_v8 = vcombine.low %v8881_v34, %v8889_v37 }
0x1b81   :  { %v8905_v1 = vrot.slane %v8898_v8, %v14626_v43 }
0x1b82   :  { %v8756_v48 = vpop.permute.xlu1 %8755  ;;  %v8966_v52 = vpop.permute.xlu0 %8965 }
0x1b83   :  { %v8932_v7 = vcombine.low %v8750_v40, %v8756_v48  ;;  %v8907_v33 = vcombine.high %v8897_v4, %v8905_v1  ;;  %v8906_v54 = vcombine.low %v8897_v4, %v8905_v1  ;;  %v8976_v56 = vcombine.low %v8960_v28, %v8966_v52 }
0x1b85   :  { %v8939_v27 = vrot.slane %v8932_v7, %v14625_v55  ;;  %v9011_v2 = vsel %vm537_vm4, %v8907_v33, -inf  ;;  %v8999_v10 = vsel %vm537_vm4, %v8906_v54, -inf  ;;  %v8983_v53 = vrot.slane %v8976_v56, %v14625_v55 }
0x1b86   :  { %v8963_v17 = vpop.permute.xlu1 %8962  ;;  %9012 = vmax.xlane.f32.xlu1 %v9011_v2  ;;  %9000 = vmax.xlane.f32.xlu0 %v8999_v10 }
0x1b87   :  { %v8948_v18 = vcombine.low %v8931_v9, %v8939_v27  ;;  %v8968_v3 = vcombine.low %v14052_v61, %v8963_v17 }
0x1b89   :  { %v8975_v60 = vrot.slane %v8968_v3, %v14625_v55  ;;  %v8955_v26 = vrot.slane %v8948_v18, %v14626_v43 }
0x1b8b   :  { %v8984_v22 = vcombine.low %v8975_v60, %v8983_v53  ;;  %v8957_v16 = vcombine.high %v8947_v11, %v8955_v26  ;;  %v8956_v51 = vcombine.low %v8947_v11, %v8955_v26 }
0x1b8d   :  { %v9014_v41 = vsel %vm537_vm4, %v8957_v16, -inf  ;;  %v9002_v32 = vsel %vm537_vm4, %v8956_v51, -inf  ;;  %v8991_v31 = vrot.slane %v8984_v22, %v14626_v43 }
0x1b8e   :  { %9015 = vmax.xlane.f32.xlu1 %v9014_v41  ;;  %9003 = vmax.xlane.f32.xlu0 %v9002_v32  ;;  %v11875_v32 = vld [vmem:[#allocation4 + $0xf8] sm:$0xff] }
0x1b8f   :  { %v8992_v61 = vcombine.high %v8991_v31, %v14530_v24  ;;  %v9169_v19 = vsel %vm1470_vm5, %v8991_v31, -inf }
0x1b91   :  { %v9172_v35 = vsel %vm1470_vm5, %v8992_v61, -inf }
0x1b92   :  { %9170 = vmax.xlane.f32.xlu0 %v9169_v19  ;;  %9173 = vmax.xlane.f32.xlu1 %v9172_v35 }
0x1bf7   :  { %v8995_v39 = vpop.xlane.xlu1 %8994 }
0x1bf8   :  { %v9017_v42 = vsub.f32 %v14076_v38, %v8995_v39 }
0x1bfa   :  { %v9025_v62 = vmul.f32 1.442695, %v9017_v42 }
0x1bfc   :  { %11664 = vpow2.f32 %v9025_v62 }
0x1bff   :  { %v9010_v44 = vpop.xlane.xlu1 %9009  ;;  %v8998_v12 = vpop.xlane.xlu0 %8997 }
0x1c00   :  { %v9022_v5 = vsub.f32 %v14084_v25, %v9010_v44  ;;  %v9018_v0 = vsub.f32 %v14086_v50, %v8998_v12 }
0x1c02   :  { %v9035_v13 = vmul.f32 1.442695, %v9022_v5  ;;  %v9027_v59 = vmul.f32 1.442695, %v9018_v0 }
0x1c03   :  { %v9007_v20 = vpop.xlane.xlu0 %9006 }
0x1c04   :  { %11666 = vpow2.f32 %v9027_v59  ;;  %v9021_v63 = vsub.f32 %v14093_v36, %v9007_v20 }
0x1c05   :  { %11668 = vpow2.f32 %v9035_v13 }
0x1c06   :  { %v9033_v23 = vmul.f32 1.442695, %v9021_v63 }
0x1c08   :  { %11670 = vpow2.f32 %v9033_v23 }
0x1c09   :  { %v14127_v21 = vpop.eup %11664 }
0x1c0a   :  { %v9041_v38 = vsel %vm537_vm4, %v14127_v21, 0.0 }
0x1c0b   :  { %9042 = vadd.xlane.f32.xlu0 %v9041_v38 }
0x1c0f   :  { %v9013_v15 = vpop.xlane.xlu1 %9012  ;;  %v9001_v25 = vpop.xlane.xlu0 %9000 }
0x1c10   :  { %v9023_v34 = vsub.f32 %v8907_v33, %v9013_v15  ;;  %v9019_v37 = vsub.f32 %v8906_v54, %v9001_v25 }
0x1c11   :  { %v11667_v50 = vpop.eup %11666 }
0x1c12   :  { %v9037_v40 = vmul.f32 1.442695, %v9023_v34  ;;  %v9029_v28 = vmul.f32 1.442695, %v9019_v37  ;;  %v9044_v8 = vsel %vm537_vm4, %v11667_v50, 0.0  ;;  %v11669_v14 = vpop.eup %11668 }
0x1c13   :  { %9045 = vadd.xlane.f32.xlu1 %v9044_v8  ;;  %v9056_v29 = vsel %vm537_vm4, %v11669_v14, 0.0 }
0x1c14   :  { %11672 = vpow2.f32 %v9037_v40 }
0x1c15   :  { %11674 = vpow2.f32 %v9029_v28  ;;  %v11671_v36 = vpop.eup %11670 }
0x1c16   :  { %v9053_v4 = vsel %vm537_vm4, %v11671_v36, 0.0 }
0x1c17   :  { %v9016_v58 = vpop.xlane.xlu1 %9015  ;;  %v9004_v1 = vpop.xlane.xlu0 %9003  ;;  %9057 = vadd.xlane.f32.xlu1 %v9056_v29  ;;  %9054 = vadd.xlane.f32.xlu0 %v9053_v4 }
0x1c18   :  { %v9024_v48 = vsub.f32 %v8957_v16, %v9016_v58  ;;  %v9020_v52 = vsub.f32 %v8956_v51, %v9004_v1 }
0x1c1a   :  { %v9039_v7 = vmul.f32 1.442695, %v9024_v48  ;;  %v9031_v33 = vmul.f32 1.442695, %v9020_v52 }
0x1c1b   :  { %v9174_v54 = vpop.xlane.xlu1 %9173  ;;  %v9171_v47 = vpop.xlane.xlu0 %9170 }
0x1c1c   :  { %11676 = vpow2.f32 %v9039_v7  ;;  %v9176_v9 = vsub.f32 %v8992_v61, %v9174_v54  ;;  %v9175_v27 = vsub.f32 %v8991_v31, %v9171_v47 }
0x1c1d   :  { %11678 = vpow2.f32 %v9031_v33 }
0x1c1e   :  { %v9179_v56 = vmul.f32 1.442695, %v9176_v9  ;;  %v9177_v2 = vmul.f32 1.442695, %v9175_v27 }
0x1c20   :  { %11680 = vpow2.f32 %v9179_v56 }
0x1c21   :  { %v11673_v10 = vpop.eup %11672  ;;  %11682 = vpow2.f32 %v9177_v2 }
0x1c22   :  { %v11675_v17 = vpop.eup %11674  ;;  %v9059_v18 = vsel %vm537_vm4, %v11673_v10, 0.0 }
0x1c23   :  { %9060 = vadd.xlane.f32.xlu1 %v9059_v18  ;;  %v9047_v3 = vsel %vm537_vm4, %v11675_v17, 0.0 }
0x1c24   :  { %9048 = vadd.xlane.f32.xlu0 %v9047_v3 }
0x1c29   :  { %v11677_v53 = vpop.eup %11676 }
0x1c2a   :  { %v11679_v60 = vpop.eup %11678  ;;  %11315 = vmatpush3.msra.mxu0 %v11677_v53  ;;  %v9062_v11 = vsel %vm537_vm4, %v11677_v53, 0.0 }
0x1c2b   :  { %11304 = vmatpush3.msra.mxu1 %v11679_v60  ;;  %11316 = vmatprep.subr.mxu0 %v14530_v24  ;;  %v9050_v26 = vsel %vm537_vm4, %v11679_v60, 0.0 }
0x1c2c   :  { %9063 = vadd.xlane.f32.xlu1 %v9062_v11  ;;  %11305 = vmatprep.subr.mxu1 %v14530_v24 }
0x1c2d   :  { %v14140_v22 = vpop.eup %11680  ;;  %9051 = vadd.xlane.f32.xlu0 %v9050_v26  ;;  %11306 = vmatpush3.msra.mxu1 %v11675_v17 }
0x1c2e   :  { %v14142_v16 = vpop.eup %11682  ;;  %11317 = vmatpush3.msra.mxu0 %v11673_v10  ;;  %11307 = vmatprep.subr.mxu1 %v14530_v24  ;;  %v9184_v51 = vsel %vm1470_vm5, %v14140_v22, 0.0 }
0x1c2f   :  { %11318 = vmatprep.subr.mxu0 %v14530_v24  ;;  %11308 = vmatpush3.msra.mxu1 %v11667_v50  ;;  %v9181_v41 = vsel %vm1470_vm5, %v14142_v16, 0.0 }
0x1c30   :  { %11319 = vmatpush3.msra.mxu0 %v11669_v14  ;;  %9185 = vadd.xlane.f32.xlu1 %v9184_v51 }
0x1c31   :  { %11320 = vmatprep.subr.mxu0 %v14530_v24  ;;  %11309 = vmatprep.subr.mxu1 %v14530_v24 }
0x1c32   :  { %9182 = vadd.xlane.f32.xlu0 %v9181_v41  ;;  %11310 = vmatpush3.msra.mxu1 %v14127_v21 }
0x1c33   :  { %11321 = vmatpush3.msra.mxu0 %v11671_v36  ;;  %11325 = vmatprep.subr.mxu1 %v14530_v24 }
0x1c34   :  { %9635 = vmatprep.subr.mxu0 %v11875_v32 }
0x1c94   :  { %v9043_v61 = vpop.xlane.xlu0 %9042 }
0x1c9c   :  { %v9046_v31 = vpop.xlane.xlu1 %9045 }
0x1ca0   :  { %v9058_v19 = vpop.xlane.xlu1 %9057  ;;  %v9055_v35 = vpop.xlane.xlu0 %9054 }
0x1ca1   :  { %11684 = vrcp.f32 %v9058_v19 }
0x1ca2   :  { %11686 = vrcp.f32 %v9055_v35 }
0x1ca3   :  { %11688 = vrcp.f32 %v9046_v31 }
0x1ca4   :  { %11690 = vrcp.f32 %v9043_v61 }
0x1cac   :  { %v9061_v39 = vpop.xlane.xlu1 %9060 }
0x1cad   :  { %11692 = vrcp.f32 %v9061_v39  ;;  %v9049_v42 = vpop.xlane.xlu0 %9048 }
0x1cae   :  { %11694 = vrcp.f32 %v9049_v42  ;;  %v11685_v44 = vpop.eup %11684 }
0x1caf   :  { %v11687_v12 = vpop.eup %11686  ;;  %v9078_v63 = vmul.f32 %v11685_v44, %v9058_v19 }
0x1cb0   :  { %v11689_v0 = vpop.eup %11688  ;;  %v9077_v23 = vmul.f32 %v11687_v12, %v9055_v35 }
0x1cb1   :  { %v11691_v13 = vpop.eup %11690  ;;  %v9074_v38 = vmul.f32 %v11689_v0, %v9046_v31  ;;  %v9086_v50 = vsub.f32 2.0, %v9078_v63  ;;  %v10973_v63 = vld [vmem:[%s14439_s0 + $0xc] sm:$0x3] }
0x1cb2   :  { %v9073_v37 = vmul.f32 %v11691_v13, %v9043_v61  ;;  %v9085_v40 = vsub.f32 2.0, %v9077_v23 }
0x1cb3   :  { %v9082_v28 = vsub.f32 2.0, %v9074_v38  ;;  %v9094_v58 = vmul.f32 %v11685_v44, %v9086_v50 }
0x1cb4   :  { %v9081_v36 = vsub.f32 2.0, %v9073_v37  ;;  %v9093_v29 = vmul.f32 %v11687_v12, %v9085_v40 }
0x1cb5   :  { %v9064_v62 = vpop.xlane.xlu1 %9063  ;;  %v9090_v1 = vmul.f32 %v11689_v0, %v9082_v28  ;;  %v9131_v9 = vrot.slane %v9094_v58, %v12294_v45  ;;  %v11876_v28 = vld [vmem:[#allocation4 + $0xf0] sm:$0xff]  ;;  %v11880_v58 = vld [vmem:[#allocation4 + $0x58] sm:$0xff] }
0x1cb6   :  { %11696 = vrcp.f32 %v9064_v62  ;;  %v9052_v5 = vpop.xlane.xlu0 %9051  ;;  %v9089_v54 = vmul.f32 %v11691_v13, %v9081_v36  ;;  %v9127_v27 = vrot.slane %v9093_v29, %v12300_v49  ;;  %v11879_v36 = vld [vmem:[#allocation4 + $0xa0] sm:$0xff]  ;;  %v11881_v29 = vld [vmem:[#allocation4 + $0x50] sm:$0xff] }
0x1cb7   :  { %11698 = vrcp.f32 %v9052_v5  ;;  %v9112_v10 = vrot.slane %v9090_v1, %v12294_v45  ;;  %v11883_v1 = vld [vmem:[#allocation4 + $0x8] sm:$0xff] }
0x1cb8   :  { %v9108_v26 = vrot.slane %v9089_v54, %v12300_v49  ;;  %v9132_v41 = vsel %vm1408_vm7, %v9131_v9, %v9127_v27  ;;  %v11889_v54 = vld [vmem:[#allocation4 + $0x60] sm:$0xff]  ;;  %v11891_v9 = vld [vmem:[#allocation4 + $0x10] sm:$0xff]  ;;  %v11892_v27 = vld [vmem:[#allocation4 + $0x128] sm:$0xff] }
0x1cb9   :  { %v9186_v59 = vpop.xlane.xlu1 %9185 }
0x1cba   :  { %v11693_v20 = vpop.eup %11692  ;;  %11700 = vrcp.f32 %v9186_v59  ;;  %v9113_v19 = vsel %vm1408_vm7, %v9112_v10, %v9108_v26 }
0x1cbb   :  { %v11695_v21 = vpop.eup %11694  ;;  %v9079_v15 = vmul.f32 %v11693_v20, %v9061_v39  ;;  %v9183_v25 = vpop.xlane.xlu0 %9182 }
0x1cbc   :  { %v9075_v34 = vmul.f32 %v11695_v21, %v9049_v42  ;;  %11702 = vrcp.f32 %v9183_v25 }
0x1cbd   :  { %v9087_v8 = vsub.f32 2.0, %v9079_v15 }
0x1cbe   :  { %v9083_v14 = vsub.f32 2.0, %v9075_v34 }
0x1cbf   :  { %v9095_v48 = vmul.f32 %v11693_v20, %v9087_v8  ;;  %v11877_v8 = vld [vmem:[#allocation4 + $0xa8] sm:$0xff] }
0x1cc0   :  { %v9091_v7 = vmul.f32 %v11695_v21, %v9083_v14  ;;  %v11878_v14 = vld [vmem:[#allocation4 + $0x108] sm:$0xff] }
0x1cc1   :  { %v9136_v17 = vrot.slane %v9095_v48, %v12297_v46  ;;  %v11885_v48 = vld [vmem:[#allocation4] sm:$0xff] }
0x1cc2   :  { %v9117_v3 = vrot.slane %v9091_v7, %v12297_v46  ;;  %v11887_v7 = vld [vmem:[#allocation4 + $0x68] sm:$0xff] }
0x1cc3   :  { %v11697_v4 = vpop.eup %11696  ;;  %v9137_v35 = vsel %vm1415_vm8, %v9136_v17, %v9132_v41 }
0x1cc4   :  { %v11699_v52 = vpop.eup %11698  ;;  %v9080_v33 = vmul.f32 %v11697_v4, %v9064_v62  ;;  %v9118_v42 = vsel %vm1415_vm8, %v9117_v3, %v9113_v19 }
0x1cc5   :  { %v9076_v47 = vmul.f32 %v11699_v52, %v9052_v5 }
0x1cc6   :  { %v9088_v56 = vsub.f32 2.0, %v9080_v33  ;;  %v11888_v33 = vld [vmem:[#allocation4 + $0x118] sm:$0xff] }
0x1cc7   :  { %v11701_v2 = vpop.eup %11700  ;;  %v9084_v18 = vsub.f32 2.0, %v9076_v47  ;;  %v11890_v47 = vld [vmem:[#allocation4 + $0x18] sm:$0xff] }
0x1cc8   :  { %v9096_v53 = vmul.f32 %v11697_v4, %v9088_v56  ;;  %v9190_v60 = vmul.f32 %v11701_v2, %v9186_v59  ;;  %v11882_v4 = vld [vmem:[#allocation4 + $0x100] sm:$0xff]  ;;  %v8289_v56 = vld [vmem:[#allocation3 + $0x98] sm:$0x30] }
0x1cc9   :  { %v11703_v11 = vpop.eup %11702  ;;  %v9092_v51 = vmul.f32 %v11699_v52, %v9084_v18  ;;  %v11886_v52 = vld [vmem:[#allocation4 + $0xb0] sm:$0xff]  ;;  %v8309_v10 = vrot.slane %v8289_v56, 4  ;;  %v11914_v56 = vld [vmem:[#allocation4 + $0x40] sm:$0xff] }
0x1cca   :  { %v9141_v32 = vrot.slane %v9096_v53, %v12303_v57  ;;  %v9192_v31 = vsub.f32 2.0, %v9190_v60  ;;  %v9189_v61 = vmul.f32 %v11703_v11, %v9183_v25 }
0x1ccb   :  { %v9122_v39 = vrot.slane %v9092_v51, %v12303_v57 }
0x1ccc   :  { %v9142_v62 = vsel %vm1422_vm9, %v9141_v32, %v9137_v35  ;;  %v9194_v44 = vmul.f32 %v11701_v2, %v9192_v31  ;;  %v9191_v5 = vsub.f32 2.0, %v9189_v61  ;;  %v8675_v2 = vpop.f32.mrf.mxu0 }
0x1ccd   :  { %v9123_v12 = vsel %vm1422_vm9, %v9122_v39, %v9118_v42  ;;  %v8676_v17 = vadd.f32 %v8675_v2, %v8309_v10  ;;  %v9568_v2 = vld [vmem:[#allocation3 + $0x50] sm:$0xc0] }
0x1cce   :  { %v9143_v0 = vsel %vm1443_vm10, %v9142_v62, %v9123_v12  ;;  %v9204_v13 = vrot.slane %v9194_v44, %v12300_v49  ;;  %v9193_v59 = vmul.f32 %v11703_v11, %v9191_v5  ;;  %v9588_v10 = vrot.slane %v9568_v2, 6 }
0x1ccf   :  { %v9145_v20 = vmul.f32 %v9143_v0, %v13951_v6  ;;  %v10979_v18 = vmul.f32 -1.442695, %v8676_v17 }
0x1cd0   :  { %v9200_v23 = vrot.slane %v9193_v59, %v12300_v49 }
0x1cd1   :  { %v9153_v21 = vrot.slane %v9145_v20, %v12320_v30  ;;  %11704 = vpow2.f32 %v10979_v18  ;;  %v9570_v18 = vld [vmem:[#allocation3 + $0x60] sm:$0xc0] }
0x1cd2   :  { %v9205_v38 = vsel %vm1443_vm10, %v9204_v13, %v9200_v23 }
0x1cd3   :  { %v9207_v15 = vmul.f32 %v10973_v63, %v9205_v38  ;;  %v9161_v25 = vrot.slane %v9153_v21, %v12320_v30  ;;  %v9154_v34 = vcombine.high %v9153_v21, %v9153_v21 }
0x1cd5   :  { %v9215_v37 = vrot.slane %v9207_v15, %v12320_v30  ;;  %11312 = vmatmul.mubr.msk.f32.vlgmr.msra.gmra.mxu1 %vm537_vm4, %v9161_v25  ;;  %v9168_v6 = vrot.slane %v9154_v34, %v12320_v30 }
0x1cd6   :  { %11326 = vmatpush3.msk.msra.mxu1 %vm1686_vm11, %v14142_v16  ;;  %11327 = vmatprep.mubr.msk.f32.mxu1 %vm11990_vm6, %v14530_v24 }
0x1cd7   :  { %11323 = vmatmul.mubr.msk.f32.vlgmr.msra.gmra.mxu0 %vm537_vm4, %v9168_v6  ;;  %11330 = vmatprep.subr.mxu1 %v14530_v24  ;;  %v9223_v50 = vrot.slane %v9215_v37, %v12320_v30  ;;  %v9216_v40 = vcombine.high %v9215_v37, %v9215_v37  ;;  %v11893_v6 = vld [vmem:[#allocation4 + $0x110] sm:$0xff] }
0x1cd8   :  { %9636 = vmatpush1.msra.mxu0 %v11876_v28  ;;  %9675 = vmatprep.mubr.f32.mxu0 %v14530_v24  ;;  %v11896_v28 = vld [vmem:[#allocation4 + $0xd8] sm:$0xff] }
0x1cd9   :  { %11328 = vmatmul.mubr.msk.f32.vlgmr.msra.gmra.mxu1 %vm1683_vm12, %v9223_v50  ;;  %9637 = vmatprep.subr.mxu0 %v11877_v8  ;;  %v9230_v16 = vrot.slane %v9216_v40, %v12320_v30  ;;  %v11894_v50 = vld [vmem:[#allocation4 + $0x120] sm:$0xff]  ;;  %v11895_v40 = vld [vmem:[#allocation4 + $0xc8] sm:$0xff] }
0x1cda   :  { %11331 = vmatpush3.msk.msra.mxu1 %vm1686_vm11, %v14140_v22  ;;  %11332 = vmatprep.mubr.msk.f32.mxu1 %vm11990_vm6, %v14530_v24  ;;  %v11884_v22 = vld [vmem:[#allocation4 + $0xb8] sm:$0xff]  ;;  %v11897_v8 = vld [vmem:[#allocation4 + $0xc0] sm:$0xff] }
0x1cdb   :  { %9706 = vmatprep.subr.mxu1 %v11878_v14  ;;  %9638 = vmatpush1.msra.mxu0 %v11879_v36  ;;  %v11899_v14 = vld [vmem:[#allocation4 + $0x78] sm:$0xff]  ;;  %v11900_v36 = vld [vmem:[#allocation4 + $0x88] sm:$0xff] }
0x1cdc   :  { %9639 = vmatprep.subr.mxu0 %v11880_v58  ;;  %v11901_v58 = vld [vmem:[#allocation4 + $0x70] sm:$0xff] }
0x1cdd   :  { %11333 = vmatmul.mubr.msk.f32.vlgmr.msra.gmra.mxu1 %vm1683_vm12, %v9230_v16  ;;  %9640 = vmatpush1.msra.mxu0 %v11881_v29  ;;  %v11898_v16 = vld [vmem:[#allocation4 + $0xd0] sm:$0xff]  ;;  %v11902_v29 = vld [vmem:[#allocation4 + $0x80] sm:$0xff] }
0x1cde   :  { %9707 = vmatpush1.msra.mxu1 %v11882_v4  ;;  %9641 = vmatprep.subr.mxu0 %v11883_v1  ;;  %v11705_v3 = vpop.eup %11704  ;;  %v11903_v4 = vld [vmem:[#allocation4 + $0x28] sm:$0xff]  ;;  %v11904_v1 = vld [vmem:[#allocation4 + $0x38] sm:$0xff] }
0x1cdf   :  { %9708 = vmatprep.subr.mxu1 %v11884_v22  ;;  %9642 = vmatpush1.msra.mxu0 %v11885_v48  ;;  %v9234_v53 = vadd.f32 1.0, %v11705_v3  ;;  %v11905_v22 = vld [vmem:[#allocation4 + $0x20] sm:$0xff]  ;;  %v11906_v48 = vld [vmem:[#allocation4 + $0x30] sm:$0xff] }
0x1ce0   :  { %9709 = vmatpush1.msra.mxu1 %v11886_v52  ;;  %9746 = vmatprep.mubr.f32.mxu1 %v14530_v24  ;;  %v11907_v52 = vld [vmem:[#allocation4 + $0x138] sm:$0xff] }
0x1ce1   :  { %9710 = vmatprep.subr.mxu1 %v11887_v7  ;;  %9777 = vmatprep.subr.mxu0 %v11888_v33  ;;  %11706 = vrcp.f32 %v9234_v53  ;;  %v11908_v7 = vld [vmem:[#allocation4 + $0x130] sm:$0xff]  ;;  %v11909_v33 = vld [vmem:[#allocation4 + $0xe8] sm:$0xff] }
0x1ce2   :  { %9711 = vmatpush1.msra.mxu1 %v11889_v54  ;;  %v11910_v54 = vld [vmem:[#allocation4 + $0xe0] sm:$0xff] }
0x1ce3   :  { %9712 = vmatprep.subr.mxu1 %v11890_v47  ;;  %v11911_v47 = vld [vmem:[#allocation4 + $0x98] sm:$0xff] }
0x1ce4   :  { %9713 = vmatpush1.msra.mxu1 %v11891_v9  ;;  %v11912_v9 = vld [vmem:[#allocation4 + $0x90] sm:$0xff] }
0x1ce5   :  { %9848 = vmatprep.subr.mxu1 %v11892_v27  ;;  %v11913_v27 = vld [vmem:[#allocation4 + $0x48] sm:$0xff] }
0x1cee   :  { %v11707_v42 = vpop.eup %11706 }
0x1d95   :  { %v9305_v60 = vpop.f32.mrf.mxu1 }
0x1d97   :  { %v11313_v11 = vpop.f32.mrf.mxu1  ;;  %v9377_v26 = vpop.f32.mrf.mxu0 }
0x1d99   :  { %v11324_v51 = vpop.f32.mrf.mxu0  ;;  %v9452_v41 = vpop.f32.mrf.mxu1 }
0x1d9a   :  { %v9531_v35 = vadd.f32 %v9452_v41, %v9305_v60  ;;  %v9590_v60 = vrot.slane %v9570_v18, 6 }
0x1d9b   :  { %v11329_v32 = vpop.f32.mrf.mxu1 }
0x1d9c   :  { %v9571_v32 = vld [vmem:[#allocation3 + $0x68] sm:$0xc0] }
0x1d9d   :  { %v9527_v31 = vpop.f32.mrf.mxu1 }
0x1d9e   :  { %v9532_v61 = vadd.f32 %v9527_v31, %v9377_v26  ;;  %v9569_v26 = vld [vmem:[#allocation3 + $0x58] sm:$0xc0] }
0x1d9f   :  { %v11334_v19 = vpop.f32.mrf.mxu1  ;;  %v9589_v41 = vrot.slane %v9569_v26, 6 }
0x1da0   :  { %v9535_v39 = vrot.slane %v9532_v61, 7  ;;  %v9591_v19 = vrot.slane %v9571_v32, 6 }
0x1da2   :  { %v9536_v62 = vsel %vm1443_vm10, %v9535_v39, %v9531_v35 }
0x1da3   :  { %v9538_v44 = vmul.f32 %v11707_v42, %v9536_v62 }
0x1da5   :  { %v9540_v5 = vrot.slane %v9538_v44, 1  ;;  %9546 = vst.msk [vmem:[#allocation7 + $0xc] sm:$0x3] %vm42_vm0, %v9538_v44  ;;  %v9543_v0 = vsub.f32 %v9531_v35, %v9538_v44  ;;  %v9572_v35 = vld [vmem:[#allocation3 + $0x70] sm:$0xc0] }
0x1da6   :  { %v9592_v62 = vrot.slane %v9572_v35, 6 }
0x1da7   :  { %v9544_v12 = vsub.f32 %v9532_v61, %v9540_v5  ;;  %v9574_v5 = vld [vmem:[#allocation3 + $0x80] sm:$0xc0] }
0x1da9   :  { %v9549_v13 = vrot.slane %v9544_v12, 7 }
0x1dab   :  { %v9550_v59 = vsel %vm1443_vm10, %v9549_v13, %v9543_v0  ;;  %v9594_v0 = vrot.slane %v9574_v5, 6 }
0x1dac   :  { %9553 = vst.msk [vmem:[#allocation8 + $0xc] sm:$0x3] %vm42_vm0, %v9550_v59  ;;  %9554 = vst.msk [vmem:[#allocation2] sm:$0x3] %vm42_vm0, %v9550_v59  ;;  %v9573_v59 = vld [vmem:[#allocation3 + $0x78] sm:$0xc0] }
0x1db3   :  { %v14202_v20 = vld [vmem:[#allocation2] sm:$0x3] }
0x1db4   :  { %v9558_v63 = vsel %vm42_vm0, %v14202_v20, 0.0 }
0x1db5   :  { %9559 = vadd.xlane.f32.xlu0 %v9558_v63 }
0x1e3e   :  { %v9560_v23 = vpop.xlane.xlu0 %9559 }
0x1e3f   :  { %vm9561_vm13 = vcmp.eq.f32.partialorder %v9560_v23, 0.0 }
0x1e40   :  { %v9562_v21 = vsel %vm9561_vm13, 1.0, %v9560_v23  ;;  %v9593_v23 = vrot.slane %v9573_v59, 6 }
0x1e41   :  { %11708 = vrcp.f32 %v9562_v21 }
0x1e4e   :  { %v11709_v38 = vpop.eup %11708 }
0x1e4f   :  { %v9564_v15 = vmul.f32 %v11709_v38, %v9562_v21  ;;  %v9575_v21 = vld [vmem:[#allocation3 + $0x88] sm:$0xc0] }
0x1e51   :  { %v9565_v25 = vsub.f32 2.0, %v9564_v15 }
0x1e53   :  { %v9566_v34 = vmul.f32 %v11709_v38, %v9565_v25  ;;  %v9595_v25 = vrot.slane %v9575_v21, 6 }
0x1e55   :  { %v9567_v37 = vmul.f32 %v9566_v34, %v14202_v20  ;;  %v9576_v34 = vld [vmem:[#allocation3 + $0x90] sm:$0xc0] }
0x1e57   :  { %10987 = vmatmul.mubr.msk.f32.vlgmr.msra.gmra.mxu0 %vm537_vm4, %v9567_v37  ;;  %10988 = vmatmul.mubr.msk.f32.vlgmr.msra.gmra.mxu1 %vm537_vm4, %v9567_v37 }
0x1e58   :  { %9778 = vmatpush1.msra.mxu0 %v11893_v6  ;;  %9849 = vmatpush1.msra.mxu1 %v11894_v50  ;;  %v9596_v50 = vrot.slane %v9576_v34, 6 }
0x1e59   :  { %9779 = vmatprep.subr.mxu0 %v11895_v40  ;;  %9850 = vmatprep.subr.mxu1 %v11896_v28 }
0x1e5a   :  { %9780 = vmatpush1.msra.mxu0 %v11897_v8  ;;  %9851 = vmatpush1.msra.mxu1 %v11898_v16 }
0x1e5b   :  { %9781 = vmatprep.subr.mxu0 %v11899_v14  ;;  %9852 = vmatprep.subr.mxu1 %v11900_v36 }
0x1e5c   :  { %9782 = vmatpush1.msra.mxu0 %v11901_v58  ;;  %9853 = vmatpush1.msra.mxu1 %v11902_v29 }
0x1e5d   :  { %9783 = vmatprep.subr.mxu0 %v11903_v4  ;;  %9854 = vmatprep.subr.mxu1 %v11904_v1 }
0x1e5e   :  { %9784 = vmatpush1.msra.mxu0 %v11905_v22  ;;  %9817 = vmatprep.mubr.f32.mxu0 %v14530_v24 }
0x1e5f   :  { %9855 = vmatpush1.msra.mxu1 %v11906_v48  ;;  %9888 = vmatprep.mubr.f32.mxu1 %v14530_v24 }
0x1e60   :  { %10989 = vmatmul.mubr.msk.f32.vlgmr.msra.gmra.mxu0 %vm537_vm4, %v9567_v37  ;;  %10990 = vmatmul.mubr.msk.f32.vlgmr.msra.gmra.mxu1 %vm537_vm4, %v9567_v37 }
0x1e61   :  { %9919 = vmatprep.subr.mxu0 %v11907_v52  ;;  %9959 = vmatprep.mubr.f32.mxu0 %v14530_v24 }
0x1e62   :  { %9920 = vmatpush1.msra.mxu0 %v11908_v7  ;;  %11335 = vmatprep.subr.mxu1 %v14530_v24 }
0x1e63   :  { %9921 = vmatprep.subr.mxu0 %v11909_v33  ;;  %11343 = vmatprep.mubr.msk.f32.mxu1 %vm11990_vm6, %v14530_v24 }
0x1e64   :  { %9922 = vmatpush1.msra.mxu0 %v11910_v54 }
0x1e65   :  { %9923 = vmatprep.subr.mxu0 %v11911_v47 }
0x1e66   :  { %9924 = vmatpush1.msra.mxu0 %v11912_v9 }
0x1e67   :  { %9925 = vmatprep.subr.mxu0 %v11913_v27 }
0x1e68   :  { %9926 = vmatpush1.msra.mxu0 %v11914_v56 }
0x1e69   :  { %10991 = vmatmul.mubr.msk.f32.vlgmr.msra.gmra.mxu0 %vm537_vm4, %v9567_v37  ;;  %11346 = vmatprep.subr.mxu0 %v14530_v24 }
0x1e6a   :  { %11354 = vmatprep.mubr.msk.f32.mxu0 %vm11990_vm6, %v14530_v24 }
0x1f17   :  { %v9677_v17 = vpop.f32.mrf.mxu0  ;;  %v9748_v53 = vpop.f32.mrf.mxu1 }
0x1f18   :  { %v14221_v3 = vadd.f32 %v9677_v17, %v9588_v10  ;;  %v14227_v11 = vadd.f32 %v9748_v53, %v9590_v60 }
0x1f19   :  { %v9679_v51 = vpop.f32.mrf.mxu0  ;;  %v9750_v61 = vpop.f32.mrf.mxu1 }
0x1f1a   :  { %9970 = vrot.lane.b32.xlu0 %v14221_v3, %s11985_s4  ;;  %9967 = vrot.lane.b32.xlu1 %v14221_v3, %s11986_s19  ;;  %v14237_v31 = vadd.f32 %v9679_v51, %v9589_v41  ;;  %v14243_v39 = vadd.f32 %v9750_v61, %v9591_v19 }
0x1f1e   :  { %9973 = vrot.lane.b32.xlu1 %v14221_v3, %s11987_s20  ;;  %9987 = vrot.lane.b32.xlu0 %v14227_v11, %s11986_s19 }
0x1f20   :  { %v9819_v42 = vpop.f32.mrf.mxu0  ;;  %v9890_v12 = vpop.f32.mrf.mxu1 }
0x1f21   :  { %v14249_v44 = vadd.f32 %v9819_v42, %v9592_v62  ;;  %v14259_v13 = vadd.f32 %v9890_v12, %v9594_v0 }
0x1f22   :  { %9990 = vrot.lane.b32.xlu1 %v14227_v11, %s11985_s4  ;;  %9993 = vrot.lane.b32.xlu0 %v14227_v11, %s11987_s20  ;;  %v9821_v63 = vpop.f32.mrf.mxu0  ;;  %v9892_v15 = vpop.f32.mrf.mxu1 }
0x1f23   :  { %v14269_v38 = vadd.f32 %v9821_v63, %v9593_v23  ;;  %v14275_v37 = vadd.f32 %v9892_v15, %v9595_v25 }
0x1f26   :  { %9977 = vrot.lane.b32.xlu1 %v14237_v31, %s11986_s19  ;;  %9980 = vrot.lane.b32.xlu0 %v14237_v31, %s11985_s4 }
0x1f29   :  { %v9961_v6 = vpop.f32.mrf.mxu0 }
0x1f2a   :  { %9983 = vrot.lane.b32.xlu1 %v14237_v31, %s11987_s20  ;;  %10000 = vrot.lane.b32.xlu0 %v14243_v39, %s11985_s4  ;;  %v14281_v40 = vadd.f32 %v9961_v6, %v9596_v50 }
0x1f2e   :  { %9997 = vrot.lane.b32.xlu1 %v14243_v39, %s11986_s19  ;;  %10007 = vrot.lane.b32.xlu0 %v14249_v44, %s11986_s19 }
0x1f32   :  { %10003 = vrot.lane.b32.xlu1 %v14243_v39, %s11987_s20  ;;  %10013 = vrot.lane.b32.xlu0 %v14249_v44, %s11987_s20 }
0x1f36   :  { %10010 = vrot.lane.b32.xlu1 %v14249_v44, %s11985_s4  ;;  %10027 = vrot.lane.b32.xlu0 %v14259_v13, %s11986_s19 }
0x1f3a   :  { %10030 = vrot.lane.b32.xlu1 %v14259_v13, %s11985_s4  ;;  %10033 = vrot.lane.b32.xlu0 %v14259_v13, %s11987_s20 }
0x1f3e   :  { %10017 = vrot.lane.b32.xlu1 %v14269_v38, %s11986_s19  ;;  %10020 = vrot.lane.b32.xlu0 %v14269_v38, %s11985_s4 }
0x1f42   :  { %10023 = vrot.lane.b32.xlu1 %v14269_v38, %s11987_s20  ;;  %10040 = vrot.lane.b32.xlu0 %v14275_v37, %s11985_s4 }
0x1f46   :  { %10037 = vrot.lane.b32.xlu1 %v14275_v37, %s11986_s19  ;;  %10247 = vrot.lane.b32.xlu0 %v14281_v40, %s11986_s19 }
0x1f4a   :  { %10043 = vrot.lane.b32.xlu1 %v14275_v37, %s11987_s20  ;;  %10253 = vrot.lane.b32.xlu0 %v14281_v40, %s11987_s20 }
0x1f4e   :  { %10250 = vrot.lane.b32.xlu1 %v14281_v40, %s11985_s4 }
0x1f8c   :  { %v9971_v28 = vpop.permute.xlu0 %9970  ;;  %v9968_v8 = vpop.permute.xlu1 %9967 }
0x1f8d   :  { %v10046_v22 = vcombine.low %v14221_v3, %v9971_v28 }
0x1f8f   :  { %v10053_v54 = vrot.slane %v10046_v22, %v14625_v55 }
0x1f90   :  { %v9974_v16 = vpop.permute.xlu1 %9973  ;;  %v9988_v14 = vpop.permute.xlu0 %9987 }
0x1f91   :  { %v10054_v29 = vcombine.low %v9968_v8, %v9974_v16 }
0x1f93   :  { %v10061_v48 = vrot.slane %v10054_v29, %v14625_v55 }
0x1f94   :  { %v9991_v36 = vpop.permute.xlu1 %9990  ;;  %v9994_v58 = vpop.permute.xlu0 %9993 }
0x1f95   :  { %v10096_v9 = vcombine.low %v14227_v11, %v9991_v36  ;;  %v10078_v27 = vcombine.low %v10053_v54, %v10061_v48  ;;  %v10104_v56 = vcombine.low %v9988_v14, %v9994_v58 }
0x1f97   :  { %v10103_v53 = vrot.slane %v10096_v9, %v14625_v55  ;;  %v10111_v60 = vrot.slane %v10104_v56, %v14625_v55  ;;  %v10085_v51 = vrot.slane %v10078_v27, %v14626_v43 }
0x1f98   :  { %v9978_v4 = vpop.permute.xlu1 %9977  ;;  %v9981_v1 = vpop.permute.xlu0 %9980 }
0x1f99   :  { %v10062_v52 = vcombine.low %v14237_v31, %v9981_v1  ;;  %v10128_v19 = vcombine.low %v10103_v53, %v10111_v60 }
0x1f9b   :  { %v10069_v2 = vrot.slane %v10062_v52, %v14625_v55  ;;  %v10135_v0 = vrot.slane %v10128_v19, %v14626_v43 }
0x1f9c   :  { %v9984_v7 = vpop.permute.xlu1 %9983  ;;  %v10001_v33 = vpop.permute.xlu0 %10000 }
0x1f9d   :  { %v10070_v47 = vcombine.low %v9978_v4, %v9984_v7  ;;  %v10112_v26 = vcombine.low %v14243_v39, %v10001_v33 }
0x1f9f   :  { %v10077_v10 = vrot.slane %v10070_v47, %v14625_v55  ;;  %v10119_v35 = vrot.slane %v10112_v26, %v14625_v55 }
0x1fa0   :  { %v9998_v17 = vpop.permute.xlu1 %9997  ;;  %v10008_v18 = vpop.permute.xlu0 %10007 }
0x1fa1   :  { %v10086_v3 = vcombine.low %v10069_v2, %v10077_v10 }
0x1fa3   :  { %v10093_v41 = vrot.slane %v10086_v3, %v14626_v43 }
0x1fa4   :  { %v10004_v11 = vpop.permute.xlu1 %10003  ;;  %v10014_v32 = vpop.permute.xlu0 %10013 }
0x1fa5   :  { %v10120_v31 = vcombine.low %v9998_v17, %v10004_v11  ;;  %v14305_v61 = vcombine.low %v10085_v51, %v10093_v41  ;;  %v14322_v8 = vcombine.high %v10085_v51, %v10093_v41  ;;  %v10154_v16 = vcombine.low %v10008_v18, %v10014_v32 }
0x1fa7   :  { %v10127_v42 = vrot.slane %v10120_v31, %v14625_v55  ;;  %v10281_v62 = vsel %vm537_vm4, %v14305_v61, -inf  ;;  %v10161_v4 = vrot.slane %v10154_v16, %v14625_v55 }
0x1fa8   :  { %v10011_v5 = vpop.permute.xlu1 %10010  ;;  %10282 = vmax.xlane.f32.xlu1 %v10281_v62  ;;  %v10028_v39 = vpop.permute.xlu0 %10027 }
0x1fa9   :  { %v10136_v12 = vcombine.low %v10119_v35, %v10127_v42  ;;  %v10146_v25 = vcombine.low %v14249_v44, %v10011_v5  ;;  %v10293_v44 = vsel %vm537_vm4, %v14322_v8, -inf }
0x1fab   :  { %v10143_v59 = vrot.slane %v10136_v12, %v14626_v43  ;;  %v10153_v14 = vrot.slane %v10146_v25, %v14625_v55 }
0x1fac   :  { %v10031_v63 = vpop.permute.xlu1 %10030  ;;  %v10034_v23 = vpop.permute.xlu0 %10033 }
0x1fad   :  { %v14313_v21 = vcombine.high %v10135_v0, %v10143_v59  ;;  %v14315_v15 = vcombine.low %v10135_v0, %v10143_v59  ;;  %v10196_v22 = vcombine.low %v14259_v13, %v10031_v63  ;;  %v10204_v48 = vcombine.low %v10028_v39, %v10034_v23 }
0x1fae   :  { %v10178_v52 = vcombine.low %v10153_v14, %v10161_v4 }
0x1faf   :  { %v10296_v34 = vsel %vm537_vm4, %v14313_v21, -inf  ;;  %v10284_v50 = vsel %vm537_vm4, %v14315_v15, -inf  ;;  %v10203_v9 = vrot.slane %v10196_v22, %v14625_v55  ;;  %v10211_v27 = vrot.slane %v10204_v48, %v14625_v55 }
0x1fb0   :  { %v10018_v6 = vpop.permute.xlu1 %10017  ;;  %10297 = vmax.xlane.f32.xlu1 %v10296_v34  ;;  %v10021_v28 = vpop.permute.xlu0 %10020  ;;  %10285 = vmax.xlane.f32.xlu0 %v10284_v50  ;;  %v10185_v2 = vrot.slane %v10178_v52, %v14626_v43 }
0x1fb1   :  { %v10162_v36 = vcombine.low %v14269_v38, %v10021_v28  ;;  %v10228_v60 = vcombine.low %v10203_v9, %v10211_v27 }
0x1fb3   :  { %v10169_v7 = vrot.slane %v10162_v36, %v14625_v55  ;;  %v10235_v62 = vrot.slane %v10228_v60, %v14626_v43 }
0x1fb4   :  { %v10024_v58 = vpop.permute.xlu1 %10023  ;;  %v10041_v29 = vpop.permute.xlu0 %10040  ;;  %10294 = vmax.xlane.f32.xlu0 %v10293_v44 }
0x1fb5   :  { %v10170_v1 = vcombine.low %v10018_v6, %v10024_v58  ;;  %v10212_v56 = vcombine.low %v14275_v37, %v10041_v29 }
0x1fb7   :  { %v10177_v33 = vrot.slane %v10170_v1, %v14625_v55  ;;  %v10219_v26 = vrot.slane %v10212_v56, %v14625_v55 }
0x1fb8   :  { %v10038_v54 = vpop.permute.xlu1 %10037  ;;  %v10248_v47 = vpop.permute.xlu0 %10247 }
0x1fb9   :  { %v10186_v38 = vcombine.low %v10169_v7, %v10177_v33 }
0x1fbb   :  { %v10193_v10 = vrot.slane %v10186_v38, %v14626_v43 }
0x1fbc   :  { %v10044_v13 = vpop.permute.xlu1 %10043  ;;  %v10254_v17 = vpop.permute.xlu0 %10253 }
0x1fbd   :  { %v10220_v18 = vcombine.low %v10038_v54, %v10044_v13  ;;  %v10195_v3 = vcombine.high %v10185_v2, %v10193_v10  ;;  %v10194_v53 = vcombine.low %v10185_v2, %v10193_v10  ;;  %v10264_v41 = vcombine.low %v10248_v47, %v10254_v17 }
0x1fbf   :  { %v10227_v51 = vrot.slane %v10220_v18, %v14625_v55  ;;  %v10299_v11 = vsel %vm537_vm4, %v10195_v3, -inf  ;;  %v10287_v32 = vsel %vm537_vm4, %v10194_v53, -inf  ;;  %v10271_v35 = vrot.slane %v10264_v41, %v14625_v55 }
0x1fc0   :  { %v10251_v37 = vpop.permute.xlu1 %10250  ;;  %10300 = vmax.xlane.f32.xlu1 %v10299_v11  ;;  %10288 = vmax.xlane.f32.xlu0 %v10287_v32 }
0x1fc1   :  { %v10236_v31 = vcombine.low %v10219_v26, %v10227_v51  ;;  %v10256_v19 = vcombine.low %v14281_v40, %v10251_v37 }
0x1fc3   :  { %v10263_v42 = vrot.slane %v10256_v19, %v14625_v55  ;;  %v10243_v5 = vrot.slane %v10236_v31, %v14626_v43 }
0x1fc5   :  { %v10272_v39 = vcombine.low %v10263_v42, %v10271_v35  ;;  %v10245_v12 = vcombine.high %v10235_v62, %v10243_v5  ;;  %v10244_v0 = vcombine.low %v10235_v62, %v10243_v5 }
0x1fc7   :  { %v10302_v59 = vsel %vm537_vm4, %v10245_v12, -inf  ;;  %v10290_v63 = vsel %vm537_vm4, %v10244_v0, -inf  ;;  %v10279_v23 = vrot.slane %v10272_v39, %v14626_v43 }
0x1fc8   :  { %10303 = vmax.xlane.f32.xlu1 %v10302_v59  ;;  %10291 = vmax.xlane.f32.xlu0 %v10290_v63 }
0x1fc9   :  { %v10280_v40 = vcombine.high %v10279_v23, %v14530_v24  ;;  %v10457_v25 = vsel %vm1470_vm5, %v10279_v23, -inf }
0x1fcb   :  { %v10460_v55 = vsel %vm1470_vm5, %v10280_v40, -inf }
0x1fcc   :  { %10458 = vmax.xlane.f32.xlu0 %v10457_v25  ;;  %10461 = vmax.xlane.f32.xlu1 %v10460_v55 }
0x2031   :  { %v10283_v34 = vpop.xlane.xlu1 %10282 }
0x2032   :  { %v10305_v6 = vsub.f32 %v14305_v61, %v10283_v34 }
0x2034   :  { %v10313_v50 = vmul.f32 1.442695, %v10305_v6 }
0x2036   :  { %11710 = vpow2.f32 %v10313_v50 }
0x2039   :  { %v10298_v28 = vpop.xlane.xlu1 %10297  ;;  %v10286_v14 = vpop.xlane.xlu0 %10285 }
0x203a   :  { %v10310_v16 = vsub.f32 %v14313_v21, %v10298_v28  ;;  %v10306_v43 = vsub.f32 %v14315_v15, %v10286_v14 }
0x203c   :  { %v10323_v36 = vmul.f32 1.442695, %v10310_v16  ;;  %v10315_v58 = vmul.f32 1.442695, %v10306_v43 }
0x203d   :  { %v10295_v44 = vpop.xlane.xlu0 %10294 }
0x203e   :  { %11712 = vpow2.f32 %v10315_v58  ;;  %v10309_v29 = vsub.f32 %v14322_v8, %v10295_v44 }
0x203f   :  { %11714 = vpow2.f32 %v10323_v36 }
0x2040   :  { %v10321_v4 = vmul.f32 1.442695, %v10309_v29 }
0x2042   :  { %11716 = vpow2.f32 %v10321_v4 }
0x2043   :  { %v14356_v1 = vpop.eup %11710 }
0x2044   :  { %v10329_v61 = vsel %vm537_vm4, %v14356_v1, 0.0 }
0x2045   :  { %10330 = vadd.xlane.f32.xlu0 %v10329_v61 }
0x2049   :  { %v10301_v22 = vpop.xlane.xlu1 %10300  ;;  %v10289_v21 = vpop.xlane.xlu0 %10288 }
0x204a   :  { %v10311_v48 = vsub.f32 %v10195_v3, %v10301_v22  ;;  %v10307_v52 = vsub.f32 %v10194_v53, %v10289_v21 }
0x204b   :  { %v11713_v15 = vpop.eup %11712 }
0x204c   :  { %v10325_v7 = vmul.f32 1.442695, %v10311_v48  ;;  %v10317_v33 = vmul.f32 1.442695, %v10307_v52  ;;  %v10332_v54 = vsel %vm537_vm4, %v11713_v15, 0.0  ;;  %v11715_v47 = vpop.eup %11714 }
0x204d   :  { %10333 = vadd.xlane.f32.xlu1 %v10332_v54  ;;  %v10344_v9 = vsel %vm537_vm4, %v11715_v47, 0.0 }
0x204e   :  { %11718 = vpow2.f32 %v10325_v7 }
0x204f   :  { %11720 = vpow2.f32 %v10317_v33  ;;  %v11717_v8 = vpop.eup %11716 }
0x2050   :  { %v10341_v27 = vsel %vm537_vm4, %v11717_v8, 0.0 }
0x2051   :  { %v10304_v38 = vpop.xlane.xlu1 %10303  ;;  %v10292_v56 = vpop.xlane.xlu0 %10291  ;;  %10345 = vadd.xlane.f32.xlu1 %v10344_v9  ;;  %10342 = vadd.xlane.f32.xlu0 %v10341_v27 }
0x2052   :  { %v10312_v2 = vsub.f32 %v10245_v12, %v10304_v38  ;;  %v10308_v10 = vsub.f32 %v10244_v0, %v10292_v56 }
0x2054   :  { %v10327_v13 = vmul.f32 1.442695, %v10312_v2  ;;  %v10319_v17 = vmul.f32 1.442695, %v10308_v10 }
0x2055   :  { %v10462_v18 = vpop.xlane.xlu1 %10461  ;;  %v10459_v3 = vpop.xlane.xlu0 %10458 }
0x2056   :  { %11722 = vpow2.f32 %v10327_v13  ;;  %v10464_v53 = vsub.f32 %v10280_v40, %v10462_v18  ;;  %v10463_v60 = vsub.f32 %v10279_v23, %v10459_v3 }
0x2057   :  { %11724 = vpow2.f32 %v10319_v17 }
0x2058   :  { %v10467_v26 = vmul.f32 1.442695, %v10464_v53  ;;  %v10465_v51 = vmul.f32 1.442695, %v10463_v60 }
0x205a   :  { %11726 = vpow2.f32 %v10467_v26 }
0x205b   :  { %v11719_v41 = vpop.eup %11718  ;;  %11728 = vpow2.f32 %v10465_v51 }
0x205c   :  { %v11721_v11 = vpop.eup %11720  ;;  %v10347_v32 = vsel %vm537_vm4, %v11719_v41, 0.0 }
0x205d   :  { %10348 = vadd.xlane.f32.xlu1 %v10347_v32  ;;  %v10335_v37 = vsel %vm537_vm4, %v11721_v11, 0.0 }
0x205e   :  { %10336 = vadd.xlane.f32.xlu0 %v10335_v37 }
0x2063   :  { %v11723_v31 = vpop.eup %11722 }
0x2064   :  { %v11725_v19 = vpop.eup %11724  ;;  %11347 = vmatpush3.msra.mxu0 %v11723_v31  ;;  %v10350_v35 = vsel %vm537_vm4, %v11723_v31, 0.0 }
0x2065   :  { %11336 = vmatpush3.msra.mxu1 %v11725_v19  ;;  %11348 = vmatprep.subr.mxu0 %v14530_v24  ;;  %v10338_v42 = vsel %vm537_vm4, %v11725_v19, 0.0 }
0x2066   :  { %10351 = vadd.xlane.f32.xlu1 %v10350_v35  ;;  %11337 = vmatprep.subr.mxu1 %v14530_v24 }
0x2067   :  { %v14369_v62 = vpop.eup %11726  ;;  %10339 = vadd.xlane.f32.xlu0 %v10338_v42  ;;  %11338 = vmatpush3.msra.mxu1 %v11721_v11 }
0x2068   :  { %v14371_v5 = vpop.eup %11728  ;;  %11349 = vmatpush3.msra.mxu0 %v11719_v41  ;;  %11339 = vmatprep.subr.mxu1 %v14530_v24  ;;  %v10472_v39 = vsel %vm1470_vm5, %v14369_v62, 0.0 }
0x2069   :  { %11350 = vmatprep.subr.mxu0 %v14530_v24  ;;  %11340 = vmatpush3.msra.mxu1 %v11713_v15  ;;  %v10469_v12 = vsel %vm1470_vm5, %v14371_v5, 0.0 }
0x206a   :  { %11351 = vmatpush3.msra.mxu0 %v11715_v47  ;;  %10473 = vadd.xlane.f32.xlu1 %v10472_v39 }
0x206b   :  { %11352 = vmatprep.subr.mxu0 %v14530_v24  ;;  %11341 = vmatprep.subr.mxu1 %v14530_v24 }
0x206c   :  { %10470 = vadd.xlane.f32.xlu0 %v10469_v12  ;;  %11342 = vmatpush3.msra.mxu1 %v14356_v1 }
0x206d   :  { %11353 = vmatpush3.msra.mxu0 %v11717_v8  ;;  %11357 = vmatprep.subr.mxu1 %v14530_v24 }
0x20ce   :  { %v10331_v59 = vpop.xlane.xlu0 %10330 }
0x20d6   :  { %v10334_v0 = vpop.xlane.xlu1 %10333 }
0x20da   :  { %v10346_v63 = vpop.xlane.xlu1 %10345  ;;  %v10343_v23 = vpop.xlane.xlu0 %10342 }
0x20db   :  { %11730 = vrcp.f32 %v10346_v63 }
0x20dc   :  { %11732 = vrcp.f32 %v10343_v23 }
0x20dd   :  { %11734 = vrcp.f32 %v10334_v0 }
0x20de   :  { %11736 = vrcp.f32 %v10331_v59 }
0x20e6   :  { %v10349_v40 = vpop.xlane.xlu1 %10348 }
0x20e7   :  { %11738 = vrcp.f32 %v10349_v40  ;;  %v10337_v25 = vpop.xlane.xlu0 %10336 }
0x20e8   :  { %11740 = vrcp.f32 %v10337_v25  ;;  %v11731_v34 = vpop.eup %11730 }
0x20e9   :  { %v11733_v50 = vpop.eup %11732  ;;  %v10366_v36 = vmul.f32 %v11731_v34, %v10346_v63 }
0x20ea   :  { %v11735_v28 = vpop.eup %11734  ;;  %v10365_v58 = vmul.f32 %v11733_v50, %v10343_v23 }
0x20eb   :  { %v11737_v16 = vpop.eup %11736  ;;  %v10362_v29 = vmul.f32 %v11735_v28, %v10334_v0  ;;  %v10374_v21 = vsub.f32 2.0, %v10366_v36 }
0x20ec   :  { %v10361_v22 = vmul.f32 %v11737_v16, %v10331_v59  ;;  %v10373_v48 = vsub.f32 2.0, %v10365_v58 }
0x20ed   :  { %v10370_v52 = vsub.f32 2.0, %v10362_v29  ;;  %v10382_v54 = vmul.f32 %v11731_v34, %v10374_v21 }
0x20ee   :  { %v10369_v33 = vsub.f32 2.0, %v10361_v22  ;;  %v10381_v47 = vmul.f32 %v11733_v50, %v10373_v48 }
0x20ef   :  { %v10352_v55 = vpop.xlane.xlu1 %10351  ;;  %v10378_v38 = vmul.f32 %v11735_v28, %v10370_v52  ;;  %v10419_v17 = vrot.slane %v10382_v54, %v12294_v45  ;;  %v10986_v28 = vld [vmem:[%s14439_s0 + $0xe] sm:$0x3]  ;;  %s11992_s0 = smov [#allocation7]  }
0x20f0   :  { %11742 = vrcp.f32 %v10352_v55  ;;  %v10340_v6 = vpop.xlane.xlu0 %10339  ;;  %v10377_v10 = vmul.f32 %v11737_v16, %v10369_v33  ;;  %v10415_v18 = vrot.slane %v10381_v47, %v12300_v49  ;;  %s10848_s12 = sshll.u32 %s11992_s0, 4  ;;  %s10849_s12 = int_to_ptr.vmem [resolvable:$true] %s10848_s12 }
0x20f1   :  { %11744 = vrcp.f32 %v10340_v6  ;;  %v10400_v60 = vrot.slane %v10378_v38, %v12294_v45  ;;  %s11935_s1 = scalar_lea.vmem %s10849_s12, 256  ;;  %p11940_p6 = scmp.lt.s32.totalorder %s10849_s12, %s10849_s12 }
0x20f2   :  { %v10396_v31 = vrot.slane %v10377_v10, %v12300_v49  ;;  %v10420_v35 = vsel %vm1408_vm7, %v10419_v17, %v10415_v18  ;;  %p11936_p5 = scmp.ne.s32.totalorder %s10849_s12, %s11935_s1  ;;  %p11941_p7 = scmp.lt.s32.totalorder %s11935_s1, %s11935_s1 }
0x20f3   :  { %v10474_v14 = vpop.xlane.xlu1 %10473 }
0x20f4   :  { %v11739_v43 = vpop.eup %11738  ;;  %11746 = vrcp.f32 %v10474_v14  ;;  %v10401_v0 = vsel %vm1408_vm7, %v10400_v60, %v10396_v31  ;;  %p11942_p8 = por %p11941_p7, %p11940_p6 }
0x20f5   :  { %v11741_v44 = vpop.eup %11740  ;;  %v10367_v4 = vmul.f32 %v11739_v43, %v10349_v40  ;;  %v10471_v1 = vpop.xlane.xlu0 %10470 }
0x20f6   :  { %v10363_v61 = vmul.f32 %v11741_v44, %v10337_v25  ;;  %11748 = vrcp.f32 %v10471_v1  ;;  %p11943_p9 = pnand %p11942_p8, %p11936_p5 }
0x20f7   :  { %v10375_v15 = vsub.f32 2.0, %v10367_v4  ;;  %v9577_v4 = vld [vmem:[#allocation3 + $0x98] sm:$0xc0] }
0x20f8   :  { %v10371_v7 = vsub.f32 2.0, %v10363_v61  ;;  %v9597_v61 = vrot.slane %v9577_v4, 6 }
0x20f9   :  { %v10383_v9 = vmul.f32 %v11739_v43, %v10375_v15 }
0x20fa   :  { %v10379_v56 = vmul.f32 %v11741_v44, %v10371_v7 }
0x20fb   :  { %v10424_v26 = vrot.slane %v10383_v9, %v12297_v46 }
0x20fc   :  { %v10405_v41 = vrot.slane %v10379_v56, %v12297_v46 }
0x20fd   :  { %v11743_v8 = vpop.eup %11742  ;;  %v10425_v45 = vsel %vm1415_vm8, %v10424_v26, %v10420_v35 }
0x20fe   :  { %v11745_v27 = vpop.eup %11744  ;;  %v10368_v2 = vmul.f32 %v11743_v8, %v10352_v55  ;;  %v10406_v46 = vsel %vm1415_vm8, %v10405_v41, %v10401_v0 }
0x20ff   :  { %v10364_v13 = vmul.f32 %v11745_v27, %v10340_v6 }
0x2100   :  { %v10376_v3 = vsub.f32 2.0, %v10368_v2 }
0x2101   :  { %v11747_v53 = vpop.eup %11746  ;;  %v10372_v51 = vsub.f32 2.0, %v10364_v13 }
0x2102   :  { %v10384_v11 = vmul.f32 %v11743_v8, %v10376_v3  ;;  %v10478_v32 = vmul.f32 %v11747_v53, %v10474_v14 }
0x2103   :  { %v11749_v37 = vpop.eup %11748  ;;  %v10380_v19 = vmul.f32 %v11745_v27, %v10372_v51 }
0x2104   :  { %v10429_v42 = vrot.slane %v10384_v11, %v12303_v57  ;;  %v10480_v39 = vsub.f32 2.0, %v10478_v32  ;;  %v10477_v12 = vmul.f32 %v11749_v37, %v10471_v1  ;;  %v9963_v1 = vpop.f32.mrf.mxu0 }
0x2105   :  { %v10410_v59 = vrot.slane %v10380_v19, %v12303_v57  ;;  %v9964_v22 = vadd.f32 %v9963_v1, %v9597_v61 }
0x2106   :  { %v10430_v63 = vsel %vm1422_vm9, %v10429_v42, %v10425_v45  ;;  %v10482_v23 = vmul.f32 %v11747_v53, %v10480_v39  ;;  %v10479_v40 = vsub.f32 2.0, %v10477_v12 }
0x2107   :  { %v10411_v25 = vsel %vm1422_vm9, %v10410_v59, %v10406_v46  ;;  %v10992_v21 = vmul.f32 -1.442695, %v9964_v22 }
0x2108   :  { %v10431_v55 = vsel %vm1443_vm10, %v10430_v63, %v10411_v25  ;;  %v10492_v34 = vrot.slane %v10482_v23, %v12300_v49  ;;  %v10481_v6 = vmul.f32 %v11749_v37, %v10479_v40 }
0x2109   :  { %v10433_v50 = vmul.f32 %v10431_v55, %v14202_v20  ;;  %11750 = vpow2.f32 %v10992_v21 }
0x210a   :  { %v10488_v57 = vrot.slane %v10481_v6, %v12300_v49 }
0x210b   :  { %v10441_v16 = vrot.slane %v10433_v50, %v12320_v30 }
0x210c   :  { %v10493_v14 = vsel %vm1443_vm10, %v10492_v34, %v10488_v57 }
0x210d   :  { %v10495_v43 = vmul.f32 %v10986_v28, %v10493_v14  ;;  %v10449_v36 = vrot.slane %v10441_v16, %v12320_v30  ;;  %v10442_v58 = vcombine.high %v10441_v16, %v10441_v16 }
0x210f   :  { %v10503_v44 = vrot.slane %v10495_v43, %v12320_v30  ;;  %11344 = vmatmul.mubr.msk.f32.vlgmr.msra.gmra.mxu1 %vm537_vm4, %v10449_v36  ;;  %v10456_v20 = vrot.slane %v10442_v58, %v12320_v30 }
0x2110   :  { %11358 = vmatpush3.msk.msra.mxu1 %vm1686_vm11, %v14371_v5  ;;  %11359 = vmatprep.mubr.msk.f32.mxu1 %vm11990_vm6, %v14530_v24 }
0x2111   :  { %11355 = vmatmul.mubr.msk.f32.vlgmr.msra.gmra.mxu0 %vm537_vm4, %v10456_v20  ;;  %11362 = vmatprep.subr.mxu1 %v14530_v24  ;;  %v10511_v49 = vrot.slane %v10503_v44, %v12320_v30  ;;  %v10504_v29 = vcombine.high %v10503_v44, %v10503_v44 }
0x2113   :  { %11360 = vmatmul.mubr.msk.f32.vlgmr.msra.gmra.mxu1 %vm1683_vm12, %v10511_v49  ;;  %v10518_v5 = vrot.slane %v10504_v29, %v12320_v30 }
0x2114   :  { %11363 = vmatpush3.msk.msra.mxu1 %vm1686_vm11, %v14369_v62  ;;  %11364 = vmatprep.mubr.msk.f32.mxu1 %vm11990_vm6, %v14530_v24 }
0x2116   :  { %v11751_v48 = vpop.eup %11750 }
0x2117   :  { %11365 = vmatmul.mubr.msk.f32.vlgmr.msra.gmra.mxu1 %vm1683_vm12, %v10518_v5  ;;  %v10522_v52 = vadd.f32 1.0, %v11751_v48 }
0x2119   :  { %11752 = vrcp.f32 %v10522_v52 }
0x2126   :  { %v11753_v27 = vpop.eup %11752 }
0x21cf   :  { %v10593_v15 = vpop.f32.mrf.mxu1 }
0x21d1   :  { %v11345_v7 = vpop.f32.mrf.mxu1  ;;  %v10665_v33 = vpop.f32.mrf.mxu0 }
0x21d3   :  { %v11356_v62 = vpop.f32.mrf.mxu0  ;;  %v10740_v54 = vpop.f32.mrf.mxu1 }
0x21d4   :  { %v10819_v38 = vadd.f32 %v10740_v54, %v10593_v15 }
0x21d5   :  { %v11361_v47 = vpop.f32.mrf.mxu1 }
0x21d7   :  { %v10815_v24 = vpop.f32.mrf.mxu1 }
0x21d8   :  { %v10820_v8 = vadd.f32 %v10815_v24, %v10665_v33 }
0x21d9   :  { %v11366_v30 = vpop.f32.mrf.mxu1 }
0x21da   :  { %v10823_v9 = vrot.slane %v10820_v8, 7 }
0x21dc   :  { %v10824_v56 = vsel %vm1443_vm10, %v10823_v9, %v10819_v38 }
0x21dd   :  { %v10826_v2 = vmul.f32 %v11753_v27, %v10824_v56 }
0x21df   :  { %v10828_v10 = vrot.slane %v10826_v2, 1  ;;  %10834 = vst.msk [vmem:[#allocation7 + $0xe] sm:$0x3] %vm42_vm0, %v10826_v2 }
0x21e0   :  { %11946 = shalt.err (!%p11943_p9)
}
0x21e1   :  { %s11993_s13 = smov 2   ;;  %v10832_v13 = vsub.f32 %v10820_v8, %v10828_v10  ;;  %s11994_s2 = smov [#allocation8]   ;;  %v10831_v17 = vsub.f32 %v10819_v38, %v10826_v2 }
0x21e2   :  { %10854 = dma.vmem_to_hbm [thread:$0]  %s10849_s12, 256, %s14444_s5, [#allocation6], %s11987_s20, %s11987_s20, %s11993_s13  }
0x21e3   :  { %s10860_s16 = sshll.u32 %s11994_s2, 4  ;;  %v10837_v18 = vrot.slane %v10832_v13, 7  ;;  %s10861_s16 = int_to_ptr.vmem [resolvable:$true] %s10860_s16 }
0x21e4   :  { %s11955_s17 = scalar_lea.vmem %s10861_s16, 256  ;;  %p11960_p11 = scmp.lt.s32.totalorder %s10861_s16, %s10861_s16 }
0x21e5   :  { %v10838_v3 = vsel %vm1443_vm10, %v10837_v18, %v10831_v17  ;;  %p11956_p10 = scmp.ne.s32.totalorder %s10861_s16, %s11955_s17  ;;  %p11961_p12 = scmp.lt.s32.totalorder %s11955_s17, %s11955_s17 }
0x21e6   :  { %10841 = vst.msk [vmem:[#allocation8 + $0xe] sm:$0x3] %vm42_vm0, %v10838_v3  ;;  %10842 = vst.msk [vmem:[#allocation2] sm:$0x3] %vm42_vm0, %v10838_v3 }
0x21e7   :  { %p11962_p13 = por %p11961_p12, %p11960_p11 }
0x21e9   :  { %p11963_p0 = pnand %p11962_p13, %p11956_p10 }
0x21eb   :  { %11966 = shalt.err (!%p11963_p0)
}
0x21ec   :  { %10866 = dma.vmem_to_hbm [thread:$0]  %s10861_s16, 256, %s14445_s6, [#allocation9], %s11987_s20, %s11987_s20, %s11993_s13  }
0x21ed   :  { %11977 = dma.done.wait [#allocation6], 256  }
0x21ee   :  { %11978 = vsyncadd [#allocation6], 4294967040 }
0x21ef   :  { %11979 = dma.done.wait [#allocation9], 256  }
0x21f0   :  { %11980 = vsyncadd [#allocation9], 4294967040 }
0x21f1   :  { %10873 = vsyncpa [#allocation5], 1 }
0x21f2   :  { %10874 = vsyncpa [#allocation6], 1 }
0x21f3   :  { %10875 = vsyncpa [#allocation9], 1 }

</bundles_post_ra>
